<compile_context>
chip_gen: v7x
topology: tpu7x:2x2x1
jax: 0.10.0
libtpu: 0.0.40
codegen_flags: <defaults>
</compile_context>

<pallas_src>
import functools

import jax
import jax.numpy as jnp
from jax.experimental import pallas as pl
from jax.experimental.pallas import tpu as pltpu

LANES = 128


def _round_up(x, m):
    return (x + m - 1) // m * m


# ----------------------------- Pallas kernels ------------------------------

def _matmul_bias_relu_kernel(x_ref, w_ref, b_ref, o_ref):
    y = jnp.dot(x_ref[...], w_ref[...], preferred_element_type=jnp.float32)
    y = jnp.maximum(y + b_ref[...], 0.0)
    o_ref[...] = y.astype(o_ref.dtype)


def conv_matmul(x, w, b, *, tm=256):
    """ReLU(x @ w + b).  x:[M,K] bf16, w:[K,N] bf16, b:[1,N] f32 -> [M,N] bf16.

    M is tiled and marked "parallel" so BlockSpec double-buffers patch tiles
    under MXU work and Mosaic can shard rows across v7x's two TensorCores;
    K and N stay whole so the weight tile is loaded once and stays in VMEM.
    """
    M, K = x.shape
    K2, N = w.shape
    assert K == K2
    tm = min(tm, M)
    return pl.pallas_call(
        _matmul_bias_relu_kernel,
        out_shape=jax.ShapeDtypeStruct((M, N), jnp.bfloat16),
        grid=(pl.cdiv(M, tm),),
        in_specs=[
            pl.BlockSpec((tm, K), lambda i: (i, 0)),
            pl.BlockSpec((K, N), lambda i: (0, 0)),
            pl.BlockSpec((1, N), lambda i: (0, 0)),
        ],
        out_specs=pl.BlockSpec((tm, N), lambda i: (i, 0)),
        compiler_params=pltpu.CompilerParams(
            dimension_semantics=("parallel",)),
    )(x, w, b)


def _fc_head_kernel(x_ref, w1_ref, b1_ref, w2_ref, b2_ref,
                    w3_ref, b3_ref, w4_ref, b4_ref, o_ref):
    """fc1 -> ReLU -> fc2 -> ReLU -> actor1 -> ReLU -> actor2 (logits)."""
    h = jnp.dot(x_ref[...], w1_ref[...], preferred_element_type=jnp.float32)
    h = jnp.maximum(h + b1_ref[...], 0.0)
    h = jnp.dot(h.astype(jnp.bfloat16), w2_ref[...],
                preferred_element_type=jnp.float32)
    h = jnp.maximum(h + b2_ref[...], 0.0)
    h = jnp.dot(h.astype(jnp.bfloat16), w3_ref[...],
                preferred_element_type=jnp.float32)
    h = jnp.maximum(h + b3_ref[...], 0.0)
    y = jnp.dot(h.astype(jnp.bfloat16), w4_ref[...],
                preferred_element_type=jnp.float32)
    o_ref[...] = (y + b4_ref[...]).astype(o_ref.dtype)


def fc_head(x, w1, b1, w2, b2, w3, b3, w4, b4):
    """All four dense layers in ONE pallas_call.

    Total weights ~4.3 MB bf16 -> resident in VMEM on every TPU generation
    (fits v5e's 16 MiB scoped default); intermediate activations live in vregs/
    VMEM only, removing 3 HBM round-trips and 3 kernel launches.
    """
    B = x.shape[0]
    n_pad = w4.shape[1]
    args = (x, w1, b1, w2, b2, w3, b3, w4, b4)
    return pl.pallas_call(
        _fc_head_kernel,
        out_shape=jax.ShapeDtypeStruct((B, n_pad), jnp.float32),
        grid=(1,),
        in_specs=[pl.BlockSpec(a.shape, lambda i: (0, 0)) for a in args],
        out_specs=pl.BlockSpec((B, n_pad), lambda i: (0, 0)),
        compiler_params=pltpu.CompilerParams(
            dimension_semantics=("arbitrary",)),
    )(*args)


# --------------------------- NHWC conv plumbing -----------------------------

def _im2col_nhwc(x, k, s):
    """x: [B,H,W,C] -> [B*OH*OW, k*k*C], feature order (kh, kw, C). No transposes."""
    B, H, W, C = x.shape
    OH = (H - k) // s + 1
    OW = (W - k) // s + 1
    cols = []
    for i in range(k):
        for j in range(k):
            cols.append(x[:, i:i + s * OH:s, j:j + s * OW:s, :])  # [B,OH,OW,C]
    p = jnp.concatenate(cols, axis=-1)                            # [B,OH,OW,k*k*C]
    return p.reshape(B * OH * OW, k * k * C), OH, OW


def conv2d_relu_nhwc(x, w_mat, b, *, k, s):
    """x:[B,H,W,Cin] bf16; w_mat:[k*k*Cin, Cout_pad] bf16; b:[1,Cout_pad] f32."""
    B = x.shape[0]
    patches, OH, OW = _im2col_nhwc(x, k, s)
    y = conv_matmul(patches, w_mat, b)            # [B*OH*OW, Cout_pad], bf16
    return y.reshape(B, OH, OW, w_mat.shape[1])   # stays NHWC


# ------------------------------- parameters ---------------------------------

def init_params(key, output_size):
    """PyTorch-layout parameters (Conv2d: [Cout,Cin,kh,kw], Linear: [N,K])."""
    ks = jax.random.split(key, 7)

    def w(k, shape, gain):
        fan_in = 1
        for d in shape[1:]:
            fan_in *= d
        # TODO(synk): scaled-Gaussian stand-in for init.orthogonal_(weight, gain)
        return (gain / jnp.sqrt(fan_in)) * jax.random.normal(k, shape, jnp.float32)

    g = float(jnp.sqrt(2.0))
    return {
        "conv1_w": w(ks[0], (32, 4, 8, 8), g),   "conv1_b": jnp.zeros((32,), jnp.float32),
        "conv2_w": w(ks[1], (64, 32, 4, 4), g),  "conv2_b": jnp.zeros((64,), jnp.float32),
        "conv3_w": w(ks[2], (64, 64, 3, 3), g),  "conv3_b": jnp.zeros((64,), jnp.float32),
        "fc1_w": w(ks[3], (256, 7 * 7 * 64), g), "fc1_b": jnp.zeros((256,), jnp.float32),
        "fc2_w": w(ks[4], (448, 256), g),        "fc2_b": jnp.zeros((448,), jnp.float32),
        "actor1_w": w(ks[5], (448, 448), 0.01),  "actor1_b": jnp.zeros((448,), jnp.float32),
        "actor2_w": w(ks[6], (output_size, 448), 0.01),
        "actor2_b": jnp.zeros((output_size,), jnp.float32),
    }


def prepare_params(p):
    """One-time conversion PyTorch layout -> kernel layout (outside jit):
    conv weights -> [kh*kw*Cin_pad, Cout_pad] (NHWC im2col order), channels
    zero-padded to 128 lanes; fc weights -> [K,N] with fc1 columns re-permuted
    from the (C,H,W) flatten order to the NHWC (H,W,C_pad) flatten order;
    actor2 output padded to 128 lanes; matmul operands bf16, biases f32."""

    def conv_mat(w, b, cin_pad):
        cout, cin, kh, kw = w.shape
        cout_pad = _round_up(cout, LANES)
        wm = jnp.transpose(w, (2, 3, 1, 0))                     # [kh,kw,Cin,Cout]
        wm = jnp.pad(wm, ((0, 0), (0, 0), (0, cin_pad - cin), (0, cout_pad - cout)))
        wm = wm.reshape(kh * kw * cin_pad, cout_pad)
        bm = jnp.pad(b, (0, cout_pad - cout)).reshape(1, cout_pad)
        return wm.astype(jnp.bfloat16), bm.astype(jnp.float32), cout_pad

    out = {}
    out["conv1_w"], out["conv1_b"], c1 = conv_mat(p["conv1_w"], p["conv1_b"], 4)
    out["conv2_w"], out["conv2_b"], c2 = conv_mat(p["conv2_w"], p["conv2_b"], c1)
    out["conv3_w"], out["conv3_b"], c3 = conv_mat(p["conv3_w"], p["conv3_b"], c2)

    # fc1: [256, 64*7*7] (PyTorch C,H,W flatten) -> [7*7*c3, 256] (H,W,C_pad flatten)
    fc1 = p["fc1_w"].reshape(256, 64, 7, 7)
    fc1 = jnp.transpose(fc1, (2, 3, 1, 0))                      # [7,7,64,256]
    fc1 = jnp.pad(fc1, ((0, 0), (0, 0), (0, c3 - 64), (0, 0)))
    out["fc1_w"] = fc1.reshape(7 * 7 * c3, 256).astype(jnp.bfloat16)
    out["fc1_b"] = p["fc1_b"].reshape(1, -1).astype(jnp.float32)

    out["fc2_w"] = p["fc2_w"].T.astype(jnp.bfloat16)
    out["fc2_b"] = p["fc2_b"].reshape(1, -1).astype(jnp.float32)
    out["actor1_w"] = p["actor1_w"].T.astype(jnp.bfloat16)
    out["actor1_b"] = p["actor1_b"].reshape(1, -1).astype(jnp.float32)

    n_out = p["actor2_w"].shape[0]
    n_pad = _round_up(n_out, LANES)
    a2 = jnp.pad(p["actor2_w"].T, ((0, 0), (0, n_pad - n_out)))
    out["actor2_w"] = a2.astype(jnp.bfloat16)
    out["actor2_b"] = jnp.pad(p["actor2_b"], (0, n_pad - n_out)).reshape(1, n_pad).astype(jnp.float32)
    return out


# -------------------------------- forward -----------------------------------

def cnn_policy_forward(kp, state, *, output_size):
    # PyTorch NCHW -> NHWC once; bf16 matmul operands from here on.
    x = jnp.transpose(state, (0, 2, 3, 1)).astype(jnp.bfloat16)       # [B,84,84,4]
    x = conv2d_relu_nhwc(x, kp["conv1_w"], kp["conv1_b"], k=8, s=4)   # [B,20,20,128]
    x = conv2d_relu_nhwc(x, kp["conv2_w"], kp["conv2_b"], k=4, s=2)   # [B, 9, 9,128]
    # nn.Dropout(0.2): identity at inference time
    x = conv2d_relu_nhwc(x, kp["conv3_w"], kp["conv3_b"], k=3, s=1)   # [B, 7, 7,128]
    B = x.shape[0]
    x = x.reshape(B, -1)                                              # [B, 6272] NHWC flatten
    logits = fc_head(x,
                     kp["fc1_w"], kp["fc1_b"],
                     kp["fc2_w"], kp["fc2_b"],
                     kp["actor1_w"], kp["actor1_b"],
                     kp["actor2_w"], kp["actor2_b"])                  # [B, 128] padded
    return logits[:, :output_size]


# ----------------------------- pure-JAX reference ---------------------------

def reference_forward(p, state):
    def conv(x, w, b, s):
        y = jax.lax.conv_general_dilated(
            x, w, (s, s), "VALID", dimension_numbers=("NCHW", "OIHW", "NCHW"))
        return jax.nn.relu(y + b.reshape(1, -1, 1, 1))

    x = conv(state, p["conv1_w"], p["conv1_b"], 4)
    x = conv(x, p["conv2_w"], p["conv2_b"], 2)
    x = conv(x, p["conv3_w"], p["conv3_b"], 1)
    x = x.reshape(x.shape[0], -1)
    x = jax.nn.relu(x @ p["fc1_w"].T + p["fc1_b"])
    x = jax.nn.relu(x @ p["fc2_w"].T + p["fc2_b"])
    x = jax.nn.relu(x @ p["actor1_w"].T + p["actor1_b"])
    return x @ p["actor2_w"].T + p["actor2_b"]


if __name__ == "__main__":
    key = jax.random.PRNGKey(0)
    kp_key, kx_key = jax.random.split(key)
    output_size = 6
    params = init_params(kp_key, output_size)
    kparams = prepare_params(params)      # one-time layout / dtype conversion

    # The hard-coded 7*7*64 flatten in CnnPolicy implies 84x84 inputs, 4 channels.
    state = jax.random.normal(kx_key, (2, 4, 84, 84), jnp.float32)

    fwd = jax.jit(functools.partial(cnn_policy_forward, output_size=output_size))
    policy = fwd(kparams, state)
    jax.block_until_ready(policy)
    assert policy.shape == (2, output_size)

    # Loose correctness check vs f32 XLA reference (bf16 matmul inputs, f32 acc).
    ref = reference_forward(params, state)
    rel_err = float(jnp.max(jnp.abs(policy - ref)) / (jnp.max(jnp.abs(ref)) + 1e-8))
    assert rel_err < 5e-2, f"mismatch vs reference: rel_err={rel_err}"

    print("KERNEL_OK")
</pallas_src>

<mosaic_0001>
module attributes {stable_mosaic.version = 11 : i64} {
  func.func @_matmul_bias_relu_kernel(%arg0: i32, %arg1: memref<256x256xbf16, #tpu.memory_space<vmem>>, %arg2: memref<256x128xbf16, #tpu.memory_space<vmem>>, %arg3: memref<1x128xf32, #tpu.memory_space<vmem>>, %arg4: memref<256x128xbf16, #tpu.memory_space<vmem>>) attributes {dimension_semantics = [#tpu.dimension_semantics<parallel>], iteration_bounds = array<i64: 4>, scalar_prefetch = 0 : i64, scratch_operands = 0 : i64, tpu.core_type = #tpu.core_type<tc>, window_params = [{transform_indices = @transform_0, window_bounds = array<i64: 256, 256>}, {pipeline_mode = #tpu.pipeline_mode<synchronous>, transform_indices = @transform_1, window_bounds = array<i64: 256, 128>}, {pipeline_mode = #tpu.pipeline_mode<synchronous>, transform_indices = @transform_2, window_bounds = array<i64: 1, 128>}, {transform_indices = @transform_3, window_bounds = array<i64: 256, 128>}]} {
    %c0 = arith.constant 0 : index
    %c0_0 = arith.constant 0 : index
    %0 = vector.load %arg1[%c0, %c0_0] : memref<256x256xbf16, #tpu.memory_space<vmem>>, vector<256x256xbf16>
    %c0_1 = arith.constant 0 : index
    %c0_2 = arith.constant 0 : index
    %1 = vector.load %arg2[%c0_1, %c0_2] : memref<256x128xbf16, #tpu.memory_space<vmem>>, vector<256x128xbf16>
    %cst = arith.constant dense<0.000000e+00> : vector<256x128xf32>
    %2 = tpu.matmul %0, %1, %cst {dimension_numbers = #tpu.dot_dimension_numbers<[1], [0], [0], [1], [0, 0, 1, 1], [], []>} : vector<256x256xbf16>, vector<256x128xbf16>, vector<256x128xf32> -> vector<256x128xf32>
    %c0_3 = arith.constant 0 : index
    %c0_4 = arith.constant 0 : index
    %3 = vector.load %arg3[%c0_3, %c0_4] : memref<1x128xf32, #tpu.memory_space<vmem>>, vector<1x128xf32>
    %4 = vector.broadcast %3 : vector<1x128xf32> to vector<256x128xf32>
    %5 = arith.addf %2, %4 : vector<256x128xf32>
    %cst_5 = arith.constant 0.000000e+00 : f32
    %6 = vector.broadcast %cst_5 : f32 to vector<256x128xf32>
    %7 = arith.maximumf %5, %6 : vector<256x128xf32>
    %8 = arith.truncf %7 : vector<256x128xf32> to vector<256x128xbf16>
    %c0_6 = arith.constant 0 : index
    %c0_7 = arith.constant 0 : index
    %9 = vector.load %arg4[%c0_6, %c0_7] : memref<256x128xbf16, #tpu.memory_space<vmem>>, vector<256x128xbf16>
    tpu.vector_store %arg4[%c0_6, %c0_7], %8 {strides = array<i32>} : memref<256x128xbf16, #tpu.memory_space<vmem>>, vector<256x128xbf16>,
    return
  }
  func.func @transform_0(%arg0: i32) -> (i32, i32) {
    %c0_i32 = arith.constant 0 : i32
    %c0_i32_0 = arith.constant 0 : i32
    return %arg0, %c0_i32 : i32, i32
  }
  func.func @transform_1(%arg0: i32) -> (i32, i32) {
    %c0_i32 = arith.constant 0 : i32
    %c0_i32_0 = arith.constant 0 : i32
    %c0_i32_1 = arith.constant 0 : i32
    return %c0_i32, %c0_i32_0 : i32, i32
  }
  func.func @transform_2(%arg0: i32) -> (i32, i32) {
    %c0_i32 = arith.constant 0 : i32
    %c0_i32_0 = arith.constant 0 : i32
    %c0_i32_1 = arith.constant 0 : i32
    return %c0_i32, %c0_i32_0 : i32, i32
  }
  func.func @transform_3(%arg0: i32) -> (i32, i32) {
    %c0_i32 = arith.constant 0 : i32
    %c0_i32_0 = arith.constant 0 : i32
    return %arg0, %c0_i32 : i32, i32
  }
}

module attributes {stable_mosaic.version = 11 : i64} {
  func.func @_matmul_bias_relu_kernel(%arg0: i32, %arg1: memref<162x2048xbf16, #tpu.memory_space<vmem>>, %arg2: memref<2048x128xbf16, #tpu.memory_space<vmem>>, %arg3: memref<1x128xf32, #tpu.memory_space<vmem>>, %arg4: memref<162x128xbf16, #tpu.memory_space<vmem>>) attributes {dimension_semantics = [#tpu.dimension_semantics<parallel>], iteration_bounds = array<i64: 1>, scalar_prefetch = 0 : i64, scratch_operands = 0 : i64, tpu.core_type = #tpu.core_type<tc>, window_params = [{transform_indices = @transform_0, window_bounds = array<i64: 162, 2048>}, {pipeline_mode = #tpu.pipeline_mode<synchronous>, transform_indices = @transform_1, window_bounds = array<i64: 2048, 128>}, {pipeline_mode = #tpu.pipeline_mode<synchronous>, transform_indices = @transform_2, window_bounds = array<i64: 1, 128>}, {transform_indices = @transform_3, window_bounds = array<i64: 162, 128>}]} {
    %c0 = arith.constant 0 : index
    %c0_0 = arith.constant 0 : index
    %0 = vector.load %arg1[%c0, %c0_0] : memref<162x2048xbf16, #tpu.memory_space<vmem>>, vector<162x2048xbf16>
    %c0_1 = arith.constant 0 : index
    %c0_2 = arith.constant 0 : index
    %1 = vector.load %arg2[%c0_1, %c0_2] : memref<2048x128xbf16, #tpu.memory_space<vmem>>, vector<2048x128xbf16>
    %cst = arith.constant dense<0.000000e+00> : vector<162x128xf32>
    %2 = tpu.matmul %0, %1, %cst {dimension_numbers = #tpu.dot_dimension_numbers<[1], [0], [0], [1], [0, 0, 1, 1], [], []>} : vector<162x2048xbf16>, vector<2048x128xbf16>, vector<162x128xf32> -> vector<162x128xf32>
    %c0_3 = arith.constant 0 : index
    %c0_4 = arith.constant 0 : index
    %3 = vector.load %arg3[%c0_3, %c0_4] : memref<1x128xf32, #tpu.memory_space<vmem>>, vector<1x128xf32>
    %4 = vector.broadcast %3 : vector<1x128xf32> to vector<162x128xf32>
    %5 = arith.addf %2, %4 : vector<162x128xf32>
    %cst_5 = arith.constant 0.000000e+00 : f32
    %6 = vector.broadcast %cst_5 : f32 to vector<162x128xf32>
    %7 = arith.maximumf %5, %6 : vector<162x128xf32>
    %8 = arith.truncf %7 : vector<162x128xf32> to vector<162x128xbf16>
    %c0_6 = arith.constant 0 : index
    %c0_7 = arith.constant 0 : index
    %9 = vector.load %arg4[%c0_6, %c0_7] : memref<162x128xbf16, #tpu.memory_space<vmem>>, vector<162x128xbf16>
    tpu.vector_store %arg4[%c0_6, %c0_7], %8 {strides = array<i32>} : memref<162x128xbf16, #tpu.memory_space<vmem>>, vector<162x128xbf16>,
    return
  }
  func.func @transform_0(%arg0: i32) -> (i32, i32) {
    %c0_i32 = arith.constant 0 : i32
    %c0_i32_0 = arith.constant 0 : i32
    return %arg0, %c0_i32 : i32, i32
  }
  func.func @transform_1(%arg0: i32) -> (i32, i32) {
    %c0_i32 = arith.constant 0 : i32
    %c0_i32_0 = arith.constant 0 : i32
    %c0_i32_1 = arith.constant 0 : i32
    return %c0_i32, %c0_i32_0 : i32, i32
  }
  func.func @transform_2(%arg0: i32) -> (i32, i32) {
    %c0_i32 = arith.constant 0 : i32
    %c0_i32_0 = arith.constant 0 : i32
    %c0_i32_1 = arith.constant 0 : i32
    return %c0_i32, %c0_i32_0 : i32, i32
  }
  func.func @transform_3(%arg0: i32) -> (i32, i32) {
    %c0_i32 = arith.constant 0 : i32
    %c0_i32_0 = arith.constant 0 : i32
    return %arg0, %c0_i32 : i32, i32
  }
}

module attributes {stable_mosaic.version = 11 : i64} {
  func.func @_matmul_bias_relu_kernel(%arg0: i32, %arg1: memref<98x1152xbf16, #tpu.memory_space<vmem>>, %arg2: memref<1152x128xbf16, #tpu.memory_space<vmem>>, %arg3: memref<1x128xf32, #tpu.memory_space<vmem>>, %arg4: memref<98x128xbf16, #tpu.memory_space<vmem>>) attributes {dimension_semantics = [#tpu.dimension_semantics<parallel>], iteration_bounds = array<i64: 1>, scalar_prefetch = 0 : i64, scratch_operands = 0 : i64, tpu.core_type = #tpu.core_type<tc>, window_params = [{transform_indices = @transform_0, window_bounds = array<i64: 98, 1152>}, {pipeline_mode = #tpu.pipeline_mode<synchronous>, transform_indices = @transform_1, window_bounds = array<i64: 1152, 128>}, {pipeline_mode = #tpu.pipeline_mode<synchronous>, transform_indices = @transform_2, window_bounds = array<i64: 1, 128>}, {transform_indices = @transform_3, window_bounds = array<i64: 98, 128>}]} {
    %c0 = arith.constant 0 : index
    %c0_0 = arith.constant 0 : index
    %0 = vector.load %arg1[%c0, %c0_0] : memref<98x1152xbf16, #tpu.memory_space<vmem>>, vector<98x1152xbf16>
    %c0_1 = arith.constant 0 : index
    %c0_2 = arith.constant 0 : index
    %1 = vector.load %arg2[%c0_1, %c0_2] : memref<1152x128xbf16, #tpu.memory_space<vmem>>, vector<1152x128xbf16>
    %cst = arith.constant dense<0.000000e+00> : vector<98x128xf32>
    %2 = tpu.matmul %0, %1, %cst {dimension_numbers = #tpu.dot_dimension_numbers<[1], [0], [0], [1], [0, 0, 1, 1], [], []>} : vector<98x1152xbf16>, vector<1152x128xbf16>, vector<98x128xf32> -> vector<98x128xf32>
    %c0_3 = arith.constant 0 : index
    %c0_4 = arith.constant 0 : index
    %3 = vector.load %arg3[%c0_3, %c0_4] : memref<1x128xf32, #tpu.memory_space<vmem>>, vector<1x128xf32>
    %4 = vector.broadcast %3 : vector<1x128xf32> to vector<98x128xf32>
    %5 = arith.addf %2, %4 : vector<98x128xf32>
    %cst_5 = arith.constant 0.000000e+00 : f32
    %6 = vector.broadcast %cst_5 : f32 to vector<98x128xf32>
    %7 = arith.maximumf %5, %6 : vector<98x128xf32>
    %8 = arith.truncf %7 : vector<98x128xf32> to vector<98x128xbf16>
    %c0_6 = arith.constant 0 : index
    %c0_7 = arith.constant 0 : index
    %9 = vector.load %arg4[%c0_6, %c0_7] : memref<98x128xbf16, #tpu.memory_space<vmem>>, vector<98x128xbf16>
    tpu.vector_store %arg4[%c0_6, %c0_7], %8 {strides = array<i32>} : memref<98x128xbf16, #tpu.memory_space<vmem>>, vector<98x128xbf16>,
    return
  }
  func.func @transform_0(%arg0: i32) -> (i32, i32) {
    %c0_i32 = arith.constant 0 : i32
    %c0_i32_0 = arith.constant 0 : i32
    return %arg0, %c0_i32 : i32, i32
  }
  func.func @transform_1(%arg0: i32) -> (i32, i32) {
    %c0_i32 = arith.constant 0 : i32
    %c0_i32_0 = arith.constant 0 : i32
    %c0_i32_1 = arith.constant 0 : i32
    return %c0_i32, %c0_i32_0 : i32, i32
  }
  func.func @transform_2(%arg0: i32) -> (i32, i32) {
    %c0_i32 = arith.constant 0 : i32
    %c0_i32_0 = arith.constant 0 : i32
    %c0_i32_1 = arith.constant 0 : i32
    return %c0_i32, %c0_i32_0 : i32, i32
  }
  func.func @transform_3(%arg0: i32) -> (i32, i32) {
    %c0_i32 = arith.constant 0 : i32
    %c0_i32_0 = arith.constant 0 : i32
    return %arg0, %c0_i32 : i32, i32
  }
}

module attributes {stable_mosaic.version = 11 : i64} {
  func.func @_fc_head_kernel(%arg0: i32, %arg1: memref<2x6272xbf16, #tpu.memory_space<vmem>>, %arg2: memref<6272x256xbf16, #tpu.memory_space<vmem>>, %arg3: memref<1x256xf32, #tpu.memory_space<vmem>>, %arg4: memref<256x448xbf16, #tpu.memory_space<vmem>>, %arg5: memref<1x448xf32, #tpu.memory_space<vmem>>, %arg6: memref<448x448xbf16, #tpu.memory_space<vmem>>, %arg7: memref<1x448xf32, #tpu.memory_space<vmem>>, %arg8: memref<448x128xbf16, #tpu.memory_space<vmem>>, %arg9: memref<1x128xf32, #tpu.memory_space<vmem>>, %arg10: memref<2x128xf32, #tpu.memory_space<vmem>>) attributes {dimension_semantics = [#tpu.dimension_semantics<arbitrary>], iteration_bounds = array<i64: 1>, scalar_prefetch = 0 : i64, scratch_operands = 0 : i64, tpu.core_type = #tpu.core_type<tc>, window_params = [{pipeline_mode = #tpu.pipeline_mode<synchronous>, transform_indices = @transform_0, window_bounds = array<i64: 2, 6272>}, {pipeline_mode = #tpu.pipeline_mode<synchronous>, transform_indices = @transform_1, window_bounds = array<i64: 6272, 256>}, {pipeline_mode = #tpu.pipeline_mode<synchronous>, transform_indices = @transform_2, window_bounds = array<i64: 1, 256>}, {pipeline_mode = #tpu.pipeline_mode<synchronous>, transform_indices = @transform_3, window_bounds = array<i64: 256, 448>}, {pipeline_mode = #tpu.pipeline_mode<synchronous>, transform_indices = @transform_4, window_bounds = array<i64: 1, 448>}, {pipeline_mode = #tpu.pipeline_mode<synchronous>, transform_indices = @transform_5, window_bounds = array<i64: 448, 448>}, {pipeline_mode = #tpu.pipeline_mode<synchronous>, transform_indices = @transform_6, window_bounds = array<i64: 1, 448>}, {pipeline_mode = #tpu.pipeline_mode<synchronous>, transform_indices = @transform_7, window_bounds = array<i64: 448, 128>}, {pipeline_mode = #tpu.pipeline_mode<synchronous>, transform_indices = @transform_8, window_bounds = array<i64: 1, 128>}, {pipeline_mode = #tpu.pipeline_mode<synchronous>, transform_indices = @transform_9, window_bounds = array<i64: 2, 128>}]} {
    %c0 = arith.constant 0 : index
    %c0_0 = arith.constant 0 : index
    %0 = vector.load %arg1[%c0, %c0_0] : memref<2x6272xbf16, #tpu.memory_space<vmem>>, vector<2x6272xbf16>
    %c0_1 = arith.constant 0 : index
    %c0_2 = arith.constant 0 : index
    %1 = vector.load %arg2[%c0_1, %c0_2] : memref<6272x256xbf16, #tpu.memory_space<vmem>>, vector<6272x256xbf16>
    %cst = arith.constant dense<0.000000e+00> : vector<2x256xf32>
    %2 = tpu.matmul %0, %1, %cst {dimension_numbers = #tpu.dot_dimension_numbers<[1], [0], [0], [1], [0, 0, 1, 1], [], []>} : vector<2x6272xbf16>, vector<6272x256xbf16>, vector<2x256xf32> -> vector<2x256xf32>
    %c0_3 = arith.constant 0 : index
    %c0_4 = arith.constant 0 : index
    %3 = vector.load %arg3[%c0_3, %c0_4] : memref<1x256xf32, #tpu.memory_space<vmem>>, vector<1x256xf32>
    %4 = vector.broadcast %3 : vector<1x256xf32> to vector<2x256xf32>
    %5 = arith.addf %2, %4 : vector<2x256xf32>
    %cst_5 = arith.constant 0.000000e+00 : f32
    %6 = vector.broadcast %cst_5 : f32 to vector<2x256xf32>
    %7 = arith.maximumf %5, %6 : vector<2x256xf32>
    %8 = arith.truncf %7 : vector<2x256xf32> to vector<2x256xbf16>
    %c0_6 = arith.constant 0 : index
    %c0_7 = arith.constant 0 : index
    %9 = vector.load %arg4[%c0_6, %c0_7] : memref<256x448xbf16, #tpu.memory_space<vmem>>, vector<256x448xbf16>
    %cst_8 = arith.constant dense<0.000000e+00> : vector<2x448xf32>
    %10 = tpu.matmul %8, %9, %cst_8 {dimension_numbers = #tpu.dot_dimension_numbers<[1], [0], [0], [1], [0, 0, 1, 1], [], []>} : vector<2x256xbf16>, vector<256x448xbf16>, vector<2x448xf32> -> vector<2x448xf32>
    %c0_9 = arith.constant 0 : index
    %c0_10 = arith.constant 0 : index
    %11 = vector.load %arg5[%c0_9, %c0_10] : memref<1x448xf32, #tpu.memory_space<vmem>>, vector<1x448xf32>
    %12 = vector.broadcast %11 : vector<1x448xf32> to vector<2x448xf32>
    %13 = arith.addf %10, %12 : vector<2x448xf32>
    %cst_11 = arith.constant 0.000000e+00 : f32
    %14 = vector.broadcast %cst_11 : f32 to vector<2x448xf32>
    %15 = arith.maximumf %13, %14 : vector<2x448xf32>
    %16 = arith.truncf %15 : vector<2x448xf32> to vector<2x448xbf16>
    %c0_12 = arith.constant 0 : index
    %c0_13 = arith.constant 0 : index
    %17 = vector.load %arg6[%c0_12, %c0_13] : memref<448x448xbf16, #tpu.memory_space<vmem>>, vector<448x448xbf16>
    %cst_14 = arith.constant dense<0.000000e+00> : vector<2x448xf32>
    %18 = tpu.matmul %16, %17, %cst_14 {dimension_numbers = #tpu.dot_dimension_numbers<[1], [0], [0], [1], [0, 0, 1, 1], [], []>} : vector<2x448xbf16>, vector<448x448xbf16>, vector<2x448xf32> -> vector<2x448xf32>
    %c0_15 = arith.constant 0 : index
    %c0_16 = arith.constant 0 : index
    %19 = vector.load %arg7[%c0_15, %c0_16] : memref<1x448xf32, #tpu.memory_space<vmem>>, vector<1x448xf32>
    %20 = vector.broadcast %19 : vector<1x448xf32> to vector<2x448xf32>
    %21 = arith.addf %18, %20 : vector<2x448xf32>
    %cst_17 = arith.constant 0.000000e+00 : f32
    %22 = vector.broadcast %cst_17 : f32 to vector<2x448xf32>
    %23 = arith.maximumf %21, %22 : vector<2x448xf32>
    %24 = arith.truncf %23 : vector<2x448xf32> to vector<2x448xbf16>
    %c0_18 = arith.constant 0 : index
    %c0_19 = arith.constant 0 : index
    %25 = vector.load %arg8[%c0_18, %c0_19] : memref<448x128xbf16, #tpu.memory_space<vmem>>, vector<448x128xbf16>
    %cst_20 = arith.constant dense<0.000000e+00> : vector<2x128xf32>
    %26 = tpu.matmul %24, %25, %cst_20 {dimension_numbers = #tpu.dot_dimension_numbers<[1], [0], [0], [1], [0, 0, 1, 1], [], []>} : vector<2x448xbf16>, vector<448x128xbf16>, vector<2x128xf32> -> vector<2x128xf32>
    %c0_21 = arith.constant 0 : index
    %c0_22 = arith.constant 0 : index
    %27 = vector.load %arg9[%c0_21, %c0_22] : memref<1x128xf32, #tpu.memory_space<vmem>>, vector<1x128xf32>
    %28 = vector.broadcast %27 : vector<1x128xf32> to vector<2x128xf32>
    %29 = arith.addf %26, %28 : vector<2x128xf32>
    %c0_23 = arith.constant 0 : index
    %c0_24 = arith.constant 0 : index
    %30 = vector.load %arg10[%c0_23, %c0_24] : memref<2x128xf32, #tpu.memory_space<vmem>>, vector<2x128xf32>
    tpu.vector_store %arg10[%c0_23, %c0_24], %29 {strides = array<i32>} : memref<2x128xf32, #tpu.memory_space<vmem>>, vector<2x128xf32>,
    return
  }
  func.func @transform_0(%arg0: i32) -> (i32, i32) {
    %c0_i32 = arith.constant 0 : i32
    %c0_i32_0 = arith.constant 0 : i32
    %c0_i32_1 = arith.constant 0 : i32
    return %c0_i32, %c0_i32_0 : i32, i32
  }
  func.func @transform_1(%arg0: i32) -> (i32, i32) {
    %c0_i32 = arith.constant 0 : i32
    %c0_i32_0 = arith.constant 0 : i32
    %c0_i32_1 = arith.constant 0 : i32
    return %c0_i32, %c0_i32_0 : i32, i32
  }
  func.func @transform_2(%arg0: i32) -> (i32, i32) {
    %c0_i32 = arith.constant 0 : i32
    %c0_i32_0 = arith.constant 0 : i32
    %c0_i32_1 = arith.constant 0 : i32
    return %c0_i32, %c0_i32_0 : i32, i32
  }
  func.func @transform_3(%arg0: i32) -> (i32, i32) {
    %c0_i32 = arith.constant 0 : i32
    %c0_i32_0 = arith.constant 0 : i32
    %c0_i32_1 = arith.constant 0 : i32
    return %c0_i32, %c0_i32_0 : i32, i32
  }
  func.func @transform_4(%arg0: i32) -> (i32, i32) {
    %c0_i32 = arith.constant 0 : i32
    %c0_i32_0 = arith.constant 0 : i32
    %c0_i32_1 = arith.constant 0 : i32
    return %c0_i32, %c0_i32_0 : i32, i32
  }
  func.func @transform_5(%arg0: i32) -> (i32, i32) {
    %c0_i32 = arith.constant 0 : i32
    %c0_i32_0 = arith.constant 0 : i32
    %c0_i32_1 = arith.constant 0 : i32
    return %c0_i32, %c0_i32_0 : i32, i32
  }
  func.func @transform_6(%arg0: i32) -> (i32, i32) {
    %c0_i32 = arith.constant 0 : i32
    %c0_i32_0 = arith.constant 0 : i32
    %c0_i32_1 = arith.constant 0 : i32
    return %c0_i32, %c0_i32_0 : i32, i32
  }
  func.func @transform_7(%arg0: i32) -> (i32, i32) {
    %c0_i32 = arith.constant 0 : i32
    %c0_i32_0 = arith.constant 0 : i32
    %c0_i32_1 = arith.constant 0 : i32
    return %c0_i32, %c0_i32_0 : i32, i32
  }
  func.func @transform_8(%arg0: i32) -> (i32, i32) {
    %c0_i32 = arith.constant 0 : i32
    %c0_i32_0 = arith.constant 0 : i32
    %c0_i32_1 = arith.constant 0 : i32
    return %c0_i32, %c0_i32_0 : i32, i32
  }
  func.func @transform_9(%arg0: i32) -> (i32, i32) {
    %c0_i32 = arith.constant 0 : i32
    %c0_i32_0 = arith.constant 0 : i32
    %c0_i32_1 = arith.constant 0 : i32
    return %c0_i32, %c0_i32_0 : i32, i32
  }
}

</mosaic_0001>

<bundles_post_ra>
// kernel: cnn_policy_forward.4
= control target key start
LH: loop header
LB: loop body
LE: loop exit
PB: predicated region body
PF: predicated region fallthrough
CT: control target
= control target key end

     0   :  { %s1844_s12 = smov 0   ;;  %s1846_s13 = smov 0   ;;  %s2154_s0 = inlined_call_operand.vmem [shape: bf16[800,256], index: 0, kind: input, shape index: {}]   ;;  %s2155_s1 = inlined_call_operand.vmem [shape: bf16[256,128], index: 1, kind: input, shape index: {}]   ;;  %s2156_s2 = inlined_call_operand.vmem [shape: f32[1,128], index: 2, kind: input, shape index: {}]   ;;  %s2157_s3 = inlined_call_operand.vmem [shape: bf16[800,128], index: 3, kind: output, shape index: {}]  }
   0x1   :  { %s1848_s14 = smov 0  }
   0x2 LB: > { %s1857_s15 = sadd.s32 4294967295, %s1790_s14   ;;  %s1859_s16 = sadd.s32 1, %s1790_s14   ;;  %s1790_s14 = sphi %s1848_s14, %s2164_s14   ;;  %s1786_s13 = sphi %s1846_s13, %s2163_s13   ;;  %s1782_s12 = sphi %s1844_s12, %s2162_s12  }
   0x3   : > { %s85_s17 = ssub.s32 %s1790_s14, %s1859_s16  ;;  %s88_s18 = sadd.s32 1, %s1786_s13 }
   0x4   : > { %p86_p0 = scmp.eq.s32.totalorder %s85_s17, 0  ;;  %p98_p1 = scmp.ne.s32.totalorder %s1786_s13, %s1782_s12 }
   0x5   : > { %p99_p2 = scmp.eq.s32.totalorder %s1857_s15, 3  ;;  %p1222_p3 = scmp.ge.s32.totalorder %s1790_s14, 1 }
   0x6   : > { %s1867_s19 = scalar_select %p86_p0, %s1786_s13, %s88_s18  }
   0x7   : > { %p1869_p4 = por %p99_p2, %p98_p1  ;;  %p149_p5 = scmp.lt.s32.totalorder %s1790_s14, 5 }
   0x9   : > { %p150_p6 = pnand %p1222_p3, %p149_p5 }
   0xa   : > { %v1672_v0 = vld [vmem:[%s2155_s1 + $0x40] sm:$0xff] (!%p150_p6)   ;;  %s1877_s23 = sshll.u32 (!%p150_p6), %s1857_s15, 5  ;;  %v1674_v2 = vld [vmem:[%s2155_s1 + $0x48] sm:$0xff] (!%p150_p6)   ;;  %v1676_v4 = vld [vmem:[%s2155_s1 + $0x50] sm:$0xff] (!%p150_p6)   ;;  %s175_s18 = sand.u32 (!%p150_p6), 1, %s1782_s12  }
   0xb   : > { %153 = sbr.rel (%p150_p6) target bundleno = 394 (0x18a), region = 32  ;;  %v1673_v1 = vld [vmem:[%s2155_s1] sm:$0xff] (!%p150_p6)   ;;  %1456 = vmatprep.subr.bf16.mxu0 (!%p150_p6), %v1672_v0  ;;  %1568 = vmatprep.subr.bf16.mxu1 (!%p150_p6), %v1672_v0  ;;  %v1675_v3 = vld [vmem:[%s2155_s1 + $0x8] sm:$0xff] (!%p150_p6)   ;;  %p184_p7 = scmp.lt.s32.totalorder (!%p150_p6), %s1877_s23, 99  ;;  %v1677_v5 = vld [vmem:[%s2155_s1 + $0x10] sm:$0xff] (!%p150_p6)  }
   0xc   : > { %1457 = vmatpush3.bf16.msra.mxu0 (!%p150_p6), %v1673_v1  ;;  %1576 = vmatpush3.bf16.msra.mxu1 (!%p150_p6), %v1673_v1  ;;  %v1678_v6 = vld [vmem:[%s2155_s1 + $0x58] sm:$0xff] (!%p150_p6)   ;;  %v1680_v8 = vld [vmem:[%s2155_s1 + $0x60] sm:$0xff] (!%p150_p6)   ;;  %v1682_v10 = vld [vmem:[%s2155_s1 + $0x68] sm:$0xff] (!%p150_p6)   ;;  %s1223_s21 = sshll.u32 (!%p150_p6), %s175_s18, 7 }
   0xd   : > { %1458 = vmatprep.subr.bf16.mxu0 (!%p150_p6), %v1674_v2  ;;  %1569 = vmatprep.subr.bf16.mxu1 (!%p150_p6), %v1674_v2  ;;  %v1679_v7 = vld [vmem:[%s2155_s1 + $0x18] sm:$0xff] (!%p150_p6)   ;;  %v1681_v9 = vld [vmem:[%s2155_s1 + $0x20] sm:$0xff] (!%p150_p6)   ;;  %v1683_v13 = vld [vmem:[%s2155_s1 + $0x28] sm:$0xff] (!%p150_p6)   ;;  %s1973_s12 = scalar_lea.vmem (!%p150_p6), [#allocation2], %s1223_s21  }
   0xe   : > { %v1684_v14 = vld [vmem:[%s2155_s1 + $0x70] sm:$0xff] (!%p150_p6)   ;;  %v1686_v16 = vld [vmem:[%s2155_s1 + $0x78] sm:$0xff] (!%p150_p6)   ;;  %v1966_v50 = vld [vmem:[%s2156_s2] ss:$0 sm:$0xff] (!%p150_p6) }
   0xf   : > { %v1685_v15 = vld [vmem:[%s2155_s1 + $0x30] sm:$0xff] (!%p150_p6)   ;;  %v1687_v17 = vld [vmem:[%s2155_s1 + $0x38] sm:$0xff] (!%p150_p6)  }
  0x10   : > { %1459 = vmatpush3.bf16.msra.mxu0 (!%p150_p6), %v1675_v3  ;;  %1577 = vmatpush3.bf16.msra.mxu1 (!%p150_p6), %v1675_v3 }
  0x11   : > { %1460 = vmatprep.subr.bf16.mxu0 (!%p150_p6), %v1676_v4  ;;  %1570 = vmatprep.subr.bf16.mxu1 (!%p150_p6), %v1676_v4 }
  0x12   : > { %s185_s7 = scalar_select %p184_p7, %s1877_s23, 99 }
  0x13   : > { %s889_s22 = ssub.s32 (%p1869_p4), 100, %s1877_s23 }
  0x14   : > { %1461 = vmatpush3.bf16.msra.mxu0 %v1677_v5  ;;  %1578 = vmatpush3.bf16.msra.mxu1 %v1677_v5  ;;  %s1325_s14 = sshll.u32 %s185_s7, 3  ;;  %p890_p8 = scmp.lt.s32.totalorder (%p1869_p4), %s889_s22, 32 }
  0x15   : > { %1462 = vmatprep.subr.bf16.mxu0 %v1678_v6  ;;  %1571 = vmatprep.subr.bf16.mxu1 %v1678_v6  ;;  %s1908_s24 = scalar_lea.vmem %s2154_s0, %s1325_s14 }
  0x16   : > { %v1690_v11 = vld [vmem:[%s1908_s24 + $0x4] ss:$8 sps:$4 sm:$0xff]   ;;  %v1688_v18 = vld [vmem:[%s1908_s24] ss:$8 sps:$4 sm:$0xff]   ;;  %v1694_v20 = vld [vmem:[%s1908_s24 + $0x14] ss:$8 sps:$4 sm:$0xff]  }
  0x17   : > { %v1693_v12 = vld [vmem:[%s1908_s24 + $0x84] ss:$8 sps:$4 sm:$0xff]   ;;  %560 = vmatprep.mubr.bf16.mxu0 %v1690_v11  ;;  %v1691_v19 = vld [vmem:[%s1908_s24 + $0x80] ss:$8 sps:$4 sm:$0xff]   ;;  %v1696_v21 = vld [vmem:[%s1908_s24 + $0x94] ss:$8 sps:$4 sm:$0xff]  }
  0x18   : > { %1463 = vmatpush3.bf16.msra.mxu0 %v1679_v7  ;;  %1579 = vmatpush3.bf16.msra.mxu1 %v1679_v7  ;;  %v1698_v22 = vld [vmem:[%s1908_s24 + $0x10] ss:$8 sps:$4 sm:$0xff]   ;;  %v1700_v24 = vld [vmem:[%s1908_s24 + $0x24] ss:$8 sps:$4 sm:$0xff]   ;;  %v1704_v26 = vld [vmem:[%s1908_s24 + $0x20] ss:$8 sps:$4 sm:$0xff]  }
  0x19   : > { %1464 = vmatprep.subr.bf16.mxu0 %v1680_v8  ;;  %1572 = vmatprep.subr.bf16.mxu1 %v1680_v8  ;;  %v1699_v23 = vld [vmem:[%s1908_s24 + $0x90] ss:$8 sps:$4 sm:$0xff]   ;;  %v1702_v25 = vld [vmem:[%s1908_s24 + $0xa4] ss:$8 sps:$4 sm:$0xff]   ;;  %v1705_v27 = vld [vmem:[%s1908_s24 + $0xa0] ss:$8 sps:$4 sm:$0xff]  }
  0x1a   : > { %624 = vmatprep.mubr.bf16.mxu1 %v1693_v12  ;;  %v1706_v28 = vld [vmem:[%s1908_s24 + $0x34] ss:$8 sps:$4 sm:$0xff]   ;;  %v1710_v30 = vld [vmem:[%s1908_s24 + $0x30] ss:$8 sps:$4 sm:$0xff]   ;;  %v1712_v32 = vld [vmem:[%s1908_s24 + $0x44] ss:$8 sps:$4 sm:$0xff]  }
  0x1b   : > { %v1708_v29 = vld [vmem:[%s1908_s24 + $0xb4] ss:$8 sps:$4 sm:$0xff]   ;;  %v1711_v31 = vld [vmem:[%s1908_s24 + $0xb0] ss:$8 sps:$4 sm:$0xff]   ;;  %v1714_v33 = vld [vmem:[%s1908_s24 + $0xc4] ss:$8 sps:$4 sm:$0xff]  }
  0x1c   : > { %1465 = vmatpush3.bf16.msra.mxu0 %v1681_v9  ;;  %1580 = vmatpush3.bf16.msra.mxu1 %v1681_v9  ;;  %v1716_v34 = vld [vmem:[%s1908_s24 + $0x40] ss:$8 sps:$4 sm:$0xff]   ;;  %v1718_v36 = vld [vmem:[%s1908_s24 + $0x54] ss:$8 sps:$4 sm:$0xff]   ;;  %v1722_v38 = vld [vmem:[%s1908_s24 + $0x50] ss:$8 sps:$4 sm:$0xff]  }
  0x1d   : > { %1466 = vmatprep.subr.bf16.mxu0 %v1682_v10  ;;  %1573 = vmatprep.subr.bf16.mxu1 %v1682_v10  ;;  %v1717_v35 = vld [vmem:[%s1908_s24 + $0xc0] ss:$8 sps:$4 sm:$0xff]   ;;  %v1720_v37 = vld [vmem:[%s1908_s24 + $0xd4] ss:$8 sps:$4 sm:$0xff]   ;;  %v1723_v39 = vld [vmem:[%s1908_s24 + $0xd0] ss:$8 sps:$4 sm:$0xff]  }
  0x1e   : > { %v1724_v40 = vld [vmem:[%s1908_s24 + $0x64] ss:$8 sps:$4 sm:$0xff]   ;;  %v1728_v42 = vld [vmem:[%s1908_s24 + $0x60] ss:$8 sps:$4 sm:$0xff]   ;;  %v1730_v44 = vld [vmem:[%s1908_s24 + $0x74] ss:$8 sps:$4 sm:$0xff]  }
  0x1f   : > { %v1726_v41 = vld [vmem:[%s1908_s24 + $0xe4] ss:$8 sps:$4 sm:$0xff]   ;;  %v1729_v43 = vld [vmem:[%s1908_s24 + $0xe0] ss:$8 sps:$4 sm:$0xff]   ;;  %v1732_v45 = vld [vmem:[%s1908_s24 + $0xf4] ss:$8 sps:$4 sm:$0xff]  }
  0x20   : > { %1467 = vmatpush3.bf16.msra.mxu0 %v1683_v13  ;;  %1581 = vmatpush3.bf16.msra.mxu1 %v1683_v13  ;;  %v1734_v46 = vld [vmem:[%s1908_s24 + $0x70] ss:$8 sps:$4 sm:$0xff]  }
  0x21   : > { %1468 = vmatprep.subr.bf16.mxu0 %v1684_v14  ;;  %1574 = vmatprep.subr.bf16.mxu1 %v1684_v14  ;;  %v1735_v47 = vld [vmem:[%s1908_s24 + $0xf0] ss:$8 sps:$4 sm:$0xff]   ;;  %s1358_s24 = sshll.u32 (%p1869_p4), %s1857_s15, 7 }
  0x22   : > { %s2026_s27 = scalar_lea.vmem (%p1869_p4), %s2157_s3, %s1358_s24  }
  0x24   : > { %1469 = vmatpush3.bf16.msra.mxu0 %v1685_v15  ;;  %1582 = vmatpush3.bf16.msra.mxu1 %v1685_v15 }
  0x25   : > { %1470 = vmatprep.subr.bf16.mxu0 %v1686_v16  ;;  %1575 = vmatprep.subr.bf16.mxu1 %v1686_v16 }
  0x28   : > { %1471 = vmatpush3.bf16.msra.mxu0 %v1687_v17  ;;  %1583 = vmatpush3.bf16.msra.mxu1 %v1687_v17 }
  0x2b   : > { %561 = vmatmul.mubr.bf16.vlgmr.msra.gmra.mrb[0].mxu0 %v1688_v18  ;;  %625 = vmatmul.mubr.bf16.vlgmr.msra.gmra.mrb[0].mxu1 %v1691_v19 }
  0x2c   : > { %568 = vmatprep.mubr.bf16.mxu0 %v1694_v20  ;;  %632 = vmatprep.mubr.bf16.mxu1 %v1696_v21 }
  0x33   : > { %569 = vmatmul.mubr.bf16.gmra.mrb[4].mxu0 %v1698_v22  ;;  %633 = vmatmul.mubr.bf16.gmra.mrb[4].mxu1 %v1699_v23 }
  0x34   : > { %576 = vmatprep.mubr.bf16.mxu0 %v1700_v24  ;;  %640 = vmatprep.mubr.bf16.mxu1 %v1702_v25 }
  0x3b   : > { %577 = vmatmul.mubr.bf16.gmra.mrb[8].mxu0 %v1704_v26  ;;  %641 = vmatmul.mubr.bf16.gmra.mrb[8].mxu1 %v1705_v27 }
  0x3c   : > { %584 = vmatprep.mubr.bf16.mxu0 %v1706_v28  ;;  %648 = vmatprep.mubr.bf16.mxu1 %v1708_v29 }
  0x43   : > { %585 = vmatmul.mubr.bf16.gmra.mrb[12].mxu0 %v1710_v30  ;;  %649 = vmatmul.mubr.bf16.gmra.mrb[12].mxu1 %v1711_v31 }
  0x44   : > { %592 = vmatprep.mubr.bf16.mxu0 %v1712_v32  ;;  %656 = vmatprep.mubr.bf16.mxu1 %v1714_v33 }
  0x4b   : > { %593 = vmatmul.mubr.bf16.gmra.mrb[16].mxu0 %v1716_v34  ;;  %657 = vmatmul.mubr.bf16.gmra.mrb[16].mxu1 %v1717_v35 }
  0x4c   : > { %600 = vmatprep.mubr.bf16.mxu0 %v1718_v36  ;;  %664 = vmatprep.mubr.bf16.mxu1 %v1720_v37 }
  0x53   : > { %601 = vmatmul.mubr.bf16.gmra.mrb[20].mxu0 %v1722_v38  ;;  %665 = vmatmul.mubr.bf16.gmra.mrb[20].mxu1 %v1723_v39 }
  0x54   : > { %608 = vmatprep.mubr.bf16.mxu0 %v1724_v40  ;;  %672 = vmatprep.mubr.bf16.mxu1 %v1726_v41 }
  0x5b   : > { %609 = vmatmul.mubr.bf16.gmra.mrb[24].mxu0 %v1728_v42  ;;  %673 = vmatmul.mubr.bf16.gmra.mrb[24].mxu1 %v1729_v43 }
  0x5c   : > { %616 = vmatprep.mubr.bf16.mxu0 %v1730_v44  ;;  %680 = vmatprep.mubr.bf16.mxu1 %v1732_v45 }
  0x63   : > { %617 = vmatmul.mubr.bf16.gmra.mrb[28].mxu0 %v1734_v46  ;;  %681 = vmatmul.mubr.bf16.gmra.mrb[28].mxu1 %v1735_v47 }
  0xfe   : > { %v1472_v48 = vpop.f32.mrb[0].mxu0  ;;  %v1520_v49 = vpop.f32.mrb[0].mxu1 }
  0xff   : > { %v1473_v51 = vpop.f32.mrb[1].mxu0  ;;  %v1521_v52 = vpop.f32.mrb[1].mxu1 }
 0x100   : > { %v1474_v53 = vadd.f32 %v1473_v51, %v1472_v48  ;;  %v1522_v54 = vadd.f32 %v1521_v52, %v1520_v49  ;;  %v1475_v55 = vpop.f32.mrb[2].mxu0  ;;  %v1523_v56 = vpop.f32.mrb[2].mxu1 }
 0x101   : > { %v1476_v57 = vpop.f32.mrb[3].mxu0  ;;  %v1524_v58 = vpop.f32.mrb[3].mxu1 }
 0x102   : > { %v563_v59 = vadd.f32 %v1474_v53, %v1966_v50  ;;  %v627_v60 = vadd.f32 %v1522_v54, %v1966_v50  ;;  %v1477_v61 = vadd.f32 %v1476_v57, %v1475_v55  ;;  %v1525_v62 = vadd.f32 %v1524_v58, %v1523_v56 }
 0x104   : > { %v566_v63 = vadd.f32 %v1477_v61, %v1966_v50  ;;  %v630_v0 = vadd.f32 %v1525_v62, %v1966_v50  ;;  %v689_v1 = vmax.f32 %v563_v59, 0.0  ;;  %v705_v2 = vmax.f32 %v627_v60, 0.0 }
 0x106   : > { %v690_v3 = vmax.f32 %v566_v63, 0.0  ;;  %v706_v4 = vmax.f32 %v630_v0, 0.0  ;;  %v1478_v5 = vpop.f32.mrb[4].mxu0  ;;  %v1526_v6 = vpop.f32.mrb[4].mxu1 }
 0x107   : > { %v1479_v7 = vpop.f32.mrb[5].mxu0  ;;  %v1527_v8 = vpop.f32.mrb[5].mxu1 }
 0x108   : > { %v1364_v9 = vpack.c.bf16 %v690_v3, %v689_v1  ;;  %v1404_v10 = vpack.c.bf16 %v706_v4, %v705_v2  ;;  %v1480_v11 = vadd.f32 %v1479_v7, %v1478_v5  ;;  %v1528_v12 = vadd.f32 %v1527_v8, %v1526_v6  ;;  %v1481_v13 = vpop.f32.mrb[6].mxu0  ;;  %v1529_v14 = vpop.f32.mrb[6].mxu1 }
 0x109   : > { %v1482_v15 = vpop.f32.mrb[7].mxu0  ;;  %v1530_v16 = vpop.f32.mrb[7].mxu1 }
 0x10a   : > { %1365 = vst [vmem:[%s1973_s12] sm:$0xff] %v1364_v9   ;;  %1448 = vst [vmem:[%s1973_s12 + $0x40] sm:$0xff] %v1404_v10   ;;  %v571_v17 = vadd.f32 %v1480_v11, %v1966_v50  ;;  %v635_v18 = vadd.f32 %v1528_v12, %v1966_v50  ;;  %v1483_v19 = vadd.f32 %v1482_v15, %v1481_v13 }
 0x10b   : > { %v1531_v20 = vadd.f32 %v1530_v16, %v1529_v14 }
 0x10c   : > { %v574_v21 = vadd.f32 %v1483_v19, %v1966_v50  ;;  %v691_v23 = vmax.f32 %v571_v17, 0.0  ;;  %v707_v24 = vmax.f32 %v635_v18, 0.0 }
 0x10d   : > { %v638_v22 = vadd.f32 %v1531_v20, %v1966_v50 }
 0x10e   : > { %v692_v25 = vmax.f32 %v574_v21, 0.0  ;;  %v1484_v27 = vpop.f32.mrb[8].mxu0  ;;  %v1532_v28 = vpop.f32.mrb[8].mxu1 }
 0x10f   : > { %v708_v26 = vmax.f32 %v638_v22, 0.0  ;;  %v1485_v29 = vpop.f32.mrb[9].mxu0  ;;  %v1533_v30 = vpop.f32.mrb[9].mxu1 }
 0x110   : > { %v1369_v31 = vpack.c.bf16 %v692_v25, %v691_v23  ;;  %v1486_v33 = vadd.f32 %v1485_v29, %v1484_v27  ;;  %v1534_v34 = vadd.f32 %v1533_v30, %v1532_v28  ;;  %v1487_v35 = vpop.f32.mrb[10].mxu0  ;;  %v1535_v36 = vpop.f32.mrb[10].mxu1 }
 0x111   : > { %v1409_v32 = vpack.c.bf16 %v708_v26, %v707_v24  ;;  %v1488_v37 = vpop.f32.mrb[11].mxu0  ;;  %v1536_v38 = vpop.f32.mrb[11].mxu1 }
 0x112   : > { %1441 = vst [vmem:[%s1973_s12 + $0x8] sm:$0xff] %v1369_v31   ;;  %v579_v39 = vadd.f32 %v1486_v33, %v1966_v50  ;;  %v643_v40 = vadd.f32 %v1534_v34, %v1966_v50  ;;  %v1489_v41 = vadd.f32 %v1488_v37, %v1487_v35  ;;  %v1537_v42 = vadd.f32 %v1536_v38, %v1535_v36 }
 0x113   : > { %1449 = vst [vmem:[%s1973_s12 + $0x48] sm:$0xff] %v1409_v32  }
 0x114   : > { %v582_v43 = vadd.f32 %v1489_v41, %v1966_v50  ;;  %v646_v44 = vadd.f32 %v1537_v42, %v1966_v50  ;;  %v693_v45 = vmax.f32 %v579_v39, 0.0  ;;  %v709_v46 = vmax.f32 %v643_v40, 0.0 }
 0x116   : > { %v694_v47 = vmax.f32 %v582_v43, 0.0  ;;  %v710_v48 = vmax.f32 %v646_v44, 0.0  ;;  %v1490_v49 = vpop.f32.mrb[12].mxu0  ;;  %v1538_v51 = vpop.f32.mrb[12].mxu1 }
 0x117   : > { %v1491_v52 = vpop.f32.mrb[13].mxu0  ;;  %v1539_v53 = vpop.f32.mrb[13].mxu1 }
 0x118   : > { %v1374_v54 = vpack.c.bf16 %v694_v47, %v693_v45  ;;  %v1414_v55 = vpack.c.bf16 %v710_v48, %v709_v46  ;;  %v1492_v56 = vadd.f32 %v1491_v52, %v1490_v49  ;;  %v1540_v57 = vadd.f32 %v1539_v53, %v1538_v51  ;;  %v1493_v58 = vpop.f32.mrb[14].mxu0  ;;  %v1541_v59 = vpop.f32.mrb[14].mxu1 }
 0x119   : > { %v1494_v60 = vpop.f32.mrb[15].mxu0  ;;  %v1542_v61 = vpop.f32.mrb[15].mxu1 }
 0x11a   : > { %1442 = vst [vmem:[%s1973_s12 + $0x10] sm:$0xff] %v1374_v54   ;;  %1450 = vst [vmem:[%s1973_s12 + $0x50] sm:$0xff] %v1414_v55   ;;  %v587_v62 = vadd.f32 %v1492_v56, %v1966_v50  ;;  %v651_v63 = vadd.f32 %v1540_v57, %v1966_v50  ;;  %v1495_v0 = vadd.f32 %v1494_v60, %v1493_v58 }
 0x11b   : > { %v1543_v1 = vadd.f32 %v1542_v61, %v1541_v59 }
 0x11c   : > { %v590_v2 = vadd.f32 %v1495_v0, %v1966_v50  ;;  %v695_v4 = vmax.f32 %v587_v62, 0.0  ;;  %v711_v5 = vmax.f32 %v651_v63, 0.0 }
 0x11d   : > { %v654_v3 = vadd.f32 %v1543_v1, %v1966_v50 }
 0x11e   : > { %v696_v6 = vmax.f32 %v590_v2, 0.0  ;;  %v1496_v8 = vpop.f32.mrb[16].mxu0  ;;  %v1544_v9 = vpop.f32.mrb[16].mxu1 }
 0x11f   : > { %v712_v7 = vmax.f32 %v654_v3, 0.0  ;;  %v1497_v10 = vpop.f32.mrb[17].mxu0  ;;  %v1545_v11 = vpop.f32.mrb[17].mxu1 }
 0x120   : > { %v1379_v12 = vpack.c.bf16 %v696_v6, %v695_v4  ;;  %v1498_v14 = vadd.f32 %v1497_v10, %v1496_v8  ;;  %v1546_v15 = vadd.f32 %v1545_v11, %v1544_v9  ;;  %v1499_v16 = vpop.f32.mrb[18].mxu0  ;;  %v1547_v17 = vpop.f32.mrb[18].mxu1 }
 0x121   : > { %v1419_v13 = vpack.c.bf16 %v712_v7, %v711_v5  ;;  %v1500_v18 = vpop.f32.mrb[19].mxu0  ;;  %v1548_v19 = vpop.f32.mrb[19].mxu1 }
 0x122   : > { %1443 = vst [vmem:[%s1973_s12 + $0x18] sm:$0xff] %v1379_v12   ;;  %v595_v20 = vadd.f32 %v1498_v14, %v1966_v50  ;;  %v659_v21 = vadd.f32 %v1546_v15, %v1966_v50  ;;  %v1501_v22 = vadd.f32 %v1500_v18, %v1499_v16  ;;  %v1549_v23 = vadd.f32 %v1548_v19, %v1547_v17 }
 0x123   : > { %1451 = vst [vmem:[%s1973_s12 + $0x58] sm:$0xff] %v1419_v13  }
 0x124   : > { %v598_v24 = vadd.f32 %v1501_v22, %v1966_v50  ;;  %v662_v25 = vadd.f32 %v1549_v23, %v1966_v50  ;;  %v697_v26 = vmax.f32 %v595_v20, 0.0  ;;  %v713_v27 = vmax.f32 %v659_v21, 0.0 }
 0x126   : > { %v698_v28 = vmax.f32 %v598_v24, 0.0  ;;  %v714_v29 = vmax.f32 %v662_v25, 0.0  ;;  %v1502_v30 = vpop.f32.mrb[20].mxu0  ;;  %v1550_v31 = vpop.f32.mrb[20].mxu1 }
 0x127   : > { %v1503_v32 = vpop.f32.mrb[21].mxu0  ;;  %v1551_v33 = vpop.f32.mrb[21].mxu1 }
 0x128   : > { %v1384_v34 = vpack.c.bf16 %v698_v28, %v697_v26  ;;  %v1424_v35 = vpack.c.bf16 %v714_v29, %v713_v27  ;;  %v1504_v36 = vadd.f32 %v1503_v32, %v1502_v30  ;;  %v1552_v37 = vadd.f32 %v1551_v33, %v1550_v31  ;;  %v1505_v38 = vpop.f32.mrb[22].mxu0  ;;  %v1553_v39 = vpop.f32.mrb[22].mxu1 }
 0x129   : > { %v1506_v40 = vpop.f32.mrb[23].mxu0  ;;  %v1554_v41 = vpop.f32.mrb[23].mxu1 }
 0x12a   : > { %1444 = vst [vmem:[%s1973_s12 + $0x20] sm:$0xff] %v1384_v34   ;;  %1452 = vst [vmem:[%s1973_s12 + $0x60] sm:$0xff] %v1424_v35   ;;  %v603_v42 = vadd.f32 %v1504_v36, %v1966_v50  ;;  %v667_v43 = vadd.f32 %v1552_v37, %v1966_v50  ;;  %v1507_v44 = vadd.f32 %v1506_v40, %v1505_v38 }
 0x12b   : > { %v1555_v45 = vadd.f32 %v1554_v41, %v1553_v39 }
 0x12c   : > { %v606_v46 = vadd.f32 %v1507_v44, %v1966_v50  ;;  %v699_v48 = vmax.f32 %v603_v42, 0.0  ;;  %v715_v49 = vmax.f32 %v667_v43, 0.0 }
 0x12d   : > { %v670_v47 = vadd.f32 %v1555_v45, %v1966_v50 }
 0x12e   : > { %v700_v51 = vmax.f32 %v606_v46, 0.0  ;;  %v1508_v53 = vpop.f32.mrb[24].mxu0  ;;  %v1556_v54 = vpop.f32.mrb[24].mxu1 }
 0x12f   : > { %v716_v52 = vmax.f32 %v670_v47, 0.0  ;;  %v1509_v55 = vpop.f32.mrb[25].mxu0  ;;  %v1557_v56 = vpop.f32.mrb[25].mxu1 }
 0x130   : > { %v1389_v57 = vpack.c.bf16 %v700_v51, %v699_v48  ;;  %v1510_v59 = vadd.f32 %v1509_v55, %v1508_v53  ;;  %v1558_v60 = vadd.f32 %v1557_v56, %v1556_v54  ;;  %v1511_v61 = vpop.f32.mrb[26].mxu0  ;;  %v1559_v62 = vpop.f32.mrb[26].mxu1 }
 0x131   : > { %v1429_v58 = vpack.c.bf16 %v716_v52, %v715_v49  ;;  %v1512_v63 = vpop.f32.mrb[27].mxu0  ;;  %v1560_v0 = vpop.f32.mrb[27].mxu1 }
 0x132   : > { %1445 = vst [vmem:[%s1973_s12 + $0x28] sm:$0xff] %v1389_v57   ;;  %v611_v1 = vadd.f32 %v1510_v59, %v1966_v50  ;;  %v675_v2 = vadd.f32 %v1558_v60, %v1966_v50  ;;  %v1513_v3 = vadd.f32 %v1512_v63, %v1511_v61  ;;  %v1561_v4 = vadd.f32 %v1560_v0, %v1559_v62 }
 0x133   : > { %1453 = vst [vmem:[%s1973_s12 + $0x68] sm:$0xff] %v1429_v58  }
 0x134   : > { %v614_v5 = vadd.f32 %v1513_v3, %v1966_v50  ;;  %v678_v6 = vadd.f32 %v1561_v4, %v1966_v50  ;;  %v701_v7 = vmax.f32 %v611_v1, 0.0  ;;  %v717_v8 = vmax.f32 %v675_v2, 0.0 }
 0x136   : > { %v702_v9 = vmax.f32 %v614_v5, 0.0  ;;  %v718_v10 = vmax.f32 %v678_v6, 0.0  ;;  %v1514_v11 = vpop.f32.mrb[28].mxu0  ;;  %v1562_v12 = vpop.f32.mrb[28].mxu1 }
 0x137   : > { %v1515_v13 = vpop.f32.mrb[29].mxu0  ;;  %v1563_v14 = vpop.f32.mrb[29].mxu1 }
 0x138   : > { %v1394_v15 = vpack.c.bf16 %v702_v9, %v701_v7  ;;  %v1434_v16 = vpack.c.bf16 %v718_v10, %v717_v8  ;;  %v1516_v17 = vadd.f32 %v1515_v13, %v1514_v11  ;;  %v1564_v18 = vadd.f32 %v1563_v14, %v1562_v12  ;;  %v1517_v19 = vpop.f32.mrb[30].mxu0  ;;  %v1565_v20 = vpop.f32.mrb[30].mxu1 }
 0x139   : > { %v1518_v21 = vpop.f32.mrb[31].mxu0  ;;  %v1566_v22 = vpop.f32.mrb[31].mxu1 }
 0x13a   : > { %1446 = vst [vmem:[%s1973_s12 + $0x30] sm:$0xff] %v1394_v15   ;;  %1454 = vst [vmem:[%s1973_s12 + $0x70] sm:$0xff] %v1434_v16   ;;  %v619_v23 = vadd.f32 %v1516_v17, %v1966_v50  ;;  %v683_v24 = vadd.f32 %v1564_v18, %v1966_v50  ;;  %v1519_v25 = vadd.f32 %v1518_v21, %v1517_v19 }
 0x13b   : > { %v1567_v26 = vadd.f32 %v1566_v22, %v1565_v20 }
 0x13c   : > { %v622_v27 = vadd.f32 %v1519_v25, %v1966_v50  ;;  %v703_v29 = vmax.f32 %v619_v23, 0.0  ;;  %v719_v30 = vmax.f32 %v683_v24, 0.0 }
 0x13d   : > { %v686_v28 = vadd.f32 %v1567_v26, %v1966_v50  ;;  %887 = sbr.rel (!%p1869_p4) target bundleno = 394 (0x18a), region = 36 }
 0x13e   : > { %v704_v31 = vmax.f32 %v622_v27, 0.0 }
 0x13f   : > { %v720_v32 = vmax.f32 %v686_v28, 0.0 }
 0x140   : > { %v1399_v33 = vpack.c.bf16 %v704_v31, %v703_v29 }
 0x141   : > { %v1439_v34 = vpack.c.bf16 %v720_v32, %v719_v30 }
 0x142   : > { %1447 = vst [vmem:[%s1973_s12 + $0x38] sm:$0xff] %v1399_v33  }
 0x143   : > { %1455 = vst [vmem:[%s1973_s12 + $0x78] sm:$0xff] %v1439_v34  }
 0x144   : > { %s2166_s22 = smov (!%p890_p8, %s889_s22), 32 }
 0x145   : > { %s1310_s28 = sshll.u32 %s2166_s22, 6 }
 0x146   : > { %p1313_p9 = scmp.eq.s32.totalorder %s1310_s28, 0 }
 0x147   : > { %s2032_s29 = sshrl.u32 (!%p1313_p9), %s2166_s22, 5 }
 0x148   : > { %898 = sbr.rel (%p1313_p9) target bundleno = 394 (0x18a), region = 40  ;;  %p1314_p10 = scmp.le.s32.totalorder (!%p1313_p9), %s2032_s29, 0 }
 0x14f   : > { %1175 = sbr.rel (%p1314_p10) target bundleno = 373 (0x175), region = 112  ;;  %s2159_s15 = smov (!%p1314_p10), %s2026_s27 }
 0x150   : > { %s2160_s20 = smov (!%p1314_p10), %s1973_s12  ;;  %s2041_s23 = smov (!%p1314_p10), 0  }
 0x151   : > { %s2043_s30 = smov (!%p1314_p10), 0  }
 0x156 LB: >> { %v914_v50 = vld [vmem:[%s1798_s20] sm:$0xf]  ;;  %v916_v35 = vld [vmem:[%s1798_s20 + $0x4] sm:$0xf]  ;;  %v918_v36 = vld [vmem:[%s1798_s20 + $0x8] sm:$0xf]  ;;  %s1806_s30 = sphi %s2043_s30, %s908_s30   ;;  %s1802_s23 = sphi %s2041_s23, %s2161_s23   ;;  %s1798_s20 = sphi %s2160_s20, %s983_s20   ;;  %s1794_s15 = sphi %s2159_s15, %s984_s15  }
 0x157   : >> { %915 = vst [vmem:[%s1794_s15] sm:$0xf] %v914_v50  ;;  %917 = vst [vmem:[%s1794_s15 + $0x4] sm:$0xf] %v916_v35  ;;  %v920_v37 = vld [vmem:[%s1798_s20 + $0xc] sm:$0xf]  ;;  %s978_s4 = sadd.s32 1, %s1802_s23 }
 0x158   : >> { %919 = vst [vmem:[%s1794_s15 + $0x8] sm:$0xf] %v918_v36  ;;  %v922_v38 = vld [vmem:[%s1798_s20 + $0x10] sm:$0xf]  ;;  %v924_v39 = vld [vmem:[%s1798_s20 + $0x14] sm:$0xf]  ;;  %p979_p11 = scmp.ge.s32.totalorder %s978_s4, %s2032_s29 }
 0x159   : >> { %921 = vst [vmem:[%s1794_s15 + $0xc] sm:$0xf] %v920_v37  ;;  %923 = vst [vmem:[%s1794_s15 + $0x10] sm:$0xf] %v922_v38  ;;  %v926_v40 = vld [vmem:[%s1798_s20 + $0x18] sm:$0xf] }
 0x15a   : >> { %925 = vst [vmem:[%s1794_s15 + $0x14] sm:$0xf] %v924_v39  ;;  %v928_v41 = vld [vmem:[%s1798_s20 + $0x1c] sm:$0xf]  ;;  %v930_v42 = vld [vmem:[%s1798_s20 + $0x20] sm:$0xf] }
 0x15b   : >> { %927 = vst [vmem:[%s1794_s15 + $0x18] sm:$0xf] %v926_v40  ;;  %929 = vst [vmem:[%s1794_s15 + $0x1c] sm:$0xf] %v928_v41  ;;  %v932_v43 = vld [vmem:[%s1798_s20 + $0x24] sm:$0xf] }
 0x15c   : >> { %931 = vst [vmem:[%s1794_s15 + $0x20] sm:$0xf] %v930_v42  ;;  %v934_v44 = vld [vmem:[%s1798_s20 + $0x28] sm:$0xf]  ;;  %v936_v45 = vld [vmem:[%s1798_s20 + $0x2c] sm:$0xf] }
 0x15d   : >> { %933 = vst [vmem:[%s1794_s15 + $0x24] sm:$0xf] %v932_v43  ;;  %935 = vst [vmem:[%s1794_s15 + $0x28] sm:$0xf] %v934_v44  ;;  %v938_v46 = vld [vmem:[%s1798_s20 + $0x30] sm:$0xf] }
 0x15e   : >> { %937 = vst [vmem:[%s1794_s15 + $0x2c] sm:$0xf] %v936_v45  ;;  %v940_v47 = vld [vmem:[%s1798_s20 + $0x34] sm:$0xf]  ;;  %v942_v48 = vld [vmem:[%s1798_s20 + $0x38] sm:$0xf] }
 0x15f   : >> { %939 = vst [vmem:[%s1794_s15 + $0x30] sm:$0xf] %v938_v46  ;;  %941 = vst [vmem:[%s1794_s15 + $0x34] sm:$0xf] %v940_v47  ;;  %v944_v49 = vld [vmem:[%s1798_s20 + $0x3c] sm:$0xf] }
 0x160   : >> { %943 = vst [vmem:[%s1794_s15 + $0x38] sm:$0xf] %v942_v48  ;;  %v946_v51 = vld [vmem:[%s1798_s20 + $0x40] sm:$0xf]  ;;  %v948_v52 = vld [vmem:[%s1798_s20 + $0x44] sm:$0xf] }
 0x161   : >> { %945 = vst [vmem:[%s1794_s15 + $0x3c] sm:$0xf] %v944_v49  ;;  %947 = vst [vmem:[%s1794_s15 + $0x40] sm:$0xf] %v946_v51  ;;  %v950_v53 = vld [vmem:[%s1798_s20 + $0x48] sm:$0xf] }
 0x162   : >> { %949 = vst [vmem:[%s1794_s15 + $0x44] sm:$0xf] %v948_v52  ;;  %v952_v54 = vld [vmem:[%s1798_s20 + $0x4c] sm:$0xf]  ;;  %v954_v55 = vld [vmem:[%s1798_s20 + $0x50] sm:$0xf] }
 0x163   : >> { %951 = vst [vmem:[%s1794_s15 + $0x48] sm:$0xf] %v950_v53  ;;  %953 = vst [vmem:[%s1794_s15 + $0x4c] sm:$0xf] %v952_v54  ;;  %v956_v56 = vld [vmem:[%s1798_s20 + $0x54] sm:$0xf] }
 0x164   : >> { %955 = vst [vmem:[%s1794_s15 + $0x50] sm:$0xf] %v954_v55  ;;  %v958_v57 = vld [vmem:[%s1798_s20 + $0x58] sm:$0xf]  ;;  %v960_v58 = vld [vmem:[%s1798_s20 + $0x5c] sm:$0xf] }
 0x165   : >> { %957 = vst [vmem:[%s1794_s15 + $0x54] sm:$0xf] %v956_v56  ;;  %959 = vst [vmem:[%s1794_s15 + $0x58] sm:$0xf] %v958_v57  ;;  %v962_v59 = vld [vmem:[%s1798_s20 + $0x60] sm:$0xf] }
 0x166   : >> { %961 = vst [vmem:[%s1794_s15 + $0x5c] sm:$0xf] %v960_v58  ;;  %v964_v60 = vld [vmem:[%s1798_s20 + $0x64] sm:$0xf]  ;;  %v966_v61 = vld [vmem:[%s1798_s20 + $0x68] sm:$0xf] }
 0x167   : >> { %963 = vst [vmem:[%s1794_s15 + $0x60] sm:$0xf] %v962_v59  ;;  %965 = vst [vmem:[%s1794_s15 + $0x64] sm:$0xf] %v964_v60  ;;  %v968_v62 = vld [vmem:[%s1798_s20 + $0x6c] sm:$0xf] }
 0x168   : >> { %967 = vst [vmem:[%s1794_s15 + $0x68] sm:$0xf] %v966_v61  ;;  %v970_v63 = vld [vmem:[%s1798_s20 + $0x70] sm:$0xf]  ;;  %v972_v0 = vld [vmem:[%s1798_s20 + $0x74] sm:$0xf] }
 0x169   : >> { %969 = vst [vmem:[%s1794_s15 + $0x6c] sm:$0xf] %v968_v62  ;;  %971 = vst [vmem:[%s1794_s15 + $0x70] sm:$0xf] %v970_v63  ;;  %v974_v1 = vld [vmem:[%s1798_s20 + $0x78] sm:$0xf] }
 0x16a   : >> { %973 = vst [vmem:[%s1794_s15 + $0x74] sm:$0xf] %v972_v0  ;;  %v976_v2 = vld [vmem:[%s1798_s20 + $0x7c] sm:$0xf]  ;;  %975 = vst [vmem:[%s1794_s15 + $0x78] sm:$0xf] %v974_v1 }
 0x16b   : >> { %977 = vst [vmem:[%s1794_s15 + $0x7c] sm:$0xf] %v976_v2  ;;  %s2168_s4 = smov (%p979_p11, %s978_s4), 0  ;;  %s908_s30 = sadd.s32 1, %s1806_s30  }
 0x16c   : >> { %s1315_s5 = sshll.u32 %s2168_s4, 7  ;;  %p907_p12 = scmp.ge.s32.totalorder %s908_s30, %s2032_s29 }
 0x16d   : >> { %s983_s20 = scalar_lea.vmem %s1973_s12, %s1315_s5 [#allocation2]   ;;  %s984_s15 = scalar_lea.vmem %s2026_s27, %s1315_s5  }
 0x16e   : >> { %s2161_s23 = smov %s2168_s4  ;;  %910 = sbr.rel (!%p907_p12) target bundleno = 342 (0x156), region = 118 }
 0x175 PF: > { %s2136_s6 = sand.u32 31, %s2166_s22   ;;  %s1359_s7 = sshll.u32 %s2032_s29, 7 }
 0x176   : > { %s989_s8 = scalar_lea.vmem %s1973_s12, %s1359_s7 [#allocation2]   ;;  %s991_s9 = scalar_lea.vmem %s2026_s27, %s1359_s7  }
 0x177   : > { %p1320_p13 = scmp.le.s32.totalorder %s2136_s6, 0 }
 0x178   : > { %s1808_s10 = smov (!%p1320_p13), %s991_s9   ;;  %s1812_s11 = smov (!%p1320_p13), %s989_s8  }
 0x179   : > { %1189 = sbr.rel (%p1320_p13) target bundleno = 394 (0x18a), region = 123  ;;  %s1816_s14 = smov (!%p1320_p13), 0  }
 0x17a   : > { %s1820_s17 = smov (!%p1320_p13), 0  }
 0x180 LB: >> { %v1001_v3 = vld [vmem:[%s1814_s11] sm:$0xf]  ;;  %s1003_s18 = sadd.s32 1, %s1818_s14  ;;  %s995_s17 = sadd.s32 1, %s1822_s17   ;;  %s1822_s17 = sphi %s1820_s17, %s995_s17   ;;  %s1818_s14 = sphi %s1816_s14, %s1817_s14   ;;  %s1814_s11 = sphi %s1812_s11, %s1008_s11   ;;  %s1810_s10 = sphi %s1808_s10, %s1009_s10  }
 0x181   : >> { %1002 = vst [vmem:[%s1810_s10] sm:$0xf] %v1001_v3  ;;  %p1004_p0 = scmp.ge.s32.totalorder %s1003_s18, %s2136_s6  ;;  %p994_p1 = scmp.ge.s32.totalorder %s995_s17, %s2136_s6 }
 0x183   : >> { %s2170_s18 = smov (%p1004_p0, %s1003_s18), 0  ;;  %997 = sbr.rel (!%p994_p1) target bundleno = 384 (0x180), region = 129 }
 0x184   : >> { %s1321_s21 = sshll.u32 %s2170_s18, 2  ;;  %s1817_s14 = smov %s2170_s18  }
 0x185   : >> { %s1008_s11 = scalar_lea.vmem %s989_s8, %s1321_s21 [#allocation2]   ;;  %s1009_s10 = scalar_lea.vmem %s991_s9, %s1321_s21  }
 0x18a PF: > { %p10_p2 = scmp.ge.s32.totalorder %s1859_s16, 6   ;;  %s2162_s12 = smov %s1786_s13 }
 0x18b   : > { %s2163_s13 = smov %s1867_s19  ;;  %s2164_s14 = smov %s1859_s16 }
 0x18c   :  { %12 = sbr.rel (!%p10_p2) target bundleno = 2 (0x2), region = 140 }

// kernel: cnn_policy_forward.6
= control target key start
LH: loop header
LB: loop body
LE: loop exit
PB: predicated region body
PF: predicated region fallthrough
CT: control target
= control target key end

     0   :  { %vm2160_vm0 = vmmov 0   ;;  %s2695_s1 = inlined_call_operand.vmem [shape: bf16[1152,128], index: 1, kind: input, shape index: {}]   ;;  %s2696_s0 = inlined_call_operand.vmem [shape: bf16[98,1152], index: 0, kind: input, shape index: {}]   ;;  %s2697_s2 = inlined_call_operand.vmem [shape: f32[1,128], index: 2, kind: input, shape index: {}]   ;;  %s2698_s3 = inlined_call_operand.vmem [shape: bf16[98,128], index: 3, kind: output, shape index: {}]  }
   0x1   :  { %v2000_v0 = vld [vmem:[%s2695_s1 + $0x40] sm:$0xff]   ;;  %v2002_v2 = vld [vmem:[%s2695_s1 + $0x48] sm:$0xff]   ;;  %v2004_v4 = vld [vmem:[%s2695_s1 + $0x50] sm:$0xff]  }
   0x2   :  { %v2001_v1 = vld [vmem:[%s2695_s1] sm:$0xff]   ;;  %1982 = vmatprep.subr.bf16.mxu1 %v2000_v0  ;;  %1691 = vmatprep.subr.bf16.mxu0 %v2000_v0  ;;  %v2003_v3 = vld [vmem:[%s2695_s1 + $0x8] sm:$0xff]   ;;  %v2005_v5 = vld [vmem:[%s2695_s1 + $0x10] sm:$0xff]  }
   0x3   :  { %1990 = vmatpush3.bf16.msra.mxu1 %v2001_v1  ;;  %1692 = vmatpush3.bf16.msra.mxu0 %v2001_v1  ;;  %v2006_v6 = vld [vmem:[%s2695_s1 + $0x58] sm:$0xff]   ;;  %v2008_v8 = vld [vmem:[%s2695_s1 + $0x60] sm:$0xff]   ;;  %v2010_v10 = vld [vmem:[%s2695_s1 + $0x68] sm:$0xff]  }
   0x4   :  { %1983 = vmatprep.subr.bf16.mxu1 %v2002_v2  ;;  %1693 = vmatprep.subr.bf16.mxu0 %v2002_v2  ;;  %v2007_v7 = vld [vmem:[%s2695_s1 + $0x18] sm:$0xff]   ;;  %v2009_v9 = vld [vmem:[%s2695_s1 + $0x20] sm:$0xff]   ;;  %v2011_v12 = vld [vmem:[%s2695_s1 + $0x28] sm:$0xff]  }
   0x5   :  { %v2018_v11 = vld [vmem:[%s2696_s0 + $0x124] ss:$36 sps:$4 sm:$0xff]   ;;  %v2012_v14 = vld [vmem:[%s2695_s1 + $0x70] sm:$0xff]   ;;  %v2014_v16 = vld [vmem:[%s2695_s1 + $0x78] sm:$0xff]  }
   0x6   :  { %v2022_v13 = vld [vmem:[%s2696_s0 + $0x4] ss:$36 sps:$4 sm:$0xff]   ;;  %1035 = vmatprep.mubr.bf16.mxu1 %v2018_v11  ;;  %v2013_v15 = vld [vmem:[%s2695_s1 + $0x30] sm:$0xff]   ;;  %v2015_v17 = vld [vmem:[%s2695_s1 + $0x38] sm:$0xff]  }
   0x7   :  { %1991 = vmatpush3.bf16.msra.mxu1 %v2003_v3  ;;  %1694 = vmatpush3.bf16.msra.mxu0 %v2003_v3  ;;  %v2019_v18 = vld [vmem:[%s2695_s1 + $0xc0] sm:$0xff]   ;;  %v2026_v24 = vld [vmem:[%s2695_s1 + $0xc8] sm:$0xff]   ;;  %v2030_v30 = vld [vmem:[%s2695_s1 + $0xd0] sm:$0xff]  }
   0x8   :  { %1984 = vmatprep.subr.bf16.mxu1 %v2004_v4  ;;  %1695 = vmatprep.subr.bf16.mxu0 %v2004_v4  ;;  %v2016_v19 = vld [vmem:[%s2696_s0 + $0x120] ss:$36 sps:$4 sm:$0xff]   ;;  %v2028_v25 = vld [vmem:[%s2695_s1 + $0x148] sm:$0xff]   ;;  %v2035_v31 = vld [vmem:[%s2695_s1 + $0x150] sm:$0xff]  }
   0x9   :  { %1003 = vmatprep.mubr.bf16.mxu0 %v2022_v13  ;;  %v2020_v20 = vld [vmem:[%s2696_s0] ss:$36 sps:$4 sm:$0xff]   ;;  %v2031_v26 = vld [vmem:[%s2696_s0 + $0x4c] ss:$36 sps:$4 sm:$0xff]   ;;  %v2037_v36 = vld [vmem:[%s2695_s1 + $0xd8] sm:$0xff]  }
   0xa   :  { %v2024_v21 = vld [vmem:[%s2695_s1 + $0x140] sm:$0xff]   ;;  %v2027_v27 = vld [vmem:[%s2695_s1 + $0x88] sm:$0xff]   ;;  %v2033_v32 = vld [vmem:[%s2695_s1 + $0x90] sm:$0xff]  }
   0xb   :  { %1992 = vmatpush3.bf16.msra.mxu1 %v2005_v5  ;;  %1696 = vmatpush3.bf16.msra.mxu0 %v2005_v5  ;;  %v2023_v22 = vld [vmem:[%s2695_s1 + $0x80] sm:$0xff]   ;;  %v2038_v28 = vld [vmem:[%s2696_s0 + $0x16c] ss:$36 sps:$4 sm:$0xff]   ;;  %v2042_v37 = vld [vmem:[%s2695_s1 + $0x158] sm:$0xff]  }
   0xc   :  { %1985 = vmatprep.subr.bf16.mxu1 %v2006_v6  ;;  %1697 = vmatprep.subr.bf16.mxu0 %v2006_v6  ;;  %v2025_v23 = vld [vmem:[%s2695_s1 + $0x100] sm:$0xff]   ;;  %v2029_v29 = vld [vmem:[%s2695_s1 + $0x108] sm:$0xff]   ;;  %v2036_v35 = vld [vmem:[%s2695_s1 + $0x110] sm:$0xff]  }
   0xd   :  { %v2034_v33 = vld [vmem:[%s2696_s0 + $0x48] ss:$36 sps:$4 sm:$0xff]   ;;  %v2040_v38 = vld [vmem:[%s2695_s1 + $0x98] sm:$0xff]   ;;  %v2044_v41 = vld [vmem:[%s2695_s1 + $0xe0] sm:$0xff]  }
   0xe   :  { %v2041_v34 = vld [vmem:[%s2696_s0 + $0x168] ss:$36 sps:$4 sm:$0xff]   ;;  %v2045_v39 = vld [vmem:[%s2696_s0 + $0x94] ss:$36 sps:$4 sm:$0xff]   ;;  %v2049_v43 = vld [vmem:[%s2695_s1 + $0x160] sm:$0xff]  }
   0xf   :  { %1993 = vmatpush3.bf16.msra.mxu1 %v2007_v7  ;;  %1698 = vmatpush3.bf16.msra.mxu0 %v2007_v7  ;;  %v2043_v40 = vld [vmem:[%s2695_s1 + $0x118] sm:$0xff]   ;;  %v75_v42 = vld [vmem:[%s2696_s0 + $0x1b0] sm:$0x11]  ;;  %v2047_v45 = vld [vmem:[%s2695_s1 + $0xa0] sm:$0xff]   ;;  %v2159_v7 = vmov 0.0  }
  0x10   :  { %1986 = vmatprep.subr.bf16.mxu1 %v2008_v8  ;;  %1699 = vmatprep.subr.bf16.mxu0 %v2008_v8  ;;  %v1550_v44 = vcombine.high %v75_v42, %v75_v42  ;;  %v2048_v46 = vld [vmem:[%s2696_s0 + $0x90] ss:$36 sps:$4 sm:$0xff]   ;;  %v2050_v47 = vld [vmem:[%s2695_s1 + $0x120] sm:$0xff]   ;;  %v1549_v48 = vcombine.low %v75_v42, %v75_v42  ;;  %v2051_v49 = vld [vmem:[%s2695_s1 + $0xe8] sm:$0xff]  }
  0x11   :  { %v2055_v50 = vld [vmem:[%s2695_s1 + $0x168] sm:$0xff]   ;;  %v2058_v52 = vld [vmem:[%s2696_s0 + $0xdc] ss:$36 sps:$4 sm:$0xff]   ;;  %v2057_v54 = vld [vmem:[%s2695_s1 + $0xf0] sm:$0xff]  }
  0x12   :  { %v2053_v51 = vld [vmem:[%s2695_s1 + $0xa8] sm:$0xff]   ;;  %v2062_v55 = vld [vmem:[%s2695_s1 + $0x170] sm:$0xff]   ;;  %v2061_v57 = vld [vmem:[%s2696_s0 + $0xd8] ss:$36 sps:$4 sm:$0xff]  }
  0x13   :  { %1994 = vmatpush3.bf16.msra.mxu1 %v2009_v9  ;;  %1700 = vmatpush3.bf16.msra.mxu0 %v2009_v9  ;;  %v2056_v53 = vld [vmem:[%s2695_s1 + $0x128] sm:$0xff]   ;;  %v2060_v56 = vld [vmem:[%s2695_s1 + $0xb0] sm:$0xff]   ;;  %v2064_v59 = vld [vmem:[%s2695_s1 + $0xf8] sm:$0xff]  }
  0x14   :  { %1987 = vmatprep.subr.bf16.mxu1 %v2010_v10  ;;  %1701 = vmatprep.subr.bf16.mxu0 %v2010_v10  ;;  %v2063_v58 = vld [vmem:[%s2695_s1 + $0x130] sm:$0xff]   ;;  %v2066_v60 = vld [vmem:[%s2695_s1 + $0x178] sm:$0xff]   ;;  %v2071_v0 = vld [vmem:[%s2695_s1 + $0x1c0] sm:$0xff]  }
  0x15   :  { %v2069_v61 = vld [vmem:[%s2696_s0 + $0xc] ss:$36 sps:$4 sm:$0xff]   ;;  %v2065_v62 = vld [vmem:[%s2695_s1 + $0xb8] sm:$0xff]   ;;  %v2075_v4 = vld [vmem:[%s2695_s1 + $0x180] sm:$0xff]  }
  0x16   :  { %v2070_v63 = vld [vmem:[%s2695_s1 + $0x138] sm:$0xff]   ;;  %v2067_v2 = vld [vmem:[%s2696_s0 + $0x8] ss:$36 sps:$4 sm:$0xff]   ;;  %v2072_v3 = vld [vmem:[%s2696_s0 + $0x10] ss:$36 sps:$4 sm:$0xff]  }
  0x17   :  { %1995 = vmatpush3.bf16.msra.mxu1 %v2011_v12  ;;  %1702 = vmatpush3.bf16.msra.mxu0 %v2011_v12  ;;  %v2074_v1 = vld [vmem:[%s2696_s0 + $0x14] ss:$36 sps:$4 sm:$0xff]   ;;  %v2076_v5 = vld [vmem:[%s2695_s1 + $0x200] sm:$0xff]   ;;  %v2079_v8 = vld [vmem:[%s2695_s1 + $0x1c8] sm:$0xff]  }
  0x18   :  { %1988 = vmatprep.subr.bf16.mxu1 %v2012_v14  ;;  %1703 = vmatprep.subr.bf16.mxu0 %v2012_v14  ;;  %v2077_v6 = vld [vmem:[%s2696_s0 + $0x54] ss:$36 sps:$4 sm:$0xff]   ;;  %v2081_v9 = vld [vmem:[%s2695_s1 + $0x188] sm:$0xff]   ;;  %v2082_v10 = vld [vmem:[%s2696_s0 + $0x5c] ss:$36 sps:$4 sm:$0xff]  }
  0x19   :  { %v2085_v11 = vld [vmem:[%s2695_s1 + $0x208] sm:$0xff]   ;;  %v2086_v12 = vld [vmem:[%s2695_s1 + $0x1d0] sm:$0xff]   ;;  %v2084_v14 = vld [vmem:[%s2696_s0 + $0x58] ss:$36 sps:$4 sm:$0xff]  }
  0x1a   :  { %v2080_v13 = vld [vmem:[%s2696_s0 + $0x50] ss:$36 sps:$4 sm:$0xff]   ;;  %v2128_v42 = vld [vmem:[%s2695_s1 + $0x1f8] sm:$0xff]  }
  0x1b   :  { %1996 = vmatpush3.bf16.msra.mxu1 %v2013_v15  ;;  %1704 = vmatpush3.bf16.msra.mxu0 %v2013_v15  ;;  %v2087_v15 = vld [vmem:[%s2696_s0 + $0x9c] ss:$36 sps:$4 sm:$0xff]  }
  0x1c   :  { %1989 = vmatprep.subr.bf16.mxu1 %v2014_v16  ;;  %1705 = vmatprep.subr.bf16.mxu0 %v2014_v16  ;;  %v2089_v16 = vld [vmem:[%s2695_s1 + $0x190] sm:$0xff]  }
  0x1f   :  { %1997 = vmatpush3.bf16.msra.mxu1 %v2015_v17  ;;  %1706 = vmatpush3.bf16.msra.mxu0 %v2015_v17  ;;  %v2091_v17 = vld [vmem:[%s2696_s0 + $0xa4] ss:$36 sps:$4 sm:$0xff]  }
  0x20   :  { %1749 = vmatprep.subr.bf16.mxu1 %v2019_v18  ;;  %1807 = vmatprep.subr.bf16.mxu0 %v2024_v21  ;;  %v2094_v18 = vld [vmem:[%s2695_s1 + $0x210] sm:$0xff]   ;;  %v2090_v21 = vld [vmem:[%s2696_s0 + $0x98] ss:$36 sps:$4 sm:$0xff]  }
  0x22   :  { %1036 = vmatmul.mubr.bf16.vlgmr.msra.gmra.mrb[0].mxu1 %v2016_v19  ;;  %1004 = vmatmul.mubr.bf16.vlgmr.msra.gmra.mrb[0].mxu0 %v2020_v20  ;;  %v2095_v19 = vld [vmem:[%s2695_s1 + $0x1d8] sm:$0xff]  }
  0x23   :  { %1750 = vmatpush3.bf16.msra.mxu1 %v2023_v22  ;;  %1808 = vmatpush3.bf16.msra.mxu0 %v2025_v23  ;;  %v2096_v20 = vld [vmem:[%s2695_s1 + $0x198] sm:$0xff]   ;;  %v2093_v22 = vld [vmem:[%s2696_s0 + $0xa0] ss:$36 sps:$4 sm:$0xff]  }
  0x24   :  { %1751 = vmatprep.subr.bf16.mxu1 %v2026_v24  ;;  %1809 = vmatprep.subr.bf16.mxu0 %v2028_v25  ;;  %v2097_v23 = vld [vmem:[%s2696_s0 + $0xe4] ss:$36 sps:$4 sm:$0xff]   ;;  %v2100_v24 = vld [vmem:[%s2696_s0 + $0xec] ss:$36 sps:$4 sm:$0xff]   ;;  %v2103_v25 = vld [vmem:[%s2695_s1 + $0x218] sm:$0xff]  }
  0x25   :  { %1011 = vmatprep.mubr.bf16.mxu0 %v2031_v26  ;;  %1043 = vmatprep.mubr.bf16.mxu1 %v2038_v28  ;;  %v2104_v26 = vld [vmem:[%s2695_s1 + $0x1e0] sm:$0xff]  }
  0x26   :  { %v2099_v28 = vld [vmem:[%s2696_s0 + $0xe0] ss:$36 sps:$4 sm:$0xff]  }
  0x27   :  { %1752 = vmatpush3.bf16.msra.mxu1 %v2027_v27  ;;  %1810 = vmatpush3.bf16.msra.mxu0 %v2029_v29  ;;  %v2105_v27 = vld [vmem:[%s2695_s1 + $0x1a0] sm:$0xff]   ;;  %v2102_v29 = vld [vmem:[%s2696_s0 + $0xe8] ss:$36 sps:$4 sm:$0xff]  }
  0x28   :  { %1753 = vmatprep.subr.bf16.mxu1 %v2030_v30  ;;  %1811 = vmatprep.subr.bf16.mxu0 %v2035_v31  ;;  %v2112_v30 = vld [vmem:[%s2695_s1 + $0x220] sm:$0xff]   ;;  %v2113_v31 = vld [vmem:[%s2695_s1 + $0x1e8] sm:$0xff]  }
  0x2a   :  { %1012 = vmatmul.mubr.bf16.gmra.mrb[4].mxu0 %v2034_v33  ;;  %1044 = vmatmul.mubr.bf16.gmra.mrb[4].mxu1 %v2041_v34  ;;  %v2106_v33 = vld [vmem:[%s2696_s0 + $0x12c] ss:$36 sps:$4 sm:$0xff]   ;;  %v2109_v34 = vld [vmem:[%s2696_s0 + $0x134] ss:$36 sps:$4 sm:$0xff]  }
  0x2b   :  { %1754 = vmatpush3.bf16.msra.mxu1 %v2033_v32  ;;  %1812 = vmatpush3.bf16.msra.mxu0 %v2036_v35  ;;  %v2114_v32 = vld [vmem:[%s2695_s1 + $0x1a8] sm:$0xff]  }
  0x2c   :  { %1755 = vmatprep.subr.bf16.mxu1 %v2037_v36  ;;  %1813 = vmatprep.subr.bf16.mxu0 %v2042_v37  ;;  %v2120_v35 = vld [vmem:[%s2695_s1 + $0x228] sm:$0xff]   ;;  %v2122_v36 = vld [vmem:[%s2695_s1 + $0x1f0] sm:$0xff]  }
  0x2d   :  { %1019 = vmatprep.mubr.bf16.mxu0 %v2045_v39  ;;  %1051 = vmatprep.mubr.bf16.mxu1 %v1550_v44  ;;  %v2108_v37 = vld [vmem:[%s2696_s0 + $0x128] ss:$36 sps:$4 sm:$0xff]   ;;  %v2123_v39 = vld [vmem:[%s2695_s1 + $0x1b0] sm:$0xff]   ;;  %v2130_v44 = vld [vmem:[%s2695_s1 + $0x1b8] sm:$0xff]  }
  0x2f   :  { %1756 = vmatpush3.bf16.msra.mxu1 %v2040_v38  ;;  %1814 = vmatpush3.bf16.msra.mxu0 %v2043_v40  ;;  %v2111_v38 = vld [vmem:[%s2696_s0 + $0x130] ss:$36 sps:$4 sm:$0xff]  }
  0x30   :  { %1757 = vmatprep.subr.bf16.mxu1 %v2044_v41  ;;  %1815 = vmatprep.subr.bf16.mxu0 %v2049_v43  ;;  %v2115_v40 = vld [vmem:[%s2696_s0 + $0x174] ss:$36 sps:$4 sm:$0xff]   ;;  %v2118_v43 = vld [vmem:[%s2696_s0 + $0x17c] ss:$36 sps:$4 sm:$0xff]  }
  0x31   :  { %v2126_v41 = vld [vmem:[%s2695_s1 + $0x230] sm:$0xff]  }
  0x32   :  { %1020 = vmatmul.mubr.bf16.gmra.mrb[8].mxu0 %v2048_v46  ;;  %1052 = vmatmul.mubr.bf16.gmra.mrb[8].mxu1 %v1549_v48  ;;  %v76_v46 = vld [vmem:[%s2696_s0 + $0x1b8] sm:$0x11]  ;;  %v2117_v48 = vld [vmem:[%s2696_s0 + $0x170] ss:$36 sps:$4 sm:$0xff]  }
  0x33   :  { %1758 = vmatpush3.bf16.msra.mxu1 %v2047_v45  ;;  %1816 = vmatpush3.bf16.msra.mxu0 %v2050_v47  ;;  %v2134_v45 = vld [vmem:[%s2695_s1 + $0x238] sm:$0xff]   ;;  %v77_v47 = vld [vmem:[%s2696_s0 + $0x1c0] sm:$0x11] }
  0x34   :  { %1759 = vmatprep.subr.bf16.mxu1 %v2051_v49  ;;  %1817 = vmatprep.subr.bf16.mxu0 %v2055_v50  ;;  %v2121_v49 = vld [vmem:[%s2696_s0 + $0x178] ss:$36 sps:$4 sm:$0xff]   ;;  %v1552_v50 = vcombine.high %v76_v46, %v76_v46 }
  0x35   :  { %1027 = vmatprep.mubr.bf16.mxu0 %v2058_v52  ;;  %1091 = vmatprep.mubr.bf16.mxu1 %v2069_v61  ;;  %v1551_v52 = vcombine.low %v76_v46, %v76_v46  ;;  %v2142_v61 = vld [vmem:[%s2696_s0 + $0xa8] ss:$36 sps:$4 sm:$0xff]  }
  0x37   :  { %1760 = vmatpush3.bf16.msra.mxu1 %v2053_v51  ;;  %1818 = vmatpush3.bf16.msra.mxu0 %v2056_v53  ;;  %v1554_v51 = vcombine.high %v77_v47, %v77_v47  ;;  %v1553_v53 = vcombine.low %v77_v47, %v77_v47 }
  0x38   :  { %1761 = vmatprep.subr.bf16.mxu1 %v2057_v54  ;;  %1819 = vmatprep.subr.bf16.mxu0 %v2062_v55  ;;  %v2133_v54 = vld [vmem:[%s2696_s0 + $0x1c] ss:$36 sps:$4 sm:$0xff]  }
  0x39   :  { %v2131_v55 = vld [vmem:[%s2696_s0 + $0x18] ss:$36 sps:$4 sm:$0xff]  }
  0x3a   :  { %1028 = vmatmul.mubr.bf16.gmra.mrb[12].mxu0 %v2061_v57  ;;  %v2136_v57 = vld [vmem:[%s2696_s0 + $0x64] ss:$36 sps:$4 sm:$0xff]  }
  0x3b   :  { %1762 = vmatpush3.bf16.msra.mxu1 %v2060_v56  ;;  %1820 = vmatpush3.bf16.msra.mxu0 %v2063_v58  ;;  %v2135_v56 = vld [vmem:[%s2696_s0 + $0x20] ss:$36 sps:$4 sm:$0xff]  }
  0x3c   :  { %1763 = vmatprep.subr.bf16.mxu1 %v2064_v59  ;;  %1821 = vmatprep.subr.bf16.mxu0 %v2066_v60  ;;  %v2138_v58 = vld [vmem:[%s2696_s0 + $0x60] ss:$36 sps:$4 sm:$0xff]   ;;  %v2139_v59 = vld [vmem:[%s2696_s0 + $0x68] ss:$36 sps:$4 sm:$0xff]  }
  0x3d   :  { %1179 = vmatprep.mubr.bf16.mxu0 %v2074_v1  ;;  %v2140_v60 = vld [vmem:[%s2696_s0 + $0xac] ss:$36 sps:$4 sm:$0xff]   ;;  %v2147_v1 = vld [vmem:[%s2696_s0 + $0xf8] ss:$36 sps:$4 sm:$0xff]  }
  0x3f   :  { %1764 = vmatpush3.bf16.msra.mxu1 %v2065_v62  ;;  %1822 = vmatpush3.bf16.msra.mxu0 %v2070_v63  ;;  %v2143_v62 = vld [vmem:[%s2696_s0 + $0xb0] ss:$36 sps:$4 sm:$0xff]  }
  0x40   :  { %1865 = vmatprep.subr.bf16.mxu1 %v2071_v0  ;;  %1938 = vmatprep.subr.bf16.mxu0 %v2159_v7  ;;  %v2144_v63 = vld [vmem:[%s2696_s0 + $0xf4] ss:$36 sps:$4 sm:$0xff]  }
  0x41   :  { %v2146_v0 = vld [vmem:[%s2696_s0 + $0xf0] ss:$36 sps:$4 sm:$0xff]  }
  0x42   :  { %1092 = vmatmul.mubr.bf16.vlgmr.msra.gmra.mrb[12].mxu1 %v2067_v2  ;;  %1180 = vmatmul.mubr.bf16.vlgmr.msra.gmra.mrb[16].mxu0 %v2072_v3  ;;  %v2148_v2 = vld [vmem:[%s2696_s0 + $0x13c] ss:$36 sps:$4 sm:$0xff]  }
  0x43   :  { %1866 = vmatpush3.bf16.msra.mxu1 %v2075_v4  ;;  %1939 = vmatpush3.bf16.msra.mxu0 %v2076_v5  ;;  %v2150_v3 = vld [vmem:[%s2696_s0 + $0x138] ss:$36 sps:$4 sm:$0xff]   ;;  %v2151_v4 = vld [vmem:[%s2696_s0 + $0x140] ss:$36 sps:$4 sm:$0xff]  }
  0x44   :  { %1099 = vmatprep.mubr.bf16.mxu1 %v2077_v6  ;;  %1867 = vmatprep.subr.bf16.mxu1 %v2079_v8  ;;  %v2152_v5 = vld [vmem:[%s2696_s0 + $0x184] ss:$36 sps:$4 sm:$0xff]  }
  0x45   :  { %1187 = vmatprep.mubr.bf16.mxu0 %v2082_v10  ;;  %1940 = vmatprep.subr.bf16.mxu0 %v2159_v7  ;;  %v78_v6 = vld [vmem:[%s2696_s0 + $0x1c8] sm:$0x11]  ;;  %v2154_v8 = vld [vmem:[%s2696_s0 + $0x180] ss:$36 sps:$4 sm:$0xff]  }
  0x46   :  { %v1556_v10 = vcombine.high %v78_v6, %v78_v6 }
  0x47   :  { %1868 = vmatpush3.bf16.msra.mxu1 %v2081_v9  ;;  %1941 = vmatpush3.bf16.msra.mxu0 %v2085_v11  ;;  %v2155_v9 = vld [vmem:[%s2696_s0 + $0x188] ss:$36 sps:$4 sm:$0xff]   ;;  %v1555_v11 = vcombine.low %v78_v6, %v78_v6 }
  0x48   :  { %1869 = vmatprep.subr.bf16.mxu1 %v2086_v12  ;;  %1942 = vmatprep.subr.bf16.mxu0 %v2159_v7  ;;  %v2158_v12 = vld [vmem:[%s2696_s0 + $0x1d0] ss:$0 sps:$4 sm:$0x11]  }
  0x4a   :  { %1100 = vmatmul.mubr.bf16.gmra.mrb[16].mxu1 %v2080_v13  ;;  %1188 = vmatmul.mubr.bf16.gmra.mrb[20].mxu0 %v2084_v14 }
  0x4b   :  { %1107 = vmatprep.mubr.bf16.mxu1 %v2087_v15  ;;  %1870 = vmatpush3.bf16.msra.mxu1 %v2089_v16 }
  0x4c   :  { %1195 = vmatprep.mubr.bf16.mxu0 %v2091_v17  ;;  %1943 = vmatpush3.bf16.msra.mxu0 %v2094_v18 }
  0x4d   :  { %1871 = vmatprep.subr.bf16.mxu1 %v2095_v19  ;;  %1944 = vmatprep.subr.bf16.mxu0 %v2159_v7 }
  0x4f   :  { %1872 = vmatpush3.bf16.msra.mxu1 %v2096_v20 }
  0x50   :  { %1945 = vmatpush3.bf16.msra.mxu0 %v2103_v25  ;;  %1873 = vmatprep.subr.bf16.mxu1 %v2104_v26 }
  0x51   :  { %1946 = vmatprep.subr.bf16.mxu0 %v2159_v7 }
  0x52   :  { %1108 = vmatmul.mubr.bf16.gmra.mrb[20].mxu1 %v2090_v21  ;;  %1196 = vmatmul.mubr.bf16.gmra.mrb[24].mxu0 %v2093_v22 }
  0x53   :  { %1115 = vmatprep.mubr.bf16.mxu1 %v2097_v23  ;;  %1203 = vmatprep.mubr.bf16.mxu0 %v2100_v24 }
  0x54   :  { %1874 = vmatpush3.bf16.msra.mxu1 %v2105_v27  ;;  %1947 = vmatpush3.bf16.msra.mxu0 %v2112_v30 }
  0x55   :  { %1875 = vmatprep.subr.bf16.mxu1 %v2113_v31  ;;  %1948 = vmatprep.subr.bf16.mxu0 %v2159_v7 }
  0x58   :  { %1876 = vmatpush3.bf16.msra.mxu1 %v2114_v32  ;;  %1949 = vmatpush3.bf16.msra.mxu0 %v2120_v35 }
  0x59   :  { %1877 = vmatprep.subr.bf16.mxu1 %v2122_v36  ;;  %1950 = vmatprep.subr.bf16.mxu0 %v2159_v7 }
  0x5a   :  { %1116 = vmatmul.mubr.bf16.gmra.mrb[24].mxu1 %v2099_v28  ;;  %1204 = vmatmul.mubr.bf16.gmra.mrb[28].mxu0 %v2102_v29 }
  0x5b   :  { %1123 = vmatprep.mubr.bf16.mxu1 %v2106_v33  ;;  %1211 = vmatprep.mubr.bf16.mxu0 %v2109_v34 }
  0x5c   :  { %1878 = vmatpush3.bf16.msra.mxu1 %v2123_v39  ;;  %1951 = vmatpush3.bf16.msra.mxu0 %v2126_v41 }
  0x5d   :  { %1879 = vmatprep.subr.bf16.mxu1 %v2128_v42  ;;  %1952 = vmatprep.subr.bf16.mxu0 %v2159_v7 }
  0x60   :  { %1880 = vmatpush3.bf16.msra.mxu1 %v2130_v44  ;;  %1953 = vmatpush3.bf16.msra.mxu0 %v2134_v45 }
  0x62   :  { %1124 = vmatmul.mubr.bf16.gmra.mrb[28].mxu1 %v2108_v37  ;;  %1212 = vmatmul.mubr.bf16.gmra.mrb[32].mxu0 %v2111_v38 }
  0x63   :  { %1131 = vmatprep.mubr.bf16.mxu1 %v2115_v40  ;;  %1219 = vmatprep.mubr.bf16.mxu0 %v2118_v43 }
  0x6a   :  { %1132 = vmatmul.mubr.bf16.gmra.mrb[32].mxu1 %v2117_v48  ;;  %1220 = vmatmul.mubr.bf16.gmra.mrb[36].mxu0 %v2121_v49 }
  0x6b   :  { %1139 = vmatprep.mubr.bf16.mxu1 %v1552_v50  ;;  %1227 = vmatprep.mubr.bf16.mxu0 %v1554_v51 }
  0x72   :  { %1140 = vmatmul.mubr.bf16.gmra.mrb[36].mxu1 %v1551_v52  ;;  %1228 = vmatmul.mubr.bf16.gmra.mrb[40].mxu0 %v1553_v53 }
  0x73   :  { %1267 = vmatprep.mubr.bf16.mxu1 %v2133_v54  ;;  %1954 = vmatprep.mubr.msk.bf16.mxu0 %vm2160_vm0, %v2159_v7 }
  0x7a   :  { %1268 = vmatmul.mubr.bf16.vlgmr.msra.gmra.mrb[40].mxu1 %v2131_v55  ;;  %1955 = vmatmul.mubr.bf16.vlgmr.msra.gmra.mrb[44].mxu0 %v2135_v56  ;;  %v2613_v55 = vld [vmem:[%s2697_s2] ss:$0 sm:$0xff] }
  0x7b   :  { %1275 = vmatprep.mubr.bf16.mxu1 %v2136_v57  ;;  %1958 = vmatprep.mubr.msk.bf16.mxu0 %vm2160_vm0, %v2159_v7 }
  0x82   :  { %1276 = vmatmul.mubr.bf16.gmra.mrb[44].mxu1 %v2138_v58  ;;  %1959 = vmatmul.mubr.bf16.gmra.mrb[48].mxu0 %v2139_v59 }
  0x83   :  { %1283 = vmatprep.mubr.bf16.mxu1 %v2140_v60  ;;  %1962 = vmatprep.mubr.msk.bf16.mxu0 %vm2160_vm0, %v2159_v7 }
  0x8a   :  { %1284 = vmatmul.mubr.bf16.gmra.mrb[48].mxu1 %v2142_v61  ;;  %1963 = vmatmul.mubr.bf16.gmra.mrb[52].mxu0 %v2143_v62 }
  0x8b   :  { %1291 = vmatprep.mubr.bf16.mxu1 %v2144_v63  ;;  %1966 = vmatprep.mubr.msk.bf16.mxu0 %vm2160_vm0, %v2159_v7 }
  0x92   :  { %1292 = vmatmul.mubr.bf16.gmra.mrb[52].mxu1 %v2146_v0  ;;  %1967 = vmatmul.mubr.bf16.gmra.mrb[56].mxu0 %v2147_v1 }
  0x93   :  { %1299 = vmatprep.mubr.bf16.mxu1 %v2148_v2  ;;  %1970 = vmatprep.mubr.msk.bf16.mxu0 %vm2160_vm0, %v2159_v7 }
  0x9a   :  { %1300 = vmatmul.mubr.bf16.gmra.mrb[56].mxu1 %v2150_v3  ;;  %1971 = vmatmul.mubr.bf16.gmra.mrb[60].mxu0 %v2151_v4 }
  0x9b   :  { %1307 = vmatprep.mubr.bf16.mxu1 %v2152_v5  ;;  %1974 = vmatprep.mubr.msk.bf16.mxu0 %vm2160_vm0, %v2159_v7 }
  0xa2   :  { %1308 = vmatmul.mubr.bf16.gmra.mrb[60].mxu1 %v2154_v8  ;;  %1975 = vmatmul.mubr.bf16.gmra.mrb[64].mxu0 %v2155_v9 }
  0xa3   :  { %1315 = vmatprep.mubr.bf16.mxu1 %v1556_v10  ;;  %1978 = vmatprep.mubr.msk.bf16.mxu0 %vm2160_vm0, %v2159_v7 }
  0xaa   :  { %1316 = vmatmul.mubr.bf16.gmra.mrb[64].mxu1 %v1555_v11  ;;  %1979 = vmatmul.mubr.bf16.gmra.mrb[68].mxu0 %v2158_v12 }
  0xf5   :  { %v1731_v13 = vpop.f32.mrb[0].mxu1  ;;  %v1707_v14 = vpop.f32.mrb[0].mxu0 }
  0xf6   :  { %v1732_v15 = vpop.f32.mrb[1].mxu1  ;;  %v1708_v16 = vpop.f32.mrb[1].mxu0 }
  0xf7   :  { %v2596_v17 = vadd.f32 %v1732_v15, %v1731_v13  ;;  %v1734_v18 = vpop.f32.mrb[2].mxu1  ;;  %v1709_v19 = vadd.f32 %v1708_v16, %v1707_v14  ;;  %v1710_v20 = vpop.f32.mrb[2].mxu0 }
  0xf8   :  { %v1735_v21 = vpop.f32.mrb[3].mxu1  ;;  %v1711_v22 = vpop.f32.mrb[3].mxu0 }
  0xf9   :  { %v2598_v23 = vadd.f32 %v1735_v21, %v1734_v18  ;;  %v1712_v7 = vadd.f32 %v1711_v22, %v1710_v20  ;;  %v1006_v58 = vadd.f32 %v1709_v19, %v2613_v55 }
  0xfb   :  { %v1009_v1 = vadd.f32 %v1712_v7, %v2613_v55 }
  0xfd   :  { %v1713_v24 = vpop.f32.mrb[4].mxu0  ;;  %v1737_v25 = vpop.f32.mrb[4].mxu1 }
  0xfe   :  { %v1714_v26 = vpop.f32.mrb[5].mxu0  ;;  %v1738_v27 = vpop.f32.mrb[5].mxu1 }
  0xff   :  { %v1715_v28 = vadd.f32 %v1714_v26, %v1713_v24  ;;  %v1716_v29 = vpop.f32.mrb[6].mxu0  ;;  %v2600_v30 = vadd.f32 %v1738_v27, %v1737_v25  ;;  %v1740_v31 = vpop.f32.mrb[6].mxu1 }
 0x100   :  { %v1717_v32 = vpop.f32.mrb[7].mxu0  ;;  %v1741_v33 = vpop.f32.mrb[7].mxu1 }
 0x101   :  { %v1718_v34 = vadd.f32 %v1717_v32, %v1716_v29  ;;  %v2602_v35 = vadd.f32 %v1741_v33, %v1740_v31  ;;  %v1014_v13 = vadd.f32 %v1715_v28, %v2613_v55 }
 0x103   :  { %v1017_v21 = vadd.f32 %v1718_v34, %v2613_v55 }
 0x105   :  { %v1719_v36 = vpop.f32.mrb[8].mxu0  ;;  %v1743_v37 = vpop.f32.mrb[8].mxu1 }
 0x106   :  { %v1720_v38 = vpop.f32.mrb[9].mxu0  ;;  %v1744_v39 = vpop.f32.mrb[9].mxu1 }
 0x107   :  { %v1721_v40 = vadd.f32 %v1720_v38, %v1719_v36  ;;  %v1722_v41 = vpop.f32.mrb[10].mxu0  ;;  %v2604_v42 = vadd.f32 %v1744_v39, %v1743_v37  ;;  %v1746_v43 = vpop.f32.mrb[10].mxu1 }
 0x108   :  { %v1723_v44 = vpop.f32.mrb[11].mxu0  ;;  %v1747_v45 = vpop.f32.mrb[11].mxu1 }
 0x109   :  { %v1724_v46 = vadd.f32 %v1723_v44, %v1722_v41  ;;  %v1022_v33 = vadd.f32 %v1721_v40, %v2613_v55 }
 0x10b   :  { %v1025_v43 = vadd.f32 %v1724_v46, %v2613_v55 }
 0x10d   :  { %v1725_v47 = vpop.f32.mrb[12].mxu0 }
 0x10e   :  { %v1726_v48 = vpop.f32.mrb[13].mxu0 }
 0x10f   :  { %v2606_v49 = vadd.f32 %v1726_v48, %v1725_v47  ;;  %v1728_v50 = vpop.f32.mrb[14].mxu0 }
 0x110   :  { %v1729_v51 = vpop.f32.mrb[15].mxu0 }
 0x111   :  { %v2608_v52 = vadd.f32 %v1729_v51, %v1728_v50 }
 0x115   :  { %v1765_v53 = vpop.f32.mrb[12].mxu1  ;;  %v1823_v54 = vpop.f32.mrb[16].mxu0 }
 0x116   :  { %v1766_v56 = vpop.f32.mrb[13].mxu1  ;;  %v1824_v57 = vpop.f32.mrb[17].mxu0 }
 0x117   :  { %v1767_v59 = vadd.f32 %v1766_v56, %v1765_v53  ;;  %v1768_v60 = vpop.f32.mrb[14].mxu1  ;;  %v1825_v61 = vadd.f32 %v1824_v57, %v1823_v54  ;;  %v1826_v62 = vpop.f32.mrb[18].mxu0  ;;  %v1030_v57 = vadd.f32 %v2606_v49, %v2613_v55 }
 0x118   :  { %v1769_v63 = vpop.f32.mrb[15].mxu1  ;;  %v1827_v0 = vpop.f32.mrb[19].mxu0 }
 0x119   :  { %v1094_v2 = vadd.f32 %v1767_v59, %v1006_v58  ;;  %v1770_v3 = vadd.f32 %v1769_v63, %v1768_v60  ;;  %v1828_v4 = vadd.f32 %v1827_v0, %v1826_v62  ;;  %v1033_v63 = vadd.f32 %v2608_v52, %v2613_v55 }
 0x11b   :  { %v1097_v5 = vadd.f32 %v1770_v3, %v1009_v1  ;;  %v2617_v6 = vadd.f32 %v1825_v61, %v1094_v2 }
 0x11d   :  { %v2619_v8 = vadd.f32 %v1828_v4, %v1097_v5  ;;  %v1771_v9 = vpop.f32.mrb[16].mxu1  ;;  %v1829_v10 = vpop.f32.mrb[20].mxu0 }
 0x11e   :  { %v1772_v11 = vpop.f32.mrb[17].mxu1  ;;  %v1830_v12 = vpop.f32.mrb[21].mxu0 }
 0x11f   :  { %v1773_v14 = vadd.f32 %v1772_v11, %v1771_v9  ;;  %v1774_v15 = vpop.f32.mrb[18].mxu1  ;;  %v1831_v16 = vadd.f32 %v1830_v12, %v1829_v10  ;;  %v1832_v18 = vpop.f32.mrb[22].mxu0  ;;  %v1038_v12 = vadd.f32 %v2596_v17, %v2613_v55 }
 0x120   :  { %v1775_v19 = vpop.f32.mrb[19].mxu1  ;;  %v1833_v20 = vpop.f32.mrb[23].mxu0 }
 0x121   :  { %v1102_v22 = vadd.f32 %v1773_v14, %v1014_v13  ;;  %v1776_v7 = vadd.f32 %v1775_v19, %v1774_v15  ;;  %v1834_v24 = vadd.f32 %v1833_v20, %v1832_v18  ;;  %v1041_v19 = vadd.f32 %v2598_v23, %v2613_v55 }
 0x123   :  { %v1105_v25 = vadd.f32 %v1776_v7, %v1017_v21  ;;  %v2623_v26 = vadd.f32 %v1831_v16, %v1102_v22 }
 0x125   :  { %v2625_v27 = vadd.f32 %v1834_v24, %v1105_v25  ;;  %v1777_v29 = vpop.f32.mrb[20].mxu1  ;;  %v1835_v31 = vpop.f32.mrb[24].mxu0 }
 0x126   :  { %v1778_v32 = vpop.f32.mrb[21].mxu1  ;;  %v1836_v28 = vpop.f32.mrb[25].mxu0 }
 0x127   :  { %v1779_v36 = vadd.f32 %v1778_v32, %v1777_v29  ;;  %v1780_v37 = vpop.f32.mrb[22].mxu1  ;;  %v1837_v38 = vadd.f32 %v1836_v28, %v1835_v31  ;;  %v1838_v39 = vpop.f32.mrb[26].mxu0  ;;  %v1046_v28 = vadd.f32 %v2600_v30, %v2613_v55 }
 0x128   :  { %v1781_v41 = vpop.f32.mrb[23].mxu1  ;;  %v1839_v34 = vpop.f32.mrb[27].mxu0 }
 0x129   :  { %v1110_v44 = vadd.f32 %v1779_v36, %v1022_v33  ;;  %v1782_v45 = vadd.f32 %v1781_v41, %v1780_v37  ;;  %v1840_v47 = vadd.f32 %v1839_v34, %v1838_v39  ;;  %v1049_v41 = vadd.f32 %v2602_v35, %v2613_v55 }
 0x12b   :  { %v1113_v48 = vadd.f32 %v1782_v45, %v1025_v43  ;;  %v2629_v50 = vadd.f32 %v1837_v38, %v1110_v44 }
 0x12d   :  { %v2631_v51 = vadd.f32 %v1840_v47, %v1113_v48  ;;  %v1783_v53 = vpop.f32.mrb[24].mxu1  ;;  %v1841_v54 = vpop.f32.mrb[28].mxu0 }
 0x12e   :  { %v1784_v56 = vpop.f32.mrb[25].mxu1  ;;  %v1842_v40 = vpop.f32.mrb[29].mxu0 }
 0x12f   :  { %v1785_v58 = vadd.f32 %v1784_v56, %v1783_v53  ;;  %v1786_v59 = vpop.f32.mrb[26].mxu1  ;;  %v1843_v60 = vadd.f32 %v1842_v40, %v1841_v54  ;;  %v1844_v61 = vpop.f32.mrb[30].mxu0  ;;  %v1054_v40 = vadd.f32 %v2604_v42, %v2613_v55 }
 0x130   :  { %v1787_v46 = vpop.f32.mrb[27].mxu1  ;;  %v1845_v62 = vpop.f32.mrb[31].mxu0 }
 0x131   :  { %v1118_v0 = vadd.f32 %v1785_v58, %v1030_v57  ;;  %v1788_v1 = vadd.f32 %v1787_v46, %v1786_v59  ;;  %v1846_v2 = vadd.f32 %v1845_v62, %v1844_v61 }
 0x133   :  { %v1121_v3 = vadd.f32 %v1788_v1, %v1033_v63  ;;  %v2637_v4 = vadd.f32 %v1843_v60, %v1118_v0 }
 0x135   :  { %v2639_v5 = vadd.f32 %v1846_v2, %v1121_v3  ;;  %v1789_v9 = vpop.f32.mrb[28].mxu1  ;;  %v1847_v10 = vpop.f32.mrb[32].mxu0 }
 0x136   :  { %v1790_v49 = vpop.f32.mrb[29].mxu1  ;;  %v1848_v11 = vpop.f32.mrb[33].mxu0 }
 0x137   :  { %v1791_v13 = vadd.f32 %v1790_v49, %v1789_v9  ;;  %v1792_v14 = vpop.f32.mrb[30].mxu1  ;;  %v1849_v15 = vadd.f32 %v1848_v11, %v1847_v10  ;;  %v1850_v16 = vpop.f32.mrb[34].mxu0 }
 0x138   :  { %v1793_v52 = vpop.f32.mrb[31].mxu1  ;;  %v1851_v18 = vpop.f32.mrb[35].mxu0 }
 0x139   :  { %v1126_v20 = vadd.f32 %v1791_v13, %v1038_v12  ;;  %v1794_v21 = vadd.f32 %v1793_v52, %v1792_v14  ;;  %v1852_v22 = vadd.f32 %v1851_v18, %v1850_v16 }
 0x13b   :  { %v1129_v7 = vadd.f32 %v1794_v21, %v1041_v19  ;;  %v2645_v24 = vadd.f32 %v1849_v15, %v1126_v20 }
 0x13d   :  { %v2647_v25 = vadd.f32 %v1852_v22, %v1129_v7  ;;  %v1795_v29 = vpop.f32.mrb[32].mxu1  ;;  %v1853_v31 = vpop.f32.mrb[36].mxu0 }
 0x13e   :  { %v1796_v17 = vpop.f32.mrb[33].mxu1  ;;  %v1854_v32 = vpop.f32.mrb[37].mxu0 }
 0x13f   :  { %v1797_v33 = vadd.f32 %v1796_v17, %v1795_v29  ;;  %v1798_v36 = vpop.f32.mrb[34].mxu1  ;;  %v1855_v37 = vadd.f32 %v1854_v32, %v1853_v31  ;;  %v1856_v38 = vpop.f32.mrb[38].mxu0 }
 0x140   :  { %v1799_v23 = vpop.f32.mrb[35].mxu1  ;;  %v1857_v39 = vpop.f32.mrb[39].mxu0 }
 0x141   :  { %v1134_v34 = vadd.f32 %v1797_v33, %v1046_v28  ;;  %v1800_v43 = vadd.f32 %v1799_v23, %v1798_v36  ;;  %v1858_v44 = vadd.f32 %v1857_v39, %v1856_v38 }
 0x143   :  { %v1137_v45 = vadd.f32 %v1800_v43, %v1049_v41  ;;  %v2653_v47 = vadd.f32 %v1855_v37, %v1134_v34 }
 0x145   :  { %v2655_v48 = vadd.f32 %v1858_v44, %v1137_v45  ;;  %v1801_v53 = vpop.f32.mrb[36].mxu1  ;;  %v1859_v54 = vpop.f32.mrb[40].mxu0 }
 0x146   :  { %v1802_v30 = vpop.f32.mrb[37].mxu1  ;;  %v1860_v56 = vpop.f32.mrb[41].mxu0 }
 0x147   :  { %v1803_v57 = vadd.f32 %v1802_v30, %v1801_v53  ;;  %v1804_v58 = vpop.f32.mrb[38].mxu1  ;;  %v1861_v59 = vadd.f32 %v1860_v56, %v1859_v54  ;;  %v1862_v60 = vpop.f32.mrb[42].mxu0 }
 0x148   :  { %v1805_v35 = vpop.f32.mrb[39].mxu1  ;;  %v1863_v61 = vpop.f32.mrb[43].mxu0 }
 0x149   :  { %v1142_v46 = vadd.f32 %v1803_v57, %v1054_v40 }
 0x14b   :  { %v2659_v62 = vadd.f32 %v1861_v59, %v1142_v46 }
 0x14d   :  { %v1881_v63 = vpop.f32.mrb[40].mxu1  ;;  %v1357_v0 = vpop.f32.mrb[44].mxu0 }
 0x14e   :  { %v1882_v1 = vpop.f32.mrb[41].mxu1  ;;  %v1956_v2 = vpop.f32.mrb[45].mxu0 }
 0x14f   :  { %v1883_v3 = vadd.f32 %v1882_v1, %v1881_v63  ;;  %v1884_v9 = vpop.f32.mrb[42].mxu1  ;;  %v1360_v10 = vpop.f32.mrb[46].mxu0 }
 0x150   :  { %v1885_v49 = vpop.f32.mrb[43].mxu1  ;;  %v1957_v11 = vpop.f32.mrb[47].mxu0 }
 0x151   :  { %v1886_v12 = vadd.f32 %v1885_v49, %v1884_v9  ;;  %v1270_v42 = vadd.f32 %v1883_v3, %v2617_v6 }
 0x153   :  { %v1358_v55 = vadd.f32 %v1357_v0, %v1270_v42  ;;  %v1273_v13 = vadd.f32 %v1886_v12, %v2619_v8 }
 0x155   :  { %v1361_v14 = vadd.f32 %v1360_v10, %v1273_v13  ;;  %v1887_v15 = vpop.f32.mrb[44].mxu1  ;;  %v1365_v16 = vpop.f32.mrb[48].mxu0  ;;  %v1411_v19 = vmax.f32 %v1358_v55, 0.0 }
 0x156   :  { %v1888_v52 = vpop.f32.mrb[45].mxu1  ;;  %v1960_v18 = vpop.f32.mrb[49].mxu0 }
 0x157   :  { %v1412_v20 = vmax.f32 %v1361_v14, 0.0  ;;  %v1889_v21 = vadd.f32 %v1888_v52, %v1887_v15  ;;  %v1890_v22 = vpop.f32.mrb[46].mxu1  ;;  %v1368_v7 = vpop.f32.mrb[50].mxu0 }
 0x158   :  { %v1891_v29 = vpop.f32.mrb[47].mxu1  ;;  %v1961_v31 = vpop.f32.mrb[51].mxu0 }
 0x159   :  { %v1659_v17 = vpack.c.bf16 %v1412_v20, %v1411_v19  ;;  %v1892_v32 = vadd.f32 %v1891_v29, %v1890_v22  ;;  %v1278_v28 = vadd.f32 %v1889_v21, %v2623_v26 }
 0x15b   :  { %1660 = vst [vmem:[%s2698_s3] sm:$0xff] %v1659_v17   ;;  %v1366_v6 = vadd.f32 %v1365_v16, %v1278_v28  ;;  %v1281_v8 = vadd.f32 %v1892_v32, %v2625_v27 }
 0x15d   :  { %v1369_v33 = vadd.f32 %v1368_v7, %v1281_v8  ;;  %v1893_v36 = vpop.f32.mrb[48].mxu1  ;;  %v1373_v37 = vpop.f32.mrb[52].mxu0  ;;  %v1413_v39 = vmax.f32 %v1366_v6, 0.0 }
 0x15e   :  { %v1894_v38 = vpop.f32.mrb[49].mxu1  ;;  %v1964_v23 = vpop.f32.mrb[53].mxu0 }
 0x15f   :  { %v1414_v41 = vmax.f32 %v1369_v33, 0.0  ;;  %v1895_v34 = vadd.f32 %v1894_v38, %v1893_v36  ;;  %v1896_v43 = vpop.f32.mrb[50].mxu1  ;;  %v1376_v44 = vpop.f32.mrb[54].mxu0 }
 0x160   :  { %v1897_v45 = vpop.f32.mrb[51].mxu1  ;;  %v1965_v53 = vpop.f32.mrb[55].mxu0 }
 0x161   :  { %v1664_v26 = vpack.c.bf16 %v1414_v41, %v1413_v39  ;;  %v1898_v54 = vadd.f32 %v1897_v45, %v1896_v43  ;;  %v1286_v30 = vadd.f32 %v1895_v34, %v2629_v50 }
 0x163   :  { %1686 = vst [vmem:[%s2698_s3 + $0x8] sm:$0xff] %v1664_v26   ;;  %v1374_v27 = vadd.f32 %v1373_v37, %v1286_v30  ;;  %v1289_v56 = vadd.f32 %v1898_v54, %v2631_v51 }
 0x165   :  { %v1377_v40 = vadd.f32 %v1376_v44, %v1289_v56  ;;  %v1899_v57 = vpop.f32.mrb[52].mxu1  ;;  %v1381_v58 = vpop.f32.mrb[56].mxu0  ;;  %v1415_v35 = vmax.f32 %v1374_v27, 0.0 }
 0x166   :  { %v1900_v59 = vpop.f32.mrb[53].mxu1  ;;  %v1968_v60 = vpop.f32.mrb[57].mxu0 }
 0x167   :  { %v1416_v61 = vmax.f32 %v1377_v40, 0.0  ;;  %v1901_v46 = vadd.f32 %v1900_v59, %v1899_v57  ;;  %v1902_v63 = vpop.f32.mrb[54].mxu1  ;;  %v1384_v0 = vpop.f32.mrb[58].mxu0 }
 0x168   :  { %v1903_v1 = vpop.f32.mrb[55].mxu1  ;;  %v1969_v2 = vpop.f32.mrb[59].mxu0 }
 0x169   :  { %v1669_v50 = vpack.c.bf16 %v1416_v61, %v1415_v35  ;;  %v1904_v3 = vadd.f32 %v1903_v1, %v1902_v63  ;;  %v1294_v9 = vadd.f32 %v1901_v46, %v2637_v4 }
 0x16b   :  { %1687 = vst [vmem:[%s2698_s3 + $0x10] sm:$0xff] %v1669_v50   ;;  %v1382_v51 = vadd.f32 %v1381_v58, %v1294_v9  ;;  %v1297_v10 = vadd.f32 %v1904_v3, %v2639_v5 }
 0x16d   :  { %v1385_v49 = vadd.f32 %v1384_v0, %v1297_v10  ;;  %v1905_v11 = vpop.f32.mrb[56].mxu1  ;;  %v1389_v12 = vpop.f32.mrb[60].mxu0  ;;  %v1417_v13 = vmax.f32 %v1382_v51, 0.0 }
 0x16e   :  { %v1906_v42 = vpop.f32.mrb[57].mxu1  ;;  %v1972_v55 = vpop.f32.mrb[61].mxu0 }
 0x16f   :  { %v1418_v14 = vmax.f32 %v1385_v49, 0.0  ;;  %v1907_v15 = vadd.f32 %v1906_v42, %v1905_v11  ;;  %v1908_v16 = vpop.f32.mrb[58].mxu1  ;;  %v1392_v52 = vpop.f32.mrb[62].mxu0 }
 0x170   :  { %v1909_v18 = vpop.f32.mrb[59].mxu1  ;;  %v1973_v19 = vpop.f32.mrb[63].mxu0 }
 0x171   :  { %v1674_v4 = vpack.c.bf16 %v1418_v14, %v1417_v13  ;;  %v1910_v20 = vadd.f32 %v1909_v18, %v1908_v16  ;;  %v1302_v21 = vadd.f32 %v1907_v15, %v2645_v24 }
 0x173   :  { %1688 = vst [vmem:[%s2698_s3 + $0x18] sm:$0xff] %v1674_v4   ;;  %v1390_v5 = vadd.f32 %v1389_v12, %v1302_v21  ;;  %v1305_v22 = vadd.f32 %v1910_v20, %v2647_v25 }
 0x175   :  { %v1393_v7 = vadd.f32 %v1392_v52, %v1305_v22  ;;  %v1911_v29 = vpop.f32.mrb[60].mxu1  ;;  %v1397_v31 = vpop.f32.mrb[64].mxu0  ;;  %v1419_v28 = vmax.f32 %v1390_v5, 0.0 }
 0x176   :  { %v1912_v17 = vpop.f32.mrb[61].mxu1  ;;  %v1976_v32 = vpop.f32.mrb[65].mxu0 }
 0x177   :  { %v1420_v6 = vmax.f32 %v1393_v7, 0.0  ;;  %v1913_v8 = vadd.f32 %v1912_v17, %v1911_v29  ;;  %v1914_v33 = vpop.f32.mrb[62].mxu1  ;;  %v1400_v36 = vpop.f32.mrb[66].mxu0 }
 0x178   :  { %v1915_v37 = vpop.f32.mrb[63].mxu1  ;;  %v1977_v38 = vpop.f32.mrb[67].mxu0 }
 0x179   :  { %v1679_v24 = vpack.c.bf16 %v1420_v6, %v1419_v28  ;;  %v1916_v23 = vadd.f32 %v1915_v37, %v1914_v33  ;;  %v1310_v39 = vadd.f32 %v1913_v8, %v2653_v47 }
 0x17b   :  { %1689 = vst [vmem:[%s2698_s3 + $0x20] sm:$0xff] %v1679_v24   ;;  %v1398_v25 = vadd.f32 %v1397_v31, %v1310_v39  ;;  %v1313_v41 = vadd.f32 %v1916_v23, %v2655_v48 }
 0x17d   :  { %v1401_v34 = vadd.f32 %v1400_v36, %v1313_v41  ;;  %v1917_v43 = vpop.f32.mrb[64].mxu1  ;;  %v1405_v44 = vpop.f32.mrb[68].mxu0  ;;  %v1421_v26 = vmax.f32 %v1398_v25, 0.0 }
 0x17e   :  { %v1918_v45 = vpop.f32.mrb[65].mxu1  ;;  %v1980_v53 = vpop.f32.mrb[69].mxu0 }
 0x17f   :  { %v1422_v54 = vmax.f32 %v1401_v34, 0.0  ;;  %v1919_v30 = vadd.f32 %v1918_v45, %v1917_v43  ;;  %v1920_v27 = vpop.f32.mrb[66].mxu1  ;;  %v1408_v56 = vpop.f32.mrb[70].mxu0 }
 0x180   :  { %v1921_v40 = vpop.f32.mrb[67].mxu1  ;;  %v1981_v57 = vpop.f32.mrb[71].mxu0 }
 0x181   :  { %v1684_v47 = vpack.c.bf16 %v1422_v54, %v1421_v26  ;;  %v1318_v58 = vadd.f32 %v1919_v30, %v2659_v62 }
 0x183   :  { %1690 = vst [vmem:[%s2698_s3 + $0x28] sm:$0xff] %v1684_v47   ;;  %v1406_v48 = vadd.f32 %v1405_v44, %v1318_v58 }
 0x185   :  { %v1423_v59 = vmax.f32 %v1406_v48, 0.0 }
 0x187   :  { %v1655_v60 = vpack.c.bf16 %v1423_v59, %v1423_v59 }
 0x189   :  { %1489 = vst [vmem:[%s2698_s3 + $0x30] sm:$0x1] %v1655_v60 }

// kernel: cnn_policy_forward.5
= control target key start
LH: loop header
LB: loop body
LE: loop exit
PB: predicated region body
PF: predicated region fallthrough
CT: control target
= control target key end

     0   :  { %s5523_s1 = inlined_call_operand.vmem [shape: bf16[2048,128], index: 1, kind: input, shape index: {}]   ;;  %s5524_s0 = inlined_call_operand.vmem [shape: bf16[162,2048], index: 0, kind: input, shape index: {}]   ;;  %s5525_s2 = inlined_call_operand.vmem [shape: f32[1,128], index: 2, kind: input, shape index: {}]   ;;  %s5526_s3 = inlined_call_operand.vmem [shape: bf16[162,128], index: 3, kind: output, shape index: {}]  }
   0x1   :  { %v4223_v0 = vld [vmem:[%s5523_s1 + $0x40] sm:$0xff]   ;;  %v4227_v4 = vld [vmem:[%s5523_s1 + $0x48] sm:$0xff]   ;;  %v4231_v8 = vld [vmem:[%s5523_s1 + $0x50] sm:$0xff]  }
   0x2   :  { %v4224_v1 = vld [vmem:[%s5523_s1 + $0xc0] sm:$0xff]   ;;  %3567 = vmatprep.subr.bf16.mxu0 %v4223_v0  ;;  %v4228_v5 = vld [vmem:[%s5523_s1 + $0xc8] sm:$0xff]   ;;  %v4232_v9 = vld [vmem:[%s5523_s1 + $0xd0] sm:$0xff]  }
   0x3   :  { %v4225_v2 = vld [vmem:[%s5523_s1] sm:$0xff]   ;;  %3649 = vmatprep.subr.bf16.mxu1 %v4224_v1  ;;  %v4229_v6 = vld [vmem:[%s5523_s1 + $0x8] sm:$0xff]   ;;  %v4233_v10 = vld [vmem:[%s5523_s1 + $0x10] sm:$0xff]  }
   0x4   :  { %v4226_v3 = vld [vmem:[%s5523_s1 + $0x80] sm:$0xff]   ;;  %3568 = vmatpush3.bf16.msra.mxu0 %v4225_v2  ;;  %v4230_v7 = vld [vmem:[%s5523_s1 + $0x88] sm:$0xff]   ;;  %v4234_v11 = vld [vmem:[%s5523_s1 + $0x90] sm:$0xff]  }
   0x5   :  { %3650 = vmatpush3.bf16.msra.mxu1 %v4226_v3  ;;  %3569 = vmatprep.subr.bf16.mxu0 %v4227_v4  ;;  %v4235_v12 = vld [vmem:[%s5523_s1 + $0x58] sm:$0xff]   ;;  %v4239_v16 = vld [vmem:[%s5523_s1 + $0x60] sm:$0xff]   ;;  %v4243_v20 = vld [vmem:[%s5523_s1 + $0x68] sm:$0xff]  }
   0x6   :  { %3651 = vmatprep.subr.bf16.mxu1 %v4228_v5  ;;  %v4236_v13 = vld [vmem:[%s5523_s1 + $0xd8] sm:$0xff]   ;;  %v4240_v17 = vld [vmem:[%s5523_s1 + $0xe0] sm:$0xff]   ;;  %v4244_v21 = vld [vmem:[%s5523_s1 + $0xe8] sm:$0xff]  }
   0x7   :  { %v4237_v14 = vld [vmem:[%s5523_s1 + $0x18] sm:$0xff]   ;;  %v4241_v18 = vld [vmem:[%s5523_s1 + $0x20] sm:$0xff]   ;;  %v4245_v22 = vld [vmem:[%s5523_s1 + $0x28] sm:$0xff]  }
   0x8   :  { %3570 = vmatpush3.bf16.msra.mxu0 %v4229_v6  ;;  %v4238_v15 = vld [vmem:[%s5523_s1 + $0x98] sm:$0xff]   ;;  %v4242_v19 = vld [vmem:[%s5523_s1 + $0xa0] sm:$0xff]   ;;  %v4246_v23 = vld [vmem:[%s5523_s1 + $0xa8] sm:$0xff]  }
   0x9   :  { %3652 = vmatpush3.bf16.msra.mxu1 %v4230_v7  ;;  %3571 = vmatprep.subr.bf16.mxu0 %v4231_v8  ;;  %v4247_v24 = vld [vmem:[%s5523_s1 + $0x70] sm:$0xff]   ;;  %v4251_v28 = vld [vmem:[%s5523_s1 + $0x78] sm:$0xff]   ;;  %v15_v32 = vld [vmem:[%s5524_s0] sm:$0xff] }
   0xa   :  { %3653 = vmatprep.subr.bf16.mxu1 %v4232_v9  ;;  %v4248_v25 = vld [vmem:[%s5523_s1 + $0xf0] sm:$0xff]   ;;  %v4252_v29 = vld [vmem:[%s5523_s1 + $0xf8] sm:$0xff]   ;;  %v23_v33 = vld [vmem:[%s5524_s0 + $0x40] sm:$0xff] }
   0xb   :  { %v4249_v26 = vld [vmem:[%s5523_s1 + $0x30] sm:$0xff]   ;;  %v4253_v30 = vld [vmem:[%s5523_s1 + $0x38] sm:$0xff]   ;;  %v16_v34 = vld [vmem:[%s5524_s0 + $0x8] sm:$0xff]  ;;  %v3162_v35 = vcombine.low %v15_v32, %v23_v33  ;;  %v3163_v36 = vcombine.high %v15_v32, %v23_v33 }
   0xc   :  { %3572 = vmatpush3.bf16.msra.mxu0 %v4233_v10  ;;  %v4250_v27 = vld [vmem:[%s5523_s1 + $0xb0] sm:$0xff]   ;;  %v4254_v31 = vld [vmem:[%s5523_s1 + $0xb8] sm:$0xff]   ;;  %v24_v37 = vld [vmem:[%s5524_s0 + $0x48] sm:$0xff] }
   0xd   :  { %3654 = vmatpush3.bf16.msra.mxu1 %v4234_v11  ;;  %3573 = vmatprep.subr.bf16.mxu0 %v4235_v12  ;;  %v3164_v38 = vcombine.low %v16_v34, %v24_v37  ;;  %v3165_v39 = vcombine.high %v16_v34, %v24_v37  ;;  %v4255_v40 = vld [vmem:[%s5523_s1 + $0x140] sm:$0xff]   ;;  %v32_v47 = vld [vmem:[%s5524_s0 + $0x88] sm:$0xff]  ;;  %v4263_v62 = vld [vmem:[%s5523_s1 + $0x150] sm:$0xff]  }
   0xe   :  { %3655 = vmatprep.subr.bf16.mxu1 %v4236_v13  ;;  %2102 = vmatprep.mubr.bf16.mxu0 %v3163_v36  ;;  %v4256_v41 = vld [vmem:[%s5523_s1 + $0x100] sm:$0xff]   ;;  %v40_v48 = vld [vmem:[%s5524_s0 + $0xc8] sm:$0xff]  ;;  %v4264_v3 = vld [vmem:[%s5523_s1 + $0x110] sm:$0xff]  }
   0xf   :  { %2222 = vmatprep.mubr.bf16.mxu1 %v3165_v39  ;;  %v4257_v42 = vld [vmem:[%s5523_s1 + $0x1c0] sm:$0xff]   ;;  %v3181_v49 = vcombine.high %v32_v47, %v40_v48  ;;  %v4259_v50 = vld [vmem:[%s5523_s1 + $0x148] sm:$0xff]   ;;  %v3180_v53 = vcombine.low %v32_v47, %v40_v48  ;;  %v4265_v5 = vld [vmem:[%s5523_s1 + $0x1d0] sm:$0xff]  }
  0x10   :  { %3574 = vmatpush3.bf16.msra.mxu0 %v4237_v14  ;;  %v4258_v43 = vld [vmem:[%s5523_s1 + $0x180] sm:$0xff]   ;;  %v4260_v52 = vld [vmem:[%s5523_s1 + $0x108] sm:$0xff]   ;;  %v4266_v8 = vld [vmem:[%s5523_s1 + $0x190] sm:$0xff]  }
  0x11   :  { %3656 = vmatpush3.bf16.msra.mxu1 %v4238_v15  ;;  %3575 = vmatprep.subr.bf16.mxu0 %v4239_v16  ;;  %v31_v44 = vld [vmem:[%s5524_s0 + $0x80] sm:$0xff]  ;;  %v4261_v54 = vld [vmem:[%s5523_s1 + $0x1c8] sm:$0xff]   ;;  %v4267_v10 = vld [vmem:[%s5523_s1 + $0x158] sm:$0xff]  }
  0x12   :  { %3657 = vmatprep.subr.bf16.mxu1 %v4240_v17  ;;  %v39_v45 = vld [vmem:[%s5524_s0 + $0xc0] sm:$0xff]  ;;  %v4262_v55 = vld [vmem:[%s5523_s1 + $0x188] sm:$0xff]   ;;  %v4268_v12 = vld [vmem:[%s5523_s1 + $0x118] sm:$0xff]  }
  0x13   :  { %v3179_v46 = vcombine.high %v31_v44, %v39_v45  ;;  %v3178_v51 = vcombine.low %v31_v44, %v39_v45  ;;  %v47_v56 = vld [vmem:[%s5524_s0 + $0x100] sm:$0xff]  ;;  %v48_v58 = vld [vmem:[%s5524_s0 + $0x108] sm:$0xff]  ;;  %v4269_v13 = vld [vmem:[%s5523_s1 + $0x1d8] sm:$0xff]  }
  0x14   :  { %3576 = vmatpush3.bf16.msra.mxu0 %v4241_v18  ;;  %v55_v57 = vld [vmem:[%s5524_s0 + $0x140] sm:$0xff]  ;;  %v56_v59 = vld [vmem:[%s5524_s0 + $0x148] sm:$0xff]  ;;  %v4270_v15 = vld [vmem:[%s5523_s1 + $0x198] sm:$0xff]  }
  0x15   :  { %3658 = vmatpush3.bf16.msra.mxu1 %v4242_v19  ;;  %3577 = vmatprep.subr.bf16.mxu0 %v4243_v20  ;;  %v3195_v60 = vcombine.high %v47_v56, %v55_v57  ;;  %v3197_v61 = vcombine.high %v48_v58, %v56_v59  ;;  %v63_v63 = vld [vmem:[%s5524_s0 + $0x180] sm:$0xff]  ;;  %v64_v1 = vld [vmem:[%s5524_s0 + $0x188] sm:$0xff]  ;;  %v3194_v4 = vcombine.low %v47_v56, %v55_v57  ;;  %v4281_v44 = vld [vmem:[%s5523_s1 + $0x1f0] sm:$0xff]  }
  0x16   :  { %3659 = vmatprep.subr.bf16.mxu1 %v4244_v21  ;;  %v71_v0 = vld [vmem:[%s5524_s0 + $0x1c0] sm:$0xff]  ;;  %v72_v2 = vld [vmem:[%s5524_s0 + $0x1c8] sm:$0xff]  ;;  %v3196_v6 = vcombine.low %v48_v58, %v56_v59  ;;  %v4282_v45 = vld [vmem:[%s5523_s1 + $0x1b0] sm:$0xff]  }
  0x17   :  { %v3211_v7 = vcombine.high %v63_v63, %v71_v0  ;;  %v3213_v9 = vcombine.high %v64_v1, %v72_v2  ;;  %v79_v11 = vld [vmem:[%s5524_s0 + $0x200] sm:$0xff]  ;;  %v80_v16 = vld [vmem:[%s5524_s0 + $0x208] sm:$0xff]  ;;  %v3210_v18 = vcombine.low %v63_v63, %v71_v0  ;;  %v3212_v20 = vcombine.low %v64_v1, %v72_v2 }
  0x18   :  { %3578 = vmatpush3.bf16.msra.mxu0 %v4245_v22  ;;  %v87_v14 = vld [vmem:[%s5524_s0 + $0x240] sm:$0xff]  ;;  %v88_v17 = vld [vmem:[%s5524_s0 + $0x248] sm:$0xff] }
  0x19   :  { %3660 = vmatpush3.bf16.msra.mxu1 %v4246_v23  ;;  %3579 = vmatprep.subr.bf16.mxu0 %v4247_v24  ;;  %v4271_v19 = vld [vmem:[%s5523_s1 + $0x160] sm:$0xff]   ;;  %v3227_v21 = vcombine.high %v79_v11, %v87_v14  ;;  %v3229_v23 = vcombine.high %v80_v16, %v88_v17  ;;  %v4276_v32 = vld [vmem:[%s5523_s1 + $0x128] sm:$0xff]   ;;  %v3228_v33 = vcombine.low %v80_v16, %v88_v17 }
  0x1a   :  { %3661 = vmatprep.subr.bf16.mxu1 %v4248_v25  ;;  %v4272_v22 = vld [vmem:[%s5523_s1 + $0x120] sm:$0xff]   ;;  %v4278_v37 = vld [vmem:[%s5523_s1 + $0x1a8] sm:$0xff]  }
  0x1b   :  { %v4273_v24 = vld [vmem:[%s5523_s1 + $0x1e0] sm:$0xff]   ;;  %v128_v56 = vld [vmem:[%s5524_s0 + $0x388] sm:$0xff] }
  0x1c   :  { %3580 = vmatpush3.bf16.msra.mxu0 %v4249_v26  ;;  %v95_v25 = vld [vmem:[%s5524_s0 + $0x280] sm:$0xff]  ;;  %v136_v57 = vld [vmem:[%s5524_s0 + $0x3c8] sm:$0xff] }
  0x1d   :  { %3662 = vmatpush3.bf16.msra.mxu1 %v4250_v27  ;;  %3581 = vmatprep.subr.bf16.mxu0 %v4251_v28  ;;  %v103_v26 = vld [vmem:[%s5524_s0 + $0x2c0] sm:$0xff]  ;;  %v96_v28 = vld [vmem:[%s5524_s0 + $0x288] sm:$0xff] }
  0x1e   :  { %3663 = vmatprep.subr.bf16.mxu1 %v4252_v29  ;;  %v4274_v27 = vld [vmem:[%s5523_s1 + $0x1a0] sm:$0xff]   ;;  %v104_v29 = vld [vmem:[%s5524_s0 + $0x2c8] sm:$0xff]  ;;  %v3243_v34 = vcombine.high %v95_v25, %v103_v26 }
  0x1f   :  { %v3245_v36 = vcombine.high %v96_v28, %v104_v29  ;;  %v119_v39 = vld [vmem:[%s5524_s0 + $0x340] sm:$0xff]  ;;  %v3244_v47 = vcombine.low %v96_v28, %v104_v29  ;;  %v144_v2 = vld [vmem:[%s5524_s0 + $0x408] sm:$0xff] }
  0x20   :  { %3582 = vmatpush3.bf16.msra.mxu0 %v4253_v30  ;;  %v4275_v30 = vld [vmem:[%s5523_s1 + $0x168] sm:$0xff]   ;;  %v4291_v59 = vld [vmem:[%s5523_s1 + $0x240] sm:$0xff]  }
  0x21   :  { %3664 = vmatpush3.bf16.msra.mxu1 %v4254_v31  ;;  %3731 = vmatprep.subr.bf16.mxu0 %v4255_v40  ;;  %v3226_v31 = vcombine.low %v79_v11, %v87_v14  ;;  %v4279_v40 = vld [vmem:[%s5523_s1 + $0x170] sm:$0xff]   ;;  %v4293_v63 = vld [vmem:[%s5523_s1 + $0x2c0] sm:$0xff]   ;;  %v168_v11 = vld [vmem:[%s5524_s0 + $0x4c8] sm:$0xff] }
  0x22   :  { %3813 = vmatprep.subr.bf16.mxu1 %v4257_v42  ;;  %v120_v42 = vld [vmem:[%s5524_s0 + $0x348] sm:$0xff]  ;;  %v143_v0 = vld [vmem:[%s5524_s0 + $0x400] sm:$0xff] }
  0x23   :  { %2103 = vmatmul.mubr.bf16.vlgmr.msra.gmra.mrb[0].mxu0 %v3162_v35  ;;  %v4277_v35 = vld [vmem:[%s5523_s1 + $0x1e8] sm:$0xff]   ;;  %v151_v1 = vld [vmem:[%s5524_s0 + $0x440] sm:$0xff] }
  0x24   :  { %2223 = vmatmul.mubr.bf16.vlgmr.msra.gmra.mrb[0].mxu1 %v3164_v38  ;;  %3732 = vmatpush3.bf16.msra.mxu0 %v4256_v41  ;;  %v111_v38 = vld [vmem:[%s5524_s0 + $0x300] sm:$0xff]  ;;  %v112_v41 = vld [vmem:[%s5524_s0 + $0x308] sm:$0xff] }
  0x25   :  { %3814 = vmatpush3.bf16.msra.mxu1 %v4258_v43  ;;  %2110 = vmatprep.mubr.bf16.mxu0 %v3179_v46  ;;  %v4280_v43 = vld [vmem:[%s5523_s1 + $0x130] sm:$0xff]   ;;  %v3242_v46 = vcombine.low %v95_v25, %v103_v26  ;;  %v3259_v48 = vcombine.high %v111_v38, %v119_v39  ;;  %v3258_v58 = vcombine.low %v111_v38, %v119_v39  ;;  %v175_v16 = vld [vmem:[%s5524_s0 + $0x500] sm:$0x11]  ;;  %v176_v17 = vld [vmem:[%s5524_s0 + $0x508] sm:$0x11] }
  0x26   :  { %2230 = vmatprep.mubr.bf16.mxu1 %v3181_v49  ;;  %3733 = vmatprep.subr.bf16.mxu0 %v4259_v50  ;;  %v3261_v49 = vcombine.high %v112_v41, %v120_v42  ;;  %v4283_v50 = vld [vmem:[%s5523_s1 + $0x178] sm:$0xff]   ;;  %v3322_v26 = vcombine.low %v175_v16, %v175_v16  ;;  %v4295_v39 = vld [vmem:[%s5523_s1 + $0x248] sm:$0xff]  }
  0x27   :  { %3815 = vmatprep.subr.bf16.mxu1 %v4261_v54  ;;  %v127_v54 = vld [vmem:[%s5524_s0 + $0x380] sm:$0xff]  ;;  %v26_v25 = vld [vmem:[%s5524_s0 + $0x58] sm:$0xff] }
  0x28   :  { %3734 = vmatpush3.bf16.msra.mxu0 %v4260_v52  ;;  %v4287_v52 = vld [vmem:[%s5523_s1 + $0x1f8] sm:$0xff]  }
  0x29   :  { %3816 = vmatpush3.bf16.msra.mxu1 %v4262_v55  ;;  %3735 = vmatprep.subr.bf16.mxu0 %v4263_v62  ;;  %v135_v55 = vld [vmem:[%s5524_s0 + $0x3c0] sm:$0xff]  ;;  %v3277_v62 = vcombine.high %v128_v56, %v136_v57 }
  0x2a   :  { %3817 = vmatprep.subr.bf16.mxu1 %v4265_v5  ;;  %v3276_v5 = vcombine.low %v128_v56, %v136_v57  ;;  %v4303_v56 = vld [vmem:[%s5523_s1 + $0x258] sm:$0xff]   ;;  %v65_v57 = vld [vmem:[%s5524_s0 + $0x190] sm:$0xff] }
  0x2b   :  { %2111 = vmatmul.mubr.bf16.gmra.mrb[4].mxu0 %v3178_v51  ;;  %v4284_v51 = vld [vmem:[%s5523_s1 + $0x138] sm:$0xff]  }
  0x2c   :  { %2231 = vmatmul.mubr.bf16.gmra.mrb[4].mxu1 %v3180_v53  ;;  %2118 = vmatprep.mubr.bf16.mxu0 %v3195_v60  ;;  %v4290_v53 = vld [vmem:[%s5523_s1 + $0x1b8] sm:$0xff]   ;;  %v3260_v60 = vcombine.low %v112_v41, %v120_v42  ;;  %v4296_v41 = vld [vmem:[%s5523_s1 + $0x208] sm:$0xff]  }
  0x2d   :  { %2238 = vmatprep.mubr.bf16.mxu1 %v3197_v61  ;;  %3736 = vmatpush3.bf16.msra.mxu0 %v4264_v3  ;;  %v3275_v61 = vcombine.high %v127_v54, %v135_v55  ;;  %v152_v3 = vld [vmem:[%s5524_s0 + $0x448] sm:$0xff] }
  0x2e   :  { %3818 = vmatpush3.bf16.msra.mxu1 %v4266_v8  ;;  %3737 = vmatprep.subr.bf16.mxu0 %v4267_v10  ;;  %v159_v8 = vld [vmem:[%s5524_s0 + $0x480] sm:$0xff]  ;;  %v160_v10 = vld [vmem:[%s5524_s0 + $0x488] sm:$0xff] }
  0x2f   :  { %3819 = vmatprep.subr.bf16.mxu1 %v4269_v13  ;;  %v3292_v13 = vcombine.low %v144_v2, %v152_v3  ;;  %v4297_v42 = vld [vmem:[%s5523_s1 + $0x2c8] sm:$0xff]  }
  0x31   :  { %3738 = vmatpush3.bf16.msra.mxu0 %v4268_v12  ;;  %v3290_v12 = vcombine.low %v143_v0, %v151_v1 }
  0x32   :  { %3820 = vmatpush3.bf16.msra.mxu1 %v4270_v15  ;;  %3739 = vmatprep.subr.bf16.mxu0 %v4271_v19  ;;  %v3309_v15 = vcombine.high %v160_v10, %v168_v11  ;;  %v3308_v19 = vcombine.low %v160_v10, %v168_v11  ;;  %v4313_v10 = vld [vmem:[%s5523_s1 + $0x2e8] sm:$0xff]   ;;  %v89_v11 = vld [vmem:[%s5524_s0 + $0x250] sm:$0xff] }
  0x33   :  { %2119 = vmatmul.mubr.bf16.gmra.mrb[8].mxu0 %v3194_v4  ;;  %3821 = vmatprep.subr.bf16.mxu1 %v4273_v24  ;;  %v3274_v4 = vcombine.low %v127_v54, %v135_v55  ;;  %v18_v24 = vld [vmem:[%s5524_s0 + $0x18] sm:$0xff]  ;;  %v4300_v54 = vld [vmem:[%s5523_s1 + $0x210] sm:$0xff]  }
  0x34   :  { %2239 = vmatmul.mubr.bf16.gmra.mrb[8].mxu1 %v3196_v6  ;;  %2126 = vmatprep.mubr.bf16.mxu0 %v3211_v7  ;;  %v3291_v6 = vcombine.high %v143_v0, %v151_v1  ;;  %v3293_v7 = vcombine.high %v144_v2, %v152_v3  ;;  %v3169_v29 = vcombine.high %v18_v24, %v26_v25  ;;  %v4302_v55 = vld [vmem:[%s5523_s1 + $0x290] sm:$0xff]   ;;  %v4307_v0 = vld [vmem:[%s5523_s1 + $0x260] sm:$0xff]  }
  0x35   :  { %2246 = vmatprep.mubr.bf16.mxu1 %v3213_v9  ;;  %3740 = vmatpush3.bf16.msra.mxu0 %v4272_v22  ;;  %v167_v9 = vld [vmem:[%s5524_s0 + $0x4c0] sm:$0xff]  ;;  %v17_v22 = vld [vmem:[%s5524_s0 + $0x10] sm:$0xff] }
  0x36   :  { %3822 = vmatpush3.bf16.msra.mxu1 %v4274_v27  ;;  %3741 = vmatprep.subr.bf16.mxu0 %v4275_v30  ;;  %v3307_v14 = vcombine.high %v159_v8, %v167_v9  ;;  %v3324_v27 = vcombine.low %v176_v17, %v176_v17  ;;  %v33_v30 = vld [vmem:[%s5524_s0 + $0x90] sm:$0xff]  ;;  %v4309_v2 = vld [vmem:[%s5523_s1 + $0x2e0] sm:$0xff]  }
  0x37   :  { %3823 = vmatprep.subr.bf16.mxu1 %v4277_v35  ;;  %v3168_v35 = vcombine.low %v18_v24, %v26_v25  ;;  %v4319_v24 = vld [vmem:[%s5523_s1 + $0x278] sm:$0xff]   ;;  %v97_v25 = vld [vmem:[%s5524_s0 + $0x290] sm:$0xff] }
  0x39   :  { %3742 = vmatpush3.bf16.msra.mxu0 %v4276_v32  ;;  %v34_v32 = vld [vmem:[%s5524_s0 + $0x98] sm:$0xff] }
  0x3a   :  { %3824 = vmatpush3.bf16.msra.mxu1 %v4278_v37  ;;  %3743 = vmatprep.subr.bf16.mxu0 %v4279_v40  ;;  %v4294_v37 = vld [vmem:[%s5523_s1 + $0x280] sm:$0xff]  }
  0x3b   :  { %2127 = vmatmul.mubr.bf16.gmra.mrb[12].mxu0 %v3210_v18  ;;  %3825 = vmatprep.subr.bf16.mxu1 %v4281_v44  ;;  %v3306_v18 = vcombine.low %v159_v8, %v167_v9  ;;  %v49_v44 = vld [vmem:[%s5524_s0 + $0x110] sm:$0xff]  ;;  %v4311_v8 = vld [vmem:[%s5523_s1 + $0x268] sm:$0xff]  }
  0x3c   :  { %2247 = vmatmul.mubr.bf16.gmra.mrb[12].mxu1 %v3212_v20  ;;  %2134 = vmatprep.mubr.bf16.mxu0 %v3227_v21  ;;  %v3323_v20 = vcombine.high %v175_v16, %v175_v16  ;;  %v3325_v21 = vcombine.high %v176_v17, %v176_v17  ;;  %v81_v9 = vld [vmem:[%s5524_s0 + $0x210] sm:$0xff] }
  0x3d   :  { %2254 = vmatprep.mubr.bf16.mxu1 %v3229_v23  ;;  %3744 = vmatpush3.bf16.msra.mxu0 %v4280_v43  ;;  %v25_v23 = vld [vmem:[%s5524_s0 + $0x50] sm:$0xff]  ;;  %v4298_v43 = vld [vmem:[%s5523_s1 + $0x288] sm:$0xff]  }
  0x3e   :  { %3826 = vmatpush3.bf16.msra.mxu1 %v4282_v45  ;;  %3745 = vmatprep.subr.bf16.mxu0 %v4283_v50  ;;  %v3167_v28 = vcombine.high %v17_v22, %v25_v23  ;;  %v57_v45 = vld [vmem:[%s5524_s0 + $0x150] sm:$0xff] }
  0x3f   :  { %3827 = vmatprep.subr.bf16.mxu1 %v4287_v52  ;;  %v3199_v52 = vcombine.high %v49_v44, %v57_v45  ;;  %v3198_v1 = vcombine.low %v49_v44, %v57_v45  ;;  %v4315_v16 = vld [vmem:[%s5523_s1 + $0x270] sm:$0xff]  }
  0x41   :  { %3746 = vmatpush3.bf16.msra.mxu0 %v4284_v51 }
  0x42   :  { %3828 = vmatpush3.bf16.msra.mxu1 %v4290_v53  ;;  %3895 = vmatprep.subr.bf16.mxu0 %v4291_v59  ;;  %v73_v59 = vld [vmem:[%s5524_s0 + $0x1d0] sm:$0xff] }
  0x43   :  { %2135 = vmatmul.mubr.bf16.gmra.mrb[16].mxu0 %v3226_v31  ;;  %3977 = vmatprep.subr.bf16.mxu1 %v4293_v63  ;;  %v41_v31 = vld [vmem:[%s5524_s0 + $0xd0] sm:$0xff]  ;;  %v4306_v63 = vld [vmem:[%s5523_s1 + $0x298] sm:$0xff]   ;;  %v3214_v17 = vcombine.low %v65_v57, %v73_v59 }
  0x44   :  { %2255 = vmatmul.mubr.bf16.gmra.mrb[16].mxu1 %v3228_v33  ;;  %2142 = vmatprep.mubr.bf16.mxu0 %v3243_v34  ;;  %v3166_v33 = vcombine.low %v17_v22, %v25_v23  ;;  %v42_v34 = vld [vmem:[%s5524_s0 + $0xd8] sm:$0xff]  ;;  %v3183_v38 = vcombine.high %v33_v30, %v41_v31  ;;  %v3182_v50 = vcombine.low %v33_v30, %v41_v31  ;;  %v4316_v22 = vld [vmem:[%s5523_s1 + $0x230] sm:$0xff]  }
  0x45   :  { %2262 = vmatprep.mubr.bf16.mxu1 %v3245_v36  ;;  %v4292_v36 = vld [vmem:[%s5523_s1 + $0x200] sm:$0xff]   ;;  %v3185_v40 = vcombine.high %v34_v32, %v42_v34  ;;  %v3184_v51 = vcombine.low %v34_v32, %v42_v34  ;;  %v4318_v23 = vld [vmem:[%s5523_s1 + $0x2b0] sm:$0xff]   ;;  %v106_v30 = vld [vmem:[%s5524_s0 + $0x2d8] sm:$0xff] }
  0x46   :  { %v4326_v31 = vld [vmem:[%s5523_s1 + $0x2b8] sm:$0xff]   ;;  %v4327_v32 = vld [vmem:[%s5523_s1 + $0x340] sm:$0xff]  }
  0x47   :  { %v4329_v34 = vld [vmem:[%s5523_s1 + $0x3c0] sm:$0xff]  }
  0x4b   :  { %2143 = vmatmul.mubr.bf16.gmra.mrb[20].mxu0 %v3242_v46  ;;  %v50_v46 = vld [vmem:[%s5524_s0 + $0x118] sm:$0xff] }
  0x4c   :  { %2263 = vmatmul.mubr.bf16.gmra.mrb[20].mxu1 %v3244_v47  ;;  %2150 = vmatprep.mubr.bf16.mxu0 %v3259_v48  ;;  %v58_v47 = vld [vmem:[%s5524_s0 + $0x158] sm:$0xff]  ;;  %v4299_v48 = vld [vmem:[%s5523_s1 + $0x250] sm:$0xff]  }
  0x4d   :  { %2270 = vmatprep.mubr.bf16.mxu1 %v3261_v49  ;;  %v4301_v49 = vld [vmem:[%s5523_s1 + $0x2d0] sm:$0xff]   ;;  %v3201_v53 = vcombine.high %v50_v46, %v58_v47  ;;  %v3200_v3 = vcombine.low %v50_v46, %v58_v47 }
  0x4e   :  { %v129_v46 = vld [vmem:[%s5524_s0 + $0x390] sm:$0xff] }
  0x4f   :  { %v137_v47 = vld [vmem:[%s5524_s0 + $0x3d0] sm:$0xff] }
  0x53   :  { %2151 = vmatmul.mubr.bf16.gmra.mrb[24].mxu0 %v3258_v58  ;;  %v4305_v58 = vld [vmem:[%s5523_s1 + $0x2d8] sm:$0xff]  }
  0x54   :  { %2271 = vmatmul.mubr.bf16.gmra.mrb[24].mxu1 %v3260_v60  ;;  %2158 = vmatprep.mubr.bf16.mxu0 %v3275_v61  ;;  %v66_v60 = vld [vmem:[%s5524_s0 + $0x198] sm:$0xff] }
  0x55   :  { %2278 = vmatprep.mubr.bf16.mxu1 %v3277_v62  ;;  %v4304_v61 = vld [vmem:[%s5523_s1 + $0x218] sm:$0xff]  }
  0x56   :  { %v74_v62 = vld [vmem:[%s5524_s0 + $0x1d8] sm:$0xff] }
  0x5b   :  { %2159 = vmatmul.mubr.bf16.gmra.mrb[28].mxu0 %v3274_v4  ;;  %v3215_v4 = vcombine.high %v65_v57, %v73_v59  ;;  %v154_v57 = vld [vmem:[%s5524_s0 + $0x458] sm:$0xff] }
  0x5c   :  { %2279 = vmatmul.mubr.bf16.gmra.mrb[28].mxu1 %v3276_v5  ;;  %2166 = vmatprep.mubr.bf16.mxu0 %v3291_v6  ;;  %v4308_v5 = vld [vmem:[%s5523_s1 + $0x220] sm:$0xff]   ;;  %v3217_v6 = vcombine.high %v66_v60, %v74_v62 }
  0x5d   :  { %2286 = vmatprep.mubr.bf16.mxu1 %v3293_v7  ;;  %v4310_v7 = vld [vmem:[%s5523_s1 + $0x2a0] sm:$0xff]  }
  0x63   :  { %2167 = vmatmul.mubr.bf16.gmra.mrb[32].mxu0 %v3290_v12  ;;  %v82_v12 = vld [vmem:[%s5524_s0 + $0x218] sm:$0xff] }
  0x64   :  { %2287 = vmatmul.mubr.bf16.gmra.mrb[32].mxu1 %v3292_v13  ;;  %2174 = vmatprep.mubr.bf16.mxu0 %v3307_v14  ;;  %v90_v13 = vld [vmem:[%s5524_s0 + $0x258] sm:$0xff]  ;;  %v4312_v14 = vld [vmem:[%s5523_s1 + $0x228] sm:$0xff]  }
  0x65   :  { %2294 = vmatprep.mubr.bf16.mxu1 %v3309_v15  ;;  %v4314_v15 = vld [vmem:[%s5523_s1 + $0x2a8] sm:$0xff]  }
  0x6b   :  { %2175 = vmatmul.mubr.bf16.gmra.mrb[36].mxu0 %v3306_v18  ;;  %v4317_v18 = vld [vmem:[%s5523_s1 + $0x2f0] sm:$0xff]  }
  0x6c   :  { %2295 = vmatmul.mubr.bf16.gmra.mrb[36].mxu1 %v3308_v19  ;;  %2182 = vmatprep.mubr.bf16.mxu0 %v3323_v20  ;;  %v3216_v19 = vcombine.low %v66_v60, %v74_v62  ;;  %v3231_v20 = vcombine.high %v81_v9, %v89_v11  ;;  %v161_v62 = vld [vmem:[%s5524_s0 + $0x490] sm:$0xff] }
  0x6d   :  { %2302 = vmatprep.mubr.bf16.mxu1 %v3325_v21  ;;  %v3233_v21 = vcombine.high %v82_v12, %v90_v13 }
  0x73   :  { %2183 = vmatmul.mubr.bf16.gmra.mrb[40].mxu0 %v3322_v26  ;;  %v105_v26 = vld [vmem:[%s5524_s0 + $0x2d0] sm:$0xff] }
  0x74   :  { %2303 = vmatmul.mubr.bf16.gmra.mrb[40].mxu1 %v3324_v27  ;;  %2342 = vmatprep.mubr.bf16.mxu0 %v3167_v28  ;;  %v4323_v27 = vld [vmem:[%s5523_s1 + $0x2f8] sm:$0xff]  }
  0x75   :  { %2462 = vmatprep.mubr.bf16.mxu1 %v3169_v29  ;;  %v98_v28 = vld [vmem:[%s5524_s0 + $0x298] sm:$0xff] }
  0x76   :  { %v4320_v29 = vld [vmem:[%s5523_s1 + $0x238] sm:$0xff]  }
  0x7b   :  { %2343 = vmatmul.mubr.bf16.vlgmr.msra.gmra.mrb[44].mxu0 %v3166_v33  ;;  %v3230_v33 = vcombine.low %v81_v9, %v89_v11 }
  0x7c   :  { %2463 = vmatmul.mubr.bf16.vlgmr.msra.gmra.mrb[44].mxu1 %v3168_v35  ;;  %3896 = vmatpush3.bf16.msra.mxu0 %v4292_v36  ;;  %v3232_v35 = vcombine.low %v82_v12, %v90_v13  ;;  %v3247_v36 = vcombine.high %v97_v25, %v105_v26  ;;  %v19_v12 = vld [vmem:[%s5524_s0 + $0x20] sm:$0xff] }
  0x7d   :  { %3978 = vmatpush3.bf16.msra.mxu1 %v4294_v37  ;;  %2350 = vmatprep.mubr.bf16.mxu0 %v3183_v38  ;;  %v3249_v37 = vcombine.high %v98_v28, %v106_v30  ;;  %v113_v38 = vld [vmem:[%s5524_s0 + $0x310] sm:$0xff]  ;;  %v27_v13 = vld [vmem:[%s5524_s0 + $0x60] sm:$0xff] }
  0x7e   :  { %2470 = vmatprep.mubr.bf16.mxu1 %v3185_v40  ;;  %3897 = vmatprep.subr.bf16.mxu0 %v4295_v39  ;;  %v121_v39 = vld [vmem:[%s5524_s0 + $0x350] sm:$0xff]  ;;  %v114_v40 = vld [vmem:[%s5524_s0 + $0x318] sm:$0xff] }
  0x7f   :  { %3979 = vmatprep.subr.bf16.mxu1 %v4297_v42  ;;  %v3246_v42 = vcombine.low %v97_v25, %v105_v26  ;;  %v3263_v44 = vcombine.high %v113_v38, %v121_v39  ;;  %v4328_v26 = vld [vmem:[%s5523_s1 + $0x300] sm:$0xff]  }
  0x80   :  { %3898 = vmatpush3.bf16.msra.mxu0 %v4296_v41  ;;  %v122_v41 = vld [vmem:[%s5524_s0 + $0x358] sm:$0xff] }
  0x81   :  { %3980 = vmatpush3.bf16.msra.mxu1 %v4298_v43  ;;  %3899 = vmatprep.subr.bf16.mxu0 %v4299_v48  ;;  %v3248_v43 = vcombine.low %v98_v28, %v106_v30  ;;  %v3265_v45 = vcombine.high %v114_v40, %v122_v41  ;;  %v130_v48 = vld [vmem:[%s5524_s0 + $0x398] sm:$0xff]  ;;  %v4331_v30 = vld [vmem:[%s5523_s1 + $0x348] sm:$0xff]  }
  0x82   :  { %3981 = vmatprep.subr.bf16.mxu1 %v4301_v49  ;;  %v138_v49 = vld [vmem:[%s5524_s0 + $0x3d8] sm:$0xff] }
  0x83   :  { %2351 = vmatmul.mubr.bf16.gmra.mrb[48].mxu0 %v3182_v50  ;;  %v3262_v50 = vcombine.low %v113_v38, %v121_v39  ;;  %v3280_v59 = vcombine.low %v130_v48, %v138_v49  ;;  %v60_v38 = vld [vmem:[%s5524_s0 + $0x168] sm:$0xff]  ;;  %v4337_v39 = vld [vmem:[%s5523_s1 + $0x3d0] sm:$0xff]  }
  0x84   :  { %2471 = vmatmul.mubr.bf16.gmra.mrb[48].mxu1 %v3184_v51  ;;  %2358 = vmatprep.mubr.bf16.mxu0 %v3199_v52  ;;  %v3264_v51 = vcombine.low %v114_v40, %v122_v41  ;;  %v3279_v52 = vcombine.high %v129_v46, %v137_v47 }
  0x85   :  { %2478 = vmatprep.mubr.bf16.mxu1 %v3201_v53  ;;  %3900 = vmatpush3.bf16.msra.mxu0 %v4300_v54  ;;  %v3281_v53 = vcombine.high %v130_v48, %v138_v49  ;;  %v145_v54 = vld [vmem:[%s5524_s0 + $0x410] sm:$0xff]  ;;  %v67_v48 = vld [vmem:[%s5524_s0 + $0x1a0] sm:$0xff] }
  0x86   :  { %3982 = vmatpush3.bf16.msra.mxu1 %v4302_v55  ;;  %3901 = vmatprep.subr.bf16.mxu0 %v4303_v56  ;;  %v153_v55 = vld [vmem:[%s5524_s0 + $0x450] sm:$0xff]  ;;  %v146_v56 = vld [vmem:[%s5524_s0 + $0x418] sm:$0xff]  ;;  %v75_v49 = vld [vmem:[%s5524_s0 + $0x1e0] sm:$0xff] }
  0x87   :  { %3983 = vmatprep.subr.bf16.mxu1 %v4305_v58  ;;  %v3278_v58 = vcombine.low %v129_v46, %v137_v47  ;;  %v3295_v60 = vcombine.high %v145_v54, %v153_v55  ;;  %v4339_v46 = vld [vmem:[%s5523_s1 + $0x358] sm:$0xff]  }
  0x88   :  { %v4341_v47 = vld [vmem:[%s5523_s1 + $0x3d8] sm:$0xff]  }
  0x89   :  { %3902 = vmatpush3.bf16.msra.mxu0 %v4304_v61  ;;  %v3297_v61 = vcombine.high %v146_v56, %v154_v57 }
  0x8a   :  { %3984 = vmatpush3.bf16.msra.mxu1 %v4306_v63  ;;  %3903 = vmatprep.subr.bf16.mxu0 %v4307_v0  ;;  %v169_v63 = vld [vmem:[%s5524_s0 + $0x4d0] sm:$0xff]  ;;  %v162_v0 = vld [vmem:[%s5524_s0 + $0x498] sm:$0xff] }
  0x8b   :  { %2359 = vmatmul.mubr.bf16.gmra.mrb[52].mxu0 %v3198_v1  ;;  %3985 = vmatprep.subr.bf16.mxu1 %v4309_v2  ;;  %v170_v1 = vld [vmem:[%s5524_s0 + $0x4d8] sm:$0xff]  ;;  %v3294_v2 = vcombine.low %v145_v54, %v153_v55  ;;  %v4343_v54 = vld [vmem:[%s5523_s1 + $0x360] sm:$0xff]  }
  0x8c   :  { %2479 = vmatmul.mubr.bf16.gmra.mrb[52].mxu1 %v3200_v3  ;;  %2366 = vmatprep.mubr.bf16.mxu0 %v3215_v4  ;;  %v3296_v3 = vcombine.low %v146_v56, %v154_v57  ;;  %v3311_v4 = vcombine.high %v161_v62, %v169_v63  ;;  %v3312_v9 = vcombine.low %v162_v0, %v170_v1  ;;  %v4345_v56 = vld [vmem:[%s5523_s1 + $0x3e0] sm:$0xff]  }
  0x8d   :  { %2486 = vmatprep.mubr.bf16.mxu1 %v3217_v6  ;;  %3904 = vmatpush3.bf16.msra.mxu0 %v4308_v5  ;;  %v3313_v5 = vcombine.high %v162_v0, %v170_v1  ;;  %v177_v6 = vld [vmem:[%s5524_s0 + $0x510] sm:$0x11]  ;;  %v83_v0 = vld [vmem:[%s5524_s0 + $0x220] sm:$0xff] }
  0x8e   :  { %3986 = vmatpush3.bf16.msra.mxu1 %v4310_v7  ;;  %3905 = vmatprep.subr.bf16.mxu0 %v4311_v8  ;;  %v178_v7 = vld [vmem:[%s5524_s0 + $0x518] sm:$0x11]  ;;  %v3310_v8 = vcombine.low %v161_v62, %v169_v63  ;;  %v4347_v62 = vld [vmem:[%s5523_s1 + $0x368] sm:$0xff]   ;;  %v91_v1 = vld [vmem:[%s5524_s0 + $0x260] sm:$0xff] }
  0x8f   :  { %3987 = vmatprep.subr.bf16.mxu1 %v4313_v10  ;;  %v3327_v10 = vcombine.high %v177_v6, %v177_v6  ;;  %v3329_v11 = vcombine.high %v178_v7, %v178_v7  ;;  %v4349_v63 = vld [vmem:[%s5523_s1 + $0x3e8] sm:$0xff]  }
  0x91   :  { %3906 = vmatpush3.bf16.msra.mxu0 %v4312_v14  ;;  %v20_v14 = vld [vmem:[%s5524_s0 + $0x28] sm:$0xff] }
  0x92   :  { %3988 = vmatpush3.bf16.msra.mxu1 %v4314_v15  ;;  %3907 = vmatprep.subr.bf16.mxu0 %v4315_v16  ;;  %v28_v15 = vld [vmem:[%s5524_s0 + $0x68] sm:$0xff]  ;;  %v3326_v16 = vcombine.low %v177_v6, %v177_v6  ;;  %v4351_v6 = vld [vmem:[%s5523_s1 + $0x370] sm:$0xff]  }
  0x93   :  { %2367 = vmatmul.mubr.bf16.gmra.mrb[56].mxu0 %v3214_v17  ;;  %3989 = vmatprep.subr.bf16.mxu1 %v4317_v18  ;;  %v3328_v17 = vcombine.low %v178_v7, %v178_v7  ;;  %v3171_v18 = vcombine.high %v19_v12, %v27_v13  ;;  %v3172_v25 = vcombine.low %v20_v14, %v28_v15 }
  0x94   :  { %2487 = vmatmul.mubr.bf16.gmra.mrb[56].mxu1 %v3216_v19  ;;  %2374 = vmatprep.mubr.bf16.mxu0 %v3231_v20  ;;  %v3173_v19 = vcombine.high %v20_v14, %v28_v15  ;;  %v35_v20 = vld [vmem:[%s5524_s0 + $0xa0] sm:$0xff]  ;;  %v3218_v7 = vcombine.low %v67_v48, %v75_v49  ;;  %v4355_v14 = vld [vmem:[%s5523_s1 + $0x378] sm:$0xff]  }
  0x95   :  { %2494 = vmatprep.mubr.bf16.mxu1 %v3233_v21  ;;  %3908 = vmatpush3.bf16.msra.mxu0 %v4316_v22  ;;  %v43_v21 = vld [vmem:[%s5524_s0 + $0xe0] sm:$0xff]  ;;  %v3170_v22 = vcombine.low %v19_v12, %v27_v13  ;;  %v4352_v12 = vld [vmem:[%s5523_s1 + $0x330] sm:$0xff]   ;;  %v4359_v15 = vld [vmem:[%s5523_s1 + $0x3f8] sm:$0xff]  }
  0x96   :  { %3990 = vmatpush3.bf16.msra.mxu1 %v4318_v23  ;;  %3909 = vmatprep.subr.bf16.mxu0 %v4319_v24  ;;  %v36_v23 = vld [vmem:[%s5524_s0 + $0xa8] sm:$0xff]  ;;  %v3187_v28 = vcombine.high %v35_v20, %v43_v21  ;;  %v3186_v40 = vcombine.low %v35_v20, %v43_v21  ;;  %v4354_v13 = vld [vmem:[%s5523_s1 + $0x3b0] sm:$0xff]   ;;  %v4362_v21 = vld [vmem:[%s5523_s1 + $0x3b8] sm:$0xff]  }
  0x97   :  { %3991 = vmatprep.subr.bf16.mxu1 %v4323_v27  ;;  %v44_v24 = vld [vmem:[%s5524_s0 + $0xe8] sm:$0xff]  ;;  %v4330_v27 = vld [vmem:[%s5523_s1 + $0x380] sm:$0xff]  }
  0x98   :  { %v3188_v41 = vcombine.low %v36_v23, %v44_v24  ;;  %v108_v20 = vld [vmem:[%s5524_s0 + $0x2e8] sm:$0xff] }
  0x99   :  { %3910 = vmatpush3.bf16.msra.mxu0 %v4320_v29  ;;  %v3189_v29 = vcombine.high %v36_v23, %v44_v24 }
  0x9a   :  { %3992 = vmatpush3.bf16.msra.mxu1 %v4326_v31  ;;  %4059 = vmatprep.subr.bf16.mxu0 %v4327_v32  ;;  %v4333_v31 = vld [vmem:[%s5523_s1 + $0x3c8] sm:$0xff]  }
  0x9b   :  { %2375 = vmatmul.mubr.bf16.gmra.mrb[60].mxu0 %v3230_v33  ;;  %4141 = vmatprep.subr.bf16.mxu1 %v4329_v34  ;;  %v4332_v32 = vld [vmem:[%s5523_s1 + $0x308] sm:$0xff]   ;;  %v51_v34 = vld [vmem:[%s5524_s0 + $0x120] sm:$0xff] }
  0x9c   :  { %2495 = vmatmul.mubr.bf16.gmra.mrb[60].mxu1 %v3232_v35  ;;  %2382 = vmatprep.mubr.bf16.mxu0 %v3247_v36  ;;  %v4334_v33 = vld [vmem:[%s5523_s1 + $0x388] sm:$0xff]   ;;  %v59_v35 = vld [vmem:[%s5524_s0 + $0x160] sm:$0xff]  ;;  %v4335_v36 = vld [vmem:[%s5523_s1 + $0x350] sm:$0xff]  }
  0x9d   :  { %2502 = vmatprep.mubr.bf16.mxu1 %v3249_v37  ;;  %v52_v37 = vld [vmem:[%s5524_s0 + $0x128] sm:$0xff]  ;;  %v3202_v55 = vcombine.low %v51_v34, %v59_v35 }
  0x9e   :  { %v3204_v57 = vcombine.low %v52_v37, %v60_v38 }
  0xa3   :  { %2383 = vmatmul.mubr.bf16.gmra.mrb[64].mxu0 %v3246_v42  ;;  %v3203_v42 = vcombine.high %v51_v34, %v59_v35 }
  0xa4   :  { %2503 = vmatmul.mubr.bf16.gmra.mrb[64].mxu1 %v3248_v43  ;;  %2390 = vmatprep.mubr.bf16.mxu0 %v3263_v44  ;;  %v3205_v43 = vcombine.high %v52_v37, %v60_v38  ;;  %v4336_v44 = vld [vmem:[%s5523_s1 + $0x310] sm:$0xff]  }
  0xa5   :  { %2510 = vmatprep.mubr.bf16.mxu1 %v3265_v45  ;;  %v4338_v45 = vld [vmem:[%s5523_s1 + $0x390] sm:$0xff]  }
  0xab   :  { %2391 = vmatmul.mubr.bf16.gmra.mrb[68].mxu0 %v3262_v50  ;;  %v68_v50 = vld [vmem:[%s5524_s0 + $0x1a8] sm:$0xff] }
  0xac   :  { %2511 = vmatmul.mubr.bf16.gmra.mrb[68].mxu1 %v3264_v51  ;;  %2398 = vmatprep.mubr.bf16.mxu0 %v3279_v52  ;;  %v4340_v51 = vld [vmem:[%s5523_s1 + $0x318] sm:$0xff]   ;;  %v76_v52 = vld [vmem:[%s5524_s0 + $0x1e8] sm:$0xff] }
  0xad   :  { %2518 = vmatprep.mubr.bf16.mxu1 %v3281_v53  ;;  %v4342_v53 = vld [vmem:[%s5523_s1 + $0x398] sm:$0xff]  }
  0xb3   :  { %2399 = vmatmul.mubr.bf16.gmra.mrb[72].mxu0 %v3278_v58  ;;  %v3219_v58 = vcombine.high %v67_v48, %v75_v49 }
  0xb4   :  { %2519 = vmatmul.mubr.bf16.gmra.mrb[72].mxu1 %v3280_v59  ;;  %2406 = vmatprep.mubr.bf16.mxu0 %v3295_v60  ;;  %v3221_v59 = vcombine.high %v68_v50, %v76_v52  ;;  %v4344_v60 = vld [vmem:[%s5523_s1 + $0x320] sm:$0xff]  }
  0xb5   :  { %2526 = vmatprep.mubr.bf16.mxu1 %v3297_v61  ;;  %v4346_v61 = vld [vmem:[%s5523_s1 + $0x3a0] sm:$0xff]  }
  0xbb   :  { %2407 = vmatmul.mubr.bf16.gmra.mrb[76].mxu0 %v3294_v2  ;;  %v84_v2 = vld [vmem:[%s5524_s0 + $0x228] sm:$0xff] }
  0xbc   :  { %2527 = vmatmul.mubr.bf16.gmra.mrb[76].mxu1 %v3296_v3  ;;  %2414 = vmatprep.mubr.bf16.mxu0 %v3311_v4  ;;  %v4348_v3 = vld [vmem:[%s5523_s1 + $0x328] sm:$0xff]  }
  0xbd   :  { %2534 = vmatprep.mubr.bf16.mxu1 %v3313_v5  ;;  %v92_v4 = vld [vmem:[%s5524_s0 + $0x268] sm:$0xff] }
  0xbe   :  { %v4350_v5 = vld [vmem:[%s5523_s1 + $0x3a8] sm:$0xff]   ;;  %v3236_v23 = vcombine.low %v84_v2, %v92_v4 }
  0xc3   :  { %2415 = vmatmul.mubr.bf16.gmra.mrb[80].mxu0 %v3310_v8  ;;  %v4353_v8 = vld [vmem:[%s5523_s1 + $0x3f0] sm:$0xff]  }
  0xc4   :  { %2535 = vmatmul.mubr.bf16.gmra.mrb[80].mxu1 %v3312_v9  ;;  %2422 = vmatprep.mubr.bf16.mxu0 %v3327_v10  ;;  %v3220_v9 = vcombine.low %v68_v50, %v76_v52  ;;  %v3235_v10 = vcombine.high %v83_v0, %v91_v1  ;;  %v131_v50 = vld [vmem:[%s5524_s0 + $0x3a0] sm:$0xff] }
  0xc5   :  { %2542 = vmatprep.mubr.bf16.mxu1 %v3329_v11  ;;  %v3237_v11 = vcombine.high %v84_v2, %v92_v4 }
  0xcb   :  { %2423 = vmatmul.mubr.bf16.gmra.mrb[84].mxu0 %v3326_v16  ;;  %v99_v16 = vld [vmem:[%s5524_s0 + $0x2a0] sm:$0xff] }
  0xcc   :  { %2543 = vmatmul.mubr.bf16.gmra.mrb[84].mxu1 %v3328_v17  ;;  %2582 = vmatprep.mubr.bf16.mxu0 %v3171_v18  ;;  %v107_v17 = vld [vmem:[%s5524_s0 + $0x2e0] sm:$0xff]  ;;  %v4356_v18 = vld [vmem:[%s5523_s1 + $0x338] sm:$0xff]  }
  0xcd   :  { %2702 = vmatprep.mubr.bf16.mxu1 %v3173_v19  ;;  %v100_v19 = vld [vmem:[%s5524_s0 + $0x2a8] sm:$0xff]  ;;  %v3251_v24 = vcombine.high %v99_v16, %v107_v17  ;;  %v3250_v34 = vcombine.low %v99_v16, %v107_v17 }
  0xce   :  { %v3252_v38 = vcombine.low %v100_v19, %v108_v20 }
  0xd3   :  { %2583 = vmatmul.mubr.bf16.vlgmr.msra.gmra.mrb[88].mxu0 %v3170_v22  ;;  %v3234_v22 = vcombine.low %v83_v0, %v91_v1 }
  0xd4   :  { %2703 = vmatmul.mubr.bf16.vlgmr.msra.gmra.mrb[88].mxu1 %v3172_v25  ;;  %4060 = vmatpush3.bf16.msra.mxu0 %v4328_v26  ;;  %v3253_v25 = vcombine.high %v100_v19, %v108_v20  ;;  %v115_v26 = vld [vmem:[%s5524_s0 + $0x320] sm:$0xff] }
  0xd5   :  { %4142 = vmatpush3.bf16.msra.mxu1 %v4330_v27  ;;  %2590 = vmatprep.mubr.bf16.mxu0 %v3187_v28  ;;  %v123_v27 = vld [vmem:[%s5524_s0 + $0x360] sm:$0xff] }
  0xd6   :  { %2710 = vmatprep.mubr.bf16.mxu1 %v3189_v29  ;;  %4061 = vmatprep.subr.bf16.mxu0 %v4331_v30  ;;  %v116_v29 = vld [vmem:[%s5524_s0 + $0x328] sm:$0xff] }
  0xd7   :  { %4143 = vmatprep.subr.bf16.mxu1 %v4333_v31  ;;  %v124_v30 = vld [vmem:[%s5524_s0 + $0x368] sm:$0xff] }
  0xd8   :  { %4062 = vmatpush3.bf16.msra.mxu0 %v4332_v32  ;;  %v5110_v32 = vld [vmem:[%s5525_s2] ss:$0 sm:$0xff] }
  0xd9   :  { %4144 = vmatpush3.bf16.msra.mxu1 %v4334_v33  ;;  %4063 = vmatprep.subr.bf16.mxu0 %v4335_v36 }
  0xda   :  { %4145 = vmatprep.subr.bf16.mxu1 %v4337_v39  ;;  %v3267_v39 = vcombine.high %v115_v26, %v123_v27 }
  0xdb   :  { %2591 = vmatmul.mubr.bf16.gmra.mrb[92].mxu0 %v3186_v40 }
  0xdc   :  { %2711 = vmatmul.mubr.bf16.gmra.mrb[92].mxu1 %v3188_v41  ;;  %2598 = vmatprep.mubr.bf16.mxu0 %v3203_v42 }
  0xdd   :  { %2718 = vmatprep.mubr.bf16.mxu1 %v3205_v43  ;;  %4064 = vmatpush3.bf16.msra.mxu0 %v4336_v44  ;;  %v3269_v43 = vcombine.high %v116_v29, %v124_v30 }
  0xde   :  { %4146 = vmatpush3.bf16.msra.mxu1 %v4338_v45  ;;  %4065 = vmatprep.subr.bf16.mxu0 %v4339_v46 }
  0xdf   :  { %4147 = vmatprep.subr.bf16.mxu1 %v4341_v47 }
  0xe1   :  { %4066 = vmatpush3.bf16.msra.mxu0 %v4340_v51  ;;  %v139_v51 = vld [vmem:[%s5524_s0 + $0x3e0] sm:$0xff] }
  0xe2   :  { %4148 = vmatpush3.bf16.msra.mxu1 %v4342_v53  ;;  %4067 = vmatprep.subr.bf16.mxu0 %v4343_v54  ;;  %v132_v54 = vld [vmem:[%s5524_s0 + $0x3a8] sm:$0xff] }
  0xe3   :  { %2599 = vmatmul.mubr.bf16.gmra.mrb[96].mxu0 %v3202_v55  ;;  %4149 = vmatprep.subr.bf16.mxu1 %v4345_v56  ;;  %v140_v55 = vld [vmem:[%s5524_s0 + $0x3e8] sm:$0xff] }
  0xe4   :  { %2719 = vmatmul.mubr.bf16.gmra.mrb[96].mxu1 %v3204_v57  ;;  %2606 = vmatprep.mubr.bf16.mxu0 %v3219_v58  ;;  %v3266_v58 = vcombine.low %v115_v26, %v123_v27 }
  0xe5   :  { %2726 = vmatprep.mubr.bf16.mxu1 %v3221_v59  ;;  %4068 = vmatpush3.bf16.msra.mxu0 %v4344_v60 }
  0xe6   :  { %4150 = vmatpush3.bf16.msra.mxu1 %v4346_v61  ;;  %4069 = vmatprep.subr.bf16.mxu0 %v4347_v62  ;;  %v3268_v62 = vcombine.low %v116_v29, %v124_v30 }
  0xe7   :  { %4151 = vmatprep.subr.bf16.mxu1 %v4349_v63  ;;  %v3283_v63 = vcombine.high %v131_v50, %v139_v51 }
  0xe9   :  { %4070 = vmatpush3.bf16.msra.mxu0 %v4348_v3  ;;  %v3285_v3 = vcombine.high %v132_v54, %v140_v55 }
  0xea   :  { %4152 = vmatpush3.bf16.msra.mxu1 %v4350_v5  ;;  %4071 = vmatprep.subr.bf16.mxu0 %v4351_v6 }
  0xeb   :  { %2607 = vmatmul.mubr.bf16.gmra.mrb[100].mxu0 %v3218_v7  ;;  %4153 = vmatprep.subr.bf16.mxu1 %v4353_v8 }
  0xec   :  { %2727 = vmatmul.mubr.bf16.gmra.mrb[100].mxu1 %v3220_v9  ;;  %2614 = vmatprep.mubr.bf16.mxu0 %v3235_v10  ;;  %v147_v10 = vld [vmem:[%s5524_s0 + $0x420] sm:$0xff] }
  0xed   :  { %2734 = vmatprep.mubr.bf16.mxu1 %v3237_v11  ;;  %4072 = vmatpush3.bf16.msra.mxu0 %v4352_v12  ;;  %v155_v11 = vld [vmem:[%s5524_s0 + $0x460] sm:$0xff] }
  0xee   :  { %4154 = vmatpush3.bf16.msra.mxu1 %v4354_v13  ;;  %4073 = vmatprep.subr.bf16.mxu0 %v4355_v14  ;;  %v148_v14 = vld [vmem:[%s5524_s0 + $0x428] sm:$0xff] }
  0xef   :  { %4155 = vmatprep.subr.bf16.mxu1 %v4359_v15  ;;  %v156_v15 = vld [vmem:[%s5524_s0 + $0x468] sm:$0xff] }
  0xf0   :  { %v3301_v27 = vcombine.high %v148_v14, %v156_v15 }
  0xf1   :  { %4074 = vmatpush3.bf16.msra.mxu0 %v4356_v18  ;;  %v3282_v18 = vcombine.low %v131_v50, %v139_v51 }
  0xf2   :  { %4156 = vmatpush3.bf16.msra.mxu1 %v4362_v21 }
  0xf3   :  { %2615 = vmatmul.mubr.bf16.gmra.mrb[104].mxu0 %v3234_v22  ;;  %v3284_v22 = vcombine.low %v132_v54, %v140_v55 }
  0xf4   :  { %2735 = vmatmul.mubr.bf16.gmra.mrb[104].mxu1 %v3236_v23  ;;  %2622 = vmatprep.mubr.bf16.mxu0 %v3251_v24  ;;  %v3299_v23 = vcombine.high %v147_v10, %v155_v11 }
  0xf5   :  { %2742 = vmatprep.mubr.bf16.mxu1 %v3253_v25 }
  0xf6   :  { %v3583_v28 = vpop.f32.mrb[0].mxu0 }
  0xf7   :  { %v3665_v31 = vpop.f32.mrb[0].mxu1  ;;  %v3584_v33 = vpop.f32.mrb[1].mxu0 }
  0xf8   :  { %v3585_v35 = vadd.f32 %v3584_v33, %v3583_v28  ;;  %v3666_v36 = vpop.f32.mrb[1].mxu1  ;;  %v3586_v37 = vpop.f32.mrb[2].mxu0 }
  0xf9   :  { %v3667_v40 = vadd.f32 %v3666_v36, %v3665_v31  ;;  %v3668_v41 = vpop.f32.mrb[2].mxu1  ;;  %v3587_v42 = vpop.f32.mrb[3].mxu0  ;;  %v171_v36 = vld [vmem:[%s5524_s0 + $0x4e0] sm:$0xff] }
  0xfa   :  { %v2105_v44 = vadd.f32 %v3585_v35, %v5110_v32  ;;  %v3588_v45 = vadd.f32 %v3587_v42, %v3586_v37  ;;  %v3669_v46 = vpop.f32.mrb[3].mxu1  ;;  %v163_v35 = vld [vmem:[%s5524_s0 + $0x4a0] sm:$0xff] }
  0xfb   :  { %v3670_v47 = vadd.f32 %v3669_v46, %v3668_v41  ;;  %2623 = vmatmul.mubr.bf16.gmra.mrb[108].mxu0 %v3250_v34 }
  0xfc   :  { %v5113_v48 = vadd.f32 %v3667_v40, %v2105_v44  ;;  %v2108_v49 = vadd.f32 %v3588_v45, %v5110_v32  ;;  %2743 = vmatmul.mubr.bf16.gmra.mrb[108].mxu1 %v3252_v38  ;;  %2630 = vmatprep.mubr.bf16.mxu0 %v3267_v39  ;;  %v164_v39 = vld [vmem:[%s5524_s0 + $0x4a8] sm:$0xff] }
  0xfd   :  { %2750 = vmatprep.mubr.bf16.mxu1 %v3269_v43  ;;  %v172_v40 = vld [vmem:[%s5524_s0 + $0x4e8] sm:$0xff]  ;;  %v3298_v43 = vcombine.low %v147_v10, %v155_v11 }
  0xfe   :  { %v5122_v52 = vadd.f32 %v3670_v47, %v2108_v49  ;;  %v3589_v53 = vpop.f32.mrb[4].mxu0  ;;  %v3300_v47 = vcombine.low %v148_v14, %v156_v15  ;;  %v3315_v49 = vcombine.high %v163_v35, %v171_v36  ;;  %v3317_v54 = vcombine.high %v164_v39, %v172_v40 }
  0xff   :  { %v3671_v56 = vpop.f32.mrb[4].mxu1  ;;  %v3590_v57 = vpop.f32.mrb[5].mxu0 }
 0x100   :  { %v3591_v59 = vadd.f32 %v3590_v57, %v3589_v53  ;;  %v3672_v60 = vpop.f32.mrb[5].mxu1  ;;  %v3592_v61 = vpop.f32.mrb[6].mxu0 }
 0x101   :  { %v3673_v0 = vadd.f32 %v3672_v60, %v3671_v56  ;;  %v3674_v1 = vpop.f32.mrb[6].mxu1  ;;  %v3593_v2 = vpop.f32.mrb[7].mxu0 }
 0x102   :  { %v2113_v4 = vadd.f32 %v3591_v59, %v5110_v32  ;;  %v3594_v5 = vadd.f32 %v3593_v2, %v3592_v61  ;;  %v3675_v6 = vpop.f32.mrb[7].mxu1  ;;  %v179_v61 = vld [vmem:[%s5524_s0 + $0x520] sm:$0x11] }
 0x103   :  { %v3676_v7 = vadd.f32 %v3675_v6, %v3674_v1  ;;  %2631 = vmatmul.mubr.bf16.gmra.mrb[112].mxu0 %v3266_v58 }
 0x104   :  { %v5131_v8 = vadd.f32 %v3673_v0, %v2113_v4  ;;  %v2116_v9 = vadd.f32 %v3594_v5, %v5110_v32  ;;  %2751 = vmatmul.mubr.bf16.gmra.mrb[112].mxu1 %v3268_v62  ;;  %2638 = vmatprep.mubr.bf16.mxu0 %v3283_v63  ;;  %v180_v0 = vld [vmem:[%s5524_s0 + $0x528] sm:$0x11] }
 0x105   :  { %2758 = vmatprep.mubr.bf16.mxu1 %v3285_v3  ;;  %v3314_v3 = vcombine.low %v163_v35, %v171_v36  ;;  %v3333_v14 = vcombine.high %v180_v0, %v180_v0  ;;  %v3332_v35 = vcombine.low %v180_v0, %v180_v0 }
 0x106   :  { %v5140_v12 = vadd.f32 %v3676_v7, %v2116_v9  ;;  %v3595_v13 = vpop.f32.mrb[8].mxu0  ;;  %v3316_v7 = vcombine.low %v164_v39, %v172_v40  ;;  %v3331_v9 = vcombine.high %v179_v61, %v179_v61 }
 0x107   :  { %v3677_v16 = vpop.f32.mrb[8].mxu1  ;;  %v3596_v17 = vpop.f32.mrb[9].mxu0 }
 0x108   :  { %v3597_v19 = vadd.f32 %v3596_v17, %v3595_v13  ;;  %v3678_v20 = vpop.f32.mrb[9].mxu1  ;;  %v3598_v21 = vpop.f32.mrb[10].mxu0 }
 0x109   :  { %v3679_v24 = vadd.f32 %v3678_v20, %v3677_v16  ;;  %v3680_v25 = vpop.f32.mrb[10].mxu1  ;;  %v3599_v26 = vpop.f32.mrb[11].mxu0 }
 0x10a   :  { %v2121_v28 = vadd.f32 %v3597_v19, %v5110_v32  ;;  %v3600_v29 = vadd.f32 %v3599_v26, %v3598_v21  ;;  %v3681_v30 = vpop.f32.mrb[11].mxu1  ;;  %v21_v21 = vld [vmem:[%s5524_s0 + $0x30] sm:$0xff]  ;;  %v30_v26 = vld [vmem:[%s5524_s0 + $0x78] sm:$0xff] }
 0x10b   :  { %v3682_v31 = vadd.f32 %v3681_v30, %v3680_v25  ;;  %2639 = vmatmul.mubr.bf16.gmra.mrb[116].mxu0 %v3282_v18  ;;  %v22_v25 = vld [vmem:[%s5524_s0 + $0x38] sm:$0xff] }
 0x10c   :  { %v5149_v33 = vadd.f32 %v3679_v24, %v2121_v28  ;;  %v2124_v34 = vadd.f32 %v3600_v29, %v5110_v32  ;;  %2759 = vmatmul.mubr.bf16.gmra.mrb[116].mxu1 %v3284_v22  ;;  %2646 = vmatprep.mubr.bf16.mxu0 %v3299_v23  ;;  %v29_v22 = vld [vmem:[%s5524_s0 + $0x70] sm:$0xff]  ;;  %v3330_v29 = vcombine.low %v179_v61, %v179_v61 }
 0x10d   :  { %2766 = vmatprep.mubr.bf16.mxu1 %v3301_v27  ;;  %v3175_v36 = vcombine.high %v21_v21, %v29_v22  ;;  %v3176_v0 = vcombine.low %v22_v25, %v30_v26 }
 0x10e   :  { %v5158_v37 = vadd.f32 %v3682_v31, %v2124_v34  ;;  %v3601_v38 = vpop.f32.mrb[12].mxu0 }
 0x10f   :  { %v3683_v41 = vpop.f32.mrb[12].mxu1  ;;  %v3602_v42 = vpop.f32.mrb[13].mxu0 }
 0x110   :  { %v3603_v44 = vadd.f32 %v3602_v42, %v3601_v38  ;;  %v3684_v45 = vpop.f32.mrb[13].mxu1  ;;  %v3604_v46 = vpop.f32.mrb[14].mxu0 }
 0x111   :  { %v3685_v50 = vadd.f32 %v3684_v45, %v3683_v41  ;;  %v3686_v51 = vpop.f32.mrb[14].mxu1  ;;  %v3605_v53 = vpop.f32.mrb[15].mxu0  ;;  %v3177_v41 = vcombine.high %v22_v25, %v30_v26 }
 0x112   :  { %v2129_v55 = vadd.f32 %v3603_v44, %v5110_v32  ;;  %v3606_v56 = vadd.f32 %v3605_v53, %v3604_v46  ;;  %v3687_v57 = vpop.f32.mrb[15].mxu1 }
 0x113   :  { %v3688_v58 = vadd.f32 %v3687_v57, %v3686_v51  ;;  %2647 = vmatmul.mubr.bf16.gmra.mrb[120].mxu0 %v3298_v43 }
 0x114   :  { %v5167_v59 = vadd.f32 %v3685_v50, %v2129_v55  ;;  %v2132_v60 = vadd.f32 %v3606_v56, %v5110_v32  ;;  %2767 = vmatmul.mubr.bf16.gmra.mrb[120].mxu1 %v3300_v47  ;;  %2654 = vmatprep.mubr.bf16.mxu0 %v3315_v49  ;;  %v37_v49 = vld [vmem:[%s5524_s0 + $0xb0] sm:$0xff]  ;;  %v46_v55 = vld [vmem:[%s5524_s0 + $0xf8] sm:$0xff] }
 0x115   :  { %2774 = vmatprep.mubr.bf16.mxu1 %v3317_v54  ;;  %v45_v50 = vld [vmem:[%s5524_s0 + $0xf0] sm:$0xff]  ;;  %v38_v54 = vld [vmem:[%s5524_s0 + $0xb8] sm:$0xff] }
 0x116   :  { %v5173_v62 = vadd.f32 %v3688_v58, %v2132_v60  ;;  %v3607_v63 = vpop.f32.mrb[16].mxu0  ;;  %v3174_v58 = vcombine.low %v21_v21, %v29_v22 }
 0x117   :  { %v3689_v1 = vpop.f32.mrb[16].mxu1  ;;  %v3608_v2 = vpop.f32.mrb[17].mxu0 }
 0x118   :  { %v3609_v4 = vadd.f32 %v3608_v2, %v3607_v63  ;;  %v3690_v5 = vpop.f32.mrb[17].mxu1  ;;  %v3610_v6 = vpop.f32.mrb[18].mxu0 }
 0x119   :  { %v3691_v10 = vadd.f32 %v3690_v5, %v3689_v1  ;;  %v3692_v11 = vpop.f32.mrb[18].mxu1  ;;  %v3611_v13 = vpop.f32.mrb[19].mxu0  ;;  %v3191_v1 = vcombine.high %v37_v49, %v45_v50  ;;  %v3193_v5 = vcombine.high %v38_v54, %v46_v55 }
 0x11a   :  { %v2137_v15 = vadd.f32 %v3609_v4, %v5110_v32  ;;  %v3612_v16 = vadd.f32 %v3611_v13, %v3610_v6  ;;  %v3693_v17 = vpop.f32.mrb[19].mxu1 }
 0x11b   :  { %v3694_v18 = vadd.f32 %v3693_v17, %v3692_v11  ;;  %2655 = vmatmul.mubr.bf16.gmra.mrb[124].mxu0 %v3314_v3 }
 0x11c   :  { %v5179_v19 = vadd.f32 %v3691_v10, %v2137_v15  ;;  %v2140_v20 = vadd.f32 %v3612_v16, %v5110_v32  ;;  %2775 = vmatmul.mubr.bf16.gmra.mrb[124].mxu1 %v3316_v7  ;;  %2662 = vmatprep.mubr.bf16.mxu0 %v3331_v9  ;;  %v61_v15 = vld [vmem:[%s5524_s0 + $0x170] sm:$0xff] }
 0x11d   :  { %2782 = vmatprep.mubr.bf16.mxu1 %v3333_v14  ;;  %v53_v14 = vld [vmem:[%s5524_s0 + $0x130] sm:$0xff] }
 0x11e   :  { %v5188_v23 = vadd.f32 %v3694_v18, %v2140_v20  ;;  %v3613_v24 = vpop.f32.mrb[20].mxu0  ;;  %v54_v18 = vld [vmem:[%s5524_s0 + $0x138] sm:$0xff] }
 0x11f   :  { %v3695_v27 = vpop.f32.mrb[20].mxu1  ;;  %v3614_v28 = vpop.f32.mrb[21].mxu0  ;;  %v62_v20 = vld [vmem:[%s5524_s0 + $0x178] sm:$0xff] }
 0x120   :  { %v3615_v30 = vadd.f32 %v3614_v28, %v3613_v24  ;;  %v3696_v31 = vpop.f32.mrb[21].mxu1  ;;  %v3616_v34 = vpop.f32.mrb[22].mxu0  ;;  %v3190_v24 = vcombine.low %v37_v49, %v45_v50  ;;  %v3192_v28 = vcombine.low %v38_v54, %v46_v55  ;;  %v70_v49 = vld [vmem:[%s5524_s0 + $0x1b8] sm:$0xff]  ;;  %v3206_v55 = vcombine.low %v53_v14, %v61_v15 }
 0x121   :  { %v3697_v38 = vadd.f32 %v3696_v31, %v3695_v27  ;;  %v3698_v39 = vpop.f32.mrb[22].mxu1  ;;  %v3617_v40 = vpop.f32.mrb[23].mxu0  ;;  %v78_v50 = vld [vmem:[%s5524_s0 + $0x1f8] sm:$0xff] }
 0x122   :  { %v2145_v42 = vadd.f32 %v3615_v30, %v5110_v32  ;;  %v3618_v43 = vadd.f32 %v3617_v40, %v3616_v34  ;;  %v3699_v44 = vpop.f32.mrb[23].mxu1 }
 0x123   :  { %v3700_v45 = vadd.f32 %v3699_v44, %v3698_v39  ;;  %2663 = vmatmul.mubr.bf16.gmra.mrb[128].mxu0 %v3330_v29  ;;  %v3207_v29 = vcombine.high %v53_v14, %v61_v15  ;;  %v77_v44 = vld [vmem:[%s5524_s0 + $0x1f0] sm:$0xff] }
 0x124   :  { %v5197_v46 = vadd.f32 %v3697_v38, %v2145_v42  ;;  %v2148_v47 = vadd.f32 %v3618_v43, %v5110_v32  ;;  %2783 = vmatmul.mubr.bf16.gmra.mrb[128].mxu1 %v3332_v35  ;;  %2822 = vmatprep.mubr.bf16.mxu0 %v3175_v36  ;;  %v3209_v35 = vcombine.high %v54_v18, %v62_v20  ;;  %v69_v43 = vld [vmem:[%s5524_s0 + $0x1b0] sm:$0xff] }
 0x125   :  { %2942 = vmatprep.mubr.bf16.mxu1 %v3177_v41 }
 0x126   :  { %v5206_v51 = vadd.f32 %v3700_v45, %v2148_v47  ;;  %v3619_v53 = vpop.f32.mrb[24].mxu0 }
 0x127   :  { %v3701_v56 = vpop.f32.mrb[24].mxu1  ;;  %v3620_v57 = vpop.f32.mrb[25].mxu0 }
 0x128   :  { %v3621_v60 = vadd.f32 %v3620_v57, %v3619_v53  ;;  %v3702_v61 = vpop.f32.mrb[25].mxu1  ;;  %v3622_v63 = vpop.f32.mrb[26].mxu0 }
 0x129   :  { %v3703_v2 = vadd.f32 %v3702_v61, %v3701_v56  ;;  %v3704_v3 = vpop.f32.mrb[26].mxu1  ;;  %v3623_v4 = vpop.f32.mrb[27].mxu0  ;;  %v3223_v61 = vcombine.high %v69_v43, %v77_v44 }
 0x12a   :  { %v2153_v6 = vadd.f32 %v3621_v60, %v5110_v32  ;;  %v3624_v7 = vadd.f32 %v3623_v4, %v3622_v63  ;;  %v3705_v9 = vpop.f32.mrb[27].mxu1  ;;  %v3208_v60 = vcombine.low %v54_v18, %v62_v20  ;;  %v94_v18 = vld [vmem:[%s5524_s0 + $0x278] sm:$0xff] }
 0x12b   :  { %v3706_v10 = vadd.f32 %v3705_v9, %v3704_v3  ;;  %2823 = vmatmul.mubr.bf16.vlgmr.msra.gmra.mrb[132].mxu0 %v3174_v58 }
 0x12c   :  { %v5215_v11 = vadd.f32 %v3703_v2, %v2153_v6  ;;  %v2156_v13 = vadd.f32 %v3624_v7, %v5110_v32  ;;  %2943 = vmatmul.mubr.bf16.vlgmr.msra.gmra.mrb[132].mxu1 %v3176_v0  ;;  %2830 = vmatprep.mubr.bf16.mxu0 %v3191_v1  ;;  %v3225_v2 = vcombine.high %v70_v49, %v78_v50 }
 0x12d   :  { %2950 = vmatprep.mubr.bf16.mxu1 %v3193_v5 }
 0x12e   :  { %v5224_v16 = vadd.f32 %v3706_v10, %v2156_v13  ;;  %v3625_v17 = vpop.f32.mrb[28].mxu0  ;;  %v85_v10 = vld [vmem:[%s5524_s0 + $0x230] sm:$0xff] }
 0x12f   :  { %v3707_v21 = vpop.f32.mrb[28].mxu1  ;;  %v3626_v22 = vpop.f32.mrb[29].mxu0  ;;  %v93_v13 = vld [vmem:[%s5524_s0 + $0x270] sm:$0xff] }
 0x130   :  { %v3627_v25 = vadd.f32 %v3626_v22, %v3625_v17  ;;  %v3708_v26 = vpop.f32.mrb[29].mxu1  ;;  %v3628_v27 = vpop.f32.mrb[30].mxu0  ;;  %v86_v17 = vld [vmem:[%s5524_s0 + $0x238] sm:$0xff]  ;;  %v3222_v22 = vcombine.low %v69_v43, %v77_v44  ;;  %v101_v43 = vld [vmem:[%s5524_s0 + $0x2b0] sm:$0xff] }
 0x131   :  { %v3709_v30 = vadd.f32 %v3708_v26, %v3707_v21  ;;  %v3710_v31 = vpop.f32.mrb[30].mxu1  ;;  %v3629_v34 = vpop.f32.mrb[31].mxu0  ;;  %v109_v44 = vld [vmem:[%s5524_s0 + $0x2f0] sm:$0xff] }
 0x132   :  { %v2161_v36 = vadd.f32 %v3627_v25, %v5110_v32  ;;  %v3630_v38 = vadd.f32 %v3629_v34, %v3628_v27  ;;  %v3711_v39 = vpop.f32.mrb[31].mxu1  ;;  %v3224_v27 = vcombine.low %v70_v49, %v78_v50  ;;  %v3241_v34 = vcombine.high %v86_v17, %v94_v18  ;;  %v102_v50 = vld [vmem:[%s5524_s0 + $0x2b8] sm:$0xff] }
 0x133   :  { %v3712_v40 = vadd.f32 %v3711_v39, %v3710_v31  ;;  %2831 = vmatmul.mubr.bf16.gmra.mrb[136].mxu0 %v3190_v24 }
 0x134   :  { %v5233_v41 = vadd.f32 %v3709_v30, %v2161_v36  ;;  %v2164_v42 = vadd.f32 %v3630_v38, %v5110_v32  ;;  %2951 = vmatmul.mubr.bf16.gmra.mrb[136].mxu1 %v3192_v28  ;;  %2838 = vmatprep.mubr.bf16.mxu0 %v3207_v29  ;;  %v3239_v28 = vcombine.high %v85_v10, %v93_v13 }
 0x135   :  { %2958 = vmatprep.mubr.bf16.mxu1 %v3209_v35 }
 0x136   :  { %v5242_v45 = vadd.f32 %v3712_v40, %v2164_v42  ;;  %v3631_v47 = vpop.f32.mrb[32].mxu0 }
 0x137   :  { %v3713_v53 = vpop.f32.mrb[32].mxu1  ;;  %v3632_v54 = vpop.f32.mrb[33].mxu0 }
 0x138   :  { %v3633_v56 = vadd.f32 %v3632_v54, %v3631_v47  ;;  %v3714_v57 = vpop.f32.mrb[33].mxu1  ;;  %v3634_v58 = vpop.f32.mrb[34].mxu0 }
 0x139   :  { %v3715_v63 = vadd.f32 %v3714_v57, %v3713_v53  ;;  %v3716_v0 = vpop.f32.mrb[34].mxu1  ;;  %v3635_v1 = vpop.f32.mrb[35].mxu0  ;;  %v110_v53 = vld [vmem:[%s5524_s0 + $0x2f8] sm:$0xff] }
 0x13a   :  { %v2169_v3 = vadd.f32 %v3633_v56, %v5110_v32  ;;  %v3636_v4 = vadd.f32 %v3635_v1, %v3634_v58  ;;  %v3717_v5 = vpop.f32.mrb[35].mxu1  ;;  %v3238_v56 = vcombine.low %v85_v10, %v93_v13  ;;  %v125_v10 = vld [vmem:[%s5524_s0 + $0x370] sm:$0xff] }
 0x13b   :  { %v3718_v6 = vadd.f32 %v3717_v5, %v3716_v0  ;;  %2839 = vmatmul.mubr.bf16.gmra.mrb[140].mxu0 %v3206_v55 }
 0x13c   :  { %v5251_v7 = vadd.f32 %v3715_v63, %v2169_v3  ;;  %v2172_v9 = vadd.f32 %v3636_v4, %v5110_v32  ;;  %2959 = vmatmul.mubr.bf16.gmra.mrb[140].mxu1 %v3208_v60  ;;  %2846 = vmatprep.mubr.bf16.mxu0 %v3223_v61  ;;  %v3240_v61 = vcombine.low %v86_v17, %v94_v18 }
 0x13d   :  { %2966 = vmatprep.mubr.bf16.mxu1 %v3225_v2  ;;  %v3255_v63 = vcombine.high %v101_v43, %v109_v44  ;;  %v3257_v3 = vcombine.high %v102_v50, %v110_v53 }
 0x13e   :  { %v5260_v14 = vadd.f32 %v3718_v6, %v2172_v9  ;;  %v3637_v15 = vpop.f32.mrb[36].mxu0  ;;  %v117_v9 = vld [vmem:[%s5524_s0 + $0x330] sm:$0xff] }
 0x13f   :  { %v3719_v20 = vpop.f32.mrb[36].mxu1  ;;  %v3638_v21 = vpop.f32.mrb[37].mxu0 }
 0x140   :  { %v3639_v24 = vadd.f32 %v3638_v21, %v3637_v15  ;;  %v3720_v25 = vpop.f32.mrb[37].mxu1  ;;  %v3640_v26 = vpop.f32.mrb[38].mxu0  ;;  %v126_v15 = vld [vmem:[%s5524_s0 + $0x378] sm:$0xff] }
 0x141   :  { %v3721_v29 = vadd.f32 %v3720_v25, %v3719_v20  ;;  %v3722_v30 = vpop.f32.mrb[38].mxu1  ;;  %v3641_v31 = vpop.f32.mrb[39].mxu0  ;;  %v3254_v20 = vcombine.low %v101_v43, %v109_v44  ;;  %v3256_v25 = vcombine.low %v102_v50, %v110_v53  ;;  %v141_v43 = vld [vmem:[%s5524_s0 + $0x3f0] sm:$0xff] }
 0x142   :  { %v2177_v35 = vadd.f32 %v3639_v24, %v5110_v32  ;;  %v3642_v36 = vadd.f32 %v3641_v31, %v3640_v26  ;;  %v3723_v38 = vpop.f32.mrb[39].mxu1  ;;  %v3271_v26 = vcombine.high %v117_v9, %v125_v10 }
 0x143   :  { %v3724_v39 = vadd.f32 %v3723_v38, %v3722_v30  ;;  %2847 = vmatmul.mubr.bf16.gmra.mrb[144].mxu0 %v3222_v22 }
 0x144   :  { %v5269_v40 = vadd.f32 %v3721_v29, %v2177_v35  ;;  %v2180_v42 = vadd.f32 %v3642_v36, %v5110_v32  ;;  %2967 = vmatmul.mubr.bf16.gmra.mrb[144].mxu1 %v3224_v27  ;;  %2854 = vmatprep.mubr.bf16.mxu0 %v3239_v28 }
 0x145   :  { %2974 = vmatprep.mubr.bf16.mxu1 %v3241_v34 }
 0x146   :  { %v5278_v47 = vadd.f32 %v3724_v39, %v2180_v42  ;;  %v3643_v49 = vpop.f32.mrb[40].mxu0  ;;  %v133_v42 = vld [vmem:[%s5524_s0 + $0x3b0] sm:$0xff] }
 0x147   :  { %v3725_v54 = vpop.f32.mrb[40].mxu1  ;;  %v3644_v55 = vpop.f32.mrb[41].mxu0 }
 0x148   :  { %v3645_v57 = vadd.f32 %v3644_v55, %v3643_v49  ;;  %v3726_v58 = vpop.f32.mrb[41].mxu1  ;;  %v3646_v60 = vpop.f32.mrb[42].mxu0  ;;  %v134_v49 = vld [vmem:[%s5524_s0 + $0x3b8] sm:$0xff] }
 0x149   :  { %v3727_v0 = vadd.f32 %v3726_v58, %v3725_v54  ;;  %v3728_v1 = vpop.f32.mrb[42].mxu1  ;;  %v3647_v2 = vpop.f32.mrb[43].mxu0  ;;  %v3270_v54 = vcombine.low %v117_v9, %v125_v10  ;;  %v3287_v60 = vcombine.high %v133_v42, %v141_v43  ;;  %v149_v9 = vld [vmem:[%s5524_s0 + $0x430] sm:$0xff] }
 0x14a   :  { %v2185_v4 = vadd.f32 %v3645_v57, %v5110_v32  ;;  %v3729_v5 = vpop.f32.mrb[43].mxu1  ;;  %v118_v32 = vld [vmem:[%s5524_s0 + $0x338] sm:$0xff]  ;;  %v157_v10 = vld [vmem:[%s5524_s0 + $0x470] sm:$0xff] }
 0x14b   :  { %2855 = vmatmul.mubr.bf16.gmra.mrb[148].mxu0 %v3238_v56  ;;  %v3273_v30 = vcombine.high %v118_v32, %v126_v15  ;;  %v3272_v58 = vcombine.low %v118_v32, %v126_v15  ;;  %v150_v15 = vld [vmem:[%s5524_s0 + $0x438] sm:$0xff] }
 0x14c   :  { %v5287_v6 = vadd.f32 %v3727_v0, %v2185_v4  ;;  %2975 = vmatmul.mubr.bf16.gmra.mrb[148].mxu1 %v3240_v61  ;;  %2862 = vmatprep.mubr.bf16.mxu0 %v3255_v63 }
 0x14d   :  { %2982 = vmatprep.mubr.bf16.mxu1 %v3257_v3 }
 0x14e   :  { %v3747_v13 = vpop.f32.mrb[44].mxu0 }
 0x14f   :  { %v3829_v17 = vpop.f32.mrb[44].mxu1  ;;  %v3748_v18 = vpop.f32.mrb[45].mxu0 }
 0x150   :  { %v3749_v21 = vadd.f32 %v3748_v18, %v3747_v13  ;;  %v3830_v22 = vpop.f32.mrb[45].mxu1  ;;  %v3750_v24 = vpop.f32.mrb[46].mxu0 }
 0x151   :  { %v3831_v27 = vadd.f32 %v3830_v22, %v3829_v17  ;;  %v3832_v28 = vpop.f32.mrb[46].mxu1  ;;  %v3751_v29 = vpop.f32.mrb[47].mxu0 }
 0x152   :  { %v2345_v31 = vadd.f32 %v3749_v21, %v5113_v48  ;;  %v3752_v34 = vadd.f32 %v3751_v29, %v3750_v24  ;;  %v3833_v35 = vpop.f32.mrb[47].mxu1  ;;  %v3286_v21 = vcombine.low %v133_v42, %v141_v43  ;;  %v165_v42 = vld [vmem:[%s5524_s0 + $0x4b0] sm:$0xff] }
 0x153   :  { %v3834_v36 = vadd.f32 %v3833_v35, %v3832_v28  ;;  %2863 = vmatmul.mubr.bf16.gmra.mrb[152].mxu0 %v3254_v20  ;;  %v173_v43 = vld [vmem:[%s5524_s0 + $0x4f0] sm:$0xff] }
 0x154   :  { %v5302_v38 = vadd.f32 %v3831_v27, %v2345_v31  ;;  %v2348_v39 = vadd.f32 %v3752_v34, %v5122_v52  ;;  %2983 = vmatmul.mubr.bf16.gmra.mrb[152].mxu1 %v3256_v25  ;;  %2870 = vmatprep.mubr.bf16.mxu0 %v3271_v26  ;;  %v142_v52 = vld [vmem:[%s5524_s0 + $0x3f8] sm:$0xff]  ;;  %v3303_v27 = vcombine.high %v149_v9, %v157_v10 }
 0x155   :  { %2990 = vmatprep.mubr.bf16.mxu1 %v3273_v30  ;;  %v3289_v1 = vcombine.high %v134_v49, %v142_v52  ;;  %v3288_v26 = vcombine.low %v134_v49, %v142_v52  ;;  %v166_v52 = vld [vmem:[%s5524_s0 + $0x4b8] sm:$0xff] }
 0x156   :  { %v5311_v48 = vadd.f32 %v3834_v36, %v2348_v39  ;;  %v3753_v44 = vpop.f32.mrb[48].mxu0 }
 0x157   :  { %v3835_v50 = vpop.f32.mrb[48].mxu1  ;;  %v3754_v53 = vpop.f32.mrb[49].mxu0 }
 0x158   :  { %v3755_v55 = vadd.f32 %v3754_v53, %v3753_v44  ;;  %v3836_v56 = vpop.f32.mrb[49].mxu1  ;;  %v3756_v57 = vpop.f32.mrb[50].mxu0 }
 0x159   :  { %v3837_v61 = vadd.f32 %v3836_v56, %v3835_v50  ;;  %v3838_v63 = vpop.f32.mrb[50].mxu1  ;;  %v3757_v0 = vpop.f32.mrb[51].mxu0 }
 0x15a   :  { %v2353_v2 = vadd.f32 %v3755_v55, %v5131_v8  ;;  %v3758_v3 = vadd.f32 %v3757_v0, %v3756_v57  ;;  %v3839_v4 = vpop.f32.mrb[51].mxu1  ;;  %v3302_v55 = vcombine.low %v149_v9, %v157_v10  ;;  %v181_v9 = vld [vmem:[%s5524_s0 + $0x530] sm:$0x11] }
 0x15b   :  { %v3840_v5 = vadd.f32 %v3839_v4, %v3838_v63  ;;  %2871 = vmatmul.mubr.bf16.gmra.mrb[156].mxu0 %v3270_v54 }
 0x15c   :  { %v5320_v13 = vadd.f32 %v3837_v61, %v2353_v2  ;;  %v2356_v17 = vadd.f32 %v3758_v3, %v5140_v12  ;;  %2991 = vmatmul.mubr.bf16.gmra.mrb[156].mxu1 %v3272_v58  ;;  %2878 = vmatprep.mubr.bf16.mxu0 %v3287_v60  ;;  %v158_v12 = vld [vmem:[%s5524_s0 + $0x478] sm:$0xff]  ;;  %v3319_v61 = vcombine.high %v165_v42, %v173_v43 }
 0x15d   :  { %2998 = vmatprep.mubr.bf16.mxu1 %v3289_v1  ;;  %v3305_v31 = vcombine.high %v150_v15, %v158_v12  ;;  %v3304_v60 = vcombine.low %v150_v15, %v158_v12 }
 0x15e   :  { %v5329_v8 = vadd.f32 %v3840_v5, %v2356_v17  ;;  %v3759_v32 = vpop.f32.mrb[52].mxu0 }
 0x15f   :  { %v3841_v18 = vpop.f32.mrb[52].mxu1  ;;  %v3760_v20 = vpop.f32.mrb[53].mxu0 }
 0x160   :  { %v3761_v22 = vadd.f32 %v3760_v20, %v3759_v32  ;;  %v3842_v24 = vpop.f32.mrb[53].mxu1  ;;  %v3762_v25 = vpop.f32.mrb[54].mxu0 }
 0x161   :  { %v3843_v28 = vadd.f32 %v3842_v24, %v3841_v18  ;;  %v3844_v29 = vpop.f32.mrb[54].mxu1  ;;  %v3763_v30 = vpop.f32.mrb[55].mxu0 }
 0x162   :  { %v2361_v34 = vadd.f32 %v3761_v22, %v5149_v33  ;;  %v3764_v35 = vadd.f32 %v3763_v30, %v3762_v25  ;;  %v3845_v36 = vpop.f32.mrb[55].mxu1 }
 0x163   :  { %v3846_v39 = vadd.f32 %v3845_v36, %v3844_v29  ;;  %2879 = vmatmul.mubr.bf16.gmra.mrb[160].mxu0 %v3286_v21  ;;  %v3318_v21 = vcombine.low %v165_v42, %v173_v43 }
 0x164   :  { %v5338_v44 = vadd.f32 %v3843_v28, %v2361_v34  ;;  %v2364_v50 = vadd.f32 %v3764_v35, %v5158_v37  ;;  %2999 = vmatmul.mubr.bf16.gmra.mrb[160].mxu1 %v3288_v26  ;;  %2886 = vmatprep.mubr.bf16.mxu0 %v3303_v27  ;;  %v174_v37 = vld [vmem:[%s5524_s0 + $0x4f8] sm:$0xff]  ;;  %v3335_v26 = vcombine.high %v181_v9, %v181_v9 }
 0x165   :  { %3006 = vmatprep.mubr.bf16.mxu1 %v3305_v31  ;;  %v3321_v2 = vcombine.high %v166_v52, %v174_v37  ;;  %v3320_v25 = vcombine.low %v166_v52, %v174_v37  ;;  %v3334_v37 = vcombine.low %v181_v9, %v181_v9 }
 0x166   :  { %v5347_v33 = vadd.f32 %v3846_v39, %v2364_v50  ;;  %v3765_v49 = vpop.f32.mrb[56].mxu0 }
 0x167   :  { %v3847_v53 = vpop.f32.mrb[56].mxu1  ;;  %v3766_v54 = vpop.f32.mrb[57].mxu0 }
 0x168   :  { %v3767_v56 = vadd.f32 %v3766_v54, %v3765_v49  ;;  %v3848_v57 = vpop.f32.mrb[57].mxu1  ;;  %v3768_v58 = vpop.f32.mrb[58].mxu0 }
 0x169   :  { %v3849_v63 = vadd.f32 %v3848_v57, %v3847_v53  ;;  %v3850_v0 = vpop.f32.mrb[58].mxu1  ;;  %v3769_v1 = vpop.f32.mrb[59].mxu0 }
 0x16a   :  { %v2369_v3 = vadd.f32 %v3767_v56, %v5167_v59  ;;  %v3770_v4 = vadd.f32 %v3769_v1, %v3768_v58  ;;  %v3851_v5 = vpop.f32.mrb[59].mxu1  ;;  %v182_v59 = vld [vmem:[%s5524_s0 + $0x538] sm:$0x11] }
 0x16b   :  { %v3852_v17 = vadd.f32 %v3851_v5, %v3850_v0  ;;  %2887 = vmatmul.mubr.bf16.gmra.mrb[164].mxu0 %v3302_v55  ;;  %v3337_v30 = vcombine.high %v182_v59, %v182_v59  ;;  %v3336_v55 = vcombine.low %v182_v59, %v182_v59 }
 0x16c   :  { %v5356_v32 = vadd.f32 %v3849_v63, %v2369_v3  ;;  %v2372_v18 = vadd.f32 %v3770_v4, %v5173_v62  ;;  %3007 = vmatmul.mubr.bf16.gmra.mrb[164].mxu1 %v3304_v60  ;;  %2894 = vmatprep.mubr.bf16.mxu0 %v3319_v61 }
 0x16d   :  { %3014 = vmatprep.mubr.bf16.mxu1 %v3321_v2 }
 0x16e   :  { %v5362_v10 = vadd.f32 %v3852_v17, %v2372_v18  ;;  %v3771_v15 = vpop.f32.mrb[60].mxu0 }
 0x16f   :  { %v3853_v12 = vpop.f32.mrb[60].mxu1  ;;  %v3772_v20 = vpop.f32.mrb[61].mxu0 }
 0x170   :  { %v3773_v22 = vadd.f32 %v3772_v20, %v3771_v15  ;;  %v3854_v24 = vpop.f32.mrb[61].mxu1  ;;  %v3774_v62 = vpop.f32.mrb[62].mxu0 }
 0x171   :  { %v3855_v27 = vadd.f32 %v3854_v24, %v3853_v12  ;;  %v3856_v28 = vpop.f32.mrb[62].mxu1  ;;  %v3775_v29 = vpop.f32.mrb[63].mxu0 }
 0x172   :  { %v2377_v31 = vadd.f32 %v3773_v22, %v5179_v19  ;;  %v3776_v34 = vadd.f32 %v3775_v29, %v3774_v62  ;;  %v3857_v35 = vpop.f32.mrb[63].mxu1 }
 0x173   :  { %v3858_v36 = vadd.f32 %v3857_v35, %v3856_v28  ;;  %2895 = vmatmul.mubr.bf16.gmra.mrb[168].mxu0 %v3318_v21 }
 0x174   :  { %v5368_v39 = vadd.f32 %v3855_v27, %v2377_v31  ;;  %v2380_v50 = vadd.f32 %v3776_v34, %v5188_v23  ;;  %3015 = vmatmul.mubr.bf16.gmra.mrb[168].mxu1 %v3320_v25  ;;  %2902 = vmatprep.mubr.bf16.mxu0 %v3335_v26 }
 0x175   :  { %3022 = vmatprep.mubr.bf16.mxu1 %v3337_v30 }
 0x176   :  { %v5371_v42 = vadd.f32 %v3858_v36, %v2380_v50  ;;  %v3777_v43 = vpop.f32.mrb[64].mxu0 }
 0x177   :  { %v3859_v49 = vpop.f32.mrb[64].mxu1  ;;  %v3778_v52 = vpop.f32.mrb[65].mxu0 }
 0x178   :  { %v3779_v53 = vadd.f32 %v3778_v52, %v3777_v43  ;;  %v3860_v54 = vpop.f32.mrb[65].mxu1  ;;  %v3780_v19 = vpop.f32.mrb[66].mxu0 }
 0x179   :  { %v3861_v56 = vadd.f32 %v3860_v54, %v3859_v49  ;;  %v3862_v57 = vpop.f32.mrb[66].mxu1  ;;  %v3781_v58 = vpop.f32.mrb[67].mxu0 }
 0x17a   :  { %v2385_v60 = vadd.f32 %v3779_v53, %v5197_v46  ;;  %v3782_v61 = vadd.f32 %v3781_v58, %v3780_v19  ;;  %v3863_v23 = vpop.f32.mrb[67].mxu1 }
 0x17b   :  { %v3864_v63 = vadd.f32 %v3863_v23, %v3862_v57  ;;  %2903 = vmatmul.mubr.bf16.gmra.mrb[172].mxu0 %v3334_v37 }
 0x17c   :  { %v5374_v0 = vadd.f32 %v3861_v56, %v2385_v60  ;;  %v2388_v1 = vadd.f32 %v3782_v61, %v5206_v51  ;;  %3023 = vmatmul.mubr.bf16.gmra.mrb[172].mxu1 %v3336_v55 }
 0x17e   :  { %v5377_v2 = vadd.f32 %v3864_v63, %v2388_v1  ;;  %v3783_v3 = vpop.f32.mrb[68].mxu0 }
 0x17f   :  { %v3865_v4 = vpop.f32.mrb[68].mxu1  ;;  %v3784_v5 = vpop.f32.mrb[69].mxu0 }
 0x180   :  { %v3785_v17 = vadd.f32 %v3784_v5, %v3783_v3  ;;  %v3866_v18 = vpop.f32.mrb[69].mxu1  ;;  %v3786_v9 = vpop.f32.mrb[70].mxu0 }
 0x181   :  { %v3867_v15 = vadd.f32 %v3866_v18, %v3865_v4  ;;  %v3868_v59 = vpop.f32.mrb[70].mxu1  ;;  %v3787_v46 = vpop.f32.mrb[71].mxu0 }
 0x182   :  { %v2393_v12 = vadd.f32 %v3785_v17, %v5215_v11  ;;  %v3788_v20 = vadd.f32 %v3787_v46, %v3786_v9  ;;  %v3869_v21 = vpop.f32.mrb[71].mxu1 }
 0x183   :  { %v3870_v22 = vadd.f32 %v3869_v21, %v3868_v59 }
 0x184   :  { %v5380_v24 = vadd.f32 %v3867_v15, %v2393_v12  ;;  %v2396_v51 = vadd.f32 %v3788_v20, %v5224_v16 }
 0x186   :  { %v5383_v62 = vadd.f32 %v3870_v22, %v2396_v51  ;;  %v3789_v25 = vpop.f32.mrb[72].mxu0 }
 0x187   :  { %v3871_v26 = vpop.f32.mrb[72].mxu1  ;;  %v3790_v27 = vpop.f32.mrb[73].mxu0 }
 0x188   :  { %v3791_v28 = vadd.f32 %v3790_v27, %v3789_v25  ;;  %v3872_v29 = vpop.f32.mrb[73].mxu1  ;;  %v3792_v30 = vpop.f32.mrb[74].mxu0 }
 0x189   :  { %v3873_v31 = vadd.f32 %v3872_v29, %v3871_v26  ;;  %v3874_v34 = vpop.f32.mrb[74].mxu1  ;;  %v3793_v35 = vpop.f32.mrb[75].mxu0 }
 0x18a   :  { %v2401_v11 = vadd.f32 %v3791_v28, %v5233_v41  ;;  %v3794_v36 = vadd.f32 %v3793_v35, %v3792_v30  ;;  %v3875_v50 = vpop.f32.mrb[75].mxu1 }
 0x18b   :  { %v3876_v43 = vadd.f32 %v3875_v50, %v3874_v34 }
 0x18c   :  { %v5386_v49 = vadd.f32 %v3873_v31, %v2401_v11  ;;  %v2404_v16 = vadd.f32 %v3794_v36, %v5242_v45 }
 0x18e   :  { %v5389_v52 = vadd.f32 %v3876_v43, %v2404_v16  ;;  %v3795_v37 = vpop.f32.mrb[76].mxu0 }
 0x18f   :  { %v3877_v53 = vpop.f32.mrb[76].mxu1  ;;  %v3796_v54 = vpop.f32.mrb[77].mxu0 }
 0x190   :  { %v3797_v19 = vadd.f32 %v3796_v54, %v3795_v37  ;;  %v3878_v55 = vpop.f32.mrb[77].mxu1  ;;  %v3798_v56 = vpop.f32.mrb[78].mxu0 }
 0x191   :  { %v3879_v57 = vadd.f32 %v3878_v55, %v3877_v53  ;;  %v3880_v58 = vpop.f32.mrb[78].mxu1  ;;  %v3799_v60 = vpop.f32.mrb[79].mxu0 }
 0x192   :  { %v2409_v41 = vadd.f32 %v3797_v19, %v5251_v7  ;;  %v3800_v61 = vadd.f32 %v3799_v60, %v3798_v56  ;;  %v3881_v23 = vpop.f32.mrb[79].mxu1 }
 0x193   :  { %v3882_v63 = vadd.f32 %v3881_v23, %v3880_v58 }
 0x194   :  { %v5392_v1 = vadd.f32 %v3879_v57, %v2409_v41  ;;  %v2412_v45 = vadd.f32 %v3800_v61, %v5260_v14 }
 0x196   :  { %v5395_v3 = vadd.f32 %v3882_v63, %v2412_v45  ;;  %v3801_v4 = vpop.f32.mrb[80].mxu0 }
 0x197   :  { %v3883_v5 = vpop.f32.mrb[80].mxu1  ;;  %v3802_v17 = vpop.f32.mrb[81].mxu0 }
 0x198   :  { %v3803_v18 = vadd.f32 %v3802_v17, %v3801_v4  ;;  %v3884_v9 = vpop.f32.mrb[81].mxu1  ;;  %v3804_v15 = vpop.f32.mrb[82].mxu0 }
 0x199   :  { %v3885_v59 = vadd.f32 %v3884_v9, %v3883_v5  ;;  %v3886_v46 = vpop.f32.mrb[82].mxu1  ;;  %v3805_v12 = vpop.f32.mrb[83].mxu0 }
 0x19a   :  { %v2417_v7 = vadd.f32 %v3803_v18, %v5269_v40  ;;  %v3806_v20 = vadd.f32 %v3805_v12, %v3804_v15  ;;  %v3887_v21 = vpop.f32.mrb[83].mxu1 }
 0x19b   :  { %v3888_v22 = vadd.f32 %v3887_v21, %v3886_v46 }
 0x19c   :  { %v5398_v51 = vadd.f32 %v3885_v59, %v2417_v7  ;;  %v2420_v14 = vadd.f32 %v3806_v20, %v5278_v47 }
 0x19e   :  { %v5401_v25 = vadd.f32 %v3888_v22, %v2420_v14  ;;  %v3807_v26 = vpop.f32.mrb[84].mxu0 }
 0x19f   :  { %v3889_v27 = vpop.f32.mrb[84].mxu1  ;;  %v3808_v28 = vpop.f32.mrb[85].mxu0 }
 0x1a0   :  { %v3809_v29 = vadd.f32 %v3808_v28, %v3807_v26  ;;  %v3890_v30 = vpop.f32.mrb[85].mxu1  ;;  %v3810_v31 = vpop.f32.mrb[86].mxu0 }
 0x1a1   :  { %v3891_v34 = vadd.f32 %v3890_v30, %v3889_v27  ;;  %v3892_v35 = vpop.f32.mrb[86].mxu1  ;;  %v3811_v11 = vpop.f32.mrb[87].mxu0 }
 0x1a2   :  { %v2425_v40 = vadd.f32 %v3809_v29, %v5287_v6  ;;  %v3893_v36 = vpop.f32.mrb[87].mxu1 }
 0x1a4   :  { %v5404_v50 = vadd.f32 %v3891_v34, %v2425_v40 }
 0x1a6   :  { %v3911_v43 = vpop.f32.mrb[88].mxu0 }
 0x1a7   :  { %v3993_v16 = vpop.f32.mrb[88].mxu1  ;;  %v3912_v37 = vpop.f32.mrb[89].mxu0 }
 0x1a8   :  { %v3913_v47 = vadd.f32 %v3912_v37, %v3911_v43  ;;  %v3994_v53 = vpop.f32.mrb[89].mxu1  ;;  %v3914_v54 = vpop.f32.mrb[90].mxu0 }
 0x1a9   :  { %v3995_v19 = vadd.f32 %v3994_v53, %v3993_v16  ;;  %v3996_v55 = vpop.f32.mrb[90].mxu1  ;;  %v3915_v56 = vpop.f32.mrb[91].mxu0 }
 0x1aa   :  { %v2585_v57 = vadd.f32 %v3913_v47, %v5302_v38  ;;  %v3916_v58 = vadd.f32 %v3915_v56, %v3914_v54  ;;  %v3997_v60 = vpop.f32.mrb[91].mxu1 }
 0x1ab   :  { %v3998_v41 = vadd.f32 %v3997_v60, %v3996_v55 }
 0x1ac   :  { %v5407_v61 = vadd.f32 %v3995_v19, %v2585_v57  ;;  %v2588_v6 = vadd.f32 %v3916_v58, %v5311_v48 }
 0x1ae   :  { %v5410_v23 = vadd.f32 %v3998_v41, %v2588_v6  ;;  %v3917_v63 = vpop.f32.mrb[92].mxu0 }
 0x1af   :  { %v3999_v45 = vpop.f32.mrb[92].mxu1  ;;  %v3918_v4 = vpop.f32.mrb[93].mxu0 }
 0x1b0   :  { %v3919_v5 = vadd.f32 %v3918_v4, %v3917_v63  ;;  %v4000_v17 = vpop.f32.mrb[93].mxu1  ;;  %v3920_v18 = vpop.f32.mrb[94].mxu0 }
 0x1b1   :  { %v4001_v9 = vadd.f32 %v4000_v17, %v3999_v45  ;;  %v4002_v15 = vpop.f32.mrb[94].mxu1  ;;  %v3921_v59 = vpop.f32.mrb[95].mxu0 }
 0x1b2   :  { %v2593_v38 = vadd.f32 %v3919_v5, %v5320_v13  ;;  %v3922_v46 = vadd.f32 %v3921_v59, %v3920_v18  ;;  %v4003_v12 = vpop.f32.mrb[95].mxu1 }
 0x1b3   :  { %v4004_v7 = vadd.f32 %v4003_v12, %v4002_v15 }
 0x1b4   :  { %v5413_v20 = vadd.f32 %v4001_v9, %v2593_v38  ;;  %v2596_v48 = vadd.f32 %v3922_v46, %v5329_v8 }
 0x1b6   :  { %v5416_v21 = vadd.f32 %v4004_v7, %v2596_v48  ;;  %v3923_v22 = vpop.f32.mrb[96].mxu0 }
 0x1b7   :  { %v4005_v14 = vpop.f32.mrb[96].mxu1  ;;  %v3924_v26 = vpop.f32.mrb[97].mxu0 }
 0x1b8   :  { %v3925_v27 = vadd.f32 %v3924_v26, %v3923_v22  ;;  %v4006_v28 = vpop.f32.mrb[97].mxu1  ;;  %v3926_v29 = vpop.f32.mrb[98].mxu0 }
 0x1b9   :  { %v4007_v30 = vadd.f32 %v4006_v28, %v4005_v14  ;;  %v4008_v31 = vpop.f32.mrb[98].mxu1  ;;  %v3927_v34 = vpop.f32.mrb[99].mxu0 }
 0x1ba   :  { %v2601_v13 = vadd.f32 %v3925_v27, %v5338_v44  ;;  %v3928_v35 = vadd.f32 %v3927_v34, %v3926_v29  ;;  %v4009_v11 = vpop.f32.mrb[99].mxu1 }
 0x1bb   :  { %v4010_v40 = vadd.f32 %v4009_v11, %v4008_v31 }
 0x1bc   :  { %v5419_v36 = vadd.f32 %v4007_v30, %v2601_v13  ;;  %v2604_v8 = vadd.f32 %v3928_v35, %v5347_v33 }
 0x1be   :  { %v5422_v43 = vadd.f32 %v4010_v40, %v2604_v8  ;;  %v3929_v16 = vpop.f32.mrb[100].mxu0 }
 0x1bf   :  { %v4011_v37 = vpop.f32.mrb[100].mxu1  ;;  %v3930_v47 = vpop.f32.mrb[101].mxu0 }
 0x1c0   :  { %v3931_v53 = vadd.f32 %v3930_v47, %v3929_v16  ;;  %v4012_v54 = vpop.f32.mrb[101].mxu1  ;;  %v3932_v19 = vpop.f32.mrb[102].mxu0 }
 0x1c1   :  { %v4013_v55 = vadd.f32 %v4012_v54, %v4011_v37  ;;  %v4014_v56 = vpop.f32.mrb[102].mxu1  ;;  %v3933_v57 = vpop.f32.mrb[103].mxu0 }
 0x1c2   :  { %v2609_v44 = vadd.f32 %v3931_v53, %v5356_v32  ;;  %v3934_v58 = vadd.f32 %v3933_v57, %v3932_v19  ;;  %v4015_v60 = vpop.f32.mrb[103].mxu1 }
 0x1c3   :  { %v4016_v41 = vadd.f32 %v4015_v60, %v4014_v56 }
 0x1c4   :  { %v5425_v6 = vadd.f32 %v4013_v55, %v2609_v44  ;;  %v2612_v33 = vadd.f32 %v3934_v58, %v5362_v10 }
 0x1c6   :  { %v5428_v63 = vadd.f32 %v4016_v41, %v2612_v33  ;;  %v3935_v45 = vpop.f32.mrb[104].mxu0 }
 0x1c7   :  { %v4017_v4 = vpop.f32.mrb[104].mxu1  ;;  %v3936_v5 = vpop.f32.mrb[105].mxu0 }
 0x1c8   :  { %v3937_v17 = vadd.f32 %v3936_v5, %v3935_v45  ;;  %v4018_v18 = vpop.f32.mrb[105].mxu1  ;;  %v3938_v9 = vpop.f32.mrb[106].mxu0 }
 0x1c9   :  { %v4019_v15 = vadd.f32 %v4018_v18, %v4017_v4  ;;  %v4020_v59 = vpop.f32.mrb[106].mxu1  ;;  %v3939_v38 = vpop.f32.mrb[107].mxu0 }
 0x1ca   :  { %v2617_v32 = vadd.f32 %v3937_v17, %v5368_v39  ;;  %v3940_v46 = vadd.f32 %v3939_v38, %v3938_v9  ;;  %v4021_v12 = vpop.f32.mrb[107].mxu1 }
 0x1cb   :  { %v4022_v7 = vadd.f32 %v4021_v12, %v4020_v59 }
 0x1cc   :  { %v5431_v48 = vadd.f32 %v4019_v15, %v2617_v32  ;;  %v2620_v10 = vadd.f32 %v3940_v46, %v5371_v42 }
 0x1ce   :  { %v5434_v22 = vadd.f32 %v4022_v7, %v2620_v10  ;;  %v3941_v14 = vpop.f32.mrb[108].mxu0 }
 0x1cf   :  { %v4023_v26 = vpop.f32.mrb[108].mxu1  ;;  %v3942_v27 = vpop.f32.mrb[109].mxu0 }
 0x1d0   :  { %v3943_v28 = vadd.f32 %v3942_v27, %v3941_v14  ;;  %v4024_v29 = vpop.f32.mrb[109].mxu1  ;;  %v3944_v30 = vpop.f32.mrb[110].mxu0 }
 0x1d1   :  { %v4025_v31 = vadd.f32 %v4024_v29, %v4023_v26  ;;  %v4026_v34 = vpop.f32.mrb[110].mxu1  ;;  %v3945_v13 = vpop.f32.mrb[111].mxu0 }
 0x1d2   :  { %v2625_v39 = vadd.f32 %v3943_v28, %v5374_v0  ;;  %v3946_v35 = vadd.f32 %v3945_v13, %v3944_v30  ;;  %v4027_v11 = vpop.f32.mrb[111].mxu1 }
 0x1d3   :  { %v4028_v40 = vadd.f32 %v4027_v11, %v4026_v34 }
 0x1d4   :  { %v5437_v8 = vadd.f32 %v4025_v31, %v2625_v39  ;;  %v2628_v42 = vadd.f32 %v3946_v35, %v5377_v2 }
 0x1d6   :  { %v5440_v16 = vadd.f32 %v4028_v40, %v2628_v42  ;;  %v3947_v37 = vpop.f32.mrb[112].mxu0 }
 0x1d7   :  { %v4029_v47 = vpop.f32.mrb[112].mxu1  ;;  %v3948_v53 = vpop.f32.mrb[113].mxu0 }
 0x1d8   :  { %v3949_v54 = vadd.f32 %v3948_v53, %v3947_v37  ;;  %v4030_v19 = vpop.f32.mrb[113].mxu1  ;;  %v3950_v55 = vpop.f32.mrb[114].mxu0 }
 0x1d9   :  { %v4031_v56 = vadd.f32 %v4030_v19, %v4029_v47  ;;  %v4032_v57 = vpop.f32.mrb[114].mxu1  ;;  %v3951_v44 = vpop.f32.mrb[115].mxu0 }
 0x1da   :  { %v2633_v0 = vadd.f32 %v3949_v54, %v5380_v24  ;;  %v3952_v58 = vadd.f32 %v3951_v44, %v3950_v55  ;;  %v4033_v60 = vpop.f32.mrb[115].mxu1 }
 0x1db   :  { %v4034_v41 = vadd.f32 %v4033_v60, %v4032_v57 }
 0x1dc   :  { %v5443_v33 = vadd.f32 %v4031_v56, %v2633_v0  ;;  %v2636_v2 = vadd.f32 %v3952_v58, %v5383_v62 }
 0x1de   :  { %v5446_v45 = vadd.f32 %v4034_v41, %v2636_v2  ;;  %v3953_v4 = vpop.f32.mrb[116].mxu0 }
 0x1df   :  { %v4035_v5 = vpop.f32.mrb[116].mxu1  ;;  %v3954_v17 = vpop.f32.mrb[117].mxu0 }
 0x1e0   :  { %v3955_v18 = vadd.f32 %v3954_v17, %v3953_v4  ;;  %v4036_v9 = vpop.f32.mrb[117].mxu1  ;;  %v3956_v15 = vpop.f32.mrb[118].mxu0 }
 0x1e1   :  { %v4037_v59 = vadd.f32 %v4036_v9, %v4035_v5  ;;  %v4038_v38 = vpop.f32.mrb[118].mxu1  ;;  %v3957_v32 = vpop.f32.mrb[119].mxu0 }
 0x1e2   :  { %v2641_v24 = vadd.f32 %v3955_v18, %v5386_v49  ;;  %v3958_v46 = vadd.f32 %v3957_v32, %v3956_v15  ;;  %v4039_v12 = vpop.f32.mrb[119].mxu1 }
 0x1e3   :  { %v4040_v7 = vadd.f32 %v4039_v12, %v4038_v38 }
 0x1e4   :  { %v5449_v10 = vadd.f32 %v4037_v59, %v2641_v24  ;;  %v2644_v62 = vadd.f32 %v3958_v46, %v5389_v52 }
 0x1e6   :  { %v5452_v14 = vadd.f32 %v4040_v7, %v2644_v62  ;;  %v3959_v26 = vpop.f32.mrb[120].mxu0 }
 0x1e7   :  { %v4041_v27 = vpop.f32.mrb[120].mxu1  ;;  %v3960_v28 = vpop.f32.mrb[121].mxu0 }
 0x1e8   :  { %v3961_v29 = vadd.f32 %v3960_v28, %v3959_v26  ;;  %v4042_v30 = vpop.f32.mrb[121].mxu1  ;;  %v3962_v31 = vpop.f32.mrb[122].mxu0 }
 0x1e9   :  { %v4043_v34 = vadd.f32 %v4042_v30, %v4041_v27  ;;  %v4044_v13 = vpop.f32.mrb[122].mxu1  ;;  %v3963_v39 = vpop.f32.mrb[123].mxu0 }
 0x1ea   :  { %v2649_v49 = vadd.f32 %v3961_v29, %v5392_v1  ;;  %v3964_v35 = vadd.f32 %v3963_v39, %v3962_v31  ;;  %v4045_v11 = vpop.f32.mrb[123].mxu1 }
 0x1eb   :  { %v4046_v40 = vadd.f32 %v4045_v11, %v4044_v13 }
 0x1ec   :  { %v5455_v42 = vadd.f32 %v4043_v34, %v2649_v49  ;;  %v2652_v52 = vadd.f32 %v3964_v35, %v5395_v3 }
 0x1ee   :  { %v5458_v37 = vadd.f32 %v4046_v40, %v2652_v52  ;;  %v3965_v47 = vpop.f32.mrb[124].mxu0 }
 0x1ef   :  { %v4047_v53 = vpop.f32.mrb[124].mxu1  ;;  %v3966_v54 = vpop.f32.mrb[125].mxu0 }
 0x1f0   :  { %v3967_v19 = vadd.f32 %v3966_v54, %v3965_v47  ;;  %v4048_v55 = vpop.f32.mrb[125].mxu1  ;;  %v3968_v56 = vpop.f32.mrb[126].mxu0 }
 0x1f1   :  { %v4049_v57 = vadd.f32 %v4048_v55, %v4047_v53  ;;  %v4050_v44 = vpop.f32.mrb[126].mxu1  ;;  %v3969_v0 = vpop.f32.mrb[127].mxu0 }
 0x1f2   :  { %v2657_v1 = vadd.f32 %v3967_v19, %v5398_v51  ;;  %v3970_v58 = vadd.f32 %v3969_v0, %v3968_v56  ;;  %v4051_v60 = vpop.f32.mrb[127].mxu1 }
 0x1f3   :  { %v4052_v41 = vadd.f32 %v4051_v60, %v4050_v44 }
 0x1f4   :  { %v5461_v2 = vadd.f32 %v4049_v57, %v2657_v1  ;;  %v2660_v3 = vadd.f32 %v3970_v58, %v5401_v25 }
 0x1f6   :  { %v5464_v4 = vadd.f32 %v4052_v41, %v2660_v3  ;;  %v3971_v5 = vpop.f32.mrb[128].mxu0 }
 0x1f7   :  { %v4053_v17 = vpop.f32.mrb[128].mxu1  ;;  %v3972_v18 = vpop.f32.mrb[129].mxu0 }
 0x1f8   :  { %v3973_v9 = vadd.f32 %v3972_v18, %v3971_v5  ;;  %v4054_v15 = vpop.f32.mrb[129].mxu1  ;;  %v3974_v59 = vpop.f32.mrb[130].mxu0 }
 0x1f9   :  { %v4055_v38 = vadd.f32 %v4054_v15, %v4053_v17  ;;  %v4056_v32 = vpop.f32.mrb[130].mxu1  ;;  %v3975_v24 = vpop.f32.mrb[131].mxu0 }
 0x1fa   :  { %v2665_v51 = vadd.f32 %v3973_v9, %v5404_v50  ;;  %v4057_v46 = vpop.f32.mrb[131].mxu1 }
 0x1fc   :  { %v5467_v12 = vadd.f32 %v4055_v38, %v2665_v51 }
 0x1fe   :  { %v4075_v7 = vpop.f32.mrb[132].mxu0 }
 0x1ff   :  { %v4157_v62 = vpop.f32.mrb[132].mxu1  ;;  %v4076_v26 = vpop.f32.mrb[133].mxu0 }
 0x200   :  { %v4077_v25 = vadd.f32 %v4076_v26, %v4075_v7  ;;  %v4158_v27 = vpop.f32.mrb[133].mxu1  ;;  %v4078_v28 = vpop.f32.mrb[134].mxu0 }
 0x201   :  { %v4159_v29 = vadd.f32 %v4158_v27, %v4157_v62  ;;  %v4160_v30 = vpop.f32.mrb[134].mxu1  ;;  %v4079_v31 = vpop.f32.mrb[135].mxu0 }
 0x202   :  { %v2825_v34 = vadd.f32 %v4077_v25, %v5407_v61  ;;  %v4080_v13 = vadd.f32 %v4079_v31, %v4078_v28  ;;  %v4161_v39 = vpop.f32.mrb[135].mxu1 }
 0x203   :  { %v4162_v49 = vadd.f32 %v4161_v39, %v4160_v30 }
 0x204   :  { %v2945_v35 = vadd.f32 %v4159_v29, %v2825_v34  ;;  %v2828_v50 = vadd.f32 %v4080_v13, %v5410_v23 }
 0x206   :  { %v2948_v11 = vadd.f32 %v4162_v49, %v2828_v50  ;;  %v4081_v40 = vpop.f32.mrb[136].mxu0  ;;  %v3030_v53 = vmax.f32 %v2945_v35, 0.0 }
 0x207   :  { %v4163_v52 = vpop.f32.mrb[136].mxu1  ;;  %v4082_v47 = vpop.f32.mrb[137].mxu0 }
 0x208   :  { %v3031_v54 = vmax.f32 %v2948_v11, 0.0  ;;  %v4083_v19 = vadd.f32 %v4082_v47, %v4081_v40  ;;  %v4164_v55 = vpop.f32.mrb[137].mxu1  ;;  %v4084_v56 = vpop.f32.mrb[138].mxu0 }
 0x209   :  { %v4165_v57 = vadd.f32 %v4164_v55, %v4163_v52  ;;  %v4166_v44 = vpop.f32.mrb[138].mxu1  ;;  %v4085_v0 = vpop.f32.mrb[139].mxu0 }
 0x20a   :  { %v3511_v1 = vpack.c.bf16 %v3031_v54, %v3030_v53  ;;  %v2833_v61 = vadd.f32 %v4083_v19, %v5413_v20  ;;  %v4086_v58 = vadd.f32 %v4085_v0, %v4084_v56  ;;  %v4167_v60 = vpop.f32.mrb[139].mxu1 }
 0x20b   :  { %v4168_v41 = vadd.f32 %v4167_v60, %v4166_v44 }
 0x20c   :  { %3512 = vst [vmem:[%s5526_s3] sm:$0xff] %v3511_v1   ;;  %v2953_v23 = vadd.f32 %v4165_v57, %v2833_v61  ;;  %v2836_v3 = vadd.f32 %v4086_v58, %v5416_v21 }
 0x20e   :  { %v2956_v5 = vadd.f32 %v4168_v41, %v2836_v3  ;;  %v4087_v17 = vpop.f32.mrb[140].mxu0  ;;  %v3032_v15 = vmax.f32 %v2953_v23, 0.0 }
 0x20f   :  { %v4169_v18 = vpop.f32.mrb[140].mxu1  ;;  %v4088_v9 = vpop.f32.mrb[141].mxu0 }
 0x210   :  { %v3033_v59 = vmax.f32 %v2956_v5, 0.0  ;;  %v4089_v38 = vadd.f32 %v4088_v9, %v4087_v17  ;;  %v4170_v32 = vpop.f32.mrb[141].mxu1  ;;  %v4090_v24 = vpop.f32.mrb[142].mxu0 }
 0x211   :  { %v4171_v20 = vadd.f32 %v4170_v32, %v4169_v18  ;;  %v4172_v51 = vpop.f32.mrb[142].mxu1  ;;  %v4091_v46 = vpop.f32.mrb[143].mxu0 }
 0x212   :  { %v3516_v7 = vpack.c.bf16 %v3033_v59, %v3032_v15  ;;  %v2841_v62 = vadd.f32 %v4089_v38, %v5419_v36  ;;  %v4092_v26 = vadd.f32 %v4091_v46, %v4090_v24  ;;  %v4173_v25 = vpop.f32.mrb[143].mxu1 }
 0x213   :  { %v4174_v27 = vadd.f32 %v4173_v25, %v4172_v51 }
 0x214   :  { %3558 = vst [vmem:[%s5526_s3 + $0x8] sm:$0xff] %v3516_v7   ;;  %v2961_v21 = vadd.f32 %v4171_v20, %v2841_v62  ;;  %v2844_v28 = vadd.f32 %v4092_v26, %v5422_v43 }
 0x216   :  { %v2964_v29 = vadd.f32 %v4174_v27, %v2844_v28  ;;  %v4093_v30 = vpop.f32.mrb[144].mxu0  ;;  %v3034_v13 = vmax.f32 %v2961_v21, 0.0 }
 0x217   :  { %v4175_v31 = vpop.f32.mrb[144].mxu1  ;;  %v4094_v34 = vpop.f32.mrb[145].mxu0 }
 0x218   :  { %v3035_v39 = vmax.f32 %v2964_v29, 0.0  ;;  %v4095_v49 = vadd.f32 %v4094_v34, %v4093_v30  ;;  %v4176_v35 = vpop.f32.mrb[145].mxu1  ;;  %v4096_v50 = vpop.f32.mrb[146].mxu0 }
 0x219   :  { %v4177_v36 = vadd.f32 %v4176_v35, %v4175_v31  ;;  %v4178_v11 = vpop.f32.mrb[146].mxu1  ;;  %v4097_v40 = vpop.f32.mrb[147].mxu0 }
 0x21a   :  { %v3521_v52 = vpack.c.bf16 %v3035_v39, %v3034_v13  ;;  %v2849_v47 = vadd.f32 %v4095_v49, %v5425_v6  ;;  %v4098_v53 = vadd.f32 %v4097_v40, %v4096_v50  ;;  %v4179_v54 = vpop.f32.mrb[147].mxu1 }
 0x21b   :  { %v4180_v19 = vadd.f32 %v4179_v54, %v4178_v11 }
 0x21c   :  { %3559 = vst [vmem:[%s5526_s3 + $0x10] sm:$0xff] %v3521_v52   ;;  %v2969_v43 = vadd.f32 %v4177_v36, %v2849_v47  ;;  %v2852_v55 = vadd.f32 %v4098_v53, %v5428_v63 }
 0x21e   :  { %v2972_v56 = vadd.f32 %v4180_v19, %v2852_v55  ;;  %v4099_v57 = vpop.f32.mrb[148].mxu0  ;;  %v3036_v1 = vmax.f32 %v2969_v43, 0.0 }
 0x21f   :  { %v4181_v44 = vpop.f32.mrb[148].mxu1  ;;  %v4100_v0 = vpop.f32.mrb[149].mxu0 }
 0x220   :  { %v3037_v61 = vmax.f32 %v2972_v56, 0.0  ;;  %v4101_v58 = vadd.f32 %v4100_v0, %v4099_v57  ;;  %v4182_v60 = vpop.f32.mrb[149].mxu1  ;;  %v4102_v41 = vpop.f32.mrb[150].mxu0 }
 0x221   :  { %v4183_v6 = vadd.f32 %v4182_v60, %v4181_v44  ;;  %v4184_v23 = vpop.f32.mrb[150].mxu1  ;;  %v4103_v3 = vpop.f32.mrb[151].mxu0 }
 0x222   :  { %v3526_v5 = vpack.c.bf16 %v3037_v61, %v3036_v1  ;;  %v2857_v17 = vadd.f32 %v4101_v58, %v5431_v48  ;;  %v4104_v18 = vadd.f32 %v4103_v3, %v4102_v41  ;;  %v4185_v9 = vpop.f32.mrb[151].mxu1 }
 0x223   :  { %v4186_v15 = vadd.f32 %v4185_v9, %v4184_v23 }
 0x224   :  { %3560 = vst [vmem:[%s5526_s3 + $0x18] sm:$0xff] %v3526_v5   ;;  %v2977_v63 = vadd.f32 %v4183_v6, %v2857_v17  ;;  %v2860_v59 = vadd.f32 %v4104_v18, %v5434_v22 }
 0x226   :  { %v2980_v38 = vadd.f32 %v4186_v15, %v2860_v59  ;;  %v4105_v32 = vpop.f32.mrb[152].mxu0  ;;  %v3038_v51 = vmax.f32 %v2977_v63, 0.0 }
 0x227   :  { %v4187_v24 = vpop.f32.mrb[152].mxu1  ;;  %v4106_v20 = vpop.f32.mrb[153].mxu0 }
 0x228   :  { %v3039_v46 = vmax.f32 %v2980_v38, 0.0  ;;  %v4107_v7 = vadd.f32 %v4106_v20, %v4105_v32  ;;  %v4188_v62 = vpop.f32.mrb[153].mxu1  ;;  %v4108_v26 = vpop.f32.mrb[154].mxu0 }
 0x229   :  { %v4189_v48 = vadd.f32 %v4188_v62, %v4187_v24  ;;  %v4190_v25 = vpop.f32.mrb[154].mxu1  ;;  %v4109_v27 = vpop.f32.mrb[155].mxu0 }
 0x22a   :  { %v3531_v21 = vpack.c.bf16 %v3039_v46, %v3038_v51  ;;  %v2865_v28 = vadd.f32 %v4107_v7, %v5437_v8  ;;  %v4110_v29 = vadd.f32 %v4109_v27, %v4108_v26  ;;  %v4191_v30 = vpop.f32.mrb[155].mxu1 }
 0x22b   :  { %v4192_v31 = vadd.f32 %v4191_v30, %v4190_v25 }
 0x22c   :  { %3561 = vst [vmem:[%s5526_s3 + $0x20] sm:$0xff] %v3531_v21   ;;  %v2985_v22 = vadd.f32 %v4189_v48, %v2865_v28  ;;  %v2868_v34 = vadd.f32 %v4110_v29, %v5440_v16 }
 0x22e   :  { %v2988_v13 = vadd.f32 %v4192_v31, %v2868_v34  ;;  %v4111_v39 = vpop.f32.mrb[156].mxu0  ;;  %v3040_v50 = vmax.f32 %v2985_v22, 0.0 }
 0x22f   :  { %v4193_v49 = vpop.f32.mrb[156].mxu1  ;;  %v4112_v35 = vpop.f32.mrb[157].mxu0 }
 0x230   :  { %v3041_v36 = vmax.f32 %v2988_v13, 0.0  ;;  %v4113_v11 = vadd.f32 %v4112_v35, %v4111_v39  ;;  %v4194_v40 = vpop.f32.mrb[157].mxu1  ;;  %v4114_v52 = vpop.f32.mrb[158].mxu0 }
 0x231   :  { %v4195_v8 = vadd.f32 %v4194_v40, %v4193_v49  ;;  %v4196_v47 = vpop.f32.mrb[158].mxu1  ;;  %v4115_v53 = vpop.f32.mrb[159].mxu0 }
 0x232   :  { %v3536_v54 = vpack.c.bf16 %v3041_v36, %v3040_v50  ;;  %v2873_v19 = vadd.f32 %v4113_v11, %v5443_v33  ;;  %v4116_v43 = vadd.f32 %v4115_v53, %v4114_v52  ;;  %v4197_v55 = vpop.f32.mrb[159].mxu1 }
 0x233   :  { %v4198_v56 = vadd.f32 %v4197_v55, %v4196_v47 }
 0x234   :  { %3562 = vst [vmem:[%s5526_s3 + $0x28] sm:$0xff] %v3536_v54   ;;  %v2993_v16 = vadd.f32 %v4195_v8, %v2873_v19  ;;  %v2876_v57 = vadd.f32 %v4116_v43, %v5446_v45 }
 0x236   :  { %v2996_v44 = vadd.f32 %v4198_v56, %v2876_v57  ;;  %v4117_v0 = vpop.f32.mrb[160].mxu0  ;;  %v3042_v58 = vmax.f32 %v2993_v16, 0.0 }
 0x237   :  { %v4199_v1 = vpop.f32.mrb[160].mxu1  ;;  %v4118_v61 = vpop.f32.mrb[161].mxu0 }
 0x238   :  { %v3043_v60 = vmax.f32 %v2996_v44, 0.0  ;;  %v4119_v41 = vadd.f32 %v4118_v61, %v4117_v0  ;;  %v4200_v6 = vpop.f32.mrb[161].mxu1  ;;  %v4120_v23 = vpop.f32.mrb[162].mxu0 }
 0x239   :  { %v4201_v33 = vadd.f32 %v4200_v6, %v4199_v1  ;;  %v4202_v3 = vpop.f32.mrb[162].mxu1  ;;  %v4121_v5 = vpop.f32.mrb[163].mxu0 }
 0x23a   :  { %v3541_v17 = vpack.c.bf16 %v3043_v60, %v3042_v58  ;;  %v2881_v18 = vadd.f32 %v4119_v41, %v5449_v10  ;;  %v4122_v9 = vadd.f32 %v4121_v5, %v4120_v23  ;;  %v4203_v15 = vpop.f32.mrb[163].mxu1 }
 0x23b   :  { %v4204_v63 = vadd.f32 %v4203_v15, %v4202_v3 }
 0x23c   :  { %3563 = vst [vmem:[%s5526_s3 + $0x30] sm:$0xff] %v3541_v17   ;;  %v3001_v45 = vadd.f32 %v4201_v33, %v2881_v18  ;;  %v2884_v59 = vadd.f32 %v4122_v9, %v5452_v14 }
 0x23e   :  { %v3004_v38 = vadd.f32 %v4204_v63, %v2884_v59  ;;  %v4123_v32 = vpop.f32.mrb[164].mxu0  ;;  %v3044_v51 = vmax.f32 %v3001_v45, 0.0 }
 0x23f   :  { %v4205_v24 = vpop.f32.mrb[164].mxu1  ;;  %v4124_v20 = vpop.f32.mrb[165].mxu0 }
 0x240   :  { %v3045_v46 = vmax.f32 %v3004_v38, 0.0  ;;  %v4125_v7 = vadd.f32 %v4124_v20, %v4123_v32  ;;  %v4206_v62 = vpop.f32.mrb[165].mxu1  ;;  %v4126_v26 = vpop.f32.mrb[166].mxu0 }
 0x241   :  { %v4207_v10 = vadd.f32 %v4206_v62, %v4205_v24  ;;  %v4208_v48 = vpop.f32.mrb[166].mxu1  ;;  %v4127_v25 = vpop.f32.mrb[167].mxu0 }
 0x242   :  { %v3546_v27 = vpack.c.bf16 %v3045_v46, %v3044_v51  ;;  %v2889_v21 = vadd.f32 %v4125_v7, %v5455_v42  ;;  %v4128_v28 = vadd.f32 %v4127_v25, %v4126_v26  ;;  %v4209_v29 = vpop.f32.mrb[167].mxu1 }
 0x243   :  { %v4210_v30 = vadd.f32 %v4209_v29, %v4208_v48 }
 0x244   :  { %3564 = vst [vmem:[%s5526_s3 + $0x38] sm:$0xff] %v3546_v27   ;;  %v3009_v14 = vadd.f32 %v4207_v10, %v2889_v21  ;;  %v2892_v31 = vadd.f32 %v4128_v28, %v5458_v37 }
 0x246   :  { %v3012_v22 = vadd.f32 %v4210_v30, %v2892_v31  ;;  %v4129_v34 = vpop.f32.mrb[168].mxu0  ;;  %v3046_v49 = vmax.f32 %v3009_v14, 0.0 }
 0x247   :  { %v4211_v13 = vpop.f32.mrb[168].mxu1  ;;  %v4130_v39 = vpop.f32.mrb[169].mxu0 }
 0x248   :  { %v3047_v35 = vmax.f32 %v3012_v22, 0.0  ;;  %v4131_v50 = vadd.f32 %v4130_v39, %v4129_v34  ;;  %v4212_v36 = vpop.f32.mrb[169].mxu1  ;;  %v4132_v11 = vpop.f32.mrb[170].mxu0 }
 0x249   :  { %v4213_v42 = vadd.f32 %v4212_v36, %v4211_v13  ;;  %v4214_v40 = vpop.f32.mrb[170].mxu1  ;;  %v4133_v52 = vpop.f32.mrb[171].mxu0 }
 0x24a   :  { %v3551_v8 = vpack.c.bf16 %v3047_v35, %v3046_v49  ;;  %v2897_v47 = vadd.f32 %v4131_v50, %v5461_v2  ;;  %v4134_v53 = vadd.f32 %v4133_v52, %v4132_v11  ;;  %v4215_v54 = vpop.f32.mrb[171].mxu1 }
 0x24b   :  { %v4216_v19 = vadd.f32 %v4215_v54, %v4214_v40 }
 0x24c   :  { %3565 = vst [vmem:[%s5526_s3 + $0x40] sm:$0xff] %v3551_v8   ;;  %v3017_v37 = vadd.f32 %v4213_v42, %v2897_v47  ;;  %v2900_v43 = vadd.f32 %v4134_v53, %v5464_v4 }
 0x24e   :  { %v3020_v55 = vadd.f32 %v4216_v19, %v2900_v43  ;;  %v4135_v56 = vpop.f32.mrb[172].mxu0  ;;  %v3048_v44 = vmax.f32 %v3017_v37, 0.0 }
 0x24f   :  { %v4217_v16 = vpop.f32.mrb[172].mxu1  ;;  %v4136_v57 = vpop.f32.mrb[173].mxu0 }
 0x250   :  { %v3049_v0 = vmax.f32 %v3020_v55, 0.0  ;;  %v4137_v1 = vadd.f32 %v4136_v57, %v4135_v56  ;;  %v4218_v61 = vpop.f32.mrb[173].mxu1  ;;  %v4138_v58 = vpop.f32.mrb[174].mxu0 }
 0x251   :  { %v4219_v2 = vadd.f32 %v4218_v61, %v4217_v16  ;;  %v4220_v60 = vpop.f32.mrb[174].mxu1  ;;  %v4139_v41 = vpop.f32.mrb[175].mxu0 }
 0x252   :  { %v3556_v6 = vpack.c.bf16 %v3049_v0, %v3048_v44  ;;  %v2905_v23 = vadd.f32 %v4137_v1, %v5467_v12  ;;  %v4221_v33 = vpop.f32.mrb[175].mxu1 }
 0x254   :  { %3566 = vst [vmem:[%s5526_s3 + $0x48] sm:$0xff] %v3556_v6   ;;  %v3025_v4 = vadd.f32 %v4219_v2, %v2905_v23 }
 0x256   :  { %v3050_v3 = vmax.f32 %v3025_v4, 0.0 }
 0x258   :  { %v3507_v5 = vpack.c.bf16 %v3050_v3, %v3050_v3 }
 0x25a   :  { %3156 = vst [vmem:[%s5526_s3 + $0x50] sm:$0x1] %v3507_v5 }

// kernel: cnn_policy_forward.7
= control target key start
LH: loop header
LB: loop body
LE: loop exit
PB: predicated region body
PF: predicated region fallthrough
CT: control target
= control target key end

     0   :  { %v827_v38 = vlaneseq  ;;  %v10473_v39 = vmov 1966171168   ;;  %s13836_s0 = inlined_call_operand.vmem [shape: bf16[2,6272], index: 0, kind: input, shape index: {}]   ;;  %s13837_s1 = inlined_call_operand.vmem [shape: bf16[6272,256], index: 1, kind: input, shape index: {}]   ;;  %s13838_s2 = inlined_call_operand.vmem [shape: f32[1,256], index: 2, kind: input, shape index: {}]   ;;  %s13839_s3 = inlined_call_operand.vmem [shape: bf16[256,448], index: 3, kind: input, shape index: {}]   ;;  %s13840_s4 = inlined_call_operand.vmem [shape: f32[1,448], index: 4, kind: input, shape index: {}]   ;;  %s13841_s5 = inlined_call_operand.vmem [shape: bf16[448,448], index: 5, kind: input, shape index: {}]   ;;  %s13842_s6 = inlined_call_operand.vmem [shape: f32[1,448], index: 6, kind: input, shape index: {}]   ;;  %s13843_s7 = inlined_call_operand.vmem [shape: bf16[448,128], index: 7, kind: input, shape index: {}]   ;;  %s13844_s8 = inlined_call_operand.vmem [shape: f32[1,128], index: 8, kind: input, shape index: {}]   ;;  %s13845_s9 = inlined_call_operand.hbm [shape: f32[2,128], index: 9, kind: output, shape index: {}]  }
   0x1   :  { %v8971_v0 = vld [vmem:[%s13837_s1 + $0x4] ss:$8 sps:$4 sm:$0xff]   ;;  %v8975_v2 = vld [vmem:[%s13837_s1] ss:$8 sps:$4 sm:$0xff]   ;;  %v8977_v4 = vld [vmem:[%s13837_s1 + $0x14] ss:$8 sps:$4 sm:$0xff]   ;;  %v846_v40 = vunpack.c.l.s4 %v10473_v39 }
   0x2   :  { %v8973_v1 = vld [vmem:[%s13837_s1 + $0x904] ss:$8 sps:$4 sm:$0xff]   ;;  %5121 = vmatprep.subr.bf16.mxu1 %v8971_v0  ;;  %v8976_v3 = vld [vmem:[%s13837_s1 + $0x900] ss:$8 sps:$4 sm:$0xff]   ;;  %v8979_v5 = vld [vmem:[%s13837_s1 + $0x914] ss:$8 sps:$4 sm:$0xff]  }
   0x3   :  { %5490 = vmatprep.subr.bf16.mxu0 %v8973_v1  ;;  %5122 = vmatpush1.bf16.msra.mxu1 %v8975_v2  ;;  %v8981_v6 = vld [vmem:[%s13837_s1 + $0x10] ss:$8 sps:$4 sm:$0xff]   ;;  %v8983_v8 = vld [vmem:[%s13837_s1 + $0x24] ss:$8 sps:$4 sm:$0xff]   ;;  %v8987_v10 = vld [vmem:[%s13837_s1 + $0x20] ss:$8 sps:$4 sm:$0xff]   ;;  %v847_v46 = vunpack.c.0.s8 %v846_v40 }
   0x4   :  { %5491 = vmatpush1.bf16.msra.mxu0 %v8976_v3  ;;  %5123 = vmatprep.subr.bf16.mxu1 %v8977_v4  ;;  %v8982_v7 = vld [vmem:[%s13837_s1 + $0x910] ss:$8 sps:$4 sm:$0xff]   ;;  %v8985_v9 = vld [vmem:[%s13837_s1 + $0x924] ss:$8 sps:$4 sm:$0xff]   ;;  %v8988_v11 = vld [vmem:[%s13837_s1 + $0x920] ss:$8 sps:$4 sm:$0xff]  }
   0x5   :  { %5492 = vmatprep.subr.bf16.mxu0 %v8979_v5  ;;  %v8989_v12 = vld [vmem:[%s13837_s1 + $0x34] ss:$8 sps:$4 sm:$0xff]   ;;  %v8993_v14 = vld [vmem:[%s13837_s1 + $0x30] ss:$8 sps:$4 sm:$0xff]   ;;  %v8995_v16 = vld [vmem:[%s13837_s1 + $0x44] ss:$8 sps:$4 sm:$0xff]  }
   0x6   :  { %v8991_v13 = vld [vmem:[%s13837_s1 + $0x934] ss:$8 sps:$4 sm:$0xff]   ;;  %v8994_v15 = vld [vmem:[%s13837_s1 + $0x930] ss:$8 sps:$4 sm:$0xff]   ;;  %v8997_v17 = vld [vmem:[%s13837_s1 + $0x944] ss:$8 sps:$4 sm:$0xff]  }
   0x7   :  { %5124 = vmatpush1.bf16.msra.mxu1 %v8981_v6  ;;  %v8999_v18 = vld [vmem:[%s13837_s1 + $0x40] ss:$8 sps:$4 sm:$0xff]   ;;  %v9001_v20 = vld [vmem:[%s13837_s1 + $0x54] ss:$8 sps:$4 sm:$0xff]   ;;  %v9005_v22 = vld [vmem:[%s13837_s1 + $0x50] ss:$8 sps:$4 sm:$0xff]  }
   0x8   :  { %5493 = vmatpush1.bf16.msra.mxu0 %v8982_v7  ;;  %5125 = vmatprep.subr.bf16.mxu1 %v8983_v8  ;;  %v9000_v19 = vld [vmem:[%s13837_s1 + $0x940] ss:$8 sps:$4 sm:$0xff]   ;;  %v9003_v21 = vld [vmem:[%s13837_s1 + $0x954] ss:$8 sps:$4 sm:$0xff]   ;;  %v9006_v23 = vld [vmem:[%s13837_s1 + $0x950] ss:$8 sps:$4 sm:$0xff]  }
   0x9   :  { %5494 = vmatprep.subr.bf16.mxu0 %v8985_v9  ;;  %v9007_v24 = vld [vmem:[%s13837_s1 + $0x64] ss:$8 sps:$4 sm:$0xff]   ;;  %v9011_v26 = vld [vmem:[%s13837_s1 + $0x60] ss:$8 sps:$4 sm:$0xff]   ;;  %v9013_v28 = vld [vmem:[%s13837_s1 + $0x74] ss:$8 sps:$4 sm:$0xff]  }
   0xa   :  { %v9009_v25 = vld [vmem:[%s13837_s1 + $0x964] ss:$8 sps:$4 sm:$0xff]   ;;  %v9012_v27 = vld [vmem:[%s13837_s1 + $0x960] ss:$8 sps:$4 sm:$0xff]   ;;  %v9015_v29 = vld [vmem:[%s13837_s1 + $0x974] ss:$8 sps:$4 sm:$0xff]  }
   0xb   :  { %5126 = vmatpush1.bf16.msra.mxu1 %v8987_v10  ;;  %v9017_v30 = vld [vmem:[%s13837_s1 + $0x70] ss:$8 sps:$4 sm:$0xff]   ;;  %v9019_v32 = vld [vmem:[%s13837_s1 + $0x84] ss:$8 sps:$4 sm:$0xff]   ;;  %v9023_v34 = vld [vmem:[%s13837_s1 + $0x80] ss:$8 sps:$4 sm:$0xff]  }
   0xc   :  { %5495 = vmatpush1.bf16.msra.mxu0 %v8988_v11  ;;  %5127 = vmatprep.subr.bf16.mxu1 %v8989_v12  ;;  %v9018_v31 = vld [vmem:[%s13837_s1 + $0x970] ss:$8 sps:$4 sm:$0xff]   ;;  %v9021_v33 = vld [vmem:[%s13837_s1 + $0x984] ss:$8 sps:$4 sm:$0xff]   ;;  %v9024_v35 = vld [vmem:[%s13837_s1 + $0x980] ss:$8 sps:$4 sm:$0xff]  }
   0xd   :  { %5496 = vmatprep.subr.bf16.mxu0 %v8991_v13  ;;  %v9025_v36 = vld [vmem:[%s13837_s1 + $0x94] ss:$8 sps:$4 sm:$0xff]   ;;  %v9029_v41 = vld [vmem:[%s13837_s1 + $0x90] ss:$8 sps:$4 sm:$0xff]   ;;  %v9031_v43 = vld [vmem:[%s13837_s1 + $0xa4] ss:$8 sps:$4 sm:$0xff]  }
   0xe   :  { %v9027_v37 = vld [vmem:[%s13837_s1 + $0x994] ss:$8 sps:$4 sm:$0xff]   ;;  %v9030_v42 = vld [vmem:[%s13837_s1 + $0x990] ss:$8 sps:$4 sm:$0xff]   ;;  %v9033_v44 = vld [vmem:[%s13837_s1 + $0x9a4] ss:$8 sps:$4 sm:$0xff]  }
   0xf   :  { %5128 = vmatpush1.bf16.msra.mxu1 %v8993_v14  ;;  %v10652_v45 = vshrl.u32 %v827_v38, 7  ;;  %v9035_v47 = vld [vmem:[%s13837_s1 + $0xa0] ss:$8 sps:$4 sm:$0xff]   ;;  %v9037_v49 = vld [vmem:[%s13837_s1 + $0xb4] ss:$8 sps:$4 sm:$0xff]  }
  0x10   :  { %5497 = vmatpush1.bf16.msra.mxu0 %v8994_v15  ;;  %5129 = vmatprep.subr.bf16.mxu1 %v8995_v16  ;;  %v9036_v48 = vld [vmem:[%s13837_s1 + $0x9a0] ss:$8 sps:$4 sm:$0xff]   ;;  %v9039_v50 = vld [vmem:[%s13837_s1 + $0x9b4] ss:$8 sps:$4 sm:$0xff]   ;;  %v9041_v53 = vld [vmem:[%s13837_s1 + $0xb0] ss:$8 sps:$4 sm:$0xff]  }
  0x11   :  { %5498 = vmatprep.subr.bf16.mxu0 %v8997_v17  ;;  %v10667_v51 = vsub.s32 %v847_v46, %v10652_v45  ;;  %v10672_v52 = vld [vmem:[%s13836_s0] sm:$0xff]  ;;  %v9042_v55 = vld [vmem:[%s13837_s1 + $0x9b0] ss:$8 sps:$4 sm:$0xff]   ;;  %v9049_v1 = vld [vmem:[%s13837_s1 + $0xd4] ss:$8 sps:$4 sm:$0xff]  }
  0x12   :  { %v36_v56 = vld [vmem:[%s13836_s0 + $0x10] sm:$0xff]  ;;  %v9043_v57 = vld [vmem:[%s13837_s1 + $0xc4] ss:$8 sps:$4 sm:$0xff]   ;;  %v9047_v63 = vld [vmem:[%s13837_s1 + $0xc0] ss:$8 sps:$4 sm:$0xff]  }
  0x13   :  { %5130 = vmatpush1.bf16.msra.mxu1 %v8999_v18  ;;  %v851_v54 = vrot.slane %v10672_v52, %v10667_v51  ;;  %v9045_v58 = vld [vmem:[%s13837_s1 + $0x9c4] ss:$8 sps:$4 sm:$0xff]   ;;  %v949_v60 = vrot.slane %v36_v56, %v10667_v51  ;;  %v9048_v0 = vld [vmem:[%s13837_s1 + $0x9c0] ss:$8 sps:$4 sm:$0xff]   ;;  %v9051_v2 = vld [vmem:[%s13837_s1 + $0x9d4] ss:$8 sps:$4 sm:$0xff]   ;;  %v942_v9 = vcombine.high %v36_v56, %v36_v56 }
  0x14   :  { %5499 = vmatpush1.bf16.msra.mxu0 %v9000_v19  ;;  %5131 = vmatprep.subr.bf16.mxu1 %v9001_v20  ;;  %v9053_v5 = vld [vmem:[%s13837_s1 + $0xd0] ss:$8 sps:$4 sm:$0xff]   ;;  %v9055_v7 = vld [vmem:[%s13837_s1 + $0xe4] ss:$8 sps:$4 sm:$0xff]   ;;  %v9059_v10 = vld [vmem:[%s13837_s1 + $0xe0] ss:$8 sps:$4 sm:$0xff]  }
  0x15   :  { %5500 = vmatprep.subr.bf16.mxu0 %v9003_v21  ;;  %v859_v59 = vcombine.high %v851_v54, %v851_v54  ;;  %v957_v62 = vcombine.high %v949_v60, %v949_v60  ;;  %v9054_v6 = vld [vmem:[%s13837_s1 + $0x9d0] ss:$8 sps:$4 sm:$0xff]   ;;  %v9057_v8 = vld [vmem:[%s13837_s1 + $0x9e4] ss:$8 sps:$4 sm:$0xff]   ;;  %v9060_v11 = vld [vmem:[%s13837_s1 + $0x9e0] ss:$8 sps:$4 sm:$0xff]   ;;  %v10738_v14 = vrot.slane %v942_v9, %v10667_v51  ;;  %v10741_v15 = vrot.slane %v949_v60, %v10667_v51 }
  0x16   :  { %v9061_v12 = vld [vmem:[%s13837_s1 + $0xf4] ss:$8 sps:$4 sm:$0xff]   ;;  %v9065_v16 = vld [vmem:[%s13837_s1 + $0xf0] ss:$8 sps:$4 sm:$0xff]   ;;  %v9070_v18 = vld [vmem:[%s13837_s1 + $0x104] ss:$8 sps:$4 sm:$0xff]   ;;  %v10758_v21 = vrot.slane %v851_v54, %v10667_v51 }
  0x17   :  { %5132 = vmatpush1.bf16.msra.mxu1 %v9005_v22  ;;  %v10693_v61 = vrot.slane %v859_v59, %v10667_v51  ;;  %v10708_v3 = vrot.slane %v957_v62, %v10667_v51  ;;  %v9063_v13 = vld [vmem:[%s13837_s1 + $0x9f4] ss:$8 sps:$4 sm:$0xff]   ;;  %v9066_v17 = vld [vmem:[%s13837_s1 + $0x9f0] ss:$8 sps:$4 sm:$0xff]   ;;  %v9074_v19 = vld [vmem:[%s13837_s1 + $0xa04] ss:$8 sps:$4 sm:$0xff]   ;;  %v958_v20 = vcombine.high %v10738_v14, %v10738_v14  ;;  %v987_v22 = vcombine.high %v10741_v15, %v10741_v15 }
  0x18   :  { %5501 = vmatpush1.bf16.msra.mxu0 %v9006_v23  ;;  %5133 = vmatprep.subr.bf16.mxu1 %v9007_v24  ;;  %v9068_v23 = vld [vmem:[%s13837_s1 + $0x100] ss:$8 sps:$4 sm:$0xff]   ;;  %v9090_v38 = vld [vmem:[%s13837_s1 + $0xa30] ss:$8 sps:$4 sm:$0xff]   ;;  %v9095_v39 = vld [vmem:[%s13837_s1 + $0x144] ss:$8 sps:$4 sm:$0xff]  }
  0x19   :  { %5502 = vmatprep.subr.bf16.mxu0 %v9009_v25  ;;  %5153 = vmatprep.mubr.bf16.mxu1 %v10693_v61  ;;  %v989_v4 = vcombine.high %v10708_v3, %v10708_v3  ;;  %v9072_v24 = vld [vmem:[%s13837_s1 + $0xa00] ss:$8 sps:$4 sm:$0xff]   ;;  %v9077_v25 = vld [vmem:[%s13837_s1 + $0x114] ss:$8 sps:$4 sm:$0xff]   ;;  %v9098_v40 = vld [vmem:[%s13837_s1 + $0xa44] ss:$8 sps:$4 sm:$0xff]  }
  0x1a   :  { %v9099_v46 = vld [vmem:[%s13837_s1 + $0x150] ss:$8 sps:$4 sm:$0xff]   ;;  %v9113_v54 = vld [vmem:[%s13837_s1 + $0x174] ss:$8 sps:$4 sm:$0xff]   ;;  %v9122_v59 = vld [vmem:[%s13837_s1 + $0xa84] ss:$8 sps:$4 sm:$0xff]  }
  0x1b   :  { %5134 = vmatpush1.bf16.msra.mxu1 %v9011_v26  ;;  %5522 = vmatprep.mubr.bf16.mxu0 %v989_v4  ;;  %v9080_v26 = vld [vmem:[%s13837_s1 + $0xa14] ss:$8 sps:$4 sm:$0xff]   ;;  %v9111_v56 = vld [vmem:[%s13837_s1 + $0x170] ss:$8 sps:$4 sm:$0xff]   ;;  %v9117_v60 = vld [vmem:[%s13837_s1 + $0x180] ss:$8 sps:$4 sm:$0xff]  }
  0x1c   :  { %5503 = vmatpush1.bf16.msra.mxu0 %v9012_v27  ;;  %5135 = vmatprep.subr.bf16.mxu1 %v9013_v28  ;;  %v891_v27 = vcombine.high %v10693_v61, %v10693_v61  ;;  %v10777_v28 = vrot.slane %v958_v20, %v10667_v51  ;;  %v9120_v61 = vld [vmem:[%s13837_s1 + $0xa80] ss:$8 sps:$4 sm:$0xff]   ;;  %v9125_v62 = vld [vmem:[%s13837_s1 + $0x194] ss:$8 sps:$4 sm:$0xff]   ;;  %v9134_v4 = vld [vmem:[%s13837_s1 + $0xaa4] ss:$8 sps:$4 sm:$0xff]  }
  0x1d   :  { %5504 = vmatprep.subr.bf16.mxu0 %v9015_v29  ;;  %v9075_v29 = vld [vmem:[%s13837_s1 + $0x110] ss:$8 sps:$4 sm:$0xff]  }
  0x1e   :  { %v9135_v9 = vld [vmem:[%s13837_s1 + $0x1b0] ss:$8 sps:$4 sm:$0xff]  }
  0x1f   :  { %5136 = vmatpush1.bf16.msra.mxu1 %v9017_v30  ;;  %v9078_v30 = vld [vmem:[%s13837_s1 + $0xa10] ss:$8 sps:$4 sm:$0xff]  }
  0x20   :  { %5505 = vmatpush1.bf16.msra.mxu0 %v9018_v31  ;;  %5137 = vmatprep.subr.bf16.mxu1 %v9019_v32  ;;  %v9083_v31 = vld [vmem:[%s13837_s1 + $0x124] ss:$8 sps:$4 sm:$0xff]   ;;  %v9150_v20 = vld [vmem:[%s13837_s1 + $0xad0] ss:$8 sps:$4 sm:$0xff]  }
  0x21   :  { %5506 = vmatprep.subr.bf16.mxu0 %v9021_v33  ;;  %v9086_v32 = vld [vmem:[%s13837_s1 + $0xa24] ss:$8 sps:$4 sm:$0xff]   ;;  %v9081_v33 = vld [vmem:[%s13837_s1 + $0x120] ss:$8 sps:$4 sm:$0xff]  }
  0x23   :  { %5138 = vmatpush1.bf16.msra.mxu1 %v9023_v34  ;;  %v9084_v34 = vld [vmem:[%s13837_s1 + $0xa20] ss:$8 sps:$4 sm:$0xff]  }
  0x24   :  { %5507 = vmatpush1.bf16.msra.mxu0 %v9024_v35  ;;  %5139 = vmatprep.subr.bf16.mxu1 %v9025_v36  ;;  %v9089_v35 = vld [vmem:[%s13837_s1 + $0x134] ss:$8 sps:$4 sm:$0xff]  }
  0x25   :  { %5508 = vmatprep.subr.bf16.mxu0 %v9027_v37  ;;  %v9092_v36 = vld [vmem:[%s13837_s1 + $0xa34] ss:$8 sps:$4 sm:$0xff]   ;;  %v9087_v37 = vld [vmem:[%s13837_s1 + $0x130] ss:$8 sps:$4 sm:$0xff]  }
  0x27   :  { %5140 = vmatpush1.bf16.msra.mxu1 %v9029_v41  ;;  %v9093_v41 = vld [vmem:[%s13837_s1 + $0x140] ss:$8 sps:$4 sm:$0xff]  }
  0x28   :  { %5509 = vmatpush1.bf16.msra.mxu0 %v9030_v42  ;;  %5141 = vmatprep.subr.bf16.mxu1 %v9031_v43  ;;  %v9096_v42 = vld [vmem:[%s13837_s1 + $0xa40] ss:$8 sps:$4 sm:$0xff]   ;;  %v9101_v43 = vld [vmem:[%s13837_s1 + $0x154] ss:$8 sps:$4 sm:$0xff]  }
  0x29   :  { %5510 = vmatprep.subr.bf16.mxu0 %v9033_v44  ;;  %v9104_v44 = vld [vmem:[%s13837_s1 + $0xa54] ss:$8 sps:$4 sm:$0xff]  }
  0x2b   :  { %5142 = vmatpush1.bf16.msra.mxu1 %v9035_v47  ;;  %v9102_v47 = vld [vmem:[%s13837_s1 + $0xa50] ss:$8 sps:$4 sm:$0xff]  }
  0x2c   :  { %5511 = vmatpush1.bf16.msra.mxu0 %v9036_v48  ;;  %5143 = vmatprep.subr.bf16.mxu1 %v9037_v49  ;;  %v9107_v48 = vld [vmem:[%s13837_s1 + $0x164] ss:$8 sps:$4 sm:$0xff]  }
  0x2d   :  { %5512 = vmatprep.subr.bf16.mxu0 %v9039_v50  ;;  %v9110_v49 = vld [vmem:[%s13837_s1 + $0xa64] ss:$8 sps:$4 sm:$0xff]   ;;  %v9105_v50 = vld [vmem:[%s13837_s1 + $0x160] ss:$8 sps:$4 sm:$0xff]  }
  0x2f   :  { %5144 = vmatpush1.bf16.msra.mxu1 %v9041_v53  ;;  %v9108_v53 = vld [vmem:[%s13837_s1 + $0xa60] ss:$8 sps:$4 sm:$0xff]  }
  0x30   :  { %5513 = vmatpush1.bf16.msra.mxu0 %v9042_v55  ;;  %5145 = vmatprep.subr.bf16.mxu1 %v9043_v57  ;;  %v9116_v55 = vld [vmem:[%s13837_s1 + $0xa74] ss:$8 sps:$4 sm:$0xff]   ;;  %v9114_v57 = vld [vmem:[%s13837_s1 + $0xa70] ss:$8 sps:$4 sm:$0xff]  }
  0x31   :  { %5514 = vmatprep.subr.bf16.mxu0 %v9045_v58  ;;  %v9119_v58 = vld [vmem:[%s13837_s1 + $0x184] ss:$8 sps:$4 sm:$0xff]  }
  0x33   :  { %5146 = vmatpush1.bf16.msra.mxu1 %v9047_v63  ;;  %v9128_v63 = vld [vmem:[%s13837_s1 + $0xa94] ss:$8 sps:$4 sm:$0xff]  }
  0x34   :  { %5515 = vmatpush1.bf16.msra.mxu0 %v9048_v0  ;;  %5147 = vmatprep.subr.bf16.mxu1 %v9049_v1  ;;  %v9123_v0 = vld [vmem:[%s13837_s1 + $0x190] ss:$8 sps:$4 sm:$0xff]  }
  0x35   :  { %5516 = vmatprep.subr.bf16.mxu0 %v9051_v2  ;;  %v9126_v1 = vld [vmem:[%s13837_s1 + $0xa90] ss:$8 sps:$4 sm:$0xff]   ;;  %v9131_v2 = vld [vmem:[%s13837_s1 + $0x1a4] ss:$8 sps:$4 sm:$0xff]  }
  0x37   :  { %5148 = vmatpush1.bf16.msra.mxu1 %v9053_v5  ;;  %v9129_v5 = vld [vmem:[%s13837_s1 + $0x1a0] ss:$8 sps:$4 sm:$0xff]  }
  0x38   :  { %5517 = vmatpush1.bf16.msra.mxu0 %v9054_v6  ;;  %5149 = vmatprep.subr.bf16.mxu1 %v9055_v7  ;;  %v9132_v6 = vld [vmem:[%s13837_s1 + $0xaa0] ss:$8 sps:$4 sm:$0xff]   ;;  %v9137_v7 = vld [vmem:[%s13837_s1 + $0x1b4] ss:$8 sps:$4 sm:$0xff]  }
  0x39   :  { %5518 = vmatprep.subr.bf16.mxu0 %v9057_v8  ;;  %v9140_v8 = vld [vmem:[%s13837_s1 + $0xab4] ss:$8 sps:$4 sm:$0xff]  }
  0x3b   :  { %5150 = vmatpush1.bf16.msra.mxu1 %v9059_v10  ;;  %v9138_v10 = vld [vmem:[%s13837_s1 + $0xab0] ss:$8 sps:$4 sm:$0xff]  }
  0x3c   :  { %5519 = vmatpush1.bf16.msra.mxu0 %v9060_v11  ;;  %5151 = vmatprep.subr.bf16.mxu1 %v9061_v12  ;;  %v9143_v11 = vld [vmem:[%s13837_s1 + $0x1c4] ss:$8 sps:$4 sm:$0xff]  }
  0x3d   :  { %5520 = vmatprep.subr.bf16.mxu0 %v9063_v13  ;;  %v9146_v12 = vld [vmem:[%s13837_s1 + $0xac4] ss:$8 sps:$4 sm:$0xff]   ;;  %v9141_v13 = vld [vmem:[%s13837_s1 + $0x1c0] ss:$8 sps:$4 sm:$0xff]  }
  0x3f   :  { %5152 = vmatpush1.bf16.msra.mxu1 %v9065_v16  ;;  %v9144_v16 = vld [vmem:[%s13837_s1 + $0xac0] ss:$8 sps:$4 sm:$0xff]  }
  0x40   :  { %5521 = vmatpush1.bf16.msra.mxu0 %v9066_v17  ;;  %5162 = vmatprep.subr.bf16.mxu1 %v9070_v18  ;;  %v9149_v17 = vld [vmem:[%s13837_s1 + $0x1d4] ss:$8 sps:$4 sm:$0xff]  }
  0x41   :  { %5531 = vmatprep.subr.bf16.mxu0 %v9074_v19  ;;  %v9152_v18 = vld [vmem:[%s13837_s1 + $0xad4] ss:$8 sps:$4 sm:$0xff]   ;;  %v9147_v19 = vld [vmem:[%s13837_s1 + $0x1d0] ss:$8 sps:$4 sm:$0xff]  }
  0x42   :  { %5154 = vmatmul.mubr.bf16.vlgmr.msra.gmra.mrb[0].mxu1 %v10758_v21 }
  0x43   :  { %5523 = vmatmul.mubr.bf16.vlgmr.msra.gmra.mrb[0].mxu0 %v987_v22  ;;  %5163 = vmatpush1.bf16.msra.mxu1 %v9068_v23  ;;  %v9155_v22 = vld [vmem:[%s13837_s1 + $0x1e4] ss:$8 sps:$4 sm:$0xff]  }
  0x44   :  { %5532 = vmatpush1.bf16.msra.mxu0 %v9072_v24  ;;  %5164 = vmatprep.subr.bf16.mxu1 %v9077_v25  ;;  %v9158_v23 = vld [vmem:[%s13837_s1 + $0xae4] ss:$8 sps:$4 sm:$0xff]   ;;  %v844_v24 = vcombine.high %v10672_v52, %v10672_v52  ;;  %v9153_v25 = vld [vmem:[%s13837_s1 + $0x1e0] ss:$8 sps:$4 sm:$0xff]   ;;  %v9164_v52 = vld [vmem:[%s13837_s1 + $0xaf4] ss:$8 sps:$4 sm:$0xff]  }
  0x45   :  { %5533 = vmatprep.subr.bf16.mxu0 %v9080_v26  ;;  %5194 = vmatprep.mubr.bf16.mxu1 %v891_v27  ;;  %v9156_v26 = vld [vmem:[%s13837_s1 + $0xae0] ss:$8 sps:$4 sm:$0xff]   ;;  %v9161_v27 = vld [vmem:[%s13837_s1 + $0x1f4] ss:$8 sps:$4 sm:$0xff]  }
  0x46   :  { %5563 = vmatprep.mubr.bf16.mxu0 %v10777_v28 }
  0x47   :  { %5165 = vmatpush1.bf16.msra.mxu1 %v9075_v29  ;;  %v10952_v29 = vrot.slane %v844_v24, %v10667_v51  ;;  %v9234_v24 = vld [vmem:[%s13837_s1 + $0xbb0] ss:$8 sps:$4 sm:$0xff]  }
  0x48   :  { %5534 = vmatpush1.bf16.msra.mxu0 %v9078_v30  ;;  %5166 = vmatprep.subr.bf16.mxu1 %v9083_v31  ;;  %v9159_v30 = vld [vmem:[%s13837_s1 + $0x1f0] ss:$8 sps:$4 sm:$0xff]  }
  0x49   :  { %5535 = vmatprep.subr.bf16.mxu0 %v9086_v32  ;;  %v9162_v31 = vld [vmem:[%s13837_s1 + $0xaf0] ss:$8 sps:$4 sm:$0xff]   ;;  %v9167_v32 = vld [vmem:[%s13837_s1 + $0x204] ss:$8 sps:$4 sm:$0xff]  }
  0x4b   :  { %5167 = vmatpush1.bf16.msra.mxu1 %v9081_v33  ;;  %v9170_v33 = vld [vmem:[%s13837_s1 + $0xb04] ss:$8 sps:$4 sm:$0xff]  }
  0x4c   :  { %5536 = vmatpush1.bf16.msra.mxu0 %v9084_v34  ;;  %5168 = vmatprep.subr.bf16.mxu1 %v9089_v35  ;;  %v860_v34 = vcombine.high %v10952_v29, %v10952_v29  ;;  %v889_v35 = vcombine.high %v10758_v21, %v10758_v21  ;;  %v9173_v21 = vld [vmem:[%s13837_s1 + $0x214] ss:$8 sps:$4 sm:$0xff]  }
  0x4d   :  { %5537 = vmatprep.subr.bf16.mxu0 %v9092_v36  ;;  %v10972_v36 = vrot.slane %v10738_v14, %v10667_v51  ;;  %v9176_v14 = vld [vmem:[%s13837_s1 + $0xb14] ss:$8 sps:$4 sm:$0xff]  }
  0x4f   :  { %5169 = vmatpush1.bf16.msra.mxu1 %v9087_v37  ;;  %v9165_v37 = vld [vmem:[%s13837_s1 + $0x200] ss:$8 sps:$4 sm:$0xff]  }
  0x50   :  { %5538 = vmatpush1.bf16.msra.mxu0 %v9090_v38  ;;  %5170 = vmatprep.subr.bf16.mxu1 %v9095_v39  ;;  %v9168_v38 = vld [vmem:[%s13837_s1 + $0xb00] ss:$8 sps:$4 sm:$0xff]   ;;  %v10987_v39 = vrot.slane %v860_v34, %v10667_v51  ;;  %v9251_v34 = vld [vmem:[%s13837_s1 + $0x2e4] ss:$8 sps:$4 sm:$0xff]  }
  0x51   :  { %5539 = vmatprep.subr.bf16.mxu0 %v9098_v40  ;;  %v990_v40 = vcombine.high %v10777_v28, %v10777_v28  ;;  %v9182_v28 = vld [vmem:[%s13837_s1 + $0xb24] ss:$8 sps:$4 sm:$0xff]  }
  0x53   :  { %5171 = vmatpush1.bf16.msra.mxu1 %v9093_v41  ;;  %v9171_v41 = vld [vmem:[%s13837_s1 + $0x210] ss:$8 sps:$4 sm:$0xff]  }
  0x54   :  { %5540 = vmatpush1.bf16.msra.mxu0 %v9096_v42  ;;  %5172 = vmatprep.subr.bf16.mxu1 %v9101_v43  ;;  %v9174_v42 = vld [vmem:[%s13837_s1 + $0xb10] ss:$8 sps:$4 sm:$0xff]   ;;  %v9179_v43 = vld [vmem:[%s13837_s1 + $0x224] ss:$8 sps:$4 sm:$0xff]  }
  0x55   :  { %5541 = vmatprep.subr.bf16.mxu0 %v9104_v44  ;;  %v9177_v44 = vld [vmem:[%s13837_s1 + $0x220] ss:$8 sps:$4 sm:$0xff]  }
  0x57   :  { %5173 = vmatpush1.bf16.msra.mxu1 %v9099_v46  ;;  %v9180_v46 = vld [vmem:[%s13837_s1 + $0xb20] ss:$8 sps:$4 sm:$0xff]  }
  0x58   :  { %5542 = vmatpush1.bf16.msra.mxu0 %v9102_v47  ;;  %5174 = vmatprep.subr.bf16.mxu1 %v9107_v48  ;;  %v9185_v47 = vld [vmem:[%s13837_s1 + $0x234] ss:$8 sps:$4 sm:$0xff]  }
  0x59   :  { %5543 = vmatprep.subr.bf16.mxu0 %v9110_v49  ;;  %v9188_v48 = vld [vmem:[%s13837_s1 + $0xb34] ss:$8 sps:$4 sm:$0xff]   ;;  %v9183_v49 = vld [vmem:[%s13837_s1 + $0x230] ss:$8 sps:$4 sm:$0xff]  }
  0x5b   :  { %5175 = vmatpush1.bf16.msra.mxu1 %v9105_v50  ;;  %v9186_v50 = vld [vmem:[%s13837_s1 + $0xb30] ss:$8 sps:$4 sm:$0xff]  }
  0x5c   :  { %5544 = vmatpush1.bf16.msra.mxu0 %v9108_v53  ;;  %5176 = vmatprep.subr.bf16.mxu1 %v9113_v54  ;;  %v9191_v53 = vld [vmem:[%s13837_s1 + $0x244] ss:$8 sps:$4 sm:$0xff]  }
  0x5d   :  { %5545 = vmatprep.subr.bf16.mxu0 %v9116_v55  ;;  %v9194_v54 = vld [vmem:[%s13837_s1 + $0xb44] ss:$8 sps:$4 sm:$0xff]   ;;  %v9189_v55 = vld [vmem:[%s13837_s1 + $0x240] ss:$8 sps:$4 sm:$0xff]  }
  0x5f   :  { %5177 = vmatpush1.bf16.msra.mxu1 %v9111_v56  ;;  %v9192_v56 = vld [vmem:[%s13837_s1 + $0xb40] ss:$8 sps:$4 sm:$0xff]  }
  0x60   :  { %5546 = vmatpush1.bf16.msra.mxu0 %v9114_v57  ;;  %5178 = vmatprep.subr.bf16.mxu1 %v9119_v58  ;;  %v9197_v57 = vld [vmem:[%s13837_s1 + $0x254] ss:$8 sps:$4 sm:$0xff]  }
  0x61   :  { %5547 = vmatprep.subr.bf16.mxu0 %v9122_v59  ;;  %v9200_v58 = vld [vmem:[%s13837_s1 + $0xb54] ss:$8 sps:$4 sm:$0xff]   ;;  %v9195_v59 = vld [vmem:[%s13837_s1 + $0x250] ss:$8 sps:$4 sm:$0xff]  }
  0x63   :  { %5179 = vmatpush1.bf16.msra.mxu1 %v9117_v60  ;;  %v9198_v60 = vld [vmem:[%s13837_s1 + $0xb50] ss:$8 sps:$4 sm:$0xff]  }
  0x64   :  { %5548 = vmatpush1.bf16.msra.mxu0 %v9120_v61  ;;  %5180 = vmatprep.subr.bf16.mxu1 %v9125_v62  ;;  %v9203_v61 = vld [vmem:[%s13837_s1 + $0x264] ss:$8 sps:$4 sm:$0xff]  }
  0x65   :  { %5549 = vmatprep.subr.bf16.mxu0 %v9128_v63  ;;  %v9206_v62 = vld [vmem:[%s13837_s1 + $0xb64] ss:$8 sps:$4 sm:$0xff]   ;;  %v9201_v63 = vld [vmem:[%s13837_s1 + $0x260] ss:$8 sps:$4 sm:$0xff]  }
  0x67   :  { %5181 = vmatpush1.bf16.msra.mxu1 %v9123_v0  ;;  %v9204_v0 = vld [vmem:[%s13837_s1 + $0xb60] ss:$8 sps:$4 sm:$0xff]  }
  0x68   :  { %5550 = vmatpush1.bf16.msra.mxu0 %v9126_v1  ;;  %5182 = vmatprep.subr.bf16.mxu1 %v9131_v2  ;;  %v9209_v1 = vld [vmem:[%s13837_s1 + $0x274] ss:$8 sps:$4 sm:$0xff]  }
  0x69   :  { %5551 = vmatprep.subr.bf16.mxu0 %v9134_v4  ;;  %v9212_v2 = vld [vmem:[%s13837_s1 + $0xb74] ss:$8 sps:$4 sm:$0xff]   ;;  %v9207_v4 = vld [vmem:[%s13837_s1 + $0x270] ss:$8 sps:$4 sm:$0xff]  }
  0x6b   :  { %5183 = vmatpush1.bf16.msra.mxu1 %v9129_v5  ;;  %v9210_v5 = vld [vmem:[%s13837_s1 + $0xb70] ss:$8 sps:$4 sm:$0xff]  }
  0x6c   :  { %5552 = vmatpush1.bf16.msra.mxu0 %v9132_v6  ;;  %5184 = vmatprep.subr.bf16.mxu1 %v9137_v7  ;;  %v9215_v6 = vld [vmem:[%s13837_s1 + $0x284] ss:$8 sps:$4 sm:$0xff]  }
  0x6d   :  { %5553 = vmatprep.subr.bf16.mxu0 %v9140_v8  ;;  %v9218_v7 = vld [vmem:[%s13837_s1 + $0xb84] ss:$8 sps:$4 sm:$0xff]   ;;  %v9213_v8 = vld [vmem:[%s13837_s1 + $0x280] ss:$8 sps:$4 sm:$0xff]  }
  0x6f   :  { %5185 = vmatpush1.bf16.msra.mxu1 %v9135_v9  ;;  %v9216_v9 = vld [vmem:[%s13837_s1 + $0xb80] ss:$8 sps:$4 sm:$0xff]  }
  0x70   :  { %5554 = vmatpush1.bf16.msra.mxu0 %v9138_v10  ;;  %5186 = vmatprep.subr.bf16.mxu1 %v9143_v11  ;;  %v9221_v10 = vld [vmem:[%s13837_s1 + $0x294] ss:$8 sps:$4 sm:$0xff]  }
  0x71   :  { %5555 = vmatprep.subr.bf16.mxu0 %v9146_v12  ;;  %v9224_v11 = vld [vmem:[%s13837_s1 + $0xb94] ss:$8 sps:$4 sm:$0xff]   ;;  %v9219_v12 = vld [vmem:[%s13837_s1 + $0x290] ss:$8 sps:$4 sm:$0xff]  }
  0x73   :  { %5187 = vmatpush1.bf16.msra.mxu1 %v9141_v13  ;;  %v9222_v13 = vld [vmem:[%s13837_s1 + $0xb90] ss:$8 sps:$4 sm:$0xff]  }
  0x74   :  { %5556 = vmatpush1.bf16.msra.mxu0 %v9144_v16  ;;  %5188 = vmatprep.subr.bf16.mxu1 %v9149_v17  ;;  %v9227_v16 = vld [vmem:[%s13837_s1 + $0x2a4] ss:$8 sps:$4 sm:$0xff]  }
  0x75   :  { %5557 = vmatprep.subr.bf16.mxu0 %v9152_v18  ;;  %v9230_v17 = vld [vmem:[%s13837_s1 + $0xba4] ss:$8 sps:$4 sm:$0xff]   ;;  %v9225_v18 = vld [vmem:[%s13837_s1 + $0x2a0] ss:$8 sps:$4 sm:$0xff]  }
  0x77   :  { %5189 = vmatpush1.bf16.msra.mxu1 %v9147_v19  ;;  %v9228_v19 = vld [vmem:[%s13837_s1 + $0xba0] ss:$8 sps:$4 sm:$0xff]  }
  0x78   :  { %5558 = vmatpush1.bf16.msra.mxu0 %v9150_v20  ;;  %5190 = vmatprep.subr.bf16.mxu1 %v9155_v22  ;;  %v9233_v20 = vld [vmem:[%s13837_s1 + $0x2b4] ss:$8 sps:$4 sm:$0xff]  }
  0x79   :  { %5559 = vmatprep.subr.bf16.mxu0 %v9158_v23  ;;  %v9236_v22 = vld [vmem:[%s13837_s1 + $0xbb4] ss:$8 sps:$4 sm:$0xff]   ;;  %v9231_v23 = vld [vmem:[%s13837_s1 + $0x2b0] ss:$8 sps:$4 sm:$0xff]  }
  0x7b   :  { %5191 = vmatpush1.bf16.msra.mxu1 %v9153_v25  ;;  %v9239_v25 = vld [vmem:[%s13837_s1 + $0x2c4] ss:$8 sps:$4 sm:$0xff]  }
  0x7c   :  { %5560 = vmatpush1.bf16.msra.mxu0 %v9156_v26  ;;  %5192 = vmatprep.subr.bf16.mxu1 %v9161_v27  ;;  %v9242_v26 = vld [vmem:[%s13837_s1 + $0xbc4] ss:$8 sps:$4 sm:$0xff]   ;;  %v9237_v27 = vld [vmem:[%s13837_s1 + $0x2c0] ss:$8 sps:$4 sm:$0xff]  }
  0x7d   :  { %5561 = vmatprep.subr.bf16.mxu0 %v9164_v52  ;;  %v9240_v52 = vld [vmem:[%s13837_s1 + $0xbc0] ss:$8 sps:$4 sm:$0xff]  }
  0x7f   :  { %5193 = vmatpush1.bf16.msra.mxu1 %v9159_v30  ;;  %v9245_v30 = vld [vmem:[%s13837_s1 + $0x2d4] ss:$8 sps:$4 sm:$0xff]  }
  0x80   :  { %5562 = vmatpush1.bf16.msra.mxu0 %v9162_v31  ;;  %5203 = vmatprep.subr.bf16.mxu1 %v9167_v32  ;;  %v9248_v31 = vld [vmem:[%s13837_s1 + $0xbd4] ss:$8 sps:$4 sm:$0xff]   ;;  %v9243_v32 = vld [vmem:[%s13837_s1 + $0x2d0] ss:$8 sps:$4 sm:$0xff]  }
  0x81   :  { %5572 = vmatprep.subr.bf16.mxu0 %v9170_v33  ;;  %v9246_v33 = vld [vmem:[%s13837_s1 + $0xbd0] ss:$8 sps:$4 sm:$0xff]  }
  0x82   :  { %5195 = vmatmul.mubr.bf16.vlgmr.msra.gmra.mrb[0].mxu1 %v889_v35  ;;  %v9254_v35 = vld [vmem:[%s13837_s1 + $0xbe4] ss:$8 sps:$4 sm:$0xff]  }
  0x83   :  { %5564 = vmatmul.mubr.bf16.vlgmr.msra.gmra.mrb[0].mxu0 %v10972_v36  ;;  %5204 = vmatpush1.bf16.msra.mxu1 %v9165_v37  ;;  %v9249_v37 = vld [vmem:[%s13837_s1 + $0x2e0] ss:$8 sps:$4 sm:$0xff]  }
  0x84   :  { %5573 = vmatpush1.bf16.msra.mxu0 %v9168_v38  ;;  %5205 = vmatprep.subr.bf16.mxu1 %v9173_v21  ;;  %v11155_v38 = vld [vmem:[%s13836_s0 + $0x18] sm:$0xff]  ;;  %v9252_v21 = vld [vmem:[%s13837_s1 + $0xbe0] ss:$8 sps:$4 sm:$0xff]  }
  0x85   :  { %5574 = vmatprep.subr.bf16.mxu0 %v9176_v14  ;;  %5235 = vmatprep.mubr.bf16.mxu1 %v10987_v39  ;;  %v9257_v14 = vld [vmem:[%s13837_s1 + $0x2f4] ss:$8 sps:$4 sm:$0xff]  }
  0x86   :  { %5604 = vmatprep.mubr.bf16.mxu0 %v990_v40  ;;  %v9260_v40 = vld [vmem:[%s13837_s1 + $0xbf4] ss:$8 sps:$4 sm:$0xff]  }
  0x87   :  { %5206 = vmatpush1.bf16.msra.mxu1 %v9171_v41  ;;  %v11168_v41 = vrot.slane %v11155_v38, %v10667_v51 }
  0x88   :  { %5575 = vmatpush1.bf16.msra.mxu0 %v9174_v42  ;;  %5207 = vmatprep.subr.bf16.mxu1 %v9179_v43  ;;  %v9255_v42 = vld [vmem:[%s13837_s1 + $0x2f0] ss:$8 sps:$4 sm:$0xff]  }
  0x89   :  { %5576 = vmatprep.subr.bf16.mxu0 %v9182_v28  ;;  %v9258_v43 = vld [vmem:[%s13837_s1 + $0xbf0] ss:$8 sps:$4 sm:$0xff]   ;;  %v9263_v28 = vld [vmem:[%s13837_s1 + $0x304] ss:$8 sps:$4 sm:$0xff]  }
  0x8b   :  { %5208 = vmatpush1.bf16.msra.mxu1 %v9177_v44  ;;  %v9266_v44 = vld [vmem:[%s13837_s1 + $0xc04] ss:$8 sps:$4 sm:$0xff]  }
  0x8c   :  { %5577 = vmatpush1.bf16.msra.mxu0 %v9180_v46  ;;  %5209 = vmatprep.subr.bf16.mxu1 %v9185_v47  ;;  %v1006_v46 = vcombine.high %v11168_v41, %v11168_v41  ;;  %v9261_v47 = vld [vmem:[%s13837_s1 + $0x300] ss:$8 sps:$4 sm:$0xff]  }
  0x8d   :  { %5578 = vmatprep.subr.bf16.mxu0 %v9188_v48  ;;  %v11189_v48 = vrot.slane %v10952_v29, %v10667_v51  ;;  %v9272_v29 = vld [vmem:[%s13837_s1 + $0xc14] ss:$8 sps:$4 sm:$0xff]  }
  0x8f   :  { %5210 = vmatpush1.bf16.msra.mxu1 %v9183_v49  ;;  %v988_v49 = vcombine.high %v10972_v36, %v10972_v36  ;;  %v11205_v36 = vrot.slane %v1006_v46, %v10667_v51  ;;  %v9342_v46 = vld [vmem:[%s13837_s1 + $0xcd0] ss:$8 sps:$4 sm:$0xff]  }
  0x90   :  { %5579 = vmatpush1.bf16.msra.mxu0 %v9186_v50  ;;  %5211 = vmatprep.subr.bf16.mxu1 %v9191_v53  ;;  %v9264_v50 = vld [vmem:[%s13837_s1 + $0xc00] ss:$8 sps:$4 sm:$0xff]   ;;  %v9269_v53 = vld [vmem:[%s13837_s1 + $0x314] ss:$8 sps:$4 sm:$0xff]  }
  0x91   :  { %5580 = vmatprep.subr.bf16.mxu0 %v9194_v54  ;;  %v892_v54 = vcombine.high %v10987_v39, %v10987_v39  ;;  %v9275_v39 = vld [vmem:[%s13837_s1 + $0x324] ss:$8 sps:$4 sm:$0xff]  }
  0x93   :  { %5212 = vmatpush1.bf16.msra.mxu1 %v9189_v55  ;;  %v9267_v55 = vld [vmem:[%s13837_s1 + $0x310] ss:$8 sps:$4 sm:$0xff]  }
  0x94   :  { %5581 = vmatpush1.bf16.msra.mxu0 %v9192_v56  ;;  %5213 = vmatprep.subr.bf16.mxu1 %v9197_v57  ;;  %v9270_v56 = vld [vmem:[%s13837_s1 + $0xc10] ss:$8 sps:$4 sm:$0xff]   ;;  %v9278_v57 = vld [vmem:[%s13837_s1 + $0xc24] ss:$8 sps:$4 sm:$0xff]  }
  0x95   :  { %5582 = vmatprep.subr.bf16.mxu0 %v9200_v58  ;;  %v9273_v58 = vld [vmem:[%s13837_s1 + $0x320] ss:$8 sps:$4 sm:$0xff]  }
  0x97   :  { %5214 = vmatpush1.bf16.msra.mxu1 %v9195_v59  ;;  %v9276_v59 = vld [vmem:[%s13837_s1 + $0xc20] ss:$8 sps:$4 sm:$0xff]  }
  0x98   :  { %5583 = vmatpush1.bf16.msra.mxu0 %v9198_v60  ;;  %5215 = vmatprep.subr.bf16.mxu1 %v9203_v61  ;;  %v9281_v60 = vld [vmem:[%s13837_s1 + $0x334] ss:$8 sps:$4 sm:$0xff]  }
  0x99   :  { %5584 = vmatprep.subr.bf16.mxu0 %v9206_v62  ;;  %v9284_v61 = vld [vmem:[%s13837_s1 + $0xc34] ss:$8 sps:$4 sm:$0xff]   ;;  %v9279_v62 = vld [vmem:[%s13837_s1 + $0x330] ss:$8 sps:$4 sm:$0xff]  }
  0x9b   :  { %5216 = vmatpush1.bf16.msra.mxu1 %v9201_v63  ;;  %v9282_v63 = vld [vmem:[%s13837_s1 + $0xc30] ss:$8 sps:$4 sm:$0xff]  }
  0x9c   :  { %5585 = vmatpush1.bf16.msra.mxu0 %v9204_v0  ;;  %5217 = vmatprep.subr.bf16.mxu1 %v9209_v1  ;;  %v9287_v0 = vld [vmem:[%s13837_s1 + $0x344] ss:$8 sps:$4 sm:$0xff]  }
  0x9d   :  { %5586 = vmatprep.subr.bf16.mxu0 %v9212_v2  ;;  %v9290_v1 = vld [vmem:[%s13837_s1 + $0xc44] ss:$8 sps:$4 sm:$0xff]   ;;  %v9285_v2 = vld [vmem:[%s13837_s1 + $0x340] ss:$8 sps:$4 sm:$0xff]  }
  0x9f   :  { %5218 = vmatpush1.bf16.msra.mxu1 %v9207_v4  ;;  %v9288_v4 = vld [vmem:[%s13837_s1 + $0xc40] ss:$8 sps:$4 sm:$0xff]  }
  0xa0   :  { %5587 = vmatpush1.bf16.msra.mxu0 %v9210_v5  ;;  %5219 = vmatprep.subr.bf16.mxu1 %v9215_v6  ;;  %v9293_v5 = vld [vmem:[%s13837_s1 + $0x354] ss:$8 sps:$4 sm:$0xff]  }
  0xa1   :  { %5588 = vmatprep.subr.bf16.mxu0 %v9218_v7  ;;  %v9296_v6 = vld [vmem:[%s13837_s1 + $0xc54] ss:$8 sps:$4 sm:$0xff]   ;;  %v9291_v7 = vld [vmem:[%s13837_s1 + $0x350] ss:$8 sps:$4 sm:$0xff]  }
  0xa3   :  { %5220 = vmatpush1.bf16.msra.mxu1 %v9213_v8  ;;  %v9294_v8 = vld [vmem:[%s13837_s1 + $0xc50] ss:$8 sps:$4 sm:$0xff]  }
  0xa4   :  { %5589 = vmatpush1.bf16.msra.mxu0 %v9216_v9  ;;  %5221 = vmatprep.subr.bf16.mxu1 %v9221_v10  ;;  %v9299_v9 = vld [vmem:[%s13837_s1 + $0x364] ss:$8 sps:$4 sm:$0xff]  }
  0xa5   :  { %5590 = vmatprep.subr.bf16.mxu0 %v9224_v11  ;;  %v9302_v10 = vld [vmem:[%s13837_s1 + $0xc64] ss:$8 sps:$4 sm:$0xff]   ;;  %v9297_v11 = vld [vmem:[%s13837_s1 + $0x360] ss:$8 sps:$4 sm:$0xff]  }
  0xa7   :  { %5222 = vmatpush1.bf16.msra.mxu1 %v9219_v12  ;;  %v9300_v12 = vld [vmem:[%s13837_s1 + $0xc60] ss:$8 sps:$4 sm:$0xff]  }
  0xa8   :  { %5591 = vmatpush1.bf16.msra.mxu0 %v9222_v13  ;;  %5223 = vmatprep.subr.bf16.mxu1 %v9227_v16  ;;  %v9305_v13 = vld [vmem:[%s13837_s1 + $0x374] ss:$8 sps:$4 sm:$0xff]  }
  0xa9   :  { %5592 = vmatprep.subr.bf16.mxu0 %v9230_v17  ;;  %v9308_v16 = vld [vmem:[%s13837_s1 + $0xc74] ss:$8 sps:$4 sm:$0xff]   ;;  %v9303_v17 = vld [vmem:[%s13837_s1 + $0x370] ss:$8 sps:$4 sm:$0xff]  }
  0xab   :  { %5224 = vmatpush1.bf16.msra.mxu1 %v9225_v18  ;;  %v9306_v18 = vld [vmem:[%s13837_s1 + $0xc70] ss:$8 sps:$4 sm:$0xff]  }
  0xac   :  { %5593 = vmatpush1.bf16.msra.mxu0 %v9228_v19  ;;  %5225 = vmatprep.subr.bf16.mxu1 %v9233_v20  ;;  %v9311_v19 = vld [vmem:[%s13837_s1 + $0x384] ss:$8 sps:$4 sm:$0xff]  }
  0xad   :  { %5594 = vmatprep.subr.bf16.mxu0 %v9236_v22  ;;  %v9314_v20 = vld [vmem:[%s13837_s1 + $0xc84] ss:$8 sps:$4 sm:$0xff]   ;;  %v9309_v22 = vld [vmem:[%s13837_s1 + $0x380] ss:$8 sps:$4 sm:$0xff]  }
  0xaf   :  { %5226 = vmatpush1.bf16.msra.mxu1 %v9231_v23  ;;  %v9312_v23 = vld [vmem:[%s13837_s1 + $0xc80] ss:$8 sps:$4 sm:$0xff]  }
  0xb0   :  { %5595 = vmatpush1.bf16.msra.mxu0 %v9234_v24  ;;  %5227 = vmatprep.subr.bf16.mxu1 %v9239_v25  ;;  %v9317_v24 = vld [vmem:[%s13837_s1 + $0x394] ss:$8 sps:$4 sm:$0xff]  }
  0xb1   :  { %5596 = vmatprep.subr.bf16.mxu0 %v9242_v26  ;;  %v9320_v25 = vld [vmem:[%s13837_s1 + $0xc94] ss:$8 sps:$4 sm:$0xff]   ;;  %v9315_v26 = vld [vmem:[%s13837_s1 + $0x390] ss:$8 sps:$4 sm:$0xff]  }
  0xb3   :  { %5228 = vmatpush1.bf16.msra.mxu1 %v9237_v27  ;;  %v9318_v27 = vld [vmem:[%s13837_s1 + $0xc90] ss:$8 sps:$4 sm:$0xff]  }
  0xb4   :  { %5597 = vmatpush1.bf16.msra.mxu0 %v9240_v52  ;;  %5229 = vmatprep.subr.bf16.mxu1 %v9245_v30  ;;  %v9323_v52 = vld [vmem:[%s13837_s1 + $0x3a4] ss:$8 sps:$4 sm:$0xff]  }
  0xb5   :  { %5598 = vmatprep.subr.bf16.mxu0 %v9248_v31  ;;  %v9326_v30 = vld [vmem:[%s13837_s1 + $0xca4] ss:$8 sps:$4 sm:$0xff]   ;;  %v9321_v31 = vld [vmem:[%s13837_s1 + $0x3a0] ss:$8 sps:$4 sm:$0xff]  }
  0xb7   :  { %5230 = vmatpush1.bf16.msra.mxu1 %v9243_v32  ;;  %v9324_v32 = vld [vmem:[%s13837_s1 + $0xca0] ss:$8 sps:$4 sm:$0xff]  }
  0xb8   :  { %5599 = vmatpush1.bf16.msra.mxu0 %v9246_v33  ;;  %5231 = vmatprep.subr.bf16.mxu1 %v9251_v34  ;;  %v9329_v33 = vld [vmem:[%s13837_s1 + $0x3b4] ss:$8 sps:$4 sm:$0xff]  }
  0xb9   :  { %5600 = vmatprep.subr.bf16.mxu0 %v9254_v35  ;;  %v9332_v34 = vld [vmem:[%s13837_s1 + $0xcb4] ss:$8 sps:$4 sm:$0xff]   ;;  %v9327_v35 = vld [vmem:[%s13837_s1 + $0x3b0] ss:$8 sps:$4 sm:$0xff]  }
  0xbb   :  { %5232 = vmatpush1.bf16.msra.mxu1 %v9249_v37  ;;  %v9330_v37 = vld [vmem:[%s13837_s1 + $0xcb0] ss:$8 sps:$4 sm:$0xff]  }
  0xbc   :  { %5601 = vmatpush1.bf16.msra.mxu0 %v9252_v21  ;;  %5233 = vmatprep.subr.bf16.mxu1 %v9257_v14  ;;  %v9335_v21 = vld [vmem:[%s13837_s1 + $0x3c4] ss:$8 sps:$4 sm:$0xff]  }
  0xbd   :  { %5602 = vmatprep.subr.bf16.mxu0 %v9260_v40  ;;  %v9338_v14 = vld [vmem:[%s13837_s1 + $0xcc4] ss:$8 sps:$4 sm:$0xff]   ;;  %v9333_v40 = vld [vmem:[%s13837_s1 + $0x3c0] ss:$8 sps:$4 sm:$0xff]  }
  0xbf   :  { %5234 = vmatpush1.bf16.msra.mxu1 %v9255_v42  ;;  %v9336_v42 = vld [vmem:[%s13837_s1 + $0xcc0] ss:$8 sps:$4 sm:$0xff]  }
  0xc0   :  { %5603 = vmatpush1.bf16.msra.mxu0 %v9258_v43  ;;  %5244 = vmatprep.subr.bf16.mxu1 %v9263_v28  ;;  %v9341_v43 = vld [vmem:[%s13837_s1 + $0x3d4] ss:$8 sps:$4 sm:$0xff]  }
  0xc1   :  { %5613 = vmatprep.subr.bf16.mxu0 %v9266_v44  ;;  %v9344_v28 = vld [vmem:[%s13837_s1 + $0xcd4] ss:$8 sps:$4 sm:$0xff]   ;;  %v9339_v44 = vld [vmem:[%s13837_s1 + $0x3d0] ss:$8 sps:$4 sm:$0xff]  }
  0xc2   :  { %5236 = vmatmul.mubr.bf16.vlgmr.msra.gmra.mrb[0].mxu1 %v11189_v48 }
  0xc3   :  { %5605 = vmatmul.mubr.bf16.vlgmr.msra.gmra.mrb[0].mxu0 %v988_v49  ;;  %5245 = vmatpush1.bf16.msra.mxu1 %v9261_v47  ;;  %v9347_v47 = vld [vmem:[%s13837_s1 + $0x3e4] ss:$8 sps:$4 sm:$0xff]  }
  0xc4   :  { %5614 = vmatpush1.bf16.msra.mxu0 %v9264_v50  ;;  %5246 = vmatprep.subr.bf16.mxu1 %v9269_v53  ;;  %v9350_v49 = vld [vmem:[%s13837_s1 + $0xce4] ss:$8 sps:$4 sm:$0xff]   ;;  %v9345_v50 = vld [vmem:[%s13837_s1 + $0x3e0] ss:$8 sps:$4 sm:$0xff]  }
  0xc5   :  { %5615 = vmatprep.subr.bf16.mxu0 %v9272_v29  ;;  %5276 = vmatprep.mubr.bf16.mxu1 %v892_v54  ;;  %v9348_v53 = vld [vmem:[%s13837_s1 + $0xce0] ss:$8 sps:$4 sm:$0xff]   ;;  %v9353_v54 = vld [vmem:[%s13837_s1 + $0x3f4] ss:$8 sps:$4 sm:$0xff]  }
  0xc6   :  { %5645 = vmatprep.mubr.bf16.mxu0 %v11205_v36  ;;  %v11374_v29 = vld.sshfl [vmem:[%s13836_s0 + $0x8] sm:$0xff pattern:$0x75316420] }
  0xc7   :  { %5247 = vmatpush1.bf16.msra.mxu1 %v9267_v55  ;;  %v9356_v55 = vld [vmem:[%s13837_s1 + $0xcf4] ss:$8 sps:$4 sm:$0xff]  }
  0xc8   :  { %5616 = vmatpush1.bf16.msra.mxu0 %v9270_v56  ;;  %5248 = vmatprep.subr.bf16.mxu1 %v9275_v39  ;;  %v9351_v56 = vld [vmem:[%s13837_s1 + $0x3f0] ss:$8 sps:$4 sm:$0xff]  }
  0xc9   :  { %5617 = vmatprep.subr.bf16.mxu0 %v9278_v57  ;;  %v9354_v39 = vld [vmem:[%s13837_s1 + $0xcf0] ss:$8 sps:$4 sm:$0xff]   ;;  %v9359_v57 = vld [vmem:[%s13837_s1 + $0x404] ss:$8 sps:$4 sm:$0xff]  }
  0xcb   :  { %5249 = vmatpush1.bf16.msra.mxu1 %v9273_v58  ;;  %v9362_v58 = vld [vmem:[%s13837_s1 + $0xd04] ss:$8 sps:$4 sm:$0xff]  }
  0xcc   :  { %5618 = vmatpush1.bf16.msra.mxu0 %v9276_v59  ;;  %5250 = vmatprep.subr.bf16.mxu1 %v9281_v60  ;;  %v908_v59 = vcombine.high %v11374_v29, %v11374_v29  ;;  %v9357_v60 = vld [vmem:[%s13837_s1 + $0x400] ss:$8 sps:$4 sm:$0xff]  }
  0xcd   :  { %5619 = vmatprep.subr.bf16.mxu0 %v9284_v61  ;;  %v9360_v61 = vld [vmem:[%s13837_s1 + $0xd00] ss:$8 sps:$4 sm:$0xff]  }
  0xcf   :  { %5251 = vmatpush1.bf16.msra.mxu1 %v9279_v62  ;;  %v890_v62 = vcombine.high %v11189_v48, %v11189_v48  ;;  %v1038_v48 = vcombine.high %v11205_v36, %v11205_v36  ;;  %v9374_v36 = vld [vmem:[%s13837_s1 + $0xd24] ss:$8 sps:$4 sm:$0xff]  }
  0xd0   :  { %5620 = vmatpush1.bf16.msra.mxu0 %v9282_v63  ;;  %5252 = vmatprep.subr.bf16.mxu1 %v9287_v0  ;;  %v11406_v63 = vrot.slane %v11168_v41, %v10667_v51  ;;  %v9365_v0 = vld [vmem:[%s13837_s1 + $0x414] ss:$8 sps:$4 sm:$0xff]   ;;  %v9363_v41 = vld [vmem:[%s13837_s1 + $0x410] ss:$8 sps:$4 sm:$0xff]  }
  0xd1   :  { %5621 = vmatprep.subr.bf16.mxu0 %v9290_v1  ;;  %v9368_v1 = vld [vmem:[%s13837_s1 + $0xd14] ss:$8 sps:$4 sm:$0xff]  }
  0xd3   :  { %5253 = vmatpush1.bf16.msra.mxu1 %v9285_v2  ;;  %v11415_v2 = vrot.slane %v908_v59, %v10667_v51  ;;  %v9438_v59 = vld [vmem:[%s13837_s1 + $0xdd0] ss:$8 sps:$4 sm:$0xff]  }
  0xd4   :  { %5622 = vmatpush1.bf16.msra.mxu0 %v9288_v4  ;;  %5254 = vmatprep.subr.bf16.mxu1 %v9293_v5  ;;  %v9366_v4 = vld [vmem:[%s13837_s1 + $0xd10] ss:$8 sps:$4 sm:$0xff]   ;;  %v9371_v5 = vld [vmem:[%s13837_s1 + $0x424] ss:$8 sps:$4 sm:$0xff]  }
  0xd5   :  { %5623 = vmatprep.subr.bf16.mxu0 %v9296_v6  ;;  %v9369_v6 = vld [vmem:[%s13837_s1 + $0x420] ss:$8 sps:$4 sm:$0xff]  }
  0xd7   :  { %5255 = vmatpush1.bf16.msra.mxu1 %v9291_v7  ;;  %v9372_v7 = vld [vmem:[%s13837_s1 + $0xd20] ss:$8 sps:$4 sm:$0xff]  }
  0xd8   :  { %5624 = vmatpush1.bf16.msra.mxu0 %v9294_v8  ;;  %5256 = vmatprep.subr.bf16.mxu1 %v9299_v9  ;;  %v9377_v8 = vld [vmem:[%s13837_s1 + $0x434] ss:$8 sps:$4 sm:$0xff]  }
  0xd9   :  { %5625 = vmatprep.subr.bf16.mxu0 %v9302_v10  ;;  %v9380_v9 = vld [vmem:[%s13837_s1 + $0xd34] ss:$8 sps:$4 sm:$0xff]   ;;  %v9375_v10 = vld [vmem:[%s13837_s1 + $0x430] ss:$8 sps:$4 sm:$0xff]  }
  0xdb   :  { %5257 = vmatpush1.bf16.msra.mxu1 %v9297_v11  ;;  %v9378_v11 = vld [vmem:[%s13837_s1 + $0xd30] ss:$8 sps:$4 sm:$0xff]  }
  0xdc   :  { %5626 = vmatpush1.bf16.msra.mxu0 %v9300_v12  ;;  %5258 = vmatprep.subr.bf16.mxu1 %v9305_v13  ;;  %v9383_v12 = vld [vmem:[%s13837_s1 + $0x444] ss:$8 sps:$4 sm:$0xff]  }
  0xdd   :  { %5627 = vmatprep.subr.bf16.mxu0 %v9308_v16  ;;  %v9386_v13 = vld [vmem:[%s13837_s1 + $0xd44] ss:$8 sps:$4 sm:$0xff]   ;;  %v9381_v16 = vld [vmem:[%s13837_s1 + $0x440] ss:$8 sps:$4 sm:$0xff]  }
  0xdf   :  { %5259 = vmatpush1.bf16.msra.mxu1 %v9303_v17  ;;  %v9384_v17 = vld [vmem:[%s13837_s1 + $0xd40] ss:$8 sps:$4 sm:$0xff]  }
  0xe0   :  { %5628 = vmatpush1.bf16.msra.mxu0 %v9306_v18  ;;  %5260 = vmatprep.subr.bf16.mxu1 %v9311_v19  ;;  %v9389_v18 = vld [vmem:[%s13837_s1 + $0x454] ss:$8 sps:$4 sm:$0xff]  }
  0xe1   :  { %5629 = vmatprep.subr.bf16.mxu0 %v9314_v20  ;;  %v9392_v19 = vld [vmem:[%s13837_s1 + $0xd54] ss:$8 sps:$4 sm:$0xff]   ;;  %v9387_v20 = vld [vmem:[%s13837_s1 + $0x450] ss:$8 sps:$4 sm:$0xff]  }
  0xe3   :  { %5261 = vmatpush1.bf16.msra.mxu1 %v9309_v22  ;;  %v9390_v22 = vld [vmem:[%s13837_s1 + $0xd50] ss:$8 sps:$4 sm:$0xff]  }
  0xe4   :  { %5630 = vmatpush1.bf16.msra.mxu0 %v9312_v23  ;;  %5262 = vmatprep.subr.bf16.mxu1 %v9317_v24  ;;  %v9395_v23 = vld [vmem:[%s13837_s1 + $0x464] ss:$8 sps:$4 sm:$0xff]  }
  0xe5   :  { %5631 = vmatprep.subr.bf16.mxu0 %v9320_v25  ;;  %v9398_v24 = vld [vmem:[%s13837_s1 + $0xd64] ss:$8 sps:$4 sm:$0xff]   ;;  %v9393_v25 = vld [vmem:[%s13837_s1 + $0x460] ss:$8 sps:$4 sm:$0xff]  }
  0xe7   :  { %5263 = vmatpush1.bf16.msra.mxu1 %v9315_v26  ;;  %v9396_v26 = vld [vmem:[%s13837_s1 + $0xd60] ss:$8 sps:$4 sm:$0xff]  }
  0xe8   :  { %5632 = vmatpush1.bf16.msra.mxu0 %v9318_v27  ;;  %5264 = vmatprep.subr.bf16.mxu1 %v9323_v52  ;;  %v9401_v27 = vld [vmem:[%s13837_s1 + $0x474] ss:$8 sps:$4 sm:$0xff]  }
  0xe9   :  { %5633 = vmatprep.subr.bf16.mxu0 %v9326_v30  ;;  %v9404_v52 = vld [vmem:[%s13837_s1 + $0xd74] ss:$8 sps:$4 sm:$0xff]   ;;  %v9399_v30 = vld [vmem:[%s13837_s1 + $0x470] ss:$8 sps:$4 sm:$0xff]  }
  0xeb   :  { %5265 = vmatpush1.bf16.msra.mxu1 %v9321_v31  ;;  %v9402_v31 = vld [vmem:[%s13837_s1 + $0xd70] ss:$8 sps:$4 sm:$0xff]  }
  0xec   :  { %5634 = vmatpush1.bf16.msra.mxu0 %v9324_v32  ;;  %5266 = vmatprep.subr.bf16.mxu1 %v9329_v33  ;;  %v9407_v32 = vld [vmem:[%s13837_s1 + $0x484] ss:$8 sps:$4 sm:$0xff]  }
  0xed   :  { %5635 = vmatprep.subr.bf16.mxu0 %v9332_v34  ;;  %v9410_v33 = vld [vmem:[%s13837_s1 + $0xd84] ss:$8 sps:$4 sm:$0xff]   ;;  %v9405_v34 = vld [vmem:[%s13837_s1 + $0x480] ss:$8 sps:$4 sm:$0xff]  }
  0xef   :  { %5267 = vmatpush1.bf16.msra.mxu1 %v9327_v35  ;;  %v9408_v35 = vld [vmem:[%s13837_s1 + $0xd80] ss:$8 sps:$4 sm:$0xff]  }
  0xf0   :  { %5636 = vmatpush1.bf16.msra.mxu0 %v9330_v37  ;;  %5268 = vmatprep.subr.bf16.mxu1 %v9335_v21  ;;  %v9413_v37 = vld [vmem:[%s13837_s1 + $0x494] ss:$8 sps:$4 sm:$0xff]  }
  0xf1   :  { %5637 = vmatprep.subr.bf16.mxu0 %v9338_v14  ;;  %v9416_v21 = vld [vmem:[%s13837_s1 + $0xd94] ss:$8 sps:$4 sm:$0xff]   ;;  %v9411_v14 = vld [vmem:[%s13837_s1 + $0x490] ss:$8 sps:$4 sm:$0xff]  }
  0xf3   :  { %5269 = vmatpush1.bf16.msra.mxu1 %v9333_v40  ;;  %v9414_v40 = vld [vmem:[%s13837_s1 + $0xd90] ss:$8 sps:$4 sm:$0xff]  }
  0xf4   :  { %5638 = vmatpush1.bf16.msra.mxu0 %v9336_v42  ;;  %5270 = vmatprep.subr.bf16.mxu1 %v9341_v43  ;;  %v9419_v42 = vld [vmem:[%s13837_s1 + $0x4a4] ss:$8 sps:$4 sm:$0xff]  }
  0xf5   :  { %5639 = vmatprep.subr.bf16.mxu0 %v9344_v28  ;;  %v9422_v43 = vld [vmem:[%s13837_s1 + $0xda4] ss:$8 sps:$4 sm:$0xff]   ;;  %v9417_v28 = vld [vmem:[%s13837_s1 + $0x4a0] ss:$8 sps:$4 sm:$0xff]  }
  0xf7   :  { %5271 = vmatpush1.bf16.msra.mxu1 %v9339_v44  ;;  %v9420_v44 = vld [vmem:[%s13837_s1 + $0xda0] ss:$8 sps:$4 sm:$0xff]  }
  0xf8   :  { %5640 = vmatpush1.bf16.msra.mxu0 %v9342_v46  ;;  %5272 = vmatprep.subr.bf16.mxu1 %v9347_v47  ;;  %v9425_v46 = vld [vmem:[%s13837_s1 + $0x4b4] ss:$8 sps:$4 sm:$0xff]  }
  0xf9   :  { %5641 = vmatprep.subr.bf16.mxu0 %v9350_v49  ;;  %v9428_v47 = vld [vmem:[%s13837_s1 + $0xdb4] ss:$8 sps:$4 sm:$0xff]   ;;  %v9423_v49 = vld [vmem:[%s13837_s1 + $0x4b0] ss:$8 sps:$4 sm:$0xff]  }
  0xfb   :  { %5273 = vmatpush1.bf16.msra.mxu1 %v9345_v50  ;;  %v9426_v50 = vld [vmem:[%s13837_s1 + $0xdb0] ss:$8 sps:$4 sm:$0xff]  }
  0xfc   :  { %5642 = vmatpush1.bf16.msra.mxu0 %v9348_v53  ;;  %5274 = vmatprep.subr.bf16.mxu1 %v9353_v54  ;;  %v9431_v53 = vld [vmem:[%s13837_s1 + $0x4c4] ss:$8 sps:$4 sm:$0xff]  }
  0xfd   :  { %5643 = vmatprep.subr.bf16.mxu0 %v9356_v55  ;;  %v9434_v54 = vld [vmem:[%s13837_s1 + $0xdc4] ss:$8 sps:$4 sm:$0xff]   ;;  %v9429_v55 = vld [vmem:[%s13837_s1 + $0x4c0] ss:$8 sps:$4 sm:$0xff]  }
  0xff   :  { %5275 = vmatpush1.bf16.msra.mxu1 %v9351_v56  ;;  %v9432_v56 = vld [vmem:[%s13837_s1 + $0xdc0] ss:$8 sps:$4 sm:$0xff]  }
 0x100   :  { %5644 = vmatpush1.bf16.msra.mxu0 %v9354_v39  ;;  %5285 = vmatprep.subr.bf16.mxu1 %v9359_v57  ;;  %v9437_v39 = vld [vmem:[%s13837_s1 + $0x4d4] ss:$8 sps:$4 sm:$0xff]  }
 0x101   :  { %5654 = vmatprep.subr.bf16.mxu0 %v9362_v58  ;;  %v9440_v57 = vld [vmem:[%s13837_s1 + $0xdd4] ss:$8 sps:$4 sm:$0xff]   ;;  %v9435_v58 = vld [vmem:[%s13837_s1 + $0x4d0] ss:$8 sps:$4 sm:$0xff]  }
 0x102   :  { %5277 = vmatmul.mubr.bf16.vlgmr.msra.gmra.mrb[0].mxu1 %v890_v62  ;;  %v991_v62 = vcombine.high %v11155_v38, %v11155_v38  ;;  %v9452_v38 = vld [vmem:[%s13837_s1 + $0xdf4] ss:$8 sps:$4 sm:$0xff]  }
 0x103   :  { %5646 = vmatmul.mubr.bf16.vlgmr.msra.gmra.mrb[0].mxu0 %v11406_v63  ;;  %5286 = vmatpush1.bf16.msra.mxu1 %v9357_v60  ;;  %v9443_v60 = vld [vmem:[%s13837_s1 + $0x4e4] ss:$8 sps:$4 sm:$0xff]  }
 0x104   :  { %5655 = vmatpush1.bf16.msra.mxu0 %v9360_v61  ;;  %5287 = vmatprep.subr.bf16.mxu1 %v9365_v0  ;;  %v9446_v61 = vld [vmem:[%s13837_s1 + $0xde4] ss:$8 sps:$4 sm:$0xff]   ;;  %v9441_v0 = vld [vmem:[%s13837_s1 + $0x4e0] ss:$8 sps:$4 sm:$0xff]  }
 0x105   :  { %5656 = vmatprep.subr.bf16.mxu0 %v9368_v1  ;;  %5317 = vmatprep.mubr.bf16.mxu1 %v11415_v2  ;;  %v9444_v1 = vld [vmem:[%s13837_s1 + $0xde0] ss:$8 sps:$4 sm:$0xff]  }
 0x106   :  { %5686 = vmatprep.mubr.bf16.mxu0 %v1038_v48  ;;  %v9449_v48 = vld [vmem:[%s13837_s1 + $0x4f4] ss:$8 sps:$4 sm:$0xff]  }
 0x107   :  { %5288 = vmatpush1.bf16.msra.mxu1 %v9363_v41  ;;  %v11592_v41 = vrot.slane %v991_v62, %v10667_v51  ;;  %v9522_v62 = vld [vmem:[%s13837_s1 + $0xeb0] ss:$8 sps:$4 sm:$0xff]  }
 0x108   :  { %5657 = vmatpush1.bf16.msra.mxu0 %v9366_v4  ;;  %5289 = vmatprep.subr.bf16.mxu1 %v9371_v5  ;;  %v9447_v4 = vld [vmem:[%s13837_s1 + $0x4f0] ss:$8 sps:$4 sm:$0xff]  }
 0x109   :  { %5658 = vmatprep.subr.bf16.mxu0 %v9374_v36  ;;  %v9450_v5 = vld [vmem:[%s13837_s1 + $0xdf0] ss:$8 sps:$4 sm:$0xff]   ;;  %v9455_v36 = vld [vmem:[%s13837_s1 + $0x504] ss:$8 sps:$4 sm:$0xff]  }
 0x10b   :  { %5290 = vmatpush1.bf16.msra.mxu1 %v9369_v6  ;;  %v9458_v6 = vld [vmem:[%s13837_s1 + $0xe04] ss:$8 sps:$4 sm:$0xff]  }
 0x10c   :  { %5659 = vmatpush1.bf16.msra.mxu0 %v9372_v7  ;;  %5291 = vmatprep.subr.bf16.mxu1 %v9377_v8  ;;  %v1007_v7 = vcombine.high %v11592_v41, %v11592_v41  ;;  %v11610_v8 = vrot.slane %v11374_v29, %v10667_v51  ;;  %v9461_v29 = vld [vmem:[%s13837_s1 + $0x514] ss:$8 sps:$4 sm:$0xff]  }
 0x10d   :  { %5660 = vmatprep.subr.bf16.mxu0 %v9380_v9  ;;  %v1036_v9 = vcombine.high %v11406_v63, %v11406_v63  ;;  %v9464_v63 = vld [vmem:[%s13837_s1 + $0xe14] ss:$8 sps:$4 sm:$0xff]  }
 0x10f   :  { %5292 = vmatpush1.bf16.msra.mxu1 %v9375_v10  ;;  %v9453_v10 = vld [vmem:[%s13837_s1 + $0x500] ss:$8 sps:$4 sm:$0xff]  }
 0x110   :  { %5661 = vmatpush1.bf16.msra.mxu0 %v9378_v11  ;;  %5293 = vmatprep.subr.bf16.mxu1 %v9383_v12  ;;  %v9456_v11 = vld [vmem:[%s13837_s1 + $0xe00] ss:$8 sps:$4 sm:$0xff]   ;;  %v940_v12 = vcombine.high %v11415_v2, %v11415_v2  ;;  %v9467_v2 = vld [vmem:[%s13837_s1 + $0x524] ss:$8 sps:$4 sm:$0xff]  }
 0x111   :  { %5662 = vmatprep.subr.bf16.mxu0 %v9386_v13  ;;  %v11629_v13 = vrot.slane %v1007_v7, %v10667_v51  ;;  %v9539_v7 = vld [vmem:[%s13837_s1 + $0x5e4] ss:$8 sps:$4 sm:$0xff]  }
 0x113   :  { %5294 = vmatpush1.bf16.msra.mxu1 %v9381_v16  ;;  %v9459_v16 = vld [vmem:[%s13837_s1 + $0x510] ss:$8 sps:$4 sm:$0xff]  }
 0x114   :  { %5663 = vmatpush1.bf16.msra.mxu0 %v9384_v17  ;;  %5295 = vmatprep.subr.bf16.mxu1 %v9389_v18  ;;  %v9462_v17 = vld [vmem:[%s13837_s1 + $0xe10] ss:$8 sps:$4 sm:$0xff]   ;;  %v9470_v18 = vld [vmem:[%s13837_s1 + $0xe24] ss:$8 sps:$4 sm:$0xff]  }
 0x115   :  { %5664 = vmatprep.subr.bf16.mxu0 %v9392_v19  ;;  %v9465_v19 = vld [vmem:[%s13837_s1 + $0x520] ss:$8 sps:$4 sm:$0xff]  }
 0x117   :  { %5296 = vmatpush1.bf16.msra.mxu1 %v9387_v20  ;;  %v9468_v20 = vld [vmem:[%s13837_s1 + $0xe20] ss:$8 sps:$4 sm:$0xff]  }
 0x118   :  { %5665 = vmatpush1.bf16.msra.mxu0 %v9390_v22  ;;  %5297 = vmatprep.subr.bf16.mxu1 %v9395_v23  ;;  %v9473_v22 = vld [vmem:[%s13837_s1 + $0x534] ss:$8 sps:$4 sm:$0xff]  }
 0x119   :  { %5666 = vmatprep.subr.bf16.mxu0 %v9398_v24  ;;  %v9476_v23 = vld [vmem:[%s13837_s1 + $0xe34] ss:$8 sps:$4 sm:$0xff]   ;;  %v9471_v24 = vld [vmem:[%s13837_s1 + $0x530] ss:$8 sps:$4 sm:$0xff]  }
 0x11b   :  { %5298 = vmatpush1.bf16.msra.mxu1 %v9393_v25  ;;  %v9474_v25 = vld [vmem:[%s13837_s1 + $0xe30] ss:$8 sps:$4 sm:$0xff]  }
 0x11c   :  { %5667 = vmatpush1.bf16.msra.mxu0 %v9396_v26  ;;  %5299 = vmatprep.subr.bf16.mxu1 %v9401_v27  ;;  %v9479_v26 = vld [vmem:[%s13837_s1 + $0x544] ss:$8 sps:$4 sm:$0xff]  }
 0x11d   :  { %5668 = vmatprep.subr.bf16.mxu0 %v9404_v52  ;;  %v9482_v27 = vld [vmem:[%s13837_s1 + $0xe44] ss:$8 sps:$4 sm:$0xff]   ;;  %v9477_v52 = vld [vmem:[%s13837_s1 + $0x540] ss:$8 sps:$4 sm:$0xff]  }
 0x11f   :  { %5300 = vmatpush1.bf16.msra.mxu1 %v9399_v30  ;;  %v9480_v30 = vld [vmem:[%s13837_s1 + $0xe40] ss:$8 sps:$4 sm:$0xff]  }
 0x120   :  { %5669 = vmatpush1.bf16.msra.mxu0 %v9402_v31  ;;  %5301 = vmatprep.subr.bf16.mxu1 %v9407_v32  ;;  %v9485_v31 = vld [vmem:[%s13837_s1 + $0x554] ss:$8 sps:$4 sm:$0xff]  }
 0x121   :  { %5670 = vmatprep.subr.bf16.mxu0 %v9410_v33  ;;  %v9488_v32 = vld [vmem:[%s13837_s1 + $0xe54] ss:$8 sps:$4 sm:$0xff]   ;;  %v9483_v33 = vld [vmem:[%s13837_s1 + $0x550] ss:$8 sps:$4 sm:$0xff]  }
 0x123   :  { %5302 = vmatpush1.bf16.msra.mxu1 %v9405_v34  ;;  %v9486_v34 = vld [vmem:[%s13837_s1 + $0xe50] ss:$8 sps:$4 sm:$0xff]  }
 0x124   :  { %5671 = vmatpush1.bf16.msra.mxu0 %v9408_v35  ;;  %5303 = vmatprep.subr.bf16.mxu1 %v9413_v37  ;;  %v9491_v35 = vld [vmem:[%s13837_s1 + $0x564] ss:$8 sps:$4 sm:$0xff]  }
 0x125   :  { %5672 = vmatprep.subr.bf16.mxu0 %v9416_v21  ;;  %v9494_v37 = vld [vmem:[%s13837_s1 + $0xe64] ss:$8 sps:$4 sm:$0xff]   ;;  %v9489_v21 = vld [vmem:[%s13837_s1 + $0x560] ss:$8 sps:$4 sm:$0xff]  }
 0x127   :  { %5304 = vmatpush1.bf16.msra.mxu1 %v9411_v14  ;;  %v9492_v14 = vld [vmem:[%s13837_s1 + $0xe60] ss:$8 sps:$4 sm:$0xff]  }
 0x128   :  { %5673 = vmatpush1.bf16.msra.mxu0 %v9414_v40  ;;  %5305 = vmatprep.subr.bf16.mxu1 %v9419_v42  ;;  %v9497_v40 = vld [vmem:[%s13837_s1 + $0x574] ss:$8 sps:$4 sm:$0xff]  }
 0x129   :  { %5674 = vmatprep.subr.bf16.mxu0 %v9422_v43  ;;  %v9500_v42 = vld [vmem:[%s13837_s1 + $0xe74] ss:$8 sps:$4 sm:$0xff]   ;;  %v9495_v43 = vld [vmem:[%s13837_s1 + $0x570] ss:$8 sps:$4 sm:$0xff]  }
 0x12b   :  { %5306 = vmatpush1.bf16.msra.mxu1 %v9417_v28  ;;  %v9498_v28 = vld [vmem:[%s13837_s1 + $0xe70] ss:$8 sps:$4 sm:$0xff]  }
 0x12c   :  { %5675 = vmatpush1.bf16.msra.mxu0 %v9420_v44  ;;  %5307 = vmatprep.subr.bf16.mxu1 %v9425_v46  ;;  %v9503_v44 = vld [vmem:[%s13837_s1 + $0x584] ss:$8 sps:$4 sm:$0xff]  }
 0x12d   :  { %5676 = vmatprep.subr.bf16.mxu0 %v9428_v47  ;;  %v9506_v46 = vld [vmem:[%s13837_s1 + $0xe84] ss:$8 sps:$4 sm:$0xff]   ;;  %v9501_v47 = vld [vmem:[%s13837_s1 + $0x580] ss:$8 sps:$4 sm:$0xff]  }
 0x12f   :  { %5308 = vmatpush1.bf16.msra.mxu1 %v9423_v49  ;;  %v9504_v49 = vld [vmem:[%s13837_s1 + $0xe80] ss:$8 sps:$4 sm:$0xff]  }
 0x130   :  { %5677 = vmatpush1.bf16.msra.mxu0 %v9426_v50  ;;  %5309 = vmatprep.subr.bf16.mxu1 %v9431_v53  ;;  %v9509_v50 = vld [vmem:[%s13837_s1 + $0x594] ss:$8 sps:$4 sm:$0xff]  }
 0x131   :  { %5678 = vmatprep.subr.bf16.mxu0 %v9434_v54  ;;  %v9512_v53 = vld [vmem:[%s13837_s1 + $0xe94] ss:$8 sps:$4 sm:$0xff]   ;;  %v9507_v54 = vld [vmem:[%s13837_s1 + $0x590] ss:$8 sps:$4 sm:$0xff]  }
 0x133   :  { %5310 = vmatpush1.bf16.msra.mxu1 %v9429_v55  ;;  %v9510_v55 = vld [vmem:[%s13837_s1 + $0xe90] ss:$8 sps:$4 sm:$0xff]  }
 0x134   :  { %5679 = vmatpush1.bf16.msra.mxu0 %v9432_v56  ;;  %5311 = vmatprep.subr.bf16.mxu1 %v9437_v39  ;;  %v9515_v56 = vld [vmem:[%s13837_s1 + $0x5a4] ss:$8 sps:$4 sm:$0xff]  }
 0x135   :  { %5680 = vmatprep.subr.bf16.mxu0 %v9440_v57  ;;  %v9518_v39 = vld [vmem:[%s13837_s1 + $0xea4] ss:$8 sps:$4 sm:$0xff]   ;;  %v9513_v57 = vld [vmem:[%s13837_s1 + $0x5a0] ss:$8 sps:$4 sm:$0xff]  }
 0x137   :  { %5312 = vmatpush1.bf16.msra.mxu1 %v9435_v58  ;;  %v9516_v58 = vld [vmem:[%s13837_s1 + $0xea0] ss:$8 sps:$4 sm:$0xff]  }
 0x138   :  { %5681 = vmatpush1.bf16.msra.mxu0 %v9438_v59  ;;  %5313 = vmatprep.subr.bf16.mxu1 %v9443_v60  ;;  %v9521_v59 = vld [vmem:[%s13837_s1 + $0x5b4] ss:$8 sps:$4 sm:$0xff]  }
 0x139   :  { %5682 = vmatprep.subr.bf16.mxu0 %v9446_v61  ;;  %v9524_v60 = vld [vmem:[%s13837_s1 + $0xeb4] ss:$8 sps:$4 sm:$0xff]   ;;  %v9519_v61 = vld [vmem:[%s13837_s1 + $0x5b0] ss:$8 sps:$4 sm:$0xff]  }
 0x13b   :  { %5314 = vmatpush1.bf16.msra.mxu1 %v9441_v0  ;;  %v9527_v0 = vld [vmem:[%s13837_s1 + $0x5c4] ss:$8 sps:$4 sm:$0xff]  }
 0x13c   :  { %5683 = vmatpush1.bf16.msra.mxu0 %v9444_v1  ;;  %5315 = vmatprep.subr.bf16.mxu1 %v9449_v48  ;;  %v9530_v1 = vld [vmem:[%s13837_s1 + $0xec4] ss:$8 sps:$4 sm:$0xff]   ;;  %v9525_v48 = vld [vmem:[%s13837_s1 + $0x5c0] ss:$8 sps:$4 sm:$0xff]  }
 0x13d   :  { %5684 = vmatprep.subr.bf16.mxu0 %v9452_v38  ;;  %v9528_v38 = vld [vmem:[%s13837_s1 + $0xec0] ss:$8 sps:$4 sm:$0xff]  }
 0x13f   :  { %5316 = vmatpush1.bf16.msra.mxu1 %v9447_v4  ;;  %v9533_v4 = vld [vmem:[%s13837_s1 + $0x5d4] ss:$8 sps:$4 sm:$0xff]  }
 0x140   :  { %5685 = vmatpush1.bf16.msra.mxu0 %v9450_v5  ;;  %5326 = vmatprep.subr.bf16.mxu1 %v9455_v36  ;;  %v9536_v5 = vld [vmem:[%s13837_s1 + $0xed4] ss:$8 sps:$4 sm:$0xff]   ;;  %v9531_v36 = vld [vmem:[%s13837_s1 + $0x5d0] ss:$8 sps:$4 sm:$0xff]  }
 0x141   :  { %5695 = vmatprep.subr.bf16.mxu0 %v9458_v6  ;;  %v9534_v6 = vld [vmem:[%s13837_s1 + $0xed0] ss:$8 sps:$4 sm:$0xff]  }
 0x142   :  { %5318 = vmatmul.mubr.bf16.vlgmr.msra.gmra.mrb[0].mxu1 %v11610_v8 }
 0x143   :  { %5687 = vmatmul.mubr.bf16.vlgmr.msra.gmra.mrb[0].mxu0 %v1036_v9  ;;  %5327 = vmatpush1.bf16.msra.mxu1 %v9453_v10  ;;  %v9542_v9 = vld [vmem:[%s13837_s1 + $0xee4] ss:$8 sps:$4 sm:$0xff]  }
 0x144   :  { %5696 = vmatpush1.bf16.msra.mxu0 %v9456_v11  ;;  %5328 = vmatprep.subr.bf16.mxu1 %v9461_v29  ;;  %v10445_v10 = vld [vmem:[%s13836_s0 + $0x8] sm:$0xff] }
 0x145   :  { %5697 = vmatprep.subr.bf16.mxu0 %v9464_v63  ;;  %5358 = vmatprep.mubr.bf16.mxu1 %v940_v12  ;;  %v893_v11 = vcombine.high %v10445_v10, %v10445_v10  ;;  %v9537_v29 = vld [vmem:[%s13837_s1 + $0x5e0] ss:$8 sps:$4 sm:$0xff]   ;;  %v9545_v12 = vld [vmem:[%s13837_s1 + $0x5f4] ss:$8 sps:$4 sm:$0xff]   ;;  %v9616_v10 = vld [vmem:[%s13837_s1 + $0x6b0] ss:$8 sps:$4 sm:$0xff]  }
 0x146   :  { %5727 = vmatprep.mubr.bf16.mxu0 %v11629_v13  ;;  %v9540_v63 = vld [vmem:[%s13837_s1 + $0xee0] ss:$8 sps:$4 sm:$0xff]  }
 0x147   :  { %5329 = vmatpush1.bf16.msra.mxu1 %v9459_v16  ;;  %v9548_v16 = vld [vmem:[%s13837_s1 + $0xef4] ss:$8 sps:$4 sm:$0xff]  }
 0x148   :  { %5698 = vmatpush1.bf16.msra.mxu0 %v9462_v17  ;;  %5330 = vmatprep.subr.bf16.mxu1 %v9467_v2  ;;  %v11805_v17 = vrot.slane %v893_v11, %v10667_v51  ;;  %v9543_v2 = vld [vmem:[%s13837_s1 + $0x5f0] ss:$8 sps:$4 sm:$0xff]  }
 0x149   :  { %5699 = vmatprep.subr.bf16.mxu0 %v9470_v18  ;;  %v9546_v18 = vld [vmem:[%s13837_s1 + $0xef0] ss:$8 sps:$4 sm:$0xff]  }
 0x14a   :  { %v9619_v11 = vld [vmem:[%s13837_s1 + $0xfb0] ss:$8 sps:$4 sm:$0xff]  }
 0x14b   :  { %5331 = vmatpush1.bf16.msra.mxu1 %v9465_v19  ;;  %v9551_v19 = vld [vmem:[%s13837_s1 + $0x604] ss:$8 sps:$4 sm:$0xff]  }
 0x14c   :  { %5700 = vmatpush1.bf16.msra.mxu0 %v9468_v20  ;;  %5332 = vmatprep.subr.bf16.mxu1 %v9473_v22  ;;  %v9555_v20 = vld [vmem:[%s13837_s1 + $0xf04] ss:$8 sps:$4 sm:$0xff]   ;;  %v909_v22 = vcombine.high %v11805_v17, %v11805_v17 }
 0x14d   :  { %5701 = vmatprep.subr.bf16.mxu0 %v9476_v23  ;;  %v938_v23 = vcombine.high %v11610_v8, %v11610_v8  ;;  %v9558_v8 = vld [vmem:[%s13837_s1 + $0x614] ss:$8 sps:$4 sm:$0xff]  }
 0x14f   :  { %5333 = vmatpush1.bf16.msra.mxu1 %v9471_v24  ;;  %v11825_v24 = vrot.slane %v11592_v41, %v10667_v51  ;;  %v9561_v41 = vld [vmem:[%s13837_s1 + $0xf14] ss:$8 sps:$4 sm:$0xff]  }
 0x150   :  { %5702 = vmatpush1.bf16.msra.mxu0 %v9474_v25  ;;  %5334 = vmatprep.subr.bf16.mxu1 %v9479_v26  ;;  %v9549_v25 = vld [vmem:[%s13837_s1 + $0x600] ss:$8 sps:$4 sm:$0xff]  }
 0x151   :  { %5703 = vmatprep.subr.bf16.mxu0 %v9482_v27  ;;  %v9553_v26 = vld [vmem:[%s13837_s1 + $0xf00] ss:$8 sps:$4 sm:$0xff]   ;;  %v11840_v27 = vrot.slane %v909_v22, %v10667_v51  ;;  %v9636_v22 = vld [vmem:[%s13837_s1 + $0x6e4] ss:$8 sps:$4 sm:$0xff]  }
 0x153   :  { %5335 = vmatpush1.bf16.msra.mxu1 %v9477_v52  ;;  %v1039_v52 = vcombine.high %v11629_v13, %v11629_v13  ;;  %v9567_v13 = vld [vmem:[%s13837_s1 + $0xf24] ss:$8 sps:$4 sm:$0xff]  }
 0x154   :  { %5704 = vmatpush1.bf16.msra.mxu0 %v9480_v30  ;;  %5336 = vmatprep.subr.bf16.mxu1 %v9485_v31  ;;  %v9556_v30 = vld [vmem:[%s13837_s1 + $0x610] ss:$8 sps:$4 sm:$0xff]  }
 0x155   :  { %5705 = vmatprep.subr.bf16.mxu0 %v9488_v32  ;;  %v9559_v31 = vld [vmem:[%s13837_s1 + $0xf10] ss:$8 sps:$4 sm:$0xff]   ;;  %v9564_v32 = vld [vmem:[%s13837_s1 + $0x624] ss:$8 sps:$4 sm:$0xff]  }
 0x157   :  { %5337 = vmatpush1.bf16.msra.mxu1 %v9483_v33  ;;  %v9562_v33 = vld [vmem:[%s13837_s1 + $0x620] ss:$8 sps:$4 sm:$0xff]  }
 0x158   :  { %5706 = vmatpush1.bf16.msra.mxu0 %v9486_v34  ;;  %5338 = vmatprep.subr.bf16.mxu1 %v9491_v35  ;;  %v9565_v34 = vld [vmem:[%s13837_s1 + $0xf20] ss:$8 sps:$4 sm:$0xff]   ;;  %v9570_v35 = vld [vmem:[%s13837_s1 + $0x634] ss:$8 sps:$4 sm:$0xff]  }
 0x159   :  { %5707 = vmatprep.subr.bf16.mxu0 %v9494_v37  ;;  %v9573_v37 = vld [vmem:[%s13837_s1 + $0xf34] ss:$8 sps:$4 sm:$0xff]  }
 0x15b   :  { %5339 = vmatpush1.bf16.msra.mxu1 %v9489_v21  ;;  %v9568_v21 = vld [vmem:[%s13837_s1 + $0x630] ss:$8 sps:$4 sm:$0xff]  }
 0x15c   :  { %5708 = vmatpush1.bf16.msra.mxu0 %v9492_v14  ;;  %5340 = vmatprep.subr.bf16.mxu1 %v9497_v40  ;;  %v9571_v14 = vld [vmem:[%s13837_s1 + $0xf30] ss:$8 sps:$4 sm:$0xff]   ;;  %v9576_v40 = vld [vmem:[%s13837_s1 + $0x644] ss:$8 sps:$4 sm:$0xff]  }
 0x15d   :  { %5709 = vmatprep.subr.bf16.mxu0 %v9500_v42  ;;  %v9579_v42 = vld [vmem:[%s13837_s1 + $0xf44] ss:$8 sps:$4 sm:$0xff]  }
 0x15f   :  { %5341 = vmatpush1.bf16.msra.mxu1 %v9495_v43  ;;  %v9574_v43 = vld [vmem:[%s13837_s1 + $0x640] ss:$8 sps:$4 sm:$0xff]  }
 0x160   :  { %5710 = vmatpush1.bf16.msra.mxu0 %v9498_v28  ;;  %5342 = vmatprep.subr.bf16.mxu1 %v9503_v44  ;;  %v9577_v28 = vld [vmem:[%s13837_s1 + $0xf40] ss:$8 sps:$4 sm:$0xff]   ;;  %v9582_v44 = vld [vmem:[%s13837_s1 + $0x654] ss:$8 sps:$4 sm:$0xff]  }
 0x161   :  { %5711 = vmatprep.subr.bf16.mxu0 %v9506_v46  ;;  %v9585_v46 = vld [vmem:[%s13837_s1 + $0xf54] ss:$8 sps:$4 sm:$0xff]  }
 0x163   :  { %5343 = vmatpush1.bf16.msra.mxu1 %v9501_v47  ;;  %v9580_v47 = vld [vmem:[%s13837_s1 + $0x650] ss:$8 sps:$4 sm:$0xff]  }
 0x164   :  { %5712 = vmatpush1.bf16.msra.mxu0 %v9504_v49  ;;  %5344 = vmatprep.subr.bf16.mxu1 %v9509_v50  ;;  %v9583_v49 = vld [vmem:[%s13837_s1 + $0xf50] ss:$8 sps:$4 sm:$0xff]   ;;  %v9588_v50 = vld [vmem:[%s13837_s1 + $0x664] ss:$8 sps:$4 sm:$0xff]  }
 0x165   :  { %5713 = vmatprep.subr.bf16.mxu0 %v9512_v53  ;;  %v9591_v53 = vld [vmem:[%s13837_s1 + $0xf64] ss:$8 sps:$4 sm:$0xff]  }
 0x167   :  { %5345 = vmatpush1.bf16.msra.mxu1 %v9507_v54  ;;  %v9586_v54 = vld [vmem:[%s13837_s1 + $0x660] ss:$8 sps:$4 sm:$0xff]  }
 0x168   :  { %5714 = vmatpush1.bf16.msra.mxu0 %v9510_v55  ;;  %5346 = vmatprep.subr.bf16.mxu1 %v9515_v56  ;;  %v9589_v55 = vld [vmem:[%s13837_s1 + $0xf60] ss:$8 sps:$4 sm:$0xff]   ;;  %v9594_v56 = vld [vmem:[%s13837_s1 + $0x674] ss:$8 sps:$4 sm:$0xff]  }
 0x169   :  { %5715 = vmatprep.subr.bf16.mxu0 %v9518_v39  ;;  %v9597_v39 = vld [vmem:[%s13837_s1 + $0xf74] ss:$8 sps:$4 sm:$0xff]  }
 0x16b   :  { %5347 = vmatpush1.bf16.msra.mxu1 %v9513_v57  ;;  %v9592_v57 = vld [vmem:[%s13837_s1 + $0x670] ss:$8 sps:$4 sm:$0xff]  }
 0x16c   :  { %5716 = vmatpush1.bf16.msra.mxu0 %v9516_v58  ;;  %5348 = vmatprep.subr.bf16.mxu1 %v9521_v59  ;;  %v9595_v58 = vld [vmem:[%s13837_s1 + $0xf70] ss:$8 sps:$4 sm:$0xff]   ;;  %v9600_v59 = vld [vmem:[%s13837_s1 + $0x684] ss:$8 sps:$4 sm:$0xff]  }
 0x16d   :  { %5717 = vmatprep.subr.bf16.mxu0 %v9524_v60  ;;  %v9603_v60 = vld [vmem:[%s13837_s1 + $0xf84] ss:$8 sps:$4 sm:$0xff]  }
 0x16f   :  { %5349 = vmatpush1.bf16.msra.mxu1 %v9519_v61  ;;  %v9598_v61 = vld [vmem:[%s13837_s1 + $0x680] ss:$8 sps:$4 sm:$0xff]  }
 0x170   :  { %5718 = vmatpush1.bf16.msra.mxu0 %v9522_v62  ;;  %5350 = vmatprep.subr.bf16.mxu1 %v9527_v0  ;;  %v9601_v62 = vld [vmem:[%s13837_s1 + $0xf80] ss:$8 sps:$4 sm:$0xff]   ;;  %v9606_v0 = vld [vmem:[%s13837_s1 + $0x694] ss:$8 sps:$4 sm:$0xff]  }
 0x171   :  { %5719 = vmatprep.subr.bf16.mxu0 %v9530_v1  ;;  %v9609_v1 = vld [vmem:[%s13837_s1 + $0xf94] ss:$8 sps:$4 sm:$0xff]  }
 0x173   :  { %5351 = vmatpush1.bf16.msra.mxu1 %v9525_v48  ;;  %v9604_v48 = vld [vmem:[%s13837_s1 + $0x690] ss:$8 sps:$4 sm:$0xff]  }
 0x174   :  { %5720 = vmatpush1.bf16.msra.mxu0 %v9528_v38  ;;  %5352 = vmatprep.subr.bf16.mxu1 %v9533_v4  ;;  %v9607_v38 = vld [vmem:[%s13837_s1 + $0xf90] ss:$8 sps:$4 sm:$0xff]   ;;  %v9612_v4 = vld [vmem:[%s13837_s1 + $0x6a4] ss:$8 sps:$4 sm:$0xff]  }
 0x175   :  { %5721 = vmatprep.subr.bf16.mxu0 %v9536_v5  ;;  %v9615_v5 = vld [vmem:[%s13837_s1 + $0xfa4] ss:$8 sps:$4 sm:$0xff]  }
 0x177   :  { %5353 = vmatpush1.bf16.msra.mxu1 %v9531_v36  ;;  %v9610_v36 = vld [vmem:[%s13837_s1 + $0x6a0] ss:$8 sps:$4 sm:$0xff]  }
 0x178   :  { %5722 = vmatpush1.bf16.msra.mxu0 %v9534_v6  ;;  %5354 = vmatprep.subr.bf16.mxu1 %v9539_v7  ;;  %v9613_v6 = vld [vmem:[%s13837_s1 + $0xfa0] ss:$8 sps:$4 sm:$0xff]   ;;  %v9618_v7 = vld [vmem:[%s13837_s1 + $0x6b4] ss:$8 sps:$4 sm:$0xff]  }
 0x179   :  { %5723 = vmatprep.subr.bf16.mxu0 %v9542_v9  ;;  %v9621_v9 = vld [vmem:[%s13837_s1 + $0xfb4] ss:$8 sps:$4 sm:$0xff]  }
 0x17b   :  { %5355 = vmatpush1.bf16.msra.mxu1 %v9537_v29  ;;  %v9624_v29 = vld [vmem:[%s13837_s1 + $0x6c4] ss:$8 sps:$4 sm:$0xff]  }
 0x17c   :  { %5724 = vmatpush1.bf16.msra.mxu0 %v9540_v63  ;;  %5356 = vmatprep.subr.bf16.mxu1 %v9545_v12  ;;  %v9627_v63 = vld [vmem:[%s13837_s1 + $0xfc4] ss:$8 sps:$4 sm:$0xff]   ;;  %v9622_v12 = vld [vmem:[%s13837_s1 + $0x6c0] ss:$8 sps:$4 sm:$0xff]  }
 0x17d   :  { %5725 = vmatprep.subr.bf16.mxu0 %v9548_v16  ;;  %v9625_v16 = vld [vmem:[%s13837_s1 + $0xfc0] ss:$8 sps:$4 sm:$0xff]  }
 0x17f   :  { %5357 = vmatpush1.bf16.msra.mxu1 %v9543_v2  ;;  %v9630_v2 = vld [vmem:[%s13837_s1 + $0x6d4] ss:$8 sps:$4 sm:$0xff]  }
 0x180   :  { %5726 = vmatpush1.bf16.msra.mxu0 %v9546_v18  ;;  %5367 = vmatprep.subr.bf16.mxu1 %v9551_v19  ;;  %v9633_v18 = vld [vmem:[%s13837_s1 + $0xfd4] ss:$8 sps:$4 sm:$0xff]   ;;  %v9628_v19 = vld [vmem:[%s13837_s1 + $0x6d0] ss:$8 sps:$4 sm:$0xff]  }
 0x181   :  { %5736 = vmatprep.subr.bf16.mxu0 %v9555_v20  ;;  %v9631_v20 = vld [vmem:[%s13837_s1 + $0xfd0] ss:$8 sps:$4 sm:$0xff]  }
 0x182   :  { %5359 = vmatmul.mubr.bf16.vlgmr.msra.gmra.mrb[0].mxu1 %v938_v23  ;;  %v9639_v23 = vld [vmem:[%s13837_s1 + $0xfe4] ss:$8 sps:$4 sm:$0xff]  }
 0x183   :  { %5728 = vmatmul.mubr.bf16.vlgmr.msra.gmra.mrb[0].mxu0 %v11825_v24  ;;  %5368 = vmatpush1.bf16.msra.mxu1 %v9549_v25  ;;  %v12005_v25 = vld.sshfl [vmem:[%s13836_s0 + $0x20] sm:$0xff pattern:$0x75316420] }
 0x184   :  { %5737 = vmatpush1.bf16.msra.mxu0 %v9553_v26  ;;  %5369 = vmatprep.subr.bf16.mxu1 %v9558_v8  ;;  %v9634_v26 = vld [vmem:[%s13837_s1 + $0x6e0] ss:$8 sps:$4 sm:$0xff]  }
 0x185   :  { %5738 = vmatprep.subr.bf16.mxu0 %v9561_v41  ;;  %5399 = vmatprep.mubr.bf16.mxu1 %v11840_v27  ;;  %v9637_v8 = vld [vmem:[%s13837_s1 + $0xfe0] ss:$8 sps:$4 sm:$0xff]   ;;  %v9642_v41 = vld [vmem:[%s13837_s1 + $0x6f4] ss:$8 sps:$4 sm:$0xff]  }
 0x186   :  { %5768 = vmatprep.mubr.bf16.mxu0 %v1039_v52  ;;  %v9645_v52 = vld [vmem:[%s13837_s1 + $0xff4] ss:$8 sps:$4 sm:$0xff]  }
 0x187   :  { %5370 = vmatpush1.bf16.msra.mxu1 %v9556_v30  ;;  %v9640_v30 = vld [vmem:[%s13837_s1 + $0x6f0] ss:$8 sps:$4 sm:$0xff]  }
 0x188   :  { %5739 = vmatpush1.bf16.msra.mxu0 %v9559_v31  ;;  %5371 = vmatprep.subr.bf16.mxu1 %v9564_v32  ;;  %v9643_v31 = vld [vmem:[%s13837_s1 + $0xff0] ss:$8 sps:$4 sm:$0xff]   ;;  %v9649_v32 = vld [vmem:[%s13837_s1 + $0x704] ss:$8 sps:$4 sm:$0xff]  }
 0x189   :  { %5740 = vmatprep.subr.bf16.mxu0 %v9567_v13  ;;  %v9652_v13 = vld [vmem:[%s13837_s1 + $0x1004] ss:$8 sps:$4 sm:$0xff]  }
 0x18b   :  { %5372 = vmatpush1.bf16.msra.mxu1 %v9562_v33  ;;  %v9647_v33 = vld [vmem:[%s13837_s1 + $0x700] ss:$8 sps:$4 sm:$0xff]  }
 0x18c   :  { %5741 = vmatpush1.bf16.msra.mxu0 %v9565_v34  ;;  %5373 = vmatprep.subr.bf16.mxu1 %v9570_v35  ;;  %v9650_v34 = vld [vmem:[%s13837_s1 + $0x1000] ss:$8 sps:$4 sm:$0xff]   ;;  %v1055_v35 = vcombine.high %v12005_v25, %v12005_v25 }
 0x18d   :  { %5742 = vmatprep.subr.bf16.mxu0 %v9573_v37  ;;  %v12041_v37 = vrot.slane %v11805_v17, %v10667_v51  ;;  %v9653_v17 = vld [vmem:[%s13837_s1 + $0x710] ss:$8 sps:$4 sm:$0xff]  }
 0x18f   :  { %5374 = vmatpush1.bf16.msra.mxu1 %v9568_v21  ;;  %v1037_v21 = vcombine.high %v11825_v24, %v11825_v24  ;;  %v9656_v24 = vld [vmem:[%s13837_s1 + $0x1010] ss:$8 sps:$4 sm:$0xff]  }
 0x190   :  { %5743 = vmatpush1.bf16.msra.mxu0 %v9571_v14  ;;  %5375 = vmatprep.subr.bf16.mxu1 %v9576_v40  ;;  %v9655_v14 = vld [vmem:[%s13837_s1 + $0x714] ss:$8 sps:$4 sm:$0xff]  }
 0x191   :  { %5744 = vmatprep.subr.bf16.mxu0 %v9579_v42  ;;  %v9658_v40 = vld [vmem:[%s13837_s1 + $0x1014] ss:$8 sps:$4 sm:$0xff]   ;;  %v941_v42 = vcombine.high %v11840_v27, %v11840_v27  ;;  %v9659_v27 = vld [vmem:[%s13837_s1 + $0x720] ss:$8 sps:$4 sm:$0xff]  }
 0x193   :  { %5376 = vmatpush1.bf16.msra.mxu1 %v9574_v43  ;;  %v12060_v43 = vrot.slane %v1055_v35, %v10667_v51  ;;  %v9731_v35 = vld [vmem:[%s13837_s1 + $0x7e0] ss:$8 sps:$4 sm:$0xff]  }
 0x194   :  { %5745 = vmatpush1.bf16.msra.mxu0 %v9577_v28  ;;  %5377 = vmatprep.subr.bf16.mxu1 %v9582_v44  ;;  %v9661_v28 = vld [vmem:[%s13837_s1 + $0x724] ss:$8 sps:$4 sm:$0xff]  }
 0x195   :  { %5746 = vmatprep.subr.bf16.mxu0 %v9585_v46  ;;  %v9664_v44 = vld [vmem:[%s13837_s1 + $0x1024] ss:$8 sps:$4 sm:$0xff]   ;;  %v9662_v46 = vld [vmem:[%s13837_s1 + $0x1020] ss:$8 sps:$4 sm:$0xff]  }
 0x197   :  { %5378 = vmatpush1.bf16.msra.mxu1 %v9580_v47  ;;  %v9667_v47 = vld [vmem:[%s13837_s1 + $0x734] ss:$8 sps:$4 sm:$0xff]  }
 0x198   :  { %5747 = vmatpush1.bf16.msra.mxu0 %v9583_v49  ;;  %5379 = vmatprep.subr.bf16.mxu1 %v9588_v50  ;;  %v9670_v49 = vld [vmem:[%s13837_s1 + $0x1034] ss:$8 sps:$4 sm:$0xff]   ;;  %v9665_v50 = vld [vmem:[%s13837_s1 + $0x730] ss:$8 sps:$4 sm:$0xff]  }
 0x199   :  { %5748 = vmatprep.subr.bf16.mxu0 %v9591_v53  ;;  %v9668_v53 = vld [vmem:[%s13837_s1 + $0x1030] ss:$8 sps:$4 sm:$0xff]  }
 0x19b   :  { %5380 = vmatpush1.bf16.msra.mxu1 %v9586_v54  ;;  %v9673_v54 = vld [vmem:[%s13837_s1 + $0x744] ss:$8 sps:$4 sm:$0xff]  }
 0x19c   :  { %5749 = vmatpush1.bf16.msra.mxu0 %v9589_v55  ;;  %5381 = vmatprep.subr.bf16.mxu1 %v9594_v56  ;;  %v9676_v55 = vld [vmem:[%s13837_s1 + $0x1044] ss:$8 sps:$4 sm:$0xff]   ;;  %v9671_v56 = vld [vmem:[%s13837_s1 + $0x740] ss:$8 sps:$4 sm:$0xff]  }
 0x19d   :  { %5750 = vmatprep.subr.bf16.mxu0 %v9597_v39  ;;  %v9674_v39 = vld [vmem:[%s13837_s1 + $0x1040] ss:$8 sps:$4 sm:$0xff]  }
 0x19f   :  { %5382 = vmatpush1.bf16.msra.mxu1 %v9592_v57  ;;  %v9679_v57 = vld [vmem:[%s13837_s1 + $0x754] ss:$8 sps:$4 sm:$0xff]  }
 0x1a0   :  { %5751 = vmatpush1.bf16.msra.mxu0 %v9595_v58  ;;  %5383 = vmatprep.subr.bf16.mxu1 %v9600_v59  ;;  %v9682_v58 = vld [vmem:[%s13837_s1 + $0x1054] ss:$8 sps:$4 sm:$0xff]   ;;  %v9677_v59 = vld [vmem:[%s13837_s1 + $0x750] ss:$8 sps:$4 sm:$0xff]  }
 0x1a1   :  { %5752 = vmatprep.subr.bf16.mxu0 %v9603_v60  ;;  %v9680_v60 = vld [vmem:[%s13837_s1 + $0x1050] ss:$8 sps:$4 sm:$0xff]  }
 0x1a3   :  { %5384 = vmatpush1.bf16.msra.mxu1 %v9598_v61  ;;  %v9685_v61 = vld [vmem:[%s13837_s1 + $0x764] ss:$8 sps:$4 sm:$0xff]  }
 0x1a4   :  { %5753 = vmatpush1.bf16.msra.mxu0 %v9601_v62  ;;  %5385 = vmatprep.subr.bf16.mxu1 %v9606_v0  ;;  %v9688_v62 = vld [vmem:[%s13837_s1 + $0x1064] ss:$8 sps:$4 sm:$0xff]   ;;  %v9683_v0 = vld [vmem:[%s13837_s1 + $0x760] ss:$8 sps:$4 sm:$0xff]  }
 0x1a5   :  { %5754 = vmatprep.subr.bf16.mxu0 %v9609_v1  ;;  %v9686_v1 = vld [vmem:[%s13837_s1 + $0x1060] ss:$8 sps:$4 sm:$0xff]  }
 0x1a7   :  { %5386 = vmatpush1.bf16.msra.mxu1 %v9604_v48  ;;  %v9691_v48 = vld [vmem:[%s13837_s1 + $0x774] ss:$8 sps:$4 sm:$0xff]  }
 0x1a8   :  { %5755 = vmatpush1.bf16.msra.mxu0 %v9607_v38  ;;  %5387 = vmatprep.subr.bf16.mxu1 %v9612_v4  ;;  %v9694_v38 = vld [vmem:[%s13837_s1 + $0x1074] ss:$8 sps:$4 sm:$0xff]   ;;  %v9689_v4 = vld [vmem:[%s13837_s1 + $0x770] ss:$8 sps:$4 sm:$0xff]  }
 0x1a9   :  { %5756 = vmatprep.subr.bf16.mxu0 %v9615_v5  ;;  %v9692_v5 = vld [vmem:[%s13837_s1 + $0x1070] ss:$8 sps:$4 sm:$0xff]  }
 0x1ab   :  { %5388 = vmatpush1.bf16.msra.mxu1 %v9610_v36  ;;  %v9697_v36 = vld [vmem:[%s13837_s1 + $0x784] ss:$8 sps:$4 sm:$0xff]  }
 0x1ac   :  { %5757 = vmatpush1.bf16.msra.mxu0 %v9613_v6  ;;  %5389 = vmatprep.subr.bf16.mxu1 %v9618_v7  ;;  %v9700_v6 = vld [vmem:[%s13837_s1 + $0x1084] ss:$8 sps:$4 sm:$0xff]   ;;  %v9695_v7 = vld [vmem:[%s13837_s1 + $0x780] ss:$8 sps:$4 sm:$0xff]  }
 0x1ad   :  { %5758 = vmatprep.subr.bf16.mxu0 %v9621_v9  ;;  %v9698_v9 = vld [vmem:[%s13837_s1 + $0x1080] ss:$8 sps:$4 sm:$0xff]  }
 0x1af   :  { %5390 = vmatpush1.bf16.msra.mxu1 %v9616_v10  ;;  %v9703_v10 = vld [vmem:[%s13837_s1 + $0x794] ss:$8 sps:$4 sm:$0xff]  }
 0x1b0   :  { %5759 = vmatpush1.bf16.msra.mxu0 %v9619_v11  ;;  %5391 = vmatprep.subr.bf16.mxu1 %v9624_v29  ;;  %v9706_v11 = vld [vmem:[%s13837_s1 + $0x1094] ss:$8 sps:$4 sm:$0xff]   ;;  %v9701_v29 = vld [vmem:[%s13837_s1 + $0x790] ss:$8 sps:$4 sm:$0xff]  }
 0x1b1   :  { %5760 = vmatprep.subr.bf16.mxu0 %v9627_v63  ;;  %v9704_v63 = vld [vmem:[%s13837_s1 + $0x1090] ss:$8 sps:$4 sm:$0xff]  }
 0x1b3   :  { %5392 = vmatpush1.bf16.msra.mxu1 %v9622_v12  ;;  %v9709_v12 = vld [vmem:[%s13837_s1 + $0x7a4] ss:$8 sps:$4 sm:$0xff]  }
 0x1b4   :  { %5761 = vmatpush1.bf16.msra.mxu0 %v9625_v16  ;;  %5393 = vmatprep.subr.bf16.mxu1 %v9630_v2  ;;  %v9712_v16 = vld [vmem:[%s13837_s1 + $0x10a4] ss:$8 sps:$4 sm:$0xff]   ;;  %v9707_v2 = vld [vmem:[%s13837_s1 + $0x7a0] ss:$8 sps:$4 sm:$0xff]  }
 0x1b5   :  { %5762 = vmatprep.subr.bf16.mxu0 %v9633_v18  ;;  %v9710_v18 = vld [vmem:[%s13837_s1 + $0x10a0] ss:$8 sps:$4 sm:$0xff]  }
 0x1b7   :  { %5394 = vmatpush1.bf16.msra.mxu1 %v9628_v19  ;;  %v9715_v19 = vld [vmem:[%s13837_s1 + $0x7b4] ss:$8 sps:$4 sm:$0xff]  }
 0x1b8   :  { %5763 = vmatpush1.bf16.msra.mxu0 %v9631_v20  ;;  %5395 = vmatprep.subr.bf16.mxu1 %v9636_v22  ;;  %v9718_v20 = vld [vmem:[%s13837_s1 + $0x10b4] ss:$8 sps:$4 sm:$0xff]   ;;  %v9713_v22 = vld [vmem:[%s13837_s1 + $0x7b0] ss:$8 sps:$4 sm:$0xff]  }
 0x1b9   :  { %5764 = vmatprep.subr.bf16.mxu0 %v9639_v23  ;;  %v9716_v23 = vld [vmem:[%s13837_s1 + $0x10b0] ss:$8 sps:$4 sm:$0xff]  }
 0x1bb   :  { %5396 = vmatpush1.bf16.msra.mxu1 %v9634_v26  ;;  %v9721_v26 = vld [vmem:[%s13837_s1 + $0x7c4] ss:$8 sps:$4 sm:$0xff]  }
 0x1bc   :  { %5765 = vmatpush1.bf16.msra.mxu0 %v9637_v8  ;;  %5397 = vmatprep.subr.bf16.mxu1 %v9642_v41  ;;  %v9724_v8 = vld [vmem:[%s13837_s1 + $0x10c4] ss:$8 sps:$4 sm:$0xff]   ;;  %v9719_v41 = vld [vmem:[%s13837_s1 + $0x7c0] ss:$8 sps:$4 sm:$0xff]  }
 0x1bd   :  { %5766 = vmatprep.subr.bf16.mxu0 %v9645_v52  ;;  %v9722_v52 = vld [vmem:[%s13837_s1 + $0x10c0] ss:$8 sps:$4 sm:$0xff]  }
 0x1bf   :  { %5398 = vmatpush1.bf16.msra.mxu1 %v9640_v30  ;;  %v9727_v30 = vld [vmem:[%s13837_s1 + $0x7d4] ss:$8 sps:$4 sm:$0xff]  }
 0x1c0   :  { %5767 = vmatpush1.bf16.msra.mxu0 %v9643_v31  ;;  %5408 = vmatprep.subr.bf16.mxu1 %v9649_v32  ;;  %v9730_v31 = vld [vmem:[%s13837_s1 + $0x10d4] ss:$8 sps:$4 sm:$0xff]   ;;  %v9725_v32 = vld [vmem:[%s13837_s1 + $0x7d0] ss:$8 sps:$4 sm:$0xff]  }
 0x1c1   :  { %5777 = vmatprep.subr.bf16.mxu0 %v9652_v13  ;;  %v9728_v13 = vld [vmem:[%s13837_s1 + $0x10d0] ss:$8 sps:$4 sm:$0xff]  }
 0x1c2   :  { %5400 = vmatmul.mubr.bf16.vlgmr.msra.gmra.mrb[0].mxu1 %v12041_v37 }
 0x1c3   :  { %5769 = vmatmul.mubr.bf16.vlgmr.msra.gmra.mrb[0].mxu0 %v1037_v21  ;;  %5409 = vmatpush1.bf16.msra.mxu1 %v9647_v33  ;;  %v9733_v33 = vld [vmem:[%s13837_s1 + $0x7e4] ss:$8 sps:$4 sm:$0xff]   ;;  %v9734_v21 = vld [vmem:[%s13837_s1 + $0x10e0] ss:$8 sps:$4 sm:$0xff]  }
 0x1c4   :  { %5778 = vmatpush1.bf16.msra.mxu0 %v9650_v34  ;;  %5410 = vmatprep.subr.bf16.mxu1 %v9655_v14  ;;  %v9736_v34 = vld [vmem:[%s13837_s1 + $0x10e4] ss:$8 sps:$4 sm:$0xff]   ;;  %v9739_v14 = vld [vmem:[%s13837_s1 + $0x7f4] ss:$8 sps:$4 sm:$0xff]  }
 0x1c5   :  { %5779 = vmatprep.subr.bf16.mxu0 %v9658_v40  ;;  %5440 = vmatprep.mubr.bf16.mxu1 %v941_v42  ;;  %v9742_v40 = vld [vmem:[%s13837_s1 + $0x10f4] ss:$8 sps:$4 sm:$0xff]   ;;  %v9745_v42 = vld [vmem:[%s13837_s1 + $0x804] ss:$8 sps:$4 sm:$0xff]  }
 0x1c6   :  { %5809 = vmatprep.mubr.bf16.mxu0 %v12060_v43 }
 0x1c7   :  { %5411 = vmatpush1.bf16.msra.mxu1 %v9653_v17  ;;  %v9737_v17 = vld [vmem:[%s13837_s1 + $0x7f0] ss:$8 sps:$4 sm:$0xff]  }
 0x1c8   :  { %5780 = vmatpush1.bf16.msra.mxu0 %v9656_v24  ;;  %5412 = vmatprep.subr.bf16.mxu1 %v9661_v28  ;;  %v9740_v24 = vld [vmem:[%s13837_s1 + $0x10f0] ss:$8 sps:$4 sm:$0xff]   ;;  %v9748_v28 = vld [vmem:[%s13837_s1 + $0x1104] ss:$8 sps:$4 sm:$0xff]  }
 0x1c9   :  { %5781 = vmatprep.subr.bf16.mxu0 %v9664_v44  ;;  %v9743_v44 = vld [vmem:[%s13837_s1 + $0x800] ss:$8 sps:$4 sm:$0xff]  }
 0x1cb   :  { %5413 = vmatpush1.bf16.msra.mxu1 %v9659_v27  ;;  %v9746_v27 = vld [vmem:[%s13837_s1 + $0x1100] ss:$8 sps:$4 sm:$0xff]  }
 0x1cc   :  { %5782 = vmatpush1.bf16.msra.mxu0 %v9662_v46  ;;  %5414 = vmatprep.subr.bf16.mxu1 %v9667_v47  ;;  %v939_v46 = vcombine.high %v12041_v37, %v12041_v37  ;;  %v12248_v47 = vrot.slane %v12005_v25, %v10667_v51  ;;  %v9749_v37 = vld [vmem:[%s13837_s1 + $0x810] ss:$8 sps:$4 sm:$0xff]  }
 0x1cd   :  { %5783 = vmatprep.subr.bf16.mxu0 %v9670_v49  ;;  %v9751_v49 = vld [vmem:[%s13837_s1 + $0x814] ss:$8 sps:$4 sm:$0xff]   ;;  %v9752_v25 = vld [vmem:[%s13837_s1 + $0x1110] ss:$8 sps:$4 sm:$0xff]  }
 0x1cf   :  { %5415 = vmatpush1.bf16.msra.mxu1 %v9665_v50  ;;  %v9754_v50 = vld [vmem:[%s13837_s1 + $0x1114] ss:$8 sps:$4 sm:$0xff]  }
 0x1d0   :  { %5784 = vmatpush1.bf16.msra.mxu0 %v9668_v53  ;;  %5416 = vmatprep.subr.bf16.mxu1 %v9673_v54  ;;  %v1087_v53 = vcombine.high %v12060_v43, %v12060_v43  ;;  %v9757_v54 = vld [vmem:[%s13837_s1 + $0x824] ss:$8 sps:$4 sm:$0xff]   ;;  %v9758_v43 = vld [vmem:[%s13837_s1 + $0x1120] ss:$8 sps:$4 sm:$0xff]  }
 0x1d1   :  { %5785 = vmatprep.subr.bf16.mxu0 %v9676_v55  ;;  %v9760_v55 = vld [vmem:[%s13837_s1 + $0x1124] ss:$8 sps:$4 sm:$0xff]  }
 0x1d3   :  { %5417 = vmatpush1.bf16.msra.mxu1 %v9671_v56  ;;  %v9755_v56 = vld [vmem:[%s13837_s1 + $0x820] ss:$8 sps:$4 sm:$0xff]  }
 0x1d4   :  { %5786 = vmatpush1.bf16.msra.mxu0 %v9674_v39  ;;  %5418 = vmatprep.subr.bf16.mxu1 %v9679_v57  ;;  %v9763_v39 = vld [vmem:[%s13837_s1 + $0x834] ss:$8 sps:$4 sm:$0xff]  }
 0x1d5   :  { %5787 = vmatprep.subr.bf16.mxu0 %v9682_v58  ;;  %v9766_v57 = vld [vmem:[%s13837_s1 + $0x1134] ss:$8 sps:$4 sm:$0xff]   ;;  %v9761_v58 = vld [vmem:[%s13837_s1 + $0x830] ss:$8 sps:$4 sm:$0xff]  }
 0x1d7   :  { %5419 = vmatpush1.bf16.msra.mxu1 %v9677_v59  ;;  %v9769_v59 = vld [vmem:[%s13837_s1 + $0x844] ss:$8 sps:$4 sm:$0xff]  }
 0x1d8   :  { %5788 = vmatpush1.bf16.msra.mxu0 %v9680_v60  ;;  %5420 = vmatprep.subr.bf16.mxu1 %v9685_v61  ;;  %v9772_v60 = vld [vmem:[%s13837_s1 + $0x1144] ss:$8 sps:$4 sm:$0xff]   ;;  %v9767_v61 = vld [vmem:[%s13837_s1 + $0x840] ss:$8 sps:$4 sm:$0xff]  }
 0x1d9   :  { %5789 = vmatprep.subr.bf16.mxu0 %v9688_v62  ;;  %v9770_v62 = vld [vmem:[%s13837_s1 + $0x1140] ss:$8 sps:$4 sm:$0xff]  }
 0x1db   :  { %5421 = vmatpush1.bf16.msra.mxu1 %v9683_v0  ;;  %v9775_v0 = vld [vmem:[%s13837_s1 + $0x854] ss:$8 sps:$4 sm:$0xff]  }
 0x1dc   :  { %5790 = vmatpush1.bf16.msra.mxu0 %v9686_v1  ;;  %5422 = vmatprep.subr.bf16.mxu1 %v9691_v48  ;;  %v9778_v1 = vld [vmem:[%s13837_s1 + $0x1154] ss:$8 sps:$4 sm:$0xff]   ;;  %v9773_v48 = vld [vmem:[%s13837_s1 + $0x850] ss:$8 sps:$4 sm:$0xff]  }
 0x1dd   :  { %5791 = vmatprep.subr.bf16.mxu0 %v9694_v38  ;;  %v9776_v38 = vld [vmem:[%s13837_s1 + $0x1150] ss:$8 sps:$4 sm:$0xff]  }
 0x1df   :  { %5423 = vmatpush1.bf16.msra.mxu1 %v9689_v4  ;;  %v9781_v4 = vld [vmem:[%s13837_s1 + $0x864] ss:$8 sps:$4 sm:$0xff]  }
 0x1e0   :  { %5792 = vmatpush1.bf16.msra.mxu0 %v9692_v5  ;;  %5424 = vmatprep.subr.bf16.mxu1 %v9697_v36  ;;  %v9784_v5 = vld [vmem:[%s13837_s1 + $0x1164] ss:$8 sps:$4 sm:$0xff]   ;;  %v9779_v36 = vld [vmem:[%s13837_s1 + $0x860] ss:$8 sps:$4 sm:$0xff]  }
 0x1e1   :  { %5793 = vmatprep.subr.bf16.mxu0 %v9700_v6  ;;  %v9782_v6 = vld [vmem:[%s13837_s1 + $0x1160] ss:$8 sps:$4 sm:$0xff]  }
 0x1e3   :  { %5425 = vmatpush1.bf16.msra.mxu1 %v9695_v7  ;;  %v9787_v7 = vld [vmem:[%s13837_s1 + $0x874] ss:$8 sps:$4 sm:$0xff]  }
 0x1e4   :  { %5794 = vmatpush1.bf16.msra.mxu0 %v9698_v9  ;;  %5426 = vmatprep.subr.bf16.mxu1 %v9703_v10  ;;  %v9790_v9 = vld [vmem:[%s13837_s1 + $0x1174] ss:$8 sps:$4 sm:$0xff]   ;;  %v9785_v10 = vld [vmem:[%s13837_s1 + $0x870] ss:$8 sps:$4 sm:$0xff]  }
 0x1e5   :  { %5795 = vmatprep.subr.bf16.mxu0 %v9706_v11  ;;  %v9788_v11 = vld [vmem:[%s13837_s1 + $0x1170] ss:$8 sps:$4 sm:$0xff]  }
 0x1e7   :  { %5427 = vmatpush1.bf16.msra.mxu1 %v9701_v29  ;;  %v9793_v29 = vld [vmem:[%s13837_s1 + $0x884] ss:$8 sps:$4 sm:$0xff]  }
 0x1e8   :  { %5796 = vmatpush1.bf16.msra.mxu0 %v9704_v63  ;;  %5428 = vmatprep.subr.bf16.mxu1 %v9709_v12  ;;  %v9796_v63 = vld [vmem:[%s13837_s1 + $0x1184] ss:$8 sps:$4 sm:$0xff]   ;;  %v9791_v12 = vld [vmem:[%s13837_s1 + $0x880] ss:$8 sps:$4 sm:$0xff]  }
 0x1e9   :  { %5797 = vmatprep.subr.bf16.mxu0 %v9712_v16  ;;  %v9794_v16 = vld [vmem:[%s13837_s1 + $0x1180] ss:$8 sps:$4 sm:$0xff]  }
 0x1eb   :  { %5429 = vmatpush1.bf16.msra.mxu1 %v9707_v2  ;;  %v9799_v2 = vld [vmem:[%s13837_s1 + $0x894] ss:$8 sps:$4 sm:$0xff]  }
 0x1ec   :  { %5798 = vmatpush1.bf16.msra.mxu0 %v9710_v18  ;;  %5430 = vmatprep.subr.bf16.mxu1 %v9715_v19  ;;  %v9802_v18 = vld [vmem:[%s13837_s1 + $0x1194] ss:$8 sps:$4 sm:$0xff]   ;;  %v9797_v19 = vld [vmem:[%s13837_s1 + $0x890] ss:$8 sps:$4 sm:$0xff]  }
 0x1ed   :  { %5799 = vmatprep.subr.bf16.mxu0 %v9718_v20  ;;  %v9800_v20 = vld [vmem:[%s13837_s1 + $0x1190] ss:$8 sps:$4 sm:$0xff]  }
 0x1ef   :  { %5431 = vmatpush1.bf16.msra.mxu1 %v9713_v22  ;;  %v9805_v22 = vld [vmem:[%s13837_s1 + $0x8a4] ss:$8 sps:$4 sm:$0xff]  }
 0x1f0   :  { %5800 = vmatpush1.bf16.msra.mxu0 %v9716_v23  ;;  %5432 = vmatprep.subr.bf16.mxu1 %v9721_v26  ;;  %v9808_v23 = vld [vmem:[%s13837_s1 + $0x11a4] ss:$8 sps:$4 sm:$0xff]  }
 0x1f1   :  { %5801 = vmatprep.subr.bf16.mxu0 %v9724_v8 }
 0x1f3   :  { %5433 = vmatpush1.bf16.msra.mxu1 %v9719_v41 }
 0x1f4   :  { %5802 = vmatpush1.bf16.msra.mxu0 %v9722_v52  ;;  %5434 = vmatprep.subr.bf16.mxu1 %v9727_v30 }
 0x1f5   :  { %5803 = vmatprep.subr.bf16.mxu0 %v9730_v31 }
 0x1f7   :  { %5435 = vmatpush1.bf16.msra.mxu1 %v9725_v32 }
 0x1f8   :  { %5804 = vmatpush1.bf16.msra.mxu0 %v9728_v13  ;;  %5436 = vmatprep.subr.bf16.mxu1 %v9733_v33 }
 0x1f9   :  { %5805 = vmatprep.subr.bf16.mxu0 %v9736_v34 }
 0x1fb   :  { %5437 = vmatpush1.bf16.msra.mxu1 %v9731_v35 }
 0x1fc   :  { %5806 = vmatpush1.bf16.msra.mxu0 %v9734_v21  ;;  %5438 = vmatprep.subr.bf16.mxu1 %v9739_v14 }
 0x1fd   :  { %5807 = vmatprep.subr.bf16.mxu0 %v9742_v40 }
 0x1ff   :  { %5439 = vmatpush1.bf16.msra.mxu1 %v9737_v17 }
 0x200   :  { %5808 = vmatpush1.bf16.msra.mxu0 %v9740_v24  ;;  %5449 = vmatprep.subr.bf16.mxu1 %v9745_v42 }
 0x201   :  { %5818 = vmatprep.subr.bf16.mxu0 %v9748_v28 }
 0x202   :  { %5441 = vmatmul.mubr.bf16.vlgmr.msra.gmra.mrb[0].mxu1 %v939_v46 }
 0x203   :  { %5810 = vmatmul.mubr.bf16.vlgmr.msra.gmra.mrb[0].mxu0 %v12248_v47  ;;  %5450 = vmatpush1.bf16.msra.mxu1 %v9743_v44 }
 0x204   :  { %5819 = vmatpush1.bf16.msra.mxu0 %v9746_v27  ;;  %5451 = vmatprep.subr.bf16.mxu1 %v9751_v49 }
 0x205   :  { %5820 = vmatprep.subr.bf16.mxu0 %v9754_v50  ;;  %5481 = vmatprep.mubr.bf16.mxu1 %v10708_v3  ;;  %v9764_v3 = vld [vmem:[%s13837_s1 + $0x1130] ss:$8 sps:$4 sm:$0xff]  }
 0x206   :  { %5850 = vmatprep.mubr.bf16.mxu0 %v1087_v53 }
 0x207   :  { %5452 = vmatpush1.bf16.msra.mxu1 %v9749_v37 }
 0x208   :  { %5821 = vmatpush1.bf16.msra.mxu0 %v9752_v25  ;;  %5453 = vmatprep.subr.bf16.mxu1 %v9757_v54 }
 0x209   :  { %5822 = vmatprep.subr.bf16.mxu0 %v9760_v55 }
 0x20b   :  { %5454 = vmatpush1.bf16.msra.mxu1 %v9755_v56 }
 0x20c   :  { %5823 = vmatpush1.bf16.msra.mxu0 %v9758_v43  ;;  %5455 = vmatprep.subr.bf16.mxu1 %v9763_v39 }
 0x20d   :  { %5824 = vmatprep.subr.bf16.mxu0 %v9766_v57 }
 0x20f   :  { %5456 = vmatpush1.bf16.msra.mxu1 %v9761_v58 }
 0x210   :  { %5825 = vmatpush1.bf16.msra.mxu0 %v9764_v3  ;;  %5457 = vmatprep.subr.bf16.mxu1 %v9769_v59 }
 0x211   :  { %5826 = vmatprep.subr.bf16.mxu0 %v9772_v60 }
 0x213   :  { %5458 = vmatpush1.bf16.msra.mxu1 %v9767_v61 }
 0x214   :  { %5827 = vmatpush1.bf16.msra.mxu0 %v9770_v62  ;;  %5459 = vmatprep.subr.bf16.mxu1 %v9775_v0 }
 0x215   :  { %5828 = vmatprep.subr.bf16.mxu0 %v9778_v1 }
 0x217   :  { %5460 = vmatpush1.bf16.msra.mxu1 %v9773_v48 }
 0x218   :  { %5829 = vmatpush1.bf16.msra.mxu0 %v9776_v38  ;;  %5461 = vmatprep.subr.bf16.mxu1 %v9781_v4 }
 0x219   :  { %5830 = vmatprep.subr.bf16.mxu0 %v9784_v5 }
 0x21b   :  { %5462 = vmatpush1.bf16.msra.mxu1 %v9779_v36 }
 0x21c   :  { %5831 = vmatpush1.bf16.msra.mxu0 %v9782_v6  ;;  %5463 = vmatprep.subr.bf16.mxu1 %v9787_v7 }
 0x21d   :  { %5832 = vmatprep.subr.bf16.mxu0 %v9790_v9 }
 0x21f   :  { %5464 = vmatpush1.bf16.msra.mxu1 %v9785_v10 }
 0x220   :  { %5833 = vmatpush1.bf16.msra.mxu0 %v9788_v11  ;;  %5465 = vmatprep.subr.bf16.mxu1 %v9793_v29 }
 0x221   :  { %5834 = vmatprep.subr.bf16.mxu0 %v9796_v63 }
 0x223   :  { %5466 = vmatpush1.bf16.msra.mxu1 %v9791_v12 }
 0x224   :  { %5835 = vmatpush1.bf16.msra.mxu0 %v9794_v16  ;;  %5467 = vmatprep.subr.bf16.mxu1 %v9799_v2 }
 0x225   :  { %5836 = vmatprep.subr.bf16.mxu0 %v9802_v18 }
 0x226   :  { %14 = vsyncpa [#allocation3], 0  ;;  %v9803_v26 = vld [vmem:[%s13837_s1 + $0x8a0] ss:$8 sps:$4 sm:$0xff]   ;;  %v9811_v41 = vld [vmem:[%s13837_s1 + $0x8b4] ss:$8 sps:$4 sm:$0xff]   ;;  %v1085_v55 = vcombine.high %v12248_v47, %v12248_v47 }
 0x227   :  { %5468 = vmatpush1.bf16.msra.mxu1 %v9797_v19  ;;  %v9806_v8 = vld [vmem:[%s13837_s1 + $0x11a0] ss:$8 sps:$4 sm:$0xff]   ;;  %v9814_v52 = vld [vmem:[%s13837_s1 + $0x11b4] ss:$8 sps:$4 sm:$0xff]   ;;  %v9809_v30 = vld [vmem:[%s13837_s1 + $0x8b0] ss:$8 sps:$4 sm:$0xff]  }
 0x228   :  { %5837 = vmatpush1.bf16.msra.mxu0 %v9800_v20  ;;  %5469 = vmatprep.subr.bf16.mxu1 %v9805_v22  ;;  %v9812_v31 = vld [vmem:[%s13837_s1 + $0x11b0] ss:$8 sps:$4 sm:$0xff]   ;;  %v9817_v32 = vld [vmem:[%s13837_s1 + $0x8c4] ss:$8 sps:$4 sm:$0xff]   ;;  %v9815_v33 = vld [vmem:[%s13837_s1 + $0x8c0] ss:$8 sps:$4 sm:$0xff]  }
 0x229   :  { %5838 = vmatprep.subr.bf16.mxu0 %v9808_v23  ;;  %v9820_v13 = vld [vmem:[%s13837_s1 + $0x11c4] ss:$8 sps:$4 sm:$0xff]   ;;  %v9818_v34 = vld [vmem:[%s13837_s1 + $0x11c0] ss:$8 sps:$4 sm:$0xff]   ;;  %v9823_v35 = vld [vmem:[%s13837_s1 + $0x8d4] ss:$8 sps:$4 sm:$0xff]  }
 0x22a   :  { %v9826_v21 = vld [vmem:[%s13837_s1 + $0x11d4] ss:$8 sps:$4 sm:$0xff]   ;;  %v9821_v14 = vld [vmem:[%s13837_s1 + $0x8d0] ss:$8 sps:$4 sm:$0xff]   ;;  %v10446_v17 = vld [vmem:[%s13836_s0 + $0x20] sm:$0xff]  ;;  %vm7340_vm0 = vcmask 523264  }
 0x22b   :  { %5470 = vmatpush1.bf16.msra.mxu1 %v9803_v26  ;;  %v9824_v40 = vld [vmem:[%s13837_s1 + $0x11d0] ss:$8 sps:$4 sm:$0xff]   ;;  %v1040_v24 = vcombine.high %v10446_v17, %v10446_v17  ;;  %v9829_v42 = vld [vmem:[%s13837_s1 + $0x8e4] ss:$8 sps:$4 sm:$0xff]   ;;  %v9827_v44 = vld [vmem:[%s13837_s1 + $0x8e0] ss:$8 sps:$4 sm:$0xff]  }
 0x22c   :  { %5839 = vmatpush1.bf16.msra.mxu0 %v9806_v8  ;;  %5471 = vmatprep.subr.bf16.mxu1 %v9811_v41  ;;  %v9832_v28 = vld [vmem:[%s13837_s1 + $0x11e4] ss:$8 sps:$4 sm:$0xff]   ;;  %v9830_v27 = vld [vmem:[%s13837_s1 + $0x11e0] ss:$8 sps:$4 sm:$0xff]   ;;  %v9835_v49 = vld [vmem:[%s13837_s1 + $0x8f4] ss:$8 sps:$4 sm:$0xff]  }
 0x22d   :  { %5840 = vmatprep.subr.bf16.mxu0 %v9814_v52  ;;  %v12426_v46 = vrot.slane %v1040_v24, %v10667_v51  ;;  %v9838_v50 = vld [vmem:[%s13837_s1 + $0x11f4] ss:$8 sps:$4 sm:$0xff]   ;;  %v9833_v37 = vld [vmem:[%s13837_s1 + $0x8f0] ss:$8 sps:$4 sm:$0xff]   ;;  %v9841_v54 = vld [vmem:[%s13837_s1 + $0x1204] ss:$8 sps:$4 sm:$0xff]  }
 0x22e   :  { %v9836_v25 = vld [vmem:[%s13837_s1 + $0x11f0] ss:$8 sps:$4 sm:$0xff]   ;;  %v9839_v56 = vld [vmem:[%s13837_s1 + $0x1200] ss:$8 sps:$4 sm:$0xff]   ;;  %v9844_v39 = vld [vmem:[%s13837_s1 + $0x1214] ss:$8 sps:$4 sm:$0xff]  }
 0x22f   :  { %5472 = vmatpush1.bf16.msra.mxu1 %v9809_v30  ;;  %v1056_v53 = vcombine.high %v12426_v46, %v12426_v46  ;;  %v9842_v47 = vld [vmem:[%s13837_s1 + $0x1210] ss:$8 sps:$4 sm:$0xff]   ;;  %v9847_v57 = vld [vmem:[%s13837_s1 + $0x1224] ss:$8 sps:$4 sm:$0xff]   ;;  %v9845_v58 = vld [vmem:[%s13837_s1 + $0x1220] ss:$8 sps:$4 sm:$0xff]   ;;  %v12550_v23 = vrot.slane %v12426_v46, %v10667_v51 }
 0x230   :  { %5841 = vmatpush1.bf16.msra.mxu0 %v9812_v31  ;;  %5473 = vmatprep.subr.bf16.mxu1 %v9817_v32  ;;  %v9848_v3 = vld [vmem:[%s13837_s1 + $0x1230] ss:$8 sps:$4 sm:$0xff]   ;;  %v9853_v59 = vld [vmem:[%s13837_s1 + $0x1244] ss:$8 sps:$4 sm:$0xff]   ;;  %v9851_v60 = vld [vmem:[%s13837_s1 + $0x1240] ss:$8 sps:$4 sm:$0xff]  }
 0x231   :  { %5842 = vmatprep.subr.bf16.mxu0 %v9820_v13  ;;  %v12451_v43 = vrot.slane %v1056_v53, %v10667_v51  ;;  %v9856_v61 = vld [vmem:[%s13837_s1 + $0x1254] ss:$8 sps:$4 sm:$0xff]   ;;  %v9854_v62 = vld [vmem:[%s13837_s1 + $0x1250] ss:$8 sps:$4 sm:$0xff]   ;;  %v9859_v0 = vld [vmem:[%s13837_s1 + $0x1264] ss:$8 sps:$4 sm:$0xff]  }
 0x232   :  { %v9857_v1 = vld [vmem:[%s13837_s1 + $0x1260] ss:$8 sps:$4 sm:$0xff]   ;;  %v9862_v48 = vld [vmem:[%s13837_s1 + $0x1274] ss:$8 sps:$4 sm:$0xff]   ;;  %v9860_v38 = vld [vmem:[%s13837_s1 + $0x1270] ss:$8 sps:$4 sm:$0xff]  }
 0x233   :  { %5474 = vmatpush1.bf16.msra.mxu1 %v9815_v33  ;;  %v9865_v4 = vld [vmem:[%s13837_s1 + $0x1284] ss:$8 sps:$4 sm:$0xff]   ;;  %v9863_v5 = vld [vmem:[%s13837_s1 + $0x1280] ss:$8 sps:$4 sm:$0xff]   ;;  %v9868_v36 = vld [vmem:[%s13837_s1 + $0x1294] ss:$8 sps:$4 sm:$0xff]   ;;  %v1088_v8 = vcombine.high %v12451_v43, %v12451_v43 }
 0x234   :  { %5843 = vmatpush1.bf16.msra.mxu0 %v9818_v34  ;;  %5475 = vmatprep.subr.bf16.mxu1 %v9823_v35  ;;  %v9866_v6 = vld [vmem:[%s13837_s1 + $0x1290] ss:$8 sps:$4 sm:$0xff]   ;;  %v9871_v7 = vld [vmem:[%s13837_s1 + $0x12a4] ss:$8 sps:$4 sm:$0xff]   ;;  %v9869_v9 = vld [vmem:[%s13837_s1 + $0x12a0] ss:$8 sps:$4 sm:$0xff]  }
 0x235   :  { %5844 = vmatprep.subr.bf16.mxu0 %v9826_v21  ;;  %v9874_v10 = vld [vmem:[%s13837_s1 + $0x12b4] ss:$8 sps:$4 sm:$0xff]   ;;  %v9872_v11 = vld [vmem:[%s13837_s1 + $0x12b0] ss:$8 sps:$4 sm:$0xff]   ;;  %v9877_v29 = vld [vmem:[%s13837_s1 + $0x12c4] ss:$8 sps:$4 sm:$0xff]  }
 0x236   :  { %v9875_v63 = vld [vmem:[%s13837_s1 + $0x12c0] ss:$8 sps:$4 sm:$0xff]   ;;  %v9880_v12 = vld [vmem:[%s13837_s1 + $0x12d4] ss:$8 sps:$4 sm:$0xff]   ;;  %v9878_v16 = vld [vmem:[%s13837_s1 + $0x12d0] ss:$8 sps:$4 sm:$0xff]  }
 0x237   :  { %5476 = vmatpush1.bf16.msra.mxu1 %v9821_v14  ;;  %v9883_v2 = vld [vmem:[%s13837_s1 + $0x12e4] ss:$8 sps:$4 sm:$0xff]   ;;  %v9881_v18 = vld [vmem:[%s13837_s1 + $0x12e0] ss:$8 sps:$4 sm:$0xff]   ;;  %v9886_v19 = vld [vmem:[%s13837_s1 + $0x12f4] ss:$8 sps:$4 sm:$0xff]  }
 0x238   :  { %5845 = vmatpush1.bf16.msra.mxu0 %v9824_v40  ;;  %5477 = vmatprep.subr.bf16.mxu1 %v9829_v42  ;;  %v9884_v20 = vld [vmem:[%s13837_s1 + $0x12f0] ss:$8 sps:$4 sm:$0xff]   ;;  %v9890_v22 = vld [vmem:[%s13837_s1 + $0x1304] ss:$8 sps:$4 sm:$0xff]   ;;  %v9888_v26 = vld [vmem:[%s13837_s1 + $0x1300] ss:$8 sps:$4 sm:$0xff]  }
 0x239   :  { %5846 = vmatprep.subr.bf16.mxu0 %v9832_v28  ;;  %v9893_v41 = vld [vmem:[%s13837_s1 + $0x1314] ss:$8 sps:$4 sm:$0xff]   ;;  %v9891_v52 = vld [vmem:[%s13837_s1 + $0x1310] ss:$8 sps:$4 sm:$0xff]   ;;  %v9896_v30 = vld [vmem:[%s13837_s1 + $0x1324] ss:$8 sps:$4 sm:$0xff]  }
 0x23a   :  { %v9894_v31 = vld [vmem:[%s13837_s1 + $0x1320] ss:$8 sps:$4 sm:$0xff]   ;;  %v9899_v32 = vld [vmem:[%s13837_s1 + $0x1334] ss:$8 sps:$4 sm:$0xff]   ;;  %v9897_v13 = vld [vmem:[%s13837_s1 + $0x1330] ss:$8 sps:$4 sm:$0xff]  }
 0x23b   :  { %5478 = vmatpush1.bf16.msra.mxu1 %v9827_v44  ;;  %v9902_v33 = vld [vmem:[%s13837_s1 + $0x1344] ss:$8 sps:$4 sm:$0xff]   ;;  %v9900_v34 = vld [vmem:[%s13837_s1 + $0x1340] ss:$8 sps:$4 sm:$0xff]   ;;  %v9905_v35 = vld [vmem:[%s13837_s1 + $0x1354] ss:$8 sps:$4 sm:$0xff]  }
 0x23c   :  { %5847 = vmatpush1.bf16.msra.mxu0 %v9830_v27  ;;  %5479 = vmatprep.subr.bf16.mxu1 %v9835_v49  ;;  %v9903_v21 = vld [vmem:[%s13837_s1 + $0x1350] ss:$8 sps:$4 sm:$0xff]   ;;  %v9908_v14 = vld [vmem:[%s13837_s1 + $0x1364] ss:$8 sps:$4 sm:$0xff]   ;;  %v9906_v40 = vld [vmem:[%s13837_s1 + $0x1360] ss:$8 sps:$4 sm:$0xff]  }
 0x23d   :  { %5848 = vmatprep.subr.bf16.mxu0 %v9838_v50  ;;  %v9911_v17 = vld [vmem:[%s13837_s1 + $0x1374] ss:$8 sps:$4 sm:$0xff]   ;;  %v9909_v24 = vld [vmem:[%s13837_s1 + $0x1370] ss:$8 sps:$4 sm:$0xff]   ;;  %v9914_v42 = vld [vmem:[%s13837_s1 + $0x1384] ss:$8 sps:$4 sm:$0xff]  }
 0x23e   :  { %v9912_v28 = vld [vmem:[%s13837_s1 + $0x1380] ss:$8 sps:$4 sm:$0xff]   ;;  %v9917_v44 = vld [vmem:[%s13837_s1 + $0x1394] ss:$8 sps:$4 sm:$0xff]   ;;  %v9915_v27 = vld [vmem:[%s13837_s1 + $0x1390] ss:$8 sps:$4 sm:$0xff]  }
 0x23f   :  { %5480 = vmatpush1.bf16.msra.mxu1 %v9833_v37  ;;  %v9920_v46 = vld [vmem:[%s13837_s1 + $0x13a4] ss:$8 sps:$4 sm:$0xff]   ;;  %v9918_v49 = vld [vmem:[%s13837_s1 + $0x13a0] ss:$8 sps:$4 sm:$0xff]   ;;  %v9923_v50 = vld [vmem:[%s13837_s1 + $0x13b4] ss:$8 sps:$4 sm:$0xff]  }
 0x240   :  { %5849 = vmatpush1.bf16.msra.mxu0 %v9836_v25  ;;  %v9921_v37 = vld [vmem:[%s13837_s1 + $0x13b0] ss:$8 sps:$4 sm:$0xff]   ;;  %v9926_v25 = vld [vmem:[%s13837_s1 + $0x13c4] ss:$8 sps:$4 sm:$0xff]   ;;  %v9924_v53 = vld [vmem:[%s13837_s1 + $0x13c0] ss:$8 sps:$4 sm:$0xff]  }
 0x241   :  { %5859 = vmatprep.subr.bf16.mxu0 %v9841_v54  ;;  %v9929_v54 = vld [vmem:[%s13837_s1 + $0x13d4] ss:$8 sps:$4 sm:$0xff]   ;;  %s10475_s13 = smov [#allocation2]  }
 0x242   :  { %5482 = vmatmul.mubr.bf16.vlgmr.msra.gmra.mrb[0].mxu1 %v10741_v15  ;;  %v9850_v15 = vld [vmem:[%s13837_s1 + $0x1234] ss:$8 sps:$4 sm:$0xff]   ;;  %s7837_s14 = sshll.u32 %s10475_s13, 4  ;;  %s7838_s14 = int_to_ptr.vmem [resolvable:$true] %s7837_s14 }
 0x243   :  { %5851 = vmatmul.mubr.bf16.vlgmr.msra.gmra.mrb[0].mxu0 %v1085_v55  ;;  %v9927_v55 = vld [vmem:[%s13837_s1 + $0x13d0] ss:$8 sps:$4 sm:$0xff]   ;;  %s10449_s15 = scalar_lea.vmem %s7838_s14, 32  ;;  %p10454_p1 = scmp.lt.s32.totalorder %s7838_s14, %s7838_s14 }
 0x244   :  { %5860 = vmatpush1.bf16.msra.mxu0 %v9839_v56  ;;  %5891 = vmatprep.mubr.bf16.mxu0 %v12451_v43  ;;  %v9932_v56 = vld [vmem:[%s13837_s1 + $0x13e4] ss:$8 sps:$4 sm:$0xff]   ;;  %p10450_p0 = scmp.ne.s32.totalorder %s7838_s14, %s10449_s15  ;;  %p10455_p2 = scmp.lt.s32.totalorder %s10449_s15, %s10449_s15 }
 0x245   :  { %5861 = vmatprep.subr.bf16.mxu0 %v9844_v39  ;;  %v12642_v43 = vld [vmem:[%s13836_s0 + $0x28] sm:$0xff] }
 0x246   :  { %v9930_v39 = vld [vmem:[%s13837_s1 + $0x13e0] ss:$8 sps:$4 sm:$0xff]   ;;  %p10456_p3 = por %p10455_p2, %p10454_p1 }
 0x248   :  { %5862 = vmatpush1.bf16.msra.mxu0 %v9842_v47  ;;  %v12649_v47 = vrot.slane %v12642_v43, %v10667_v51  ;;  %p10457_p4 = pnand %p10456_p3, %p10450_p0 }
 0x249   :  { %5863 = vmatprep.subr.bf16.mxu0 %v9847_v57  ;;  %v9935_v57 = vld [vmem:[%s13837_s1 + $0x13f4] ss:$8 sps:$4 sm:$0xff]  }
 0x24c   :  { %5864 = vmatpush1.bf16.msra.mxu0 %v9845_v58  ;;  %v9933_v58 = vld [vmem:[%s13837_s1 + $0x13f0] ss:$8 sps:$4 sm:$0xff]  }
 0x24d   :  { %5865 = vmatprep.subr.bf16.mxu0 %v9850_v15  ;;  %v1104_v15 = vcombine.high %v12649_v47, %v12649_v47 }
 0x250   :  { %5866 = vmatpush1.bf16.msra.mxu0 %v9848_v3  ;;  %v9938_v3 = vld [vmem:[%s13837_s1 + $0x1404] ss:$8 sps:$4 sm:$0xff]  }
 0x251   :  { %5867 = vmatprep.subr.bf16.mxu0 %v9853_v59  ;;  %v1086_v59 = vcombine.high %v12550_v23, %v12550_v23 }
 0x254   :  { %5868 = vmatpush1.bf16.msra.mxu0 %v9851_v60  ;;  %v9936_v60 = vld [vmem:[%s13837_s1 + $0x1400] ss:$8 sps:$4 sm:$0xff]  }
 0x255   :  { %5869 = vmatprep.subr.bf16.mxu0 %v9856_v61  ;;  %v12668_v61 = vrot.slane %v1104_v15, %v10667_v51  ;;  %v10016_v15 = vld [vmem:[%s13837_s1 + $0x15a4] ss:$8 sps:$4 sm:$0xff]  }
 0x258   :  { %5870 = vmatpush1.bf16.msra.mxu0 %v9854_v62  ;;  %v9941_v62 = vld [vmem:[%s13837_s1 + $0x1414] ss:$8 sps:$4 sm:$0xff]  }
 0x259   :  { %5871 = vmatprep.subr.bf16.mxu0 %v9859_v0  ;;  %v9939_v0 = vld [vmem:[%s13837_s1 + $0x1410] ss:$8 sps:$4 sm:$0xff]  }
 0x25c   :  { %5872 = vmatpush1.bf16.msra.mxu0 %v9857_v1  ;;  %v9944_v1 = vld [vmem:[%s13837_s1 + $0x1424] ss:$8 sps:$4 sm:$0xff]  }
 0x25d   :  { %5873 = vmatprep.subr.bf16.mxu0 %v9862_v48  ;;  %v9942_v48 = vld [vmem:[%s13837_s1 + $0x1420] ss:$8 sps:$4 sm:$0xff]  }
 0x260   :  { %5874 = vmatpush1.bf16.msra.mxu0 %v9860_v38  ;;  %v9947_v38 = vld [vmem:[%s13837_s1 + $0x1434] ss:$8 sps:$4 sm:$0xff]  }
 0x261   :  { %5875 = vmatprep.subr.bf16.mxu0 %v9865_v4  ;;  %v9945_v4 = vld [vmem:[%s13837_s1 + $0x1430] ss:$8 sps:$4 sm:$0xff]  }
 0x264   :  { %5876 = vmatpush1.bf16.msra.mxu0 %v9863_v5  ;;  %v9950_v5 = vld [vmem:[%s13837_s1 + $0x1444] ss:$8 sps:$4 sm:$0xff]  }
 0x265   :  { %5877 = vmatprep.subr.bf16.mxu0 %v9868_v36  ;;  %v9948_v36 = vld [vmem:[%s13837_s1 + $0x1440] ss:$8 sps:$4 sm:$0xff]  }
 0x268   :  { %5878 = vmatpush1.bf16.msra.mxu0 %v9866_v6  ;;  %v9953_v6 = vld [vmem:[%s13837_s1 + $0x1454] ss:$8 sps:$4 sm:$0xff]  }
 0x269   :  { %5879 = vmatprep.subr.bf16.mxu0 %v9871_v7  ;;  %v9951_v7 = vld [vmem:[%s13837_s1 + $0x1450] ss:$8 sps:$4 sm:$0xff]  }
 0x26c   :  { %5880 = vmatpush1.bf16.msra.mxu0 %v9869_v9  ;;  %v9956_v9 = vld [vmem:[%s13837_s1 + $0x1464] ss:$8 sps:$4 sm:$0xff]  }
 0x26d   :  { %5881 = vmatprep.subr.bf16.mxu0 %v9874_v10  ;;  %v9954_v10 = vld [vmem:[%s13837_s1 + $0x1460] ss:$8 sps:$4 sm:$0xff]  }
 0x270   :  { %5882 = vmatpush1.bf16.msra.mxu0 %v9872_v11  ;;  %v9959_v11 = vld [vmem:[%s13837_s1 + $0x1474] ss:$8 sps:$4 sm:$0xff]  }
 0x271   :  { %5883 = vmatprep.subr.bf16.mxu0 %v9877_v29  ;;  %v9957_v29 = vld [vmem:[%s13837_s1 + $0x1470] ss:$8 sps:$4 sm:$0xff]  }
 0x274   :  { %5884 = vmatpush1.bf16.msra.mxu0 %v9875_v63  ;;  %v9962_v63 = vld [vmem:[%s13837_s1 + $0x1484] ss:$8 sps:$4 sm:$0xff]  }
 0x275   :  { %5885 = vmatprep.subr.bf16.mxu0 %v9880_v12  ;;  %v9960_v12 = vld [vmem:[%s13837_s1 + $0x1480] ss:$8 sps:$4 sm:$0xff]  }
 0x278   :  { %5886 = vmatpush1.bf16.msra.mxu0 %v9878_v16  ;;  %v9965_v16 = vld [vmem:[%s13837_s1 + $0x1494] ss:$8 sps:$4 sm:$0xff]  }
 0x279   :  { %5887 = vmatprep.subr.bf16.mxu0 %v9883_v2  ;;  %v9963_v2 = vld [vmem:[%s13837_s1 + $0x1490] ss:$8 sps:$4 sm:$0xff]  }
 0x27c   :  { %5888 = vmatpush1.bf16.msra.mxu0 %v9881_v18  ;;  %v9968_v18 = vld [vmem:[%s13837_s1 + $0x14a4] ss:$8 sps:$4 sm:$0xff]  }
 0x27d   :  { %5889 = vmatprep.subr.bf16.mxu0 %v9886_v19  ;;  %v9966_v19 = vld [vmem:[%s13837_s1 + $0x14a0] ss:$8 sps:$4 sm:$0xff]  }
 0x280   :  { %5890 = vmatpush1.bf16.msra.mxu0 %v9884_v20  ;;  %v9971_v20 = vld [vmem:[%s13837_s1 + $0x14b4] ss:$8 sps:$4 sm:$0xff]  }
 0x281   :  { %5900 = vmatprep.subr.bf16.mxu0 %v9890_v22  ;;  %v9969_v22 = vld [vmem:[%s13837_s1 + $0x14b0] ss:$8 sps:$4 sm:$0xff]  }
 0x283   :  { %5892 = vmatmul.mubr.bf16.vlgmr.msra.gmra.mrb[0].mxu0 %v12550_v23  ;;  %v9974_v23 = vld [vmem:[%s13837_s1 + $0x14c4] ss:$8 sps:$4 sm:$0xff]  }
 0x284   :  { %5901 = vmatpush1.bf16.msra.mxu0 %v9888_v26  ;;  %5932 = vmatprep.mubr.bf16.mxu0 %v1088_v8  ;;  %v9972_v26 = vld [vmem:[%s13837_s1 + $0x14c0] ss:$8 sps:$4 sm:$0xff]   ;;  %v9977_v8 = vld [vmem:[%s13837_s1 + $0x14d4] ss:$8 sps:$4 sm:$0xff]  }
 0x285   :  { %5902 = vmatprep.subr.bf16.mxu0 %v9893_v41  ;;  %v9975_v41 = vld [vmem:[%s13837_s1 + $0x14d0] ss:$8 sps:$4 sm:$0xff]  }
 0x288   :  { %5903 = vmatpush1.bf16.msra.mxu0 %v9891_v52  ;;  %v9980_v52 = vld [vmem:[%s13837_s1 + $0x14e4] ss:$8 sps:$4 sm:$0xff]  }
 0x289   :  { %5904 = vmatprep.subr.bf16.mxu0 %v9896_v30  ;;  %v9978_v30 = vld [vmem:[%s13837_s1 + $0x14e0] ss:$8 sps:$4 sm:$0xff]  }
 0x28c   :  { %5905 = vmatpush1.bf16.msra.mxu0 %v9894_v31  ;;  %v9983_v31 = vld [vmem:[%s13837_s1 + $0x14f4] ss:$8 sps:$4 sm:$0xff]  }
 0x28d   :  { %5906 = vmatprep.subr.bf16.mxu0 %v9899_v32  ;;  %v9981_v32 = vld [vmem:[%s13837_s1 + $0x14f0] ss:$8 sps:$4 sm:$0xff]  }
 0x290   :  { %5907 = vmatpush1.bf16.msra.mxu0 %v9897_v13  ;;  %v9986_v13 = vld [vmem:[%s13837_s1 + $0x1504] ss:$8 sps:$4 sm:$0xff]  }
 0x291   :  { %5908 = vmatprep.subr.bf16.mxu0 %v9902_v33  ;;  %v12766_v33 = vrot.slane %v12649_v47, %v10667_v51  ;;  %v10008_v47 = vld [vmem:[%s13837_s1 + $0x1580] ss:$8 sps:$4 sm:$0xff]  }
 0x294   :  { %5909 = vmatpush1.bf16.msra.mxu0 %v9900_v34  ;;  %v9984_v34 = vld [vmem:[%s13837_s1 + $0x1500] ss:$8 sps:$4 sm:$0xff]  }
 0x295   :  { %5910 = vmatprep.subr.bf16.mxu0 %v9905_v35  ;;  %v1136_v35 = vcombine.high %v12668_v61, %v12668_v61 }
 0x298   :  { %5911 = vmatpush1.bf16.msra.mxu0 %v9903_v21  ;;  %v9989_v21 = vld [vmem:[%s13837_s1 + $0x1514] ss:$8 sps:$4 sm:$0xff]  }
 0x299   :  { %5912 = vmatprep.subr.bf16.mxu0 %v9908_v14  ;;  %v9987_v14 = vld [vmem:[%s13837_s1 + $0x1510] ss:$8 sps:$4 sm:$0xff]  }
 0x29c   :  { %5913 = vmatpush1.bf16.msra.mxu0 %v9906_v40  ;;  %v9992_v40 = vld [vmem:[%s13837_s1 + $0x1524] ss:$8 sps:$4 sm:$0xff]  }
 0x29d   :  { %5914 = vmatprep.subr.bf16.mxu0 %v9911_v17  ;;  %v9990_v17 = vld [vmem:[%s13837_s1 + $0x1520] ss:$8 sps:$4 sm:$0xff]  }
 0x2a0   :  { %5915 = vmatpush1.bf16.msra.mxu0 %v9909_v24  ;;  %v9995_v24 = vld [vmem:[%s13837_s1 + $0x1534] ss:$8 sps:$4 sm:$0xff]  }
 0x2a1   :  { %5916 = vmatprep.subr.bf16.mxu0 %v9914_v42  ;;  %v9993_v42 = vld [vmem:[%s13837_s1 + $0x1530] ss:$8 sps:$4 sm:$0xff]  }
 0x2a4   :  { %5917 = vmatpush1.bf16.msra.mxu0 %v9912_v28  ;;  %v9998_v28 = vld [vmem:[%s13837_s1 + $0x1544] ss:$8 sps:$4 sm:$0xff]  }
 0x2a5   :  { %5918 = vmatprep.subr.bf16.mxu0 %v9917_v44  ;;  %v9996_v44 = vld [vmem:[%s13837_s1 + $0x1540] ss:$8 sps:$4 sm:$0xff]  }
 0x2a8   :  { %5919 = vmatpush1.bf16.msra.mxu0 %v9915_v27  ;;  %v10001_v27 = vld [vmem:[%s13837_s1 + $0x1554] ss:$8 sps:$4 sm:$0xff]  }
 0x2a9   :  { %5920 = vmatprep.subr.bf16.mxu0 %v9920_v46  ;;  %v9999_v46 = vld [vmem:[%s13837_s1 + $0x1550] ss:$8 sps:$4 sm:$0xff]  }
 0x2ac   :  { %5921 = vmatpush1.bf16.msra.mxu0 %v9918_v49  ;;  %v10004_v49 = vld [vmem:[%s13837_s1 + $0x1564] ss:$8 sps:$4 sm:$0xff]  }
 0x2ad   :  { %5922 = vmatprep.subr.bf16.mxu0 %v9923_v50 }
 0x2b0   :  { %5923 = vmatpush1.bf16.msra.mxu0 %v9921_v37 }
 0x2b1   :  { %5924 = vmatprep.subr.bf16.mxu0 %v9926_v25 }
 0x2b4   :  { %5925 = vmatpush1.bf16.msra.mxu0 %v9924_v53  ;;  %v10002_v53 = vld [vmem:[%s13837_s1 + $0x1560] ss:$8 sps:$4 sm:$0xff]  }
 0x2b5   :  { %5926 = vmatprep.subr.bf16.mxu0 %v9929_v54 }
 0x2b8   :  { %5927 = vmatpush1.bf16.msra.mxu0 %v9927_v55  ;;  %v10007_v55 = vld [vmem:[%s13837_s1 + $0x1574] ss:$8 sps:$4 sm:$0xff]  }
 0x2b9   :  { %5928 = vmatprep.subr.bf16.mxu0 %v9932_v56  ;;  %v10005_v56 = vld [vmem:[%s13837_s1 + $0x1570] ss:$8 sps:$4 sm:$0xff]  }
 0x2bc   :  { %5929 = vmatpush1.bf16.msra.mxu0 %v9930_v39  ;;  %v10010_v39 = vld [vmem:[%s13837_s1 + $0x1584] ss:$8 sps:$4 sm:$0xff]  }
 0x2bd   :  { %5930 = vmatprep.subr.bf16.mxu0 %v9935_v57  ;;  %v10013_v57 = vld [vmem:[%s13837_s1 + $0x1594] ss:$8 sps:$4 sm:$0xff]  }
 0x2c0   :  { %5931 = vmatpush1.bf16.msra.mxu0 %v9933_v58  ;;  %v10011_v58 = vld [vmem:[%s13837_s1 + $0x1590] ss:$8 sps:$4 sm:$0xff]  }
 0x2c1   :  { %5941 = vmatprep.subr.bf16.mxu0 %v9938_v3  ;;  %v10014_v3 = vld [vmem:[%s13837_s1 + $0x15a0] ss:$8 sps:$4 sm:$0xff]  }
 0x2c3   :  { %5933 = vmatmul.mubr.bf16.vlgmr.msra.gmra.mrb[0].mxu0 %v1086_v59  ;;  %v10019_v59 = vld [vmem:[%s13837_s1 + $0x15b4] ss:$8 sps:$4 sm:$0xff]  }
 0x2c4   :  { %5942 = vmatpush1.bf16.msra.mxu0 %v9936_v60  ;;  %5973 = vmatprep.mubr.bf16.mxu0 %v12668_v61  ;;  %v10017_v60 = vld [vmem:[%s13837_s1 + $0x15b0] ss:$8 sps:$4 sm:$0xff]   ;;  %v10022_v61 = vld [vmem:[%s13837_s1 + $0x15c4] ss:$8 sps:$4 sm:$0xff]  }
 0x2c5   :  { %5943 = vmatprep.subr.bf16.mxu0 %v9941_v62  ;;  %v10020_v62 = vld [vmem:[%s13837_s1 + $0x15c0] ss:$8 sps:$4 sm:$0xff]  }
 0x2c8   :  { %5944 = vmatpush1.bf16.msra.mxu0 %v9939_v0  ;;  %v10025_v0 = vld [vmem:[%s13837_s1 + $0x15d4] ss:$8 sps:$4 sm:$0xff]  }
 0x2c9   :  { %5945 = vmatprep.subr.bf16.mxu0 %v9944_v1  ;;  %v10023_v1 = vld [vmem:[%s13837_s1 + $0x15d0] ss:$8 sps:$4 sm:$0xff]  }
 0x2cc   :  { %5946 = vmatpush1.bf16.msra.mxu0 %v9942_v48  ;;  %v1089_v48 = vcombine.high %v12642_v43, %v12642_v43  ;;  %v10029_v43 = vld [vmem:[%s13837_s1 + $0x15f0] ss:$8 sps:$4 sm:$0xff]  }
 0x2cd   :  { %5947 = vmatprep.subr.bf16.mxu0 %v9947_v38  ;;  %v10028_v38 = vld [vmem:[%s13837_s1 + $0x15e4] ss:$8 sps:$4 sm:$0xff]  }
 0x2d0   :  { %5948 = vmatpush1.bf16.msra.mxu0 %v9945_v4  ;;  %v10026_v4 = vld [vmem:[%s13837_s1 + $0x15e0] ss:$8 sps:$4 sm:$0xff]  }
 0x2d1   :  { %5949 = vmatprep.subr.bf16.mxu0 %v9950_v5  ;;  %v12865_v5 = vrot.slane %v1089_v48, %v10667_v51  ;;  %v10081_v48 = vld [vmem:[%s13837_s1 + $0x1700] ss:$8 sps:$4 sm:$0xff]  }
 0x2d4   :  { %5950 = vmatpush1.bf16.msra.mxu0 %v9948_v36  ;;  %v10031_v36 = vld [vmem:[%s13837_s1 + $0x15f4] ss:$8 sps:$4 sm:$0xff]  }
 0x2d5   :  { %5951 = vmatprep.subr.bf16.mxu0 %v9953_v6  ;;  %v1105_v6 = vcombine.high %v12865_v5, %v12865_v5 }
 0x2d8   :  { %5952 = vmatpush1.bf16.msra.mxu0 %v9951_v7  ;;  %v10034_v7 = vld [vmem:[%s13837_s1 + $0x1604] ss:$8 sps:$4 sm:$0xff]  }
 0x2d9   :  { %5953 = vmatprep.subr.bf16.mxu0 %v9956_v9  ;;  %v1134_v9 = vcombine.high %v12766_v33, %v12766_v33 }
 0x2dc   :  { %5954 = vmatpush1.bf16.msra.mxu0 %v9954_v10  ;;  %v10032_v10 = vld [vmem:[%s13837_s1 + $0x1600] ss:$8 sps:$4 sm:$0xff]  }
 0x2dd   :  { %5955 = vmatprep.subr.bf16.mxu0 %v9959_v11  ;;  %v12884_v11 = vrot.slane %v1105_v6, %v10667_v51  ;;  %v10089_v6 = vld [vmem:[%s13837_s1 + $0x1724] ss:$8 sps:$4 sm:$0xff]  }
 0x2e0   :  { %5956 = vmatpush1.bf16.msra.mxu0 %v9957_v29  ;;  %v10037_v29 = vld [vmem:[%s13837_s1 + $0x1614] ss:$8 sps:$4 sm:$0xff]  }
 0x2e1   :  { %5957 = vmatprep.subr.bf16.mxu0 %v9962_v63  ;;  %v10035_v63 = vld [vmem:[%s13837_s1 + $0x1610] ss:$8 sps:$4 sm:$0xff]  }
 0x2e4   :  { %5958 = vmatpush1.bf16.msra.mxu0 %v9960_v12  ;;  %v10040_v12 = vld [vmem:[%s13837_s1 + $0x1624] ss:$8 sps:$4 sm:$0xff]  }
 0x2e5   :  { %5959 = vmatprep.subr.bf16.mxu0 %v9965_v16  ;;  %v10038_v16 = vld [vmem:[%s13837_s1 + $0x1620] ss:$8 sps:$4 sm:$0xff]  }
 0x2e8   :  { %5960 = vmatpush1.bf16.msra.mxu0 %v9963_v2  ;;  %v10043_v2 = vld [vmem:[%s13837_s1 + $0x1634] ss:$8 sps:$4 sm:$0xff]  }
 0x2e9   :  { %5961 = vmatprep.subr.bf16.mxu0 %v9968_v18  ;;  %v10041_v18 = vld [vmem:[%s13837_s1 + $0x1630] ss:$8 sps:$4 sm:$0xff]  }
 0x2ec   :  { %5962 = vmatpush1.bf16.msra.mxu0 %v9966_v19  ;;  %v10046_v19 = vld [vmem:[%s13837_s1 + $0x1644] ss:$8 sps:$4 sm:$0xff]  }
 0x2ed   :  { %5963 = vmatprep.subr.bf16.mxu0 %v9971_v20  ;;  %v10044_v20 = vld [vmem:[%s13837_s1 + $0x1640] ss:$8 sps:$4 sm:$0xff]  }
 0x2f0   :  { %5964 = vmatpush1.bf16.msra.mxu0 %v9969_v22  ;;  %v10049_v22 = vld [vmem:[%s13837_s1 + $0x1654] ss:$8 sps:$4 sm:$0xff]  }
 0x2f1   :  { %5965 = vmatprep.subr.bf16.mxu0 %v9974_v23  ;;  %v10047_v23 = vld [vmem:[%s13837_s1 + $0x1650] ss:$8 sps:$4 sm:$0xff]  }
 0x2f4   :  { %5966 = vmatpush1.bf16.msra.mxu0 %v9972_v26  ;;  %v10052_v26 = vld [vmem:[%s13837_s1 + $0x1664] ss:$8 sps:$4 sm:$0xff]  }
 0x2f5   :  { %5967 = vmatprep.subr.bf16.mxu0 %v9977_v8  ;;  %v10050_v8 = vld [vmem:[%s13837_s1 + $0x1660] ss:$8 sps:$4 sm:$0xff]  }
 0x2f8   :  { %5968 = vmatpush1.bf16.msra.mxu0 %v9975_v41  ;;  %v10055_v41 = vld [vmem:[%s13837_s1 + $0x1674] ss:$8 sps:$4 sm:$0xff]  }
 0x2f9   :  { %5969 = vmatprep.subr.bf16.mxu0 %v9980_v52  ;;  %v10053_v52 = vld [vmem:[%s13837_s1 + $0x1670] ss:$8 sps:$4 sm:$0xff]  }
 0x2fc   :  { %5970 = vmatpush1.bf16.msra.mxu0 %v9978_v30  ;;  %v10058_v30 = vld [vmem:[%s13837_s1 + $0x1684] ss:$8 sps:$4 sm:$0xff]  }
 0x2fd   :  { %5971 = vmatprep.subr.bf16.mxu0 %v9983_v31  ;;  %v10056_v31 = vld [vmem:[%s13837_s1 + $0x1680] ss:$8 sps:$4 sm:$0xff]  }
 0x300   :  { %5972 = vmatpush1.bf16.msra.mxu0 %v9981_v32  ;;  %v10061_v32 = vld [vmem:[%s13837_s1 + $0x1694] ss:$8 sps:$4 sm:$0xff]  }
 0x301   :  { %5982 = vmatprep.subr.bf16.mxu0 %v9986_v13  ;;  %v10153_v13 = vld [vmem:[%s13839_s3] ss:$16 sps:$4 sm:$0xff]  }
 0x303   :  { %5974 = vmatmul.mubr.bf16.vlgmr.msra.gmra.mrb[0].mxu0 %v12766_v33  ;;  %v10155_v33 = vld [vmem:[%s13839_s3 + $0x4] ss:$16 sps:$4 sm:$0xff]  }
 0x304   :  { %5983 = vmatpush1.bf16.msra.mxu0 %v9984_v34  ;;  %6014 = vmatprep.mubr.bf16.mxu0 %v1136_v35  ;;  %v10059_v34 = vld [vmem:[%s13837_s1 + $0x1690] ss:$8 sps:$4 sm:$0xff]   ;;  %v10158_v35 = vld [vmem:[%s13839_s3 + $0x24] ss:$16 sps:$4 sm:$0xff]  }
 0x305   :  { %5984 = vmatprep.subr.bf16.mxu0 %v9989_v21  ;;  %v10064_v21 = vld [vmem:[%s13837_s1 + $0x16a4] ss:$8 sps:$4 sm:$0xff]   ;;  %6556 = vmatprep.subr.bf16.mxu1 %v10155_v33  ;;  %v10110_v33 = vld [vmem:[%s13837_s1 + $0x1794] ss:$8 sps:$4 sm:$0xff]  }
 0x306   :  { %6557 = vmatpush1.bf16.msra.mxu1 %v10153_v13  ;;  %v10105_v13 = vld [vmem:[%s13837_s1 + $0x1780] ss:$8 sps:$4 sm:$0xff]  }
 0x307   :  { %6558 = vmatprep.subr.bf16.mxu1 %v10158_v35  ;;  %v10113_v35 = vld [vmem:[%s13837_s1 + $0x17a4] ss:$8 sps:$4 sm:$0xff]  }
 0x308   :  { %5985 = vmatpush1.bf16.msra.mxu0 %v9987_v14  ;;  %v10156_v14 = vld [vmem:[%s13839_s3 + $0x20] ss:$16 sps:$4 sm:$0xff]  }
 0x309   :  { %5986 = vmatprep.subr.bf16.mxu0 %v9992_v40  ;;  %v10161_v40 = vld [vmem:[%s13839_s3 + $0x44] ss:$16 sps:$4 sm:$0xff]  }
 0x30a   :  { %6559 = vmatpush1.bf16.msra.mxu1 %v10156_v14  ;;  %v10116_v14 = vld [vmem:[%s13837_s1 + $0x17b4] ss:$8 sps:$4 sm:$0xff]  }
 0x30b   :  { %6560 = vmatprep.subr.bf16.mxu1 %v10161_v40  ;;  %v10114_v40 = vld [vmem:[%s13837_s1 + $0x17b0] ss:$8 sps:$4 sm:$0xff]  }
 0x30c   :  { %5987 = vmatpush1.bf16.msra.mxu0 %v9990_v17  ;;  %v10062_v17 = vld [vmem:[%s13837_s1 + $0x16a0] ss:$8 sps:$4 sm:$0xff]  }
 0x30d   :  { %5988 = vmatprep.subr.bf16.mxu0 %v9995_v24  ;;  %v10067_v24 = vld [vmem:[%s13837_s1 + $0x16b4] ss:$8 sps:$4 sm:$0xff]  }
 0x310   :  { %5989 = vmatpush1.bf16.msra.mxu0 %v9993_v42  ;;  %v10159_v42 = vld [vmem:[%s13839_s3 + $0x40] ss:$16 sps:$4 sm:$0xff]  }
 0x311   :  { %5990 = vmatprep.subr.bf16.mxu0 %v9998_v28  ;;  %v10164_v28 = vld [vmem:[%s13839_s3 + $0x64] ss:$16 sps:$4 sm:$0xff]   ;;  %6561 = vmatpush1.bf16.msra.mxu1 %v10159_v42 }
 0x312   :  { %6562 = vmatprep.subr.bf16.mxu1 %v10164_v28  ;;  %v10122_v42 = vld [vmem:[%s13837_s1 + $0x17d4] ss:$8 sps:$4 sm:$0xff]   ;;  %v10120_v28 = vld [vmem:[%s13837_s1 + $0x17d0] ss:$8 sps:$4 sm:$0xff]  }
 0x314   :  { %5991 = vmatpush1.bf16.msra.mxu0 %v9996_v44  ;;  %v10065_v44 = vld [vmem:[%s13837_s1 + $0x16b0] ss:$8 sps:$4 sm:$0xff]  }
 0x315   :  { %5992 = vmatprep.subr.bf16.mxu0 %v10001_v27  ;;  %v12807_v50 = vpop.f32.mrb[0].mxu1  ;;  %v10070_v27 = vld [vmem:[%s13837_s1 + $0x16c4] ss:$8 sps:$4 sm:$0xff]  }
 0x316   :  { %v12809_v37 = vpop.f32.mrb[1].mxu1 }
 0x317   :  { %v5487_v25 = vpop.f32.mrb[2].mxu1 }
 0x318   :  { %5993 = vmatpush1.bf16.msra.mxu0 %v9999_v46  ;;  %v5488_v54 = vpop.f32.mrb[3].mxu1  ;;  %v10162_v46 = vld [vmem:[%s13839_s3 + $0x60] ss:$16 sps:$4 sm:$0xff]  }
 0x319   :  { %5994 = vmatprep.subr.bf16.mxu0 %v10004_v49  ;;  %v10167_v49 = vld [vmem:[%s13839_s3 + $0x84] ss:$16 sps:$4 sm:$0xff]   ;;  %v10068_v25 = vld [vmem:[%s13837_s1 + $0x16c0] ss:$8 sps:$4 sm:$0xff]   ;;  %6563 = vmatpush1.bf16.msra.mxu1 %v10162_v46 }
 0x31a   :  { %v10165_v54 = vld [vmem:[%s13839_s3 + $0x80] ss:$16 sps:$4 sm:$0xff]   ;;  %6564 = vmatprep.subr.bf16.mxu1 %v10167_v49  ;;  %v10128_v46 = vld [vmem:[%s13837_s1 + $0x17f4] ss:$8 sps:$4 sm:$0xff]  }
 0x31b   :  { %v10126_v49 = vld [vmem:[%s13837_s1 + $0x17f0] ss:$8 sps:$4 sm:$0xff]  }
 0x31c   :  { %5995 = vmatpush1.bf16.msra.mxu0 %v10002_v53  ;;  %v10073_v53 = vld [vmem:[%s13837_s1 + $0x16d4] ss:$8 sps:$4 sm:$0xff]  }
 0x31d   :  { %5996 = vmatprep.subr.bf16.mxu0 %v10007_v55  ;;  %v10170_v55 = vld [vmem:[%s13839_s3 + $0xa4] ss:$16 sps:$4 sm:$0xff]   ;;  %6565 = vmatpush1.bf16.msra.mxu1 %v10165_v54  ;;  %v10129_v54 = vld [vmem:[%s13837_s1 + $0x1800] ss:$8 sps:$4 sm:$0xff]  }
 0x31e   :  { %6566 = vmatprep.subr.bf16.mxu1 %v10170_v55  ;;  %v10134_v55 = vld [vmem:[%s13837_s1 + $0x1814] ss:$8 sps:$4 sm:$0xff]  }
 0x320   :  { %5997 = vmatpush1.bf16.msra.mxu0 %v10005_v56  ;;  %v10071_v56 = vld [vmem:[%s13837_s1 + $0x16d0] ss:$8 sps:$4 sm:$0xff]  }
 0x321   :  { %5998 = vmatprep.subr.bf16.mxu0 %v10010_v39  ;;  %v10076_v39 = vld [vmem:[%s13837_s1 + $0x16e4] ss:$8 sps:$4 sm:$0xff]  }
 0x324   :  { %5999 = vmatpush1.bf16.msra.mxu0 %v10008_v47  ;;  %v10168_v47 = vld [vmem:[%s13839_s3 + $0xa0] ss:$16 sps:$4 sm:$0xff]  }
 0x325   :  { %6000 = vmatprep.subr.bf16.mxu0 %v10013_v57  ;;  %v10173_v57 = vld [vmem:[%s13839_s3 + $0xc4] ss:$16 sps:$4 sm:$0xff]   ;;  %6567 = vmatpush1.bf16.msra.mxu1 %v10168_v47 }
 0x326   :  { %6568 = vmatprep.subr.bf16.mxu1 %v10173_v57  ;;  %v10137_v47 = vld [vmem:[%s13837_s1 + $0x1824] ss:$8 sps:$4 sm:$0xff]   ;;  %v10135_v57 = vld [vmem:[%s13837_s1 + $0x1820] ss:$8 sps:$4 sm:$0xff]  }
 0x328   :  { %6001 = vmatpush1.bf16.msra.mxu0 %v10011_v58  ;;  %v10074_v58 = vld [vmem:[%s13837_s1 + $0x16e0] ss:$8 sps:$4 sm:$0xff]  }
 0x329   :  { %6002 = vmatprep.subr.bf16.mxu0 %v10016_v15  ;;  %v10079_v15 = vld [vmem:[%s13837_s1 + $0x16f4] ss:$8 sps:$4 sm:$0xff]  }
 0x32c   :  { %6003 = vmatpush1.bf16.msra.mxu0 %v10014_v3  ;;  %v10171_v3 = vld [vmem:[%s13839_s3 + $0xc0] ss:$16 sps:$4 sm:$0xff]  }
 0x32d   :  { %6004 = vmatprep.subr.bf16.mxu0 %v10019_v59  ;;  %v10176_v59 = vld [vmem:[%s13839_s3 + $0xe4] ss:$16 sps:$4 sm:$0xff]   ;;  %6569 = vmatpush1.bf16.msra.mxu1 %v10171_v3 }
 0x32e   :  { %6570 = vmatprep.subr.bf16.mxu1 %v10176_v59  ;;  %v10143_v3 = vld [vmem:[%s13837_s1 + $0x1844] ss:$8 sps:$4 sm:$0xff]   ;;  %v10141_v59 = vld [vmem:[%s13837_s1 + $0x1840] ss:$8 sps:$4 sm:$0xff]  }
 0x330   :  { %6005 = vmatpush1.bf16.msra.mxu0 %v10017_v60  ;;  %v10077_v60 = vld [vmem:[%s13837_s1 + $0x16f0] ss:$8 sps:$4 sm:$0xff]  }
 0x331   :  { %6006 = vmatprep.subr.bf16.mxu0 %v10022_v61  ;;  %v10083_v61 = vld [vmem:[%s13837_s1 + $0x1704] ss:$8 sps:$4 sm:$0xff]  }
 0x334   :  { %6007 = vmatpush1.bf16.msra.mxu0 %v10020_v62  ;;  %v10174_v62 = vld [vmem:[%s13839_s3 + $0xe0] ss:$16 sps:$4 sm:$0xff]  }
 0x335   :  { %6008 = vmatprep.subr.bf16.mxu0 %v10025_v0  ;;  %v13030_v0 = vrot.slane %v12865_v5, %v10667_v51  ;;  %6571 = vmatpush1.bf16.msra.mxu1 %v10174_v62  ;;  %v10177_v5 = vld [vmem:[%s13839_s3 + $0x100] ss:$16 sps:$4 sm:$0xff]   ;;  %v10149_v62 = vld [vmem:[%s13837_s1 + $0x1864] ss:$8 sps:$4 sm:$0xff]  }
 0x338   :  { %6009 = vmatpush1.bf16.msra.mxu0 %v10023_v1  ;;  %v10179_v1 = vld [vmem:[%s13839_s3 + $0x104] ss:$16 sps:$4 sm:$0xff]  }
 0x339   :  { %6010 = vmatprep.subr.bf16.mxu0 %v10028_v38  ;;  %v1137_v38 = vcombine.high %v12884_v11, %v12884_v11  ;;  %6572 = vmatprep.subr.bf16.mxu1 %v10179_v1  ;;  %v10152_v1 = vld [vmem:[%s13837_s1 + $0x1874] ss:$8 sps:$4 sm:$0xff]  }
 0x33a   :  { %6573 = vmatpush1.bf16.msra.mxu1 %v10177_v5  ;;  %v10197_v5 = vld [vmem:[%s13839_s3 + $0x1c4] ss:$16 sps:$4 sm:$0xff]  }
 0x33c   :  { %6011 = vmatpush1.bf16.msra.mxu0 %v10026_v4  ;;  %v10086_v4 = vld [vmem:[%s13837_s1 + $0x1714] ss:$8 sps:$4 sm:$0xff]  }
 0x33d   :  { %6012 = vmatprep.subr.bf16.mxu0 %v10031_v36  ;;  %v10182_v36 = vld [vmem:[%s13839_s3 + $0x124] ss:$16 sps:$4 sm:$0xff]  }
 0x33e   :  { %6574 = vmatprep.subr.bf16.mxu1 %v10182_v36  ;;  %v10195_v36 = vld [vmem:[%s13839_s3 + $0x1c0] ss:$16 sps:$4 sm:$0xff]  }
 0x340   :  { %6013 = vmatpush1.bf16.msra.mxu0 %v10029_v43  ;;  %v10084_v43 = vld [vmem:[%s13837_s1 + $0x1710] ss:$8 sps:$4 sm:$0xff]  }
 0x341   :  { %6023 = vmatprep.subr.bf16.mxu0 %v10034_v7  ;;  %v10180_v7 = vld [vmem:[%s13839_s3 + $0x120] ss:$16 sps:$4 sm:$0xff]  }
 0x342   :  { %6575 = vmatpush1.bf16.msra.mxu1 %v10180_v7  ;;  %v13235_v7 = vsub.s32 0, %v10652_v45 }
 0x343   :  { %6015 = vmatmul.mubr.bf16.vlgmr.msra.gmra.mrb[0].mxu0 %v1134_v9  ;;  %v10185_v9 = vld [vmem:[%s13839_s3 + $0x144] ss:$16 sps:$4 sm:$0xff]  }
 0x344   :  { %6024 = vmatpush1.bf16.msra.mxu0 %v10032_v10  ;;  %6055 = vmatprep.mubr.bf16.mxu0 %v12884_v11  ;;  %v10087_v10 = vld [vmem:[%s13837_s1 + $0x1720] ss:$8 sps:$4 sm:$0xff]   ;;  %v10092_v11 = vld [vmem:[%s13837_s1 + $0x1734] ss:$8 sps:$4 sm:$0xff]  }
 0x345   :  { %6025 = vmatprep.subr.bf16.mxu0 %v10037_v29  ;;  %v10183_v29 = vld [vmem:[%s13839_s3 + $0x140] ss:$16 sps:$4 sm:$0xff]   ;;  %6576 = vmatprep.subr.bf16.mxu1 %v10185_v9 }
 0x346   :  { %6577 = vmatpush1.bf16.msra.mxu1 %v10183_v29  ;;  %v825_v9 = vld [vmem:[%s13838_s2] sm:$0x3] }
 0x348   :  { %6026 = vmatpush1.bf16.msra.mxu0 %v10035_v63  ;;  %v10188_v63 = vld [vmem:[%s13839_s3 + $0x164] ss:$16 sps:$4 sm:$0xff]  }
 0x349   :  { %6027 = vmatprep.subr.bf16.mxu0 %v10040_v12  ;;  %v10090_v12 = vld [vmem:[%s13837_s1 + $0x1730] ss:$8 sps:$4 sm:$0xff]   ;;  %6578 = vmatprep.subr.bf16.mxu1 %v10188_v63 }
 0x34c   :  { %6028 = vmatpush1.bf16.msra.mxu0 %v10038_v16  ;;  %v10095_v16 = vld [vmem:[%s13837_s1 + $0x1744] ss:$8 sps:$4 sm:$0xff]  }
 0x34d   :  { %6029 = vmatprep.subr.bf16.mxu0 %v10043_v2  ;;  %v10186_v2 = vld [vmem:[%s13839_s3 + $0x160] ss:$16 sps:$4 sm:$0xff]  }
 0x34e   :  { %6579 = vmatpush1.bf16.msra.mxu1 %v10186_v2 }
 0x350   :  { %6030 = vmatpush1.bf16.msra.mxu0 %v10041_v18  ;;  %v10191_v18 = vld [vmem:[%s13839_s3 + $0x184] ss:$16 sps:$4 sm:$0xff]  }
 0x351   :  { %6031 = vmatprep.subr.bf16.mxu0 %v10046_v19  ;;  %v10093_v19 = vld [vmem:[%s13837_s1 + $0x1740] ss:$8 sps:$4 sm:$0xff]   ;;  %6580 = vmatprep.subr.bf16.mxu1 %v10191_v18 }
 0x354   :  { %6032 = vmatpush1.bf16.msra.mxu0 %v10044_v20  ;;  %v10098_v20 = vld [vmem:[%s13837_s1 + $0x1754] ss:$8 sps:$4 sm:$0xff]  }
 0x355   :  { %6033 = vmatprep.subr.bf16.mxu0 %v10049_v22  ;;  %v10189_v22 = vld [vmem:[%s13839_s3 + $0x180] ss:$16 sps:$4 sm:$0xff]  }
 0x356   :  { %6581 = vmatpush1.bf16.msra.mxu1 %v10189_v22 }
 0x358   :  { %6034 = vmatpush1.bf16.msra.mxu0 %v10047_v23  ;;  %v10194_v23 = vld [vmem:[%s13839_s3 + $0x1a4] ss:$16 sps:$4 sm:$0xff]  }
 0x359   :  { %6035 = vmatprep.subr.bf16.mxu0 %v10052_v26  ;;  %v10096_v26 = vld [vmem:[%s13837_s1 + $0x1750] ss:$8 sps:$4 sm:$0xff]   ;;  %6582 = vmatprep.subr.bf16.mxu1 %v10194_v23 }
 0x35c   :  { %6036 = vmatpush1.bf16.msra.mxu0 %v10050_v8  ;;  %v10101_v8 = vld [vmem:[%s13837_s1 + $0x1764] ss:$8 sps:$4 sm:$0xff]  }
 0x35d   :  { %6037 = vmatprep.subr.bf16.mxu0 %v10055_v41  ;;  %v10192_v41 = vld [vmem:[%s13839_s3 + $0x1a0] ss:$16 sps:$4 sm:$0xff]  }
 0x35e   :  { %6583 = vmatpush1.bf16.msra.mxu1 %v10192_v41  ;;  %v10201_v41 = vld [vmem:[%s13839_s3 + $0x8] ss:$16 sps:$4 sm:$0xff]  }
 0x35f   :  { %6584 = vmatprep.subr.bf16.mxu1 %v10197_v5  ;;  %v10261_v5 = vld [vmem:[%s13841_s5 + $0x80] ss:$16 sps:$4 sm:$0xff]  }
 0x360   :  { %6038 = vmatpush1.bf16.msra.mxu0 %v10053_v52  ;;  %v10099_v52 = vld [vmem:[%s13837_s1 + $0x1760] ss:$8 sps:$4 sm:$0xff]  }
 0x361   :  { %6039 = vmatprep.subr.bf16.mxu0 %v10058_v30  ;;  %v10104_v30 = vld [vmem:[%s13837_s1 + $0x1774] ss:$8 sps:$4 sm:$0xff]  }
 0x362   :  { %6585 = vmatpush1.bf16.msra.mxu1 %v10195_v36  ;;  %v10266_v36 = vld [vmem:[%s13841_s5 + $0xa4] ss:$16 sps:$4 sm:$0xff]  }
 0x364   :  { %6040 = vmatpush1.bf16.msra.mxu0 %v10056_v31  ;;  %v10102_v31 = vld [vmem:[%s13837_s1 + $0x1770] ss:$8 sps:$4 sm:$0xff]  }
 0x365   :  { %6041 = vmatprep.subr.bf16.mxu0 %v10061_v32  ;;  %v10107_v32 = vld [vmem:[%s13837_s1 + $0x1784] ss:$8 sps:$4 sm:$0xff]  }
 0x368   :  { %6042 = vmatpush1.bf16.msra.mxu0 %v10059_v34  ;;  %v10108_v34 = vld [vmem:[%s13837_s1 + $0x1790] ss:$8 sps:$4 sm:$0xff]  }
 0x369   :  { %6043 = vmatprep.subr.bf16.mxu0 %v10064_v21  ;;  %v10111_v21 = vld [vmem:[%s13837_s1 + $0x17a0] ss:$8 sps:$4 sm:$0xff]  }
 0x36c   :  { %6044 = vmatpush1.bf16.msra.mxu0 %v10062_v17  ;;  %v10119_v17 = vld [vmem:[%s13837_s1 + $0x17c4] ss:$8 sps:$4 sm:$0xff]  }
 0x36d   :  { %6045 = vmatprep.subr.bf16.mxu0 %v10067_v24  ;;  %v10117_v24 = vld [vmem:[%s13837_s1 + $0x17c0] ss:$8 sps:$4 sm:$0xff]  }
 0x370   :  { %6046 = vmatpush1.bf16.msra.mxu0 %v10065_v44  ;;  %v10125_v44 = vld [vmem:[%s13837_s1 + $0x17e4] ss:$8 sps:$4 sm:$0xff]  }
 0x371   :  { %6047 = vmatprep.subr.bf16.mxu0 %v10070_v27  ;;  %v10123_v27 = vld [vmem:[%s13837_s1 + $0x17e0] ss:$8 sps:$4 sm:$0xff]  }
 0x374   :  { %6048 = vmatpush1.bf16.msra.mxu0 %v10068_v25  ;;  %v10131_v25 = vld [vmem:[%s13837_s1 + $0x1804] ss:$8 sps:$4 sm:$0xff]  }
 0x375   :  { %6049 = vmatprep.subr.bf16.mxu0 %v10073_v53  ;;  %v1135_v53 = vcombine.high %v13030_v0, %v13030_v0 }
 0x378   :  { %6050 = vmatpush1.bf16.msra.mxu0 %v10071_v56  ;;  %v10132_v56 = vld [vmem:[%s13837_s1 + $0x1810] ss:$8 sps:$4 sm:$0xff]  }
 0x379   :  { %6051 = vmatprep.subr.bf16.mxu0 %v10076_v39  ;;  %v10474_v39 = vmov 0  }
 0x37c   :  { %6052 = vmatpush1.bf16.msra.mxu0 %v10074_v58  ;;  %v10140_v58 = vld [vmem:[%s13837_s1 + $0x1834] ss:$8 sps:$4 sm:$0xff]  }
 0x37d   :  { %6053 = vmatprep.subr.bf16.mxu0 %v10079_v15  ;;  %v10138_v15 = vld [vmem:[%s13837_s1 + $0x1830] ss:$8 sps:$4 sm:$0xff]  }
 0x380   :  { %6054 = vmatpush1.bf16.msra.mxu0 %v10077_v60  ;;  %v10146_v60 = vld [vmem:[%s13837_s1 + $0x1854] ss:$8 sps:$4 sm:$0xff]  }
 0x381   :  { %6064 = vmatprep.subr.bf16.mxu0 %v10083_v61  ;;  %v10144_v61 = vld [vmem:[%s13837_s1 + $0x1850] ss:$8 sps:$4 sm:$0xff]  }
 0x383   :  { %6056 = vmatmul.mubr.bf16.vlgmr.msra.gmra.mrb[0].mxu0 %v13030_v0  ;;  %v10147_v0 = vld [vmem:[%s13837_s1 + $0x1860] ss:$8 sps:$4 sm:$0xff]  }
 0x384   :  { %6065 = vmatpush1.bf16.msra.mxu0 %v10081_v48  ;;  %6096 = vmatprep.mubr.bf16.mxu0 %v1137_v38  ;;  %v10150_v48 = vld [vmem:[%s13837_s1 + $0x1870] ss:$8 sps:$4 sm:$0xff]  }
 0x385   :  { %6066 = vmatprep.subr.bf16.mxu0 %v10086_v4  ;;  %v7845_v38 = vld.sshfl [vmem:[%s13836_s0 + $0x30] sm:$0x1 pattern:$0x75316420] }
 0x386   :  { %v1151_v4 = vrot.slane %v7845_v38, %v10667_v51  ;;  %v10198_v51 = vld [vmem:[%s13839_s3 + $0x1e0] ss:$16 sps:$4 sm:$0xff]  }
 0x387   :  { %v10258_v38 = vld [vmem:[%s13841_s5 + $0x60] ss:$16 sps:$4 sm:$0xff]  }
 0x388   :  { %6067 = vmatpush1.bf16.msra.mxu0 %v10084_v43  ;;  %v10200_v43 = vld [vmem:[%s13839_s3 + $0x1e4] ss:$16 sps:$4 sm:$0xff]  }
 0x389   :  { %6068 = vmatprep.subr.bf16.mxu0 %v10089_v6  ;;  %6586 = vmatprep.subr.bf16.mxu1 %v10200_v43  ;;  %v10203_v6 = vld [vmem:[%s13839_s3 + $0xc] ss:$16 sps:$4 sm:$0xff]   ;;  %v10264_v43 = vld [vmem:[%s13841_s5 + $0xa0] ss:$16 sps:$4 sm:$0xff]  }
 0x38a   :  { %6587 = vmatpush1.bf16.msra.mxu1 %v10198_v51  ;;  %v10269_v51 = vld [vmem:[%s13841_s5 + $0xc4] ss:$16 sps:$4 sm:$0xff]  }
 0x38b   :  { %6597 = vmatprep.subr.bf16.mxu1 %v10203_v6  ;;  %v10267_v6 = vld [vmem:[%s13841_s5 + $0xc0] ss:$16 sps:$4 sm:$0xff]  }
 0x38c   :  { %6069 = vmatpush1.bf16.msra.mxu0 %v10087_v10  ;;  %v13241_v10 = vsub.s32 1, %v10652_v45 }
 0x38d   :  { %6070 = vmatprep.subr.bf16.mxu0 %v10092_v11  ;;  %v830_v11 = vrot.slane %v825_v9, %v13235_v7 }
 0x38e   :  { %v834_v29 = vrot.slane %v825_v9, %v13241_v10  ;;  %v10272_v9 = vld [vmem:[%s13841_s5 + $0xe4] ss:$16 sps:$4 sm:$0xff]  }
 0x38f   :  { %v8860_v63 = vadd.f32 %v12807_v50, %v830_v11  ;;  %v10206_v50 = vld [vmem:[%s13839_s3 + $0x2c] ss:$16 sps:$4 sm:$0xff]   ;;  %v10270_v11 = vld [vmem:[%s13841_s5 + $0xe0] ss:$16 sps:$4 sm:$0xff]  }
 0x390   :  { %6071 = vmatpush1.bf16.msra.mxu0 %v10090_v12  ;;  %v8862_v12 = vadd.f32 %v12809_v37, %v834_v29  ;;  %v10204_v37 = vld [vmem:[%s13839_s3 + $0x28] ss:$16 sps:$4 sm:$0xff]   ;;  %v10275_v29 = vld [vmem:[%s13841_s5 + $0x104] ss:$16 sps:$4 sm:$0xff]  }
 0x391   :  { %6072 = vmatprep.subr.bf16.mxu0 %v10095_v16 }
 0x394   :  { %6073 = vmatpush1.bf16.msra.mxu0 %v10093_v19 }
 0x395   :  { %6074 = vmatprep.subr.bf16.mxu0 %v10098_v20 }
 0x398   :  { %6075 = vmatpush1.bf16.msra.mxu0 %v10096_v26 }
 0x399   :  { %6076 = vmatprep.subr.bf16.mxu0 %v10101_v8 }
 0x39c   :  { %6077 = vmatpush1.bf16.msra.mxu0 %v10099_v52 }
 0x39d   :  { %6078 = vmatprep.subr.bf16.mxu0 %v10104_v30  ;;  %v10209_v30 = vld [vmem:[%s13839_s3 + $0x4c] ss:$16 sps:$4 sm:$0xff]  }
 0x3a0   :  { %6079 = vmatpush1.bf16.msra.mxu0 %v10102_v31  ;;  %v10207_v31 = vld [vmem:[%s13839_s3 + $0x48] ss:$16 sps:$4 sm:$0xff]  }
 0x3a1   :  { %6080 = vmatprep.subr.bf16.mxu0 %v10107_v32  ;;  %v10212_v32 = vld [vmem:[%s13839_s3 + $0x6c] ss:$16 sps:$4 sm:$0xff]  }
 0x3a4   :  { %6081 = vmatpush1.bf16.msra.mxu0 %v10105_v13  ;;  %v10210_v13 = vld [vmem:[%s13839_s3 + $0x68] ss:$16 sps:$4 sm:$0xff]  }
 0x3a5   :  { %6082 = vmatprep.subr.bf16.mxu0 %v10110_v33  ;;  %v10215_v33 = vld [vmem:[%s13839_s3 + $0x8c] ss:$16 sps:$4 sm:$0xff]  }
 0x3a8   :  { %6083 = vmatpush1.bf16.msra.mxu0 %v10108_v34  ;;  %v10213_v34 = vld [vmem:[%s13839_s3 + $0x88] ss:$16 sps:$4 sm:$0xff]  }
 0x3a9   :  { %6084 = vmatprep.subr.bf16.mxu0 %v10113_v35  ;;  %v10218_v35 = vld [vmem:[%s13839_s3 + $0xac] ss:$16 sps:$4 sm:$0xff]  }
 0x3ac   :  { %6085 = vmatpush1.bf16.msra.mxu0 %v10111_v21  ;;  %v10216_v21 = vld [vmem:[%s13839_s3 + $0xa8] ss:$16 sps:$4 sm:$0xff]  }
 0x3ad   :  { %6086 = vmatprep.subr.bf16.mxu0 %v10116_v14  ;;  %v10221_v14 = vld [vmem:[%s13839_s3 + $0xcc] ss:$16 sps:$4 sm:$0xff]  }
 0x3b0   :  { %6087 = vmatpush1.bf16.msra.mxu0 %v10114_v40  ;;  %v10219_v40 = vld [vmem:[%s13839_s3 + $0xc8] ss:$16 sps:$4 sm:$0xff]  }
 0x3b1   :  { %6088 = vmatprep.subr.bf16.mxu0 %v10119_v17  ;;  %v10224_v17 = vld [vmem:[%s13839_s3 + $0xec] ss:$16 sps:$4 sm:$0xff]  }
 0x3b4   :  { %6089 = vmatpush1.bf16.msra.mxu0 %v10117_v24  ;;  %v10222_v24 = vld [vmem:[%s13839_s3 + $0xe8] ss:$16 sps:$4 sm:$0xff]  }
 0x3b5   :  { %6090 = vmatprep.subr.bf16.mxu0 %v10122_v42  ;;  %v10227_v42 = vld [vmem:[%s13839_s3 + $0x10c] ss:$16 sps:$4 sm:$0xff]  }
 0x3b8   :  { %6091 = vmatpush1.bf16.msra.mxu0 %v10120_v28  ;;  %v10225_v28 = vld [vmem:[%s13839_s3 + $0x108] ss:$16 sps:$4 sm:$0xff]  }
 0x3b9   :  { %6092 = vmatprep.subr.bf16.mxu0 %v10125_v44  ;;  %v10230_v44 = vld [vmem:[%s13839_s3 + $0x12c] ss:$16 sps:$4 sm:$0xff]  }
 0x3bc   :  { %6093 = vmatpush1.bf16.msra.mxu0 %v10123_v27  ;;  %v10228_v27 = vld [vmem:[%s13839_s3 + $0x128] ss:$16 sps:$4 sm:$0xff]  }
 0x3bd   :  { %6094 = vmatprep.subr.bf16.mxu0 %v10128_v46  ;;  %v10233_v46 = vld [vmem:[%s13839_s3 + $0x14c] ss:$16 sps:$4 sm:$0xff]  }
 0x3c0   :  { %6095 = vmatpush1.bf16.msra.mxu0 %v10126_v49  ;;  %v10231_v49 = vld [vmem:[%s13839_s3 + $0x148] ss:$16 sps:$4 sm:$0xff]  }
 0x3c1   :  { %6105 = vmatprep.subr.bf16.mxu0 %v10131_v25  ;;  %v10236_v25 = vld [vmem:[%s13839_s3 + $0x16c] ss:$16 sps:$4 sm:$0xff]  }
 0x3c3   :  { %6097 = vmatmul.mubr.bf16.vlgmr.msra.gmra.mrb[0].mxu0 %v1135_v53  ;;  %v10234_v53 = vld [vmem:[%s13839_s3 + $0x168] ss:$16 sps:$4 sm:$0xff]  }
 0x3c4   :  { %6106 = vmatpush1.bf16.msra.mxu0 %v10129_v54  ;;  %6137 = vmatprep.mubr.bf16.mxu0 %v10474_v39  ;;  %v10239_v54 = vld [vmem:[%s13839_s3 + $0x18c] ss:$16 sps:$4 sm:$0xff]  }
 0x3c5   :  { %6107 = vmatprep.subr.bf16.mxu0 %v10134_v55  ;;  %v10237_v55 = vld [vmem:[%s13839_s3 + $0x188] ss:$16 sps:$4 sm:$0xff]  }
 0x3c8   :  { %6108 = vmatpush1.bf16.msra.mxu0 %v10132_v56  ;;  %v10242_v56 = vld [vmem:[%s13839_s3 + $0x1ac] ss:$16 sps:$4 sm:$0xff]  }
 0x3c9   :  { %6109 = vmatprep.subr.bf16.mxu0 %v10137_v47  ;;  %v10240_v47 = vld [vmem:[%s13839_s3 + $0x1a8] ss:$16 sps:$4 sm:$0xff]  }
 0x3cc   :  { %6110 = vmatpush1.bf16.msra.mxu0 %v10135_v57  ;;  %v10245_v57 = vld [vmem:[%s13839_s3 + $0x1cc] ss:$16 sps:$4 sm:$0xff]  }
 0x3cd   :  { %6111 = vmatprep.subr.bf16.mxu0 %v10140_v58  ;;  %v10243_v58 = vld [vmem:[%s13839_s3 + $0x1c8] ss:$16 sps:$4 sm:$0xff]  }
 0x3d0   :  { %6112 = vmatpush1.bf16.msra.mxu0 %v10138_v15  ;;  %v10248_v15 = vld [vmem:[%s13839_s3 + $0x1ec] ss:$16 sps:$4 sm:$0xff]  }
 0x3d1   :  { %6113 = vmatprep.subr.bf16.mxu0 %v10143_v3  ;;  %v10246_v3 = vld [vmem:[%s13839_s3 + $0x1e8] ss:$16 sps:$4 sm:$0xff]  }
 0x3d4   :  { %6114 = vmatpush1.bf16.msra.mxu0 %v10141_v59  ;;  %v10251_v59 = vld [vmem:[%s13841_s5 + $0x4] ss:$16 sps:$4 sm:$0xff]  }
 0x3d5   :  { %6115 = vmatprep.subr.bf16.mxu0 %v10146_v60  ;;  %v10249_v60 = vld [vmem:[%s13841_s5] ss:$16 sps:$4 sm:$0xff]  }
 0x3d8   :  { %6116 = vmatpush1.bf16.msra.mxu0 %v10144_v61  ;;  %v10254_v61 = vld [vmem:[%s13841_s5 + $0x24] ss:$16 sps:$4 sm:$0xff]  }
 0x3d9   :  { %6117 = vmatprep.subr.bf16.mxu0 %v10149_v62  ;;  %v10252_v62 = vld [vmem:[%s13841_s5 + $0x20] ss:$16 sps:$4 sm:$0xff]  }
 0x3dc   :  { %6118 = vmatpush1.bf16.msra.mxu0 %v10147_v0  ;;  %v10257_v0 = vld [vmem:[%s13841_s5 + $0x44] ss:$16 sps:$4 sm:$0xff]  }
 0x3dd   :  { %6119 = vmatprep.subr.bf16.mxu0 %v10152_v1  ;;  %v10255_v1 = vld [vmem:[%s13841_s5 + $0x40] ss:$16 sps:$4 sm:$0xff]  }
 0x3e0   :  { %6120 = vmatpush1.bf16.msra.mxu0 %v10150_v48  ;;  %v10260_v48 = vld [vmem:[%s13841_s5 + $0x64] ss:$16 sps:$4 sm:$0xff]  }
 0x3e3   :  { %6138 = vmatmul.mubr.bf16.vlgmr.msra.gmra.mrb[0].mxu0 %v1151_v4  ;;  %v10263_v4 = vld [vmem:[%s13841_s5 + $0x84] ss:$16 sps:$4 sm:$0xff]  }
 0x4b6   :  { %v6139_v16 = vpop.f32.mrb[0].mxu0 }
 0x4b7   :  { %v8861_v2 = vadd.f32 %v8860_v63, %v6139_v16  ;;  %v6141_v18 = vpop.f32.mrb[1].mxu0  ;;  %v10273_v63 = vld [vmem:[%s13841_s5 + $0x100] ss:$16 sps:$4 sm:$0xff]  }
 0x4b8   :  { %v8863_v19 = vadd.f32 %v8862_v12, %v6141_v18  ;;  %v6143_v20 = vpop.f32.mrb[2].mxu0  ;;  %v10278_v12 = vld [vmem:[%s13841_s5 + $0x124] ss:$16 sps:$4 sm:$0xff]   ;;  %v10276_v16 = vld [vmem:[%s13841_s5 + $0x120] ss:$16 sps:$4 sm:$0xff]  }
 0x4b9   :  { %v6146_v22 = vmax.f32 %v8861_v2, 0.0  ;;  %v6144_v23 = vpop.f32.mrb[3].mxu0  ;;  %v10281_v2 = vld [vmem:[%s13841_s5 + $0x144] ss:$16 sps:$4 sm:$0xff]   ;;  %v10279_v18 = vld [vmem:[%s13841_s5 + $0x140] ss:$16 sps:$4 sm:$0xff]  }
 0x4ba   :  { %v6147_v26 = vmax.f32 %v8863_v19, 0.0  ;;  %v10284_v19 = vld [vmem:[%s13841_s5 + $0x164] ss:$16 sps:$4 sm:$0xff]   ;;  %v10282_v20 = vld [vmem:[%s13841_s5 + $0x160] ss:$16 sps:$4 sm:$0xff]  }
 0x4bb   :  { %v13250_v52 = vpack.c.bf16 %v6146_v22, %v6146_v22  ;;  %v10287_v22 = vld [vmem:[%s13841_s5 + $0x184] ss:$16 sps:$4 sm:$0xff]   ;;  %v10285_v23 = vld [vmem:[%s13841_s5 + $0x180] ss:$16 sps:$4 sm:$0xff]  }
 0x4bc   :  { %v6149_v8 = vpack.c.bf16 %v6147_v26, %v6147_v26  ;;  %v10290_v26 = vld [vmem:[%s13841_s5 + $0x1a4] ss:$16 sps:$4 sm:$0xff]  }
 0x4be   :  { %6588 = vmatprep.mubr.bf16.mxu1 %v6149_v8 }
 0x4bf   :  { %6589 = vmatmul.mubr.bf16.vlgmr.msra.gmra.mrb[4].mxu1 %v13250_v52 }
 0x4c0   :  { %6598 = vmatpush1.bf16.msra.mxu1 %v10201_v41  ;;  %6629 = vmatprep.mubr.bf16.mxu1 %v6149_v8  ;;  %v10288_v8 = vld [vmem:[%s13841_s5 + $0x1a0] ss:$16 sps:$4 sm:$0xff]   ;;  %v10293_v41 = vld [vmem:[%s13841_s5 + $0x1c4] ss:$16 sps:$4 sm:$0xff]  }
 0x4c1   :  { %6599 = vmatprep.subr.bf16.mxu1 %v10206_v50  ;;  %v10296_v50 = vld [vmem:[%s13841_s5 + $0x1e4] ss:$16 sps:$4 sm:$0xff]  }
 0x4c4   :  { %6600 = vmatpush1.bf16.msra.mxu1 %v10204_v37  ;;  %v10294_v37 = vld [vmem:[%s13841_s5 + $0x1e0] ss:$16 sps:$4 sm:$0xff]  }
 0x4c5   :  { %6601 = vmatprep.subr.bf16.mxu1 %v10209_v30  ;;  %v10299_v30 = vld [vmem:[%s13841_s5 + $0x204] ss:$16 sps:$4 sm:$0xff]  }
 0x4c8   :  { %6602 = vmatpush1.bf16.msra.mxu1 %v10207_v31  ;;  %v13446_v31 = vld [vmem:[%s13840_s4] sm:$0xf] }
 0x4c9   :  { %6603 = vmatprep.subr.bf16.mxu1 %v10212_v32  ;;  %v6219_v32 = vrot.slane %v13446_v31, %v13235_v7 }
 0x4cc   :  { %6604 = vmatpush1.bf16.msra.mxu1 %v10210_v13  ;;  %v6223_v13 = vrot.slane %v13446_v31, %v13241_v10 }
 0x4cd   :  { %6605 = vmatprep.subr.bf16.mxu1 %v10215_v33 }
 0x4d0   :  { %6606 = vmatpush1.bf16.msra.mxu1 %v10213_v34 }
 0x4d1   :  { %6607 = vmatprep.subr.bf16.mxu1 %v10218_v35 }
 0x4d4   :  { %6608 = vmatpush1.bf16.msra.mxu1 %v10216_v21 }
 0x4d5   :  { %6609 = vmatprep.subr.bf16.mxu1 %v10221_v14 }
 0x4d8   :  { %6610 = vmatpush1.bf16.msra.mxu1 %v10219_v40 }
 0x4d9   :  { %6611 = vmatprep.subr.bf16.mxu1 %v10224_v17 }
 0x4dc   :  { %6612 = vmatpush1.bf16.msra.mxu1 %v10222_v24 }
 0x4dd   :  { %6613 = vmatprep.subr.bf16.mxu1 %v10227_v42 }
 0x4e0   :  { %6614 = vmatpush1.bf16.msra.mxu1 %v10225_v28  ;;  %v10297_v28 = vld [vmem:[%s13841_s5 + $0x200] ss:$16 sps:$4 sm:$0xff]  }
 0x4e1   :  { %6615 = vmatprep.subr.bf16.mxu1 %v10230_v44 }
 0x4e4   :  { %6616 = vmatpush1.bf16.msra.mxu1 %v10228_v27  ;;  %v10302_v27 = vld [vmem:[%s13841_s5 + $0x224] ss:$16 sps:$4 sm:$0xff]  }
 0x4e5   :  { %6617 = vmatprep.subr.bf16.mxu1 %v10233_v46  ;;  %v10300_v46 = vld [vmem:[%s13841_s5 + $0x220] ss:$16 sps:$4 sm:$0xff]  }
 0x4e8   :  { %6618 = vmatpush1.bf16.msra.mxu1 %v10231_v49  ;;  %v10305_v49 = vld [vmem:[%s13841_s5 + $0x244] ss:$16 sps:$4 sm:$0xff]  }
 0x4e9   :  { %6619 = vmatprep.subr.bf16.mxu1 %v10236_v25  ;;  %v10303_v25 = vld [vmem:[%s13841_s5 + $0x240] ss:$16 sps:$4 sm:$0xff]  }
 0x4ec   :  { %6620 = vmatpush1.bf16.msra.mxu1 %v10234_v53  ;;  %v10308_v53 = vld [vmem:[%s13841_s5 + $0x264] ss:$16 sps:$4 sm:$0xff]  }
 0x4ed   :  { %6621 = vmatprep.subr.bf16.mxu1 %v10239_v54  ;;  %v10306_v54 = vld [vmem:[%s13841_s5 + $0x260] ss:$16 sps:$4 sm:$0xff]  }
 0x4f0   :  { %6622 = vmatpush1.bf16.msra.mxu1 %v10237_v55  ;;  %v10311_v55 = vld [vmem:[%s13841_s5 + $0x284] ss:$16 sps:$4 sm:$0xff]  }
 0x4f1   :  { %6623 = vmatprep.subr.bf16.mxu1 %v10242_v56  ;;  %v10309_v56 = vld [vmem:[%s13841_s5 + $0x280] ss:$16 sps:$4 sm:$0xff]  }
 0x4f4   :  { %6624 = vmatpush1.bf16.msra.mxu1 %v10240_v47  ;;  %v10314_v47 = vld [vmem:[%s13841_s5 + $0x2a4] ss:$16 sps:$4 sm:$0xff]  }
 0x4f5   :  { %6625 = vmatprep.subr.bf16.mxu1 %v10245_v57  ;;  %v10312_v57 = vld [vmem:[%s13841_s5 + $0x2a0] ss:$16 sps:$4 sm:$0xff]  }
 0x4f8   :  { %6626 = vmatpush1.bf16.msra.mxu1 %v10243_v58  ;;  %v10317_v58 = vld [vmem:[%s13841_s5 + $0x2c4] ss:$16 sps:$4 sm:$0xff]  }
 0x4f9   :  { %6627 = vmatprep.subr.bf16.mxu1 %v10248_v15  ;;  %v10315_v15 = vld [vmem:[%s13841_s5 + $0x2c0] ss:$16 sps:$4 sm:$0xff]  }
 0x4fc   :  { %6628 = vmatpush1.bf16.msra.mxu1 %v10246_v3  ;;  %v10320_v3 = vld [vmem:[%s13841_s5 + $0x2e4] ss:$16 sps:$4 sm:$0xff]  }
 0x4fd   :  { %7344 = vmatprep.subr.bf16.mxu1 %v10251_v59  ;;  %v10318_v59 = vld [vmem:[%s13841_s5 + $0x2e0] ss:$16 sps:$4 sm:$0xff]  }
 0x4ff   :  { %6630 = vmatmul.mubr.bf16.vlgmr.msra.gmra.mrb[8].mxu1 %v13250_v52  ;;  %v10291_v52 = vld [vmem:[%s13841_s5 + $0x1c0] ss:$16 sps:$4 sm:$0xff]  }
 0x500   :  { %7345 = vmatpush1.bf16.msra.mxu1 %v10249_v60  ;;  %v10323_v60 = vld [vmem:[%s13841_s5 + $0x304] ss:$16 sps:$4 sm:$0xff]  }
 0x501   :  { %7346 = vmatprep.subr.bf16.mxu1 %v10254_v61  ;;  %v10321_v61 = vld [vmem:[%s13841_s5 + $0x300] ss:$16 sps:$4 sm:$0xff]  }
 0x504   :  { %7347 = vmatpush1.bf16.msra.mxu1 %v10252_v62  ;;  %v10326_v62 = vld [vmem:[%s13841_s5 + $0x324] ss:$16 sps:$4 sm:$0xff]  }
 0x505   :  { %7348 = vmatprep.subr.bf16.mxu1 %v10257_v0  ;;  %v10324_v0 = vld [vmem:[%s13841_s5 + $0x320] ss:$16 sps:$4 sm:$0xff]  }
 0x508   :  { %7349 = vmatpush1.bf16.msra.mxu1 %v10255_v1  ;;  %v10329_v1 = vld [vmem:[%s13841_s5 + $0x344] ss:$16 sps:$4 sm:$0xff]  }
 0x509   :  { %7350 = vmatprep.subr.bf16.mxu1 %v10260_v48  ;;  %v10327_v48 = vld [vmem:[%s13841_s5 + $0x340] ss:$16 sps:$4 sm:$0xff]  }
 0x50c   :  { %7351 = vmatpush1.bf16.msra.mxu1 %v10258_v38  ;;  %v10332_v38 = vld [vmem:[%s13841_s5 + $0x364] ss:$16 sps:$4 sm:$0xff]  }
 0x50d   :  { %7352 = vmatprep.subr.bf16.mxu1 %v10263_v4  ;;  %v10330_v4 = vld [vmem:[%s13841_s5 + $0x360] ss:$16 sps:$4 sm:$0xff]  }
 0x510   :  { %7353 = vmatpush1.bf16.msra.mxu1 %v10261_v5  ;;  %v10335_v5 = vld [vmem:[%s13841_s5 + $0xc] ss:$16 sps:$4 sm:$0xff]  }
 0x511   :  { %7354 = vmatprep.subr.bf16.mxu1 %v10266_v36  ;;  %v6226_v36 = vsub.s32 2, %v10652_v45 }
 0x514   :  { %7355 = vmatpush1.bf16.msra.mxu1 %v10264_v43  ;;  %v6230_v43 = vsub.s32 3, %v10652_v45  ;;  %v8808_v45 = vld [vmem:[%s13844_s8] ss:$0 sm:$0xff] }
 0x515   :  { %7356 = vmatprep.subr.bf16.mxu1 %v10269_v51  ;;  %v6227_v51 = vrot.slane %v13446_v31, %v6226_v36 }
 0x518   :  { %7357 = vmatpush1.bf16.msra.mxu1 %v10267_v6  ;;  %v6231_v6 = vrot.slane %v13446_v31, %v6230_v43  ;;  %v10350_v31 = vld [vmem:[%s13841_s5 + $0xac] ss:$16 sps:$4 sm:$0xff]  }
 0x519   :  { %7358 = vmatprep.subr.bf16.mxu1 %v10272_v9 }
 0x51c   :  { %7359 = vmatpush1.bf16.msra.mxu1 %v10270_v11 }
 0x51d   :  { %7360 = vmatprep.subr.bf16.mxu1 %v10275_v29 }
 0x520   :  { %7361 = vmatpush1.bf16.msra.mxu1 %v10273_v63 }
 0x521   :  { %7362 = vmatprep.subr.bf16.mxu1 %v10278_v12 }
 0x524   :  { %7363 = vmatpush1.bf16.msra.mxu1 %v10276_v16 }
 0x525   :  { %7364 = vmatprep.subr.bf16.mxu1 %v10281_v2 }
 0x528   :  { %7365 = vmatpush1.bf16.msra.mxu1 %v10279_v18 }
 0x529   :  { %7366 = vmatprep.subr.bf16.mxu1 %v10284_v19 }
 0x52c   :  { %7367 = vmatpush1.bf16.msra.mxu1 %v10282_v20  ;;  %v10333_v20 = vld [vmem:[%s13841_s5 + $0x8] ss:$16 sps:$4 sm:$0xff]  }
 0x52d   :  { %7368 = vmatprep.subr.bf16.mxu1 %v10287_v22 }
 0x530   :  { %7369 = vmatpush1.bf16.msra.mxu1 %v10285_v23  ;;  %v10338_v23 = vld [vmem:[%s13841_s5 + $0x2c] ss:$16 sps:$4 sm:$0xff]  }
 0x531   :  { %7370 = vmatprep.subr.bf16.mxu1 %v10290_v26  ;;  %v10336_v26 = vld [vmem:[%s13841_s5 + $0x28] ss:$16 sps:$4 sm:$0xff]  }
 0x534   :  { %7371 = vmatpush1.bf16.msra.mxu1 %v10288_v8  ;;  %v10341_v8 = vld [vmem:[%s13841_s5 + $0x4c] ss:$16 sps:$4 sm:$0xff]  }
 0x535   :  { %7372 = vmatprep.subr.bf16.mxu1 %v10293_v41  ;;  %v10339_v41 = vld [vmem:[%s13841_s5 + $0x48] ss:$16 sps:$4 sm:$0xff]  }
 0x538   :  { %7373 = vmatpush1.bf16.msra.mxu1 %v10291_v52  ;;  %v10344_v52 = vld [vmem:[%s13841_s5 + $0x6c] ss:$16 sps:$4 sm:$0xff]  }
 0x539   :  { %7374 = vmatprep.subr.bf16.mxu1 %v10296_v50  ;;  %v10342_v50 = vld [vmem:[%s13841_s5 + $0x68] ss:$16 sps:$4 sm:$0xff]  }
 0x53c   :  { %7375 = vmatpush1.bf16.msra.mxu1 %v10294_v37  ;;  %v10347_v37 = vld [vmem:[%s13841_s5 + $0x8c] ss:$16 sps:$4 sm:$0xff]  }
 0x53d   :  { %7385 = vmatprep.subr.bf16.mxu1 %v10299_v30  ;;  %v10345_v30 = vld [vmem:[%s13841_s5 + $0x88] ss:$16 sps:$4 sm:$0xff]  }
 0x592   :  { %v6590_v33 = vpop.f32.mrb[4].mxu1 }
 0x593   :  { %v6591_v34 = vadd.f32 %v6590_v33, %v6219_v32  ;;  %v6592_v35 = vpop.f32.mrb[5].mxu1  ;;  %v10348_v32 = vld [vmem:[%s13841_s5 + $0xa8] ss:$16 sps:$4 sm:$0xff]  }
 0x594   :  { %v6593_v21 = vadd.f32 %v6592_v35, %v6223_v13  ;;  %v6594_v14 = vpop.f32.mrb[6].mxu1  ;;  %v10353_v13 = vld [vmem:[%s13841_s5 + $0xcc] ss:$16 sps:$4 sm:$0xff]   ;;  %v10351_v33 = vld [vmem:[%s13841_s5 + $0xc8] ss:$16 sps:$4 sm:$0xff]  }
 0x595   :  { %v6638_v40 = vmax.f32 %v6591_v34, 0.0  ;;  %v6595_v17 = vpop.f32.mrb[7].mxu1  ;;  %v10356_v34 = vld [vmem:[%s13841_s5 + $0xec] ss:$16 sps:$4 sm:$0xff]   ;;  %v10354_v35 = vld [vmem:[%s13841_s5 + $0xe8] ss:$16 sps:$4 sm:$0xff]  }
 0x596   :  { %v6639_v24 = vmax.f32 %v6593_v21, 0.0  ;;  %v10359_v21 = vld [vmem:[%s13841_s5 + $0x10c] ss:$16 sps:$4 sm:$0xff]   ;;  %v10357_v14 = vld [vmem:[%s13841_s5 + $0x108] ss:$16 sps:$4 sm:$0xff]  }
 0x597   :  { %v13457_v44 = vpack.c.bf16 %v6638_v40, %v6638_v40  ;;  %v10362_v40 = vld [vmem:[%s13841_s5 + $0x12c] ss:$16 sps:$4 sm:$0xff]   ;;  %v10360_v17 = vld [vmem:[%s13841_s5 + $0x128] ss:$16 sps:$4 sm:$0xff]  }
 0x598   :  { %v13452_v42 = vpack.c.bf16 %v6639_v24, %v6639_v24  ;;  %v10365_v24 = vld [vmem:[%s13841_s5 + $0x14c] ss:$16 sps:$4 sm:$0xff]  }
 0x59a   :  { %7376 = vmatprep.mubr.bf16.mxu1 %v13452_v42 }
 0x59b   :  { %7377 = vmatmul.mubr.bf16.vlgmr.msra.gmra.mrb[12].mxu1 %v13457_v44 }
 0x59c   :  { %7386 = vmatpush1.bf16.msra.mxu1 %v10297_v28  ;;  %v10368_v28 = vld [vmem:[%s13841_s5 + $0x16c] ss:$16 sps:$4 sm:$0xff]  }
 0x59d   :  { %7387 = vmatprep.subr.bf16.mxu1 %v10302_v27  ;;  %v10366_v27 = vld [vmem:[%s13841_s5 + $0x168] ss:$16 sps:$4 sm:$0xff]  }
 0x5a0   :  { %7388 = vmatpush1.bf16.msra.mxu1 %v10300_v46  ;;  %v10371_v46 = vld [vmem:[%s13841_s5 + $0x18c] ss:$16 sps:$4 sm:$0xff]  }
 0x5a1   :  { %7389 = vmatprep.subr.bf16.mxu1 %v10305_v49  ;;  %v10369_v49 = vld [vmem:[%s13841_s5 + $0x188] ss:$16 sps:$4 sm:$0xff]  }
 0x5a4   :  { %7390 = vmatpush1.bf16.msra.mxu1 %v10303_v25  ;;  %v10374_v25 = vld [vmem:[%s13841_s5 + $0x1ac] ss:$16 sps:$4 sm:$0xff]  }
 0x5a5   :  { %7391 = vmatprep.subr.bf16.mxu1 %v10308_v53  ;;  %v10372_v53 = vld [vmem:[%s13841_s5 + $0x1a8] ss:$16 sps:$4 sm:$0xff]  }
 0x5a8   :  { %7392 = vmatpush1.bf16.msra.mxu1 %v10306_v54  ;;  %v10377_v54 = vld [vmem:[%s13841_s5 + $0x1cc] ss:$16 sps:$4 sm:$0xff]  }
 0x5a9   :  { %7393 = vmatprep.subr.bf16.mxu1 %v10311_v55  ;;  %v10375_v55 = vld [vmem:[%s13841_s5 + $0x1c8] ss:$16 sps:$4 sm:$0xff]  }
 0x5ac   :  { %7394 = vmatpush1.bf16.msra.mxu1 %v10309_v56  ;;  %v10380_v56 = vld [vmem:[%s13841_s5 + $0x1ec] ss:$16 sps:$4 sm:$0xff]  }
 0x5ad   :  { %7395 = vmatprep.subr.bf16.mxu1 %v10314_v47  ;;  %v10378_v47 = vld [vmem:[%s13841_s5 + $0x1e8] ss:$16 sps:$4 sm:$0xff]  }
 0x5b0   :  { %7396 = vmatpush1.bf16.msra.mxu1 %v10312_v57  ;;  %v10383_v57 = vld [vmem:[%s13841_s5 + $0x20c] ss:$16 sps:$4 sm:$0xff]  }
 0x5b1   :  { %7397 = vmatprep.subr.bf16.mxu1 %v10317_v58  ;;  %v10381_v58 = vld [vmem:[%s13841_s5 + $0x208] ss:$16 sps:$4 sm:$0xff]  }
 0x5b4   :  { %7398 = vmatpush1.bf16.msra.mxu1 %v10315_v15  ;;  %v10386_v15 = vld [vmem:[%s13841_s5 + $0x22c] ss:$16 sps:$4 sm:$0xff]  }
 0x5b5   :  { %7399 = vmatprep.subr.bf16.mxu1 %v10320_v3  ;;  %v10384_v3 = vld [vmem:[%s13841_s5 + $0x228] ss:$16 sps:$4 sm:$0xff]  }
 0x5b8   :  { %7400 = vmatpush1.bf16.msra.mxu1 %v10318_v59  ;;  %v10389_v59 = vld [vmem:[%s13841_s5 + $0x24c] ss:$16 sps:$4 sm:$0xff]  }
 0x5b9   :  { %7401 = vmatprep.subr.bf16.mxu1 %v10323_v60  ;;  %v10387_v60 = vld [vmem:[%s13841_s5 + $0x248] ss:$16 sps:$4 sm:$0xff]  }
 0x5bc   :  { %7402 = vmatpush1.bf16.msra.mxu1 %v10321_v61  ;;  %v10390_v61 = vld [vmem:[%s13841_s5 + $0x268] ss:$16 sps:$4 sm:$0xff]  }
 0x5bd   :  { %7403 = vmatprep.subr.bf16.mxu1 %v10326_v62  ;;  %v10395_v62 = vld [vmem:[%s13841_s5 + $0x28c] ss:$16 sps:$4 sm:$0xff]  }
 0x5c0   :  { %7404 = vmatpush1.bf16.msra.mxu1 %v10324_v0  ;;  %v10393_v0 = vld [vmem:[%s13841_s5 + $0x288] ss:$16 sps:$4 sm:$0xff]  }
 0x5c1   :  { %7405 = vmatprep.subr.bf16.mxu1 %v10329_v1  ;;  %v10398_v1 = vld [vmem:[%s13841_s5 + $0x2ac] ss:$16 sps:$4 sm:$0xff]  }
 0x5c4   :  { %7406 = vmatpush1.bf16.msra.mxu1 %v10327_v48  ;;  %v10396_v48 = vld [vmem:[%s13841_s5 + $0x2a8] ss:$16 sps:$4 sm:$0xff]  }
 0x5c5   :  { %7407 = vmatprep.subr.bf16.mxu1 %v10332_v38  ;;  %v10401_v38 = vld [vmem:[%s13841_s5 + $0x2cc] ss:$16 sps:$4 sm:$0xff]  }
 0x5c8   :  { %7408 = vmatpush1.bf16.msra.mxu1 %v10330_v4  ;;  %v10399_v4 = vld [vmem:[%s13841_s5 + $0x2c8] ss:$16 sps:$4 sm:$0xff]  }
 0x5c9   :  { %7426 = vmatprep.subr.bf16.mxu1 %v10335_v5  ;;  %v10404_v5 = vld [vmem:[%s13841_s5 + $0x2ec] ss:$16 sps:$4 sm:$0xff]  }
 0x5d2   :  { %v6631_v9 = vpop.f32.mrb[8].mxu1 }
 0x5d3   :  { %v6632_v11 = vadd.f32 %v6631_v9, %v6227_v51  ;;  %v6633_v29 = vpop.f32.mrb[9].mxu1  ;;  %v10402_v51 = vld [vmem:[%s13841_s5 + $0x2e8] ss:$16 sps:$4 sm:$0xff]  }
 0x5d4   :  { %v6634_v63 = vadd.f32 %v6633_v29, %v6231_v6  ;;  %v6635_v12 = vpop.f32.mrb[10].mxu1  ;;  %v10407_v6 = vld [vmem:[%s13841_s5 + $0x30c] ss:$16 sps:$4 sm:$0xff]   ;;  %v10405_v9 = vld [vmem:[%s13841_s5 + $0x308] ss:$16 sps:$4 sm:$0xff]  }
 0x5d5   :  { %v6640_v16 = vmax.f32 %v6632_v11, 0.0  ;;  %v6636_v2 = vpop.f32.mrb[11].mxu1  ;;  %v10410_v11 = vld [vmem:[%s13841_s5 + $0x32c] ss:$16 sps:$4 sm:$0xff]   ;;  %v10408_v29 = vld [vmem:[%s13841_s5 + $0x328] ss:$16 sps:$4 sm:$0xff]  }
 0x5d6   :  { %v6641_v18 = vmax.f32 %v6634_v63, 0.0  ;;  %v10413_v63 = vld [vmem:[%s13841_s5 + $0x34c] ss:$16 sps:$4 sm:$0xff]   ;;  %v10411_v12 = vld [vmem:[%s13841_s5 + $0x348] ss:$16 sps:$4 sm:$0xff]  }
 0x5d7   :  { %v13543_v22 = vpack.c.bf16 %v6640_v16, %v6640_v16  ;;  %v10416_v16 = vld [vmem:[%s13841_s5 + $0x36c] ss:$16 sps:$4 sm:$0xff]   ;;  %v10414_v2 = vld [vmem:[%s13841_s5 + $0x368] ss:$16 sps:$4 sm:$0xff]  }
 0x5d8   :  { %v13538_v19 = vpack.c.bf16 %v6641_v18, %v6641_v18  ;;  %v10417_v18 = vld [vmem:[%s13843_s7 + $0x40] sm:$0xff]  }
 0x5da   :  { %8806 = vmatprep.mubr.msk.bf16.mxu1 %vm7340_vm0, %v13538_v19 }
 0x5db   :  { %7418 = vmatmul.mubr.bf16.vlgmr.msra.gmra.mrb[12].mxu1 %v13543_v22 }
 0x5dc   :  { %7427 = vmatpush1.bf16.msra.mxu1 %v10333_v20  ;;  %7458 = vmatprep.mubr.bf16.mxu1 %v13452_v42  ;;  %v10363_v42 = vld [vmem:[%s13841_s5 + $0x148] ss:$16 sps:$4 sm:$0xff]  }
 0x5dd   :  { %7428 = vmatprep.subr.bf16.mxu1 %v10338_v23  ;;  %v10419_v20 = vld [vmem:[%s13843_s7 + $0x48] sm:$0xff]  }
 0x5de   :  { %v10420_v23 = vld [vmem:[%s13843_s7 + $0x8] sm:$0xff]  }
 0x5e0   :  { %7429 = vmatpush1.bf16.msra.mxu1 %v10336_v26  ;;  %v10421_v26 = vld [vmem:[%s13843_s7 + $0x50] sm:$0xff]  }
 0x5e1   :  { %7430 = vmatprep.subr.bf16.mxu1 %v10341_v8  ;;  %v10422_v8 = vld [vmem:[%s13843_s7 + $0x10] sm:$0xff]  }
 0x5e4   :  { %7431 = vmatpush1.bf16.msra.mxu1 %v10339_v41  ;;  %v10424_v41 = vld [vmem:[%s13843_s7 + $0x18] sm:$0xff]  }
 0x5e5   :  { %7432 = vmatprep.subr.bf16.mxu1 %v10344_v52  ;;  %v10425_v52 = vld [vmem:[%s13843_s7 + $0x60] sm:$0xff]  }
 0x5e8   :  { %7433 = vmatpush1.bf16.msra.mxu1 %v10342_v50  ;;  %v10426_v50 = vld [vmem:[%s13843_s7 + $0x20] sm:$0xff]  }
 0x5e9   :  { %7434 = vmatprep.subr.bf16.mxu1 %v10347_v37  ;;  %v10427_v37 = vld [vmem:[%s13843_s7 + $0x68] sm:$0xff]  }
 0x5ec   :  { %7435 = vmatpush1.bf16.msra.mxu1 %v10345_v30  ;;  %v10428_v30 = vld [vmem:[%s13843_s7 + $0x28] sm:$0xff]  }
 0x5ed   :  { %7436 = vmatprep.subr.bf16.mxu1 %v10350_v31  ;;  %v10429_v31 = vld [vmem:[%s13843_s7 + $0x70] sm:$0xff]  }
 0x5f0   :  { %7437 = vmatpush1.bf16.msra.mxu1 %v10348_v32  ;;  %v10430_v32 = vld [vmem:[%s13843_s7 + $0x30] sm:$0xff]  }
 0x5f1   :  { %7438 = vmatprep.subr.bf16.mxu1 %v10353_v13  ;;  %v10431_v13 = vld [vmem:[%s13843_s7 + $0x78] sm:$0xff]  }
 0x5f4   :  { %7439 = vmatpush1.bf16.msra.mxu1 %v10351_v33  ;;  %v10432_v33 = vld [vmem:[%s13843_s7 + $0x38] sm:$0xff]  }
 0x5f5   :  { %7440 = vmatprep.subr.bf16.mxu1 %v10356_v34  ;;  %v6758_v34 = vld [vmem:[%s13842_s6] sm:$0xf] }
 0x5f8   :  { %7441 = vmatpush1.bf16.msra.mxu1 %v10354_v35  ;;  %v6763_v35 = vrot.slane %v6758_v34, %v13235_v7  ;;  %v10434_v7 = vld [vmem:[%s13843_s7 + $0x88] sm:$0xff]  }
 0x5f9   :  { %7442 = vmatprep.subr.bf16.mxu1 %v10359_v21  ;;  %v6767_v21 = vrot.slane %v6758_v34, %v13241_v10  ;;  %v10435_v10 = vld [vmem:[%s13843_s7 + $0x90] sm:$0xff]  }
 0x5fc   :  { %7443 = vmatpush1.bf16.msra.mxu1 %v10357_v14 }
 0x5fd   :  { %7444 = vmatprep.subr.bf16.mxu1 %v10362_v40 }
 0x600   :  { %7445 = vmatpush1.bf16.msra.mxu1 %v10360_v17 }
 0x601   :  { %7446 = vmatprep.subr.bf16.mxu1 %v10365_v24 }
 0x604   :  { %7447 = vmatpush1.bf16.msra.mxu1 %v10363_v42 }
 0x605   :  { %7448 = vmatprep.subr.bf16.mxu1 %v10368_v28 }
 0x608   :  { %7449 = vmatpush1.bf16.msra.mxu1 %v10366_v27 }
 0x609   :  { %7450 = vmatprep.subr.bf16.mxu1 %v10371_v46 }
 0x60c   :  { %7451 = vmatpush1.bf16.msra.mxu1 %v10369_v49 }
 0x60d   :  { %7452 = vmatprep.subr.bf16.mxu1 %v10374_v25  ;;  %v10433_v25 = vld [vmem:[%s13843_s7 + $0x80] sm:$0xff]  }
 0x610   :  { %7453 = vmatpush1.bf16.msra.mxu1 %v10372_v53 }
 0x611   :  { %7454 = vmatprep.subr.bf16.mxu1 %v10377_v54  ;;  %v10436_v54 = vld [vmem:[%s13843_s7 + $0x98] sm:$0xff]  }
 0x614   :  { %7455 = vmatpush1.bf16.msra.mxu1 %v10375_v55  ;;  %v10437_v55 = vld [vmem:[%s13843_s7 + $0xa0] sm:$0xff]  }
 0x615   :  { %7456 = vmatprep.subr.bf16.mxu1 %v10380_v56  ;;  %v10438_v56 = vld [vmem:[%s13843_s7 + $0xa8] sm:$0xff]  }
 0x618   :  { %7457 = vmatpush1.bf16.msra.mxu1 %v10378_v47  ;;  %v10439_v47 = vld [vmem:[%s13843_s7 + $0xb0] sm:$0xff]  }
 0x619   :  { %7467 = vmatprep.subr.bf16.mxu1 %v10383_v57  ;;  %v10440_v57 = vld [vmem:[%s13843_s7 + $0xb8] sm:$0xff]  }
 0x61b   :  { %7459 = vmatmul.mubr.bf16.vlgmr.msra.gmra.mrb[16].mxu1 %v13457_v44  ;;  %v10392_v44 = vld [vmem:[%s13841_s5 + $0x26c] ss:$16 sps:$4 sm:$0xff]  }
 0x61c   :  { %7468 = vmatpush1.bf16.msra.mxu1 %v10381_v58  ;;  %8807 = vmatprep.mubr.msk.bf16.mxu1 %vm7340_vm0, %v13538_v19  ;;  %v10418_v19 = vld [vmem:[%s13843_s7] sm:$0xff]  }
 0x61d   :  { %7469 = vmatprep.subr.bf16.mxu1 %v10386_v15  ;;  %v10441_v58 = vld [vmem:[%s13843_s7 + $0xc0] sm:$0xff]   ;;  %v10442_v15 = vld [vmem:[%s13843_s7 + $0xc8] sm:$0xff]  }
 0x620   :  { %7470 = vmatpush1.bf16.msra.mxu1 %v10384_v3  ;;  %v10443_v3 = vld [vmem:[%s13843_s7 + $0xd0] sm:$0xff]  }
 0x621   :  { %7471 = vmatprep.subr.bf16.mxu1 %v10389_v59  ;;  %v10444_v59 = vld [vmem:[%s13843_s7 + $0xd8] sm:$0xff]  }
 0x624   :  { %7472 = vmatpush1.bf16.msra.mxu1 %v10387_v60  ;;  %v6771_v60 = vrot.slane %v6758_v34, %v6226_v36 }
 0x625   :  { %7473 = vmatprep.subr.bf16.mxu1 %v10392_v44  ;;  %v6775_v44 = vrot.slane %v6758_v34, %v6230_v43 }
 0x628   :  { %7474 = vmatpush1.bf16.msra.mxu1 %v10390_v61 }
 0x629   :  { %7475 = vmatprep.subr.bf16.mxu1 %v10395_v62 }
 0x62c   :  { %7476 = vmatpush1.bf16.msra.mxu1 %v10393_v0 }
 0x62d   :  { %7477 = vmatprep.subr.bf16.mxu1 %v10398_v1 }
 0x630   :  { %7478 = vmatpush1.bf16.msra.mxu1 %v10396_v48 }
 0x631   :  { %7479 = vmatprep.subr.bf16.mxu1 %v10401_v38 }
 0x634   :  { %7480 = vmatpush1.bf16.msra.mxu1 %v10399_v4 }
 0x635   :  { %7481 = vmatprep.subr.bf16.mxu1 %v10404_v5 }
 0x638   :  { %7482 = vmatpush1.bf16.msra.mxu1 %v10402_v51 }
 0x639   :  { %7483 = vmatprep.subr.bf16.mxu1 %v10407_v6 }
 0x63c   :  { %7484 = vmatpush1.bf16.msra.mxu1 %v10405_v9 }
 0x63d   :  { %7485 = vmatprep.subr.bf16.mxu1 %v10410_v11 }
 0x640   :  { %7486 = vmatpush1.bf16.msra.mxu1 %v10408_v29 }
 0x641   :  { %7487 = vmatprep.subr.bf16.mxu1 %v10413_v63 }
 0x644   :  { %7488 = vmatpush1.bf16.msra.mxu1 %v10411_v12 }
 0x645   :  { %7489 = vmatprep.subr.bf16.mxu1 %v10416_v16 }
 0x648   :  { %7490 = vmatpush1.bf16.msra.mxu1 %v10414_v2 }
 0x649   :  { %8838 = vmatprep.subr.bf16.mxu1 %v10417_v18 }
 0x64b   :  { %7500 = vmatmul.mubr.bf16.vlgmr.msra.gmra.mrb[16].mxu1 %v13543_v22  ;;  %v10423_v22 = vld [vmem:[%s13843_s7 + $0x58] sm:$0xff]  }
 0x64c   :  { %8839 = vmatpush3.bf16.msra.mxu1 %v10418_v19 }
 0x64d   :  { %8840 = vmatprep.subr.bf16.mxu1 %v10419_v20 }
 0x650   :  { %8841 = vmatpush3.bf16.msra.mxu1 %v10420_v23 }
 0x651   :  { %8842 = vmatprep.subr.bf16.mxu1 %v10421_v26 }
 0x654   :  { %8843 = vmatpush3.bf16.msra.mxu1 %v10422_v8 }
 0x655   :  { %8844 = vmatprep.subr.bf16.mxu1 %v10423_v22 }
 0x658   :  { %8845 = vmatpush3.bf16.msra.mxu1 %v10424_v41 }
 0x659   :  { %8846 = vmatprep.subr.bf16.mxu1 %v10425_v52 }
 0x65c   :  { %8847 = vmatpush3.bf16.msra.mxu1 %v10426_v50 }
 0x65d   :  { %8848 = vmatprep.subr.bf16.mxu1 %v10427_v37 }
 0x660   :  { %8849 = vmatpush3.bf16.msra.mxu1 %v10428_v30 }
 0x661   :  { %8850 = vmatprep.subr.bf16.mxu1 %v10429_v31 }
 0x664   :  { %8851 = vmatpush3.bf16.msra.mxu1 %v10430_v32 }
 0x665   :  { %8852 = vmatprep.subr.bf16.mxu1 %v10431_v13 }
 0x668   :  { %8853 = vmatpush3.bf16.msra.mxu1 %v10432_v33 }
 0x669   :  { %7790 = vmatprep.subr.bf16.mxu1 %v10474_v39 }
 0x6ae   :  { %v7419_v14 = vpop.f32.mrb[12].mxu1 }
 0x6af   :  { %v8864_v40 = vadd.f32 %v7419_v14, %v6763_v35  ;;  %v7421_v17 = vpop.f32.mrb[13].mxu1 }
 0x6b0   :  { %v8865_v24 = vadd.f32 %v7421_v17, %v6767_v21  ;;  %v7423_v42 = vpop.f32.mrb[14].mxu1 }
 0x6b1   :  { %v7508_v28 = vmax.f32 %v8864_v40, 0.0  ;;  %v7424_v27 = vpop.f32.mrb[15].mxu1 }
 0x6b2   :  { %v7509_v46 = vmax.f32 %v8865_v24, 0.0 }
 0x6b3   :  { %v7512_v53 = vpack.c.bf16 %v7508_v28, %v7508_v28 }
 0x6b4   :  { %v7513_v49 = vpack.c.bf16 %v7509_v46, %v7509_v46 }
 0x6b6   :  { %7782 = vmatprep.mubr.bf16.mxu1 %v7513_v49 }
 0x6b7   :  { %7783 = vmatmul.mubr.bf16.vlgmr.msra.gmra.mrb[20].mxu1 %v7512_v53 }
 0x6b8   :  { %7791 = vmatpush1.bf16.msra.mxu1 %v10433_v25 }
 0x6b9   :  { %7792 = vmatprep.subr.bf16.mxu1 %v10474_v39 }
 0x6bc   :  { %7793 = vmatpush1.bf16.msra.mxu1 %v10434_v7 }
 0x6bd   :  { %7794 = vmatprep.subr.bf16.mxu1 %v10474_v39 }
 0x6c0   :  { %7795 = vmatpush1.bf16.msra.mxu1 %v10435_v10 }
 0x6c1   :  { %7796 = vmatprep.subr.bf16.mxu1 %v10474_v39 }
 0x6c4   :  { %7797 = vmatpush1.bf16.msra.mxu1 %v10436_v54 }
 0x6c5   :  { %7798 = vmatprep.subr.bf16.mxu1 %v10474_v39 }
 0x6c8   :  { %7799 = vmatpush1.bf16.msra.mxu1 %v10437_v55 }
 0x6c9   :  { %7800 = vmatprep.subr.bf16.mxu1 %v10474_v39 }
 0x6cc   :  { %7801 = vmatpush1.bf16.msra.mxu1 %v10438_v56 }
 0x6cd   :  { %7802 = vmatprep.subr.bf16.mxu1 %v10474_v39 }
 0x6d0   :  { %7803 = vmatpush1.bf16.msra.mxu1 %v10439_v47 }
 0x6d1   :  { %7804 = vmatprep.subr.bf16.mxu1 %v10474_v39 }
 0x6d4   :  { %7805 = vmatpush1.bf16.msra.mxu1 %v10440_v57 }
 0x6d5   :  { %7806 = vmatprep.subr.bf16.mxu1 %v10474_v39 }
 0x6d8   :  { %7807 = vmatpush1.bf16.msra.mxu1 %v10441_v58 }
 0x6d9   :  { %7808 = vmatprep.subr.bf16.mxu1 %v10474_v39 }
 0x6dc   :  { %7809 = vmatpush1.bf16.msra.mxu1 %v10442_v15 }
 0x6dd   :  { %7810 = vmatprep.subr.bf16.mxu1 %v10474_v39 }
 0x6e0   :  { %7811 = vmatpush1.bf16.msra.mxu1 %v10443_v3 }
 0x6e1   :  { %7812 = vmatprep.subr.bf16.mxu1 %v10474_v39 }
 0x6e4   :  { %7813 = vmatpush1.bf16.msra.mxu1 %v10444_v59 }
 0x71e   :  { %v7501_v61 = vpop.f32.mrb[16].mxu1 }
 0x71f   :  { %v8866_v62 = vadd.f32 %v7501_v61, %v6771_v60  ;;  %v7503_v0 = vpop.f32.mrb[17].mxu1 }
 0x720   :  { %v8867_v1 = vadd.f32 %v7503_v0, %v6775_v44  ;;  %v7505_v48 = vpop.f32.mrb[18].mxu1 }
 0x721   :  { %v7510_v38 = vmax.f32 %v8866_v62, 0.0  ;;  %v7506_v4 = vpop.f32.mrb[19].mxu1 }
 0x722   :  { %v7511_v5 = vmax.f32 %v8867_v1, 0.0 }
 0x723   :  { %v7514_v6 = vpack.c.bf16 %v7510_v38, %v7510_v38 }
 0x724   :  { %v7515_v51 = vpack.c.bf16 %v7511_v5, %v7511_v5 }
 0x726   :  { %8837 = vmatprep.mubr.msk.bf16.mxu1 %vm7340_vm0, %v7515_v51 }
 0x727   :  { %7823 = vmatmul.mubr.bf16.vlgmr.msra.gmra.mrb[24].mxu1 %v7514_v6 }
 0x78a   :  { %v8854_v39 = vpop.f32.mrb[20].mxu1 }
 0x78b   :  { %v8855_v9 = vpop.f32.mrb[21].mxu1 }
 0x78c   :  { %v8856_v11 = vadd.f32 %v8855_v9, %v8854_v39  ;;  %v8857_v36 = vpop.f32.mrb[22].mxu1 }
 0x78d   :  { %v8858_v29 = vpop.f32.mrb[23].mxu1 }
 0x78e   :  { %v7785_v43 = vadd.f32 %v8856_v11, %v8808_v45 }
 0x7fa   :  { %v7824_v63 = vpop.f32.mrb[24].mxu1 }
 0x7fb   :  { %v7825_v12 = vadd.f32 %v7824_v63, %v7785_v43  ;;  %v7826_v16 = vpop.f32.mrb[25].mxu1 }
 0x7fc   :  { %v7827_v2 = vpop.f32.mrb[26].mxu1 }
 0x7fd   :  { %7830 = vst [vmem:[#allocation2] sm:$0x3] %v7825_v12  ;;  %v7828_v18 = vpop.f32.mrb[27].mxu1 }
 0x7fe   :  { %10460 = shalt.err (!%p10457_p4)
}
 0x7ff   :  { %s10461_s8 = scalar_lea.hbm %s13845_s9, 32 }
 0x800   :  { %p10462_p5 = scmp.ne.s32.totalorder %s13845_s9, %s10461_s8  ;;  %p10465_p6 = scmp.lt.u32.totalorder %s10461_s8, %s13845_s9 }
 0x802   :  { %p10467_p7 = pnand %p10465_p6, %p10462_p5 }
 0x804   :  { %10470 = shalt.err (!%p10467_p7)
}
 0x805   :  { %7840 = dma.vmem_to_hbm [thread:$0]  %s7838_s14, 32, %s13845_s9, [#allocation3]  }
 0x806   :  { %10471 = dma.done.wait [#allocation3], 32  }
 0x807   :  { %10472 = vsyncadd [#allocation3], 4294967264 }
 0x808   :  { %7844 = vsyncpa [#allocation3], 1 }

</bundles_post_ra>
